<compile_context>
chip_gen: v6e
topology: v6e:2x2x1
jax: 0.10.0
libtpu: 0.0.40
codegen_flags: <defaults>
</compile_context>

<pallas_src>
import functools

import numpy as np
import jax
import jax.numpy as jnp
from jax.experimental import pallas as pl
from jax.experimental.pallas import tpu as pltpu


def convtranspose2d_as_matrix(w, hin, win, stride, padding, output_padding):
    """Dense matrix for ConvTranspose2d acting on the NCHW flatten.

    w: (Cin, Cout, K, K) -- PyTorch ConvTranspose2d weight layout.
    Returns (M, hout, wout) with M shape (Cin*hin*win, Cout*hout*wout) such
    that out_flat = in_flat @ M reproduces F.conv_transpose2d (without bias).
    """
    cin, cout, k, _ = w.shape
    hout = (hin - 1) * stride - 2 * padding + k + output_padding
    wout = (win - 1) * stride - 2 * padding + k + output_padding
    m = np.zeros((cin * hin * win, cout * hout * wout), dtype=np.float32)
    rows_c = np.arange(cin) * (hin * win)
    cols_c = np.arange(cout) * (hout * wout)
    for ih in range(hin):
        for iw in range(win):
            for kh in range(k):
                for kw in range(k):
                    oh = ih * stride + kh - padding
                    ow = iw * stride + kw - padding
                    if 0 <= oh < hout and 0 <= ow < wout:
                        r = rows_c + ih * win + iw
                        c = cols_c + oh * wout + ow
                        m[np.ix_(r, c)] += w[:, :, kh, kw]
    return m, hout, wout


def decoder_kernel(x_ref, wl_ref, bl_ref, m1_ref, b1_ref, m2_ref, b2_ref,
                   w3_ref, o_ref, *, dim):
    # preprocess: Linear(dim, 4*4*4*dim) + ReLU  (bf16 weights, f32 accum)
    h = jnp.dot(x_ref[...].astype(jnp.bfloat16), wl_ref[...],
                preferred_element_type=jnp.float32)
    # bias + ReLU + bf16 cast fused into one expression (one VMEM pass)
    h = jnp.maximum(h + bl_ref[...], 0.0).astype(jnp.bfloat16)

    # block1: ConvTranspose2d(4d -> 2d, k5 s2 p2 op1) + ReLU  (dense matmul)
    h = jnp.dot(h, m1_ref[...], preferred_element_type=jnp.float32)
    h = jnp.maximum(h + b1_ref[...], 0.0).astype(jnp.bfloat16)

    # block2: ConvTranspose2d(2d -> d, k5 s2 p2 op1) + ReLU  (dense matmul)
    h = jnp.dot(h, m2_ref[...], preferred_element_type=jnp.float32)
    h = jnp.maximum(h + b2_ref[...], 0.0)   # (bt, dim*256) f32; pixel = ih*16+iw

    # deconv_out: ConvTranspose2d(dim -> 1, k2 s2 p2) + Sigmoid.
    # Each output pixel has exactly one (kh,kw) contribution, so only a
    # channel contraction is needed.  Output slot k*256 + p holds
    # sum_c h[b, c, p] * w3[c, 0, kh, kw] + b3, with k = kh*2 + kw.
    #
    # Hoist all SMEM scalar reads out of the loops (JAX does not CSE them).
    w3 = [w3_ref[i] for i in range(dim * 4)]
    b3 = w3_ref[dim * 4]

    bt = o_ref.shape[0]
    # 32-row chunks: each (rows, 256) f32 slab/accumulator is 8 vregs, so the
    # 4 k-accumulators + one h slab (~40 vregs) stay register-resident.
    rows = 32 if bt >= 32 else bt
    for r0 in range(0, bt, rows):
        r = min(rows, bt - r0)
        accs = None
        for c in range(dim):                       # channel innermost:
            slab = h[r0:r0 + r, c * 256:(c + 1) * 256]   # load each slab once
            if accs is None:
                accs = [slab * w3[c * 4 + k] for k in range(4)]
            else:
                accs = [accs[k] + slab * w3[c * 4 + k] for k in range(4)]
        for k in range(4):
            t = accs[k] + b3
            # sigmoid(t) == 0.5*tanh(0.5*t)+0.5 : single EUP op, exact [0,1]
            o_ref[r0:r0 + r, k * 256:(k + 1) * 256] = 0.5 * jnp.tanh(0.5 * t) + 0.5


def _round_up(a, b):
    return (a + b - 1) // b * b


def mnist_decoder(x, params, *, block_b=256):
    wl, bl, m1, bb1, m2, bb2, w3s = params
    b, dim = x.shape

    # Pad batch to a multiple of 8 (f32 sublane); grid over batch tiles.
    b8 = _round_up(b, 8)
    bt = min(block_b, b8)
    # Prefer >= 2 grid steps when the batch allows it, so the "parallel" batch
    # axis can actually shard across both TensorCores on v7x.
    if b8 >= 16 and b8 <= bt:
        bt = _round_up((b8 + 1) // 2, 8)
    b_pad = _round_up(b, bt)
    x_p = x if b_pad == b else jnp.pad(x, ((0, b_pad - b), (0, 0)))
    nb = b_pad // bt

    def const2d(shape):
        # Constant index_map -> weight stays VMEM-resident across the grid.
        # Single-buffered: it never re-DMAs, so double-buffering only wastes
        # VMEM (m2 alone is 4 MiB bf16 at dim=8).
        return pl.BlockSpec(tuple(shape), lambda i: (0, 0),
                            pipeline_mode=pl.Buffered(1))

    out = pl.pallas_call(
        functools.partial(decoder_kernel, dim=dim),
        out_shape=jax.ShapeDtypeStruct((b_pad, 1024), jnp.float32),
        grid=(nb,),
        in_specs=[
            pl.BlockSpec((bt, dim), lambda i: (i, 0)),   # x (batch-tiled)
            const2d(wl.shape), const2d(bl.shape),        # linear (resident)
            const2d(m1.shape), const2d(bb1.shape),       # block1 (resident)
            const2d(m2.shape), const2d(bb2.shape),       # block2 (resident)
            pl.BlockSpec(w3s.shape, lambda i: (0,),      # deconv_out wts/bias
                         memory_space=pltpu.MemorySpace.SMEM),
        ],
        out_specs=pl.BlockSpec((bt, 1024), lambda i: (i, 0)),
        compiler_params=pltpu.CompilerParams(
            dimension_semantics=("parallel",),
            # 48 MiB fits v7x's 64 MiB/TC and covers v5e's 16 MiB default.
            vmem_limit_bytes=48 * 1024 * 1024),
    )(x_p, wl, bl, m1, bb1, m2, bb2, w3s)

    # Sub-pixel interleave + crop (pure layout, done outside the kernel):
    # out[:, k*256 + ih*16 + iw] -> pixel (2*ih + kh - 2, 2*iw + kw - 2).
    out = out[:b]
    g = out.reshape(b, 2, 2, 16, 16)                 # (b, kh, kw, ih, iw)
    g = jnp.transpose(g, (0, 3, 1, 4, 2))            # (b, ih, kh, iw, kw)
    g = g.reshape(b, 32, 32)[:, 2:30, 2:30]          # crop 32x32 -> 28x28
    return g.reshape(b, 784)


def make_params(dim, rng):
    # Linear(dim, 4*4*4*dim): torch stores (out, in); keep transposed (in, out).
    wl = (rng.standard_normal((dim, 64 * dim), dtype=np.float32)
          / np.sqrt(dim)).astype(np.float32)
    bl = 0.1 * rng.standard_normal((1, 64 * dim), dtype=np.float32)

    # block1: ConvTranspose2d(4*dim, 2*dim, k=5, s=2, p=2, op=1), 4x4 -> 8x8
    w1 = 0.05 * rng.standard_normal((4 * dim, 2 * dim, 5, 5), dtype=np.float32)
    b1 = 0.1 * rng.standard_normal((2 * dim,), dtype=np.float32)
    m1, h1, w1o = convtranspose2d_as_matrix(w1, 4, 4, 2, 2, 1)
    bb1 = np.repeat(b1, h1 * w1o)[None, :].astype(np.float32)

    # block2: ConvTranspose2d(2*dim, dim, k=5, s=2, p=2, op=1), 8x8 -> 16x16
    # NOTE: dense m2 is (128*dim) x (256*dim) = 64 KiB * dim^2 in bf16.
    w2 = 0.05 * rng.standard_normal((2 * dim, dim, 5, 5), dtype=np.float32)
    b2 = 0.1 * rng.standard_normal((dim,), dtype=np.float32)
    m2, h2, w2o = convtranspose2d_as_matrix(w2, h1, w1o, 2, 2, 1)
    bb2 = np.repeat(b2, h2 * w2o)[None, :].astype(np.float32)

    # deconv_out: ConvTranspose2d(dim, 1, k=2, s=2, p=2), 16x16 -> 28x28.
    # Kept in its original compact form (dim*4 weights + scalar bias in SMEM).
    w3 = 0.1 * rng.standard_normal((dim, 1, 2, 2), dtype=np.float32)
    b3 = 0.1 * rng.standard_normal((1,), dtype=np.float32)
    w3s = np.concatenate([w3.reshape(-1), b3]).astype(np.float32)  # (dim*4+1,)

    assert (h1, w1o) == (8, 8) and (h2, w2o) == (16, 16)

    bf16 = jnp.bfloat16   # weights bf16 (halves HBM traffic); biases f32
    return (jnp.asarray(wl, dtype=bf16), jnp.asarray(bl),
            jnp.asarray(m1, dtype=bf16), jnp.asarray(bb1),
            jnp.asarray(m2, dtype=bf16), jnp.asarray(bb2),
            jnp.asarray(w3s))


def _reference(x, params):
    """Pure-JAX reference mirroring the kernel's bf16 weight quantization."""
    wl, bl, m1, bb1, m2, bb2, w3s = params
    dim = x.shape[1]
    f32 = lambda a: a.astype(jnp.float32)
    h = jnp.maximum(f32(x.astype(jnp.bfloat16)) @ f32(wl) + bl, 0.0)
    h = jnp.maximum(f32(h.astype(jnp.bfloat16)) @ f32(m1) + bb1, 0.0)
    h = jnp.maximum(f32(h.astype(jnp.bfloat16)) @ f32(m2) + bb2, 0.0)
    w3 = f32(w3s[:dim * 4]).reshape(dim, 1, 2, 2)
    b3 = w3s[dim * 4]
    hm = h.reshape(-1, dim, 16, 16)
    t = jnp.einsum('bchw,cokl->bohkwl', hm, w3)      # (B,1,16,2,16,2)
    t = t.reshape(-1, 32, 32)[:, 2:30, 2:30] + b3
    return jax.nn.sigmoid(t.reshape(-1, 784))


if __name__ == "__main__":
    dim = 8       # args.dim
    batch = 2

    rng = np.random.default_rng(0)
    params = make_params(dim, rng)

    key = jax.random.PRNGKey(0)
    x = jax.random.normal(key, (batch, dim), dtype=jnp.float32)

    out = jax.block_until_ready(mnist_decoder(x, params))

    assert out.shape == (batch, 784), out.shape
    assert out.dtype == jnp.float32
    assert bool(jnp.all(jnp.isfinite(out)))
    assert bool(jnp.all((out >= 0.0) & (out <= 1.0)))   # sigmoid range

    ref = _reference(x, params)
    np.testing.assert_allclose(np.asarray(out), np.asarray(ref), atol=2e-2)

    print("KERNEL_OK")
</pallas_src>

<mosaic_0001>
module attributes {stable_mosaic.version = 11 : i64} {
  func.func @decoder_kernel(%arg0: i32, %arg1: memref<8x8xf32, #tpu.memory_space<vmem>>, %arg2: memref<8x512xbf16, #tpu.memory_space<vmem>>, %arg3: memref<1x512xf32, #tpu.memory_space<vmem>>, %arg4: memref<512x1024xbf16, #tpu.memory_space<vmem>>, %arg5: memref<1x1024xf32, #tpu.memory_space<vmem>>, %arg6: memref<1024x2048xbf16, #tpu.memory_space<vmem>>, %arg7: memref<1x2048xf32, #tpu.memory_space<vmem>>, %arg8: memref<33xf32, #tpu.memory_space<smem>>, %arg9: memref<8x1024xf32, #tpu.memory_space<vmem>>) attributes {dimension_semantics = [#tpu.dimension_semantics<parallel>], iteration_bounds = array<i64: 1>, scalar_prefetch = 0 : i64, scratch_operands = 0 : i64, tpu.core_type = #tpu.core_type<tc>, window_params = [{transform_indices = @transform_0, window_bounds = array<i64: 8, 8>}, {pipeline_mode = #tpu.pipeline_mode<synchronous>, transform_indices = @transform_1, window_bounds = array<i64: 8, 512>}, {pipeline_mode = #tpu.pipeline_mode<synchronous>, transform_indices = @transform_2, window_bounds = array<i64: 1, 512>}, {pipeline_mode = #tpu.pipeline_mode<synchronous>, transform_indices = @transform_3, window_bounds = array<i64: 512, 1024>}, {pipeline_mode = #tpu.pipeline_mode<synchronous>, transform_indices = @transform_4, window_bounds = array<i64: 1, 1024>}, {pipeline_mode = #tpu.pipeline_mode<synchronous>, transform_indices = @transform_5, window_bounds = array<i64: 1024, 2048>}, {pipeline_mode = #tpu.pipeline_mode<synchronous>, transform_indices = @transform_6, window_bounds = array<i64: 1, 2048>}, {transform_indices = @transform_7, window_bounds = array<i64: 33>}, {transform_indices = @transform_8, window_bounds = array<i64: 8, 1024>}]} {
    %c0 = arith.constant 0 : index
    %c0_0 = arith.constant 0 : index
    %0 = vector.load %arg1[%c0, %c0_0] : memref<8x8xf32, #tpu.memory_space<vmem>>, vector<8x8xf32>
    %1 = arith.truncf %0 : vector<8x8xf32> to vector<8x8xbf16>
    %c0_1 = arith.constant 0 : index
    %c0_2 = arith.constant 0 : index
    %2 = vector.load %arg2[%c0_1, %c0_2] : memref<8x512xbf16, #tpu.memory_space<vmem>>, vector<8x512xbf16>
    %cst = arith.constant dense<0.000000e+00> : vector<8x512xf32>
    %3 = tpu.matmul %1, %2, %cst {dimension_numbers = #tpu.dot_dimension_numbers<[1], [0], [0], [1], [0, 0, 1, 1], [], []>} : vector<8x8xbf16>, vector<8x512xbf16>, vector<8x512xf32> -> vector<8x512xf32>
    %c0_3 = arith.constant 0 : index
    %c0_4 = arith.constant 0 : index
    %4 = vector.load %arg3[%c0_3, %c0_4] : memref<1x512xf32, #tpu.memory_space<vmem>>, vector<1x512xf32>
    %5 = vector.broadcast %4 : vector<1x512xf32> to vector<8x512xf32>
    %6 = arith.addf %3, %5 : vector<8x512xf32>
    %cst_5 = arith.constant 0.000000e+00 : f32
    %7 = vector.broadcast %cst_5 : f32 to vector<8x512xf32>
    %8 = arith.maximumf %6, %7 : vector<8x512xf32>
    %9 = arith.truncf %8 : vector<8x512xf32> to vector<8x512xbf16>
    %c0_6 = arith.constant 0 : index
    %c0_7 = arith.constant 0 : index
    %10 = vector.load %arg4[%c0_6, %c0_7] : memref<512x1024xbf16, #tpu.memory_space<vmem>>, vector<512x1024xbf16>
    %cst_8 = arith.constant dense<0.000000e+00> : vector<8x1024xf32>
    %11 = tpu.matmul %9, %10, %cst_8 {dimension_numbers = #tpu.dot_dimension_numbers<[1], [0], [0], [1], [0, 0, 1, 1], [], []>} : vector<8x512xbf16>, vector<512x1024xbf16>, vector<8x1024xf32> -> vector<8x1024xf32>
    %c0_9 = arith.constant 0 : index
    %c0_10 = arith.constant 0 : index
    %12 = vector.load %arg5[%c0_9, %c0_10] : memref<1x1024xf32, #tpu.memory_space<vmem>>, vector<1x1024xf32>
    %13 = vector.broadcast %12 : vector<1x1024xf32> to vector<8x1024xf32>
    %14 = arith.addf %11, %13 : vector<8x1024xf32>
    %cst_11 = arith.constant 0.000000e+00 : f32
    %15 = vector.broadcast %cst_11 : f32 to vector<8x1024xf32>
    %16 = arith.maximumf %14, %15 : vector<8x1024xf32>
    %17 = arith.truncf %16 : vector<8x1024xf32> to vector<8x1024xbf16>
    %c0_12 = arith.constant 0 : index
    %c0_13 = arith.constant 0 : index
    %18 = vector.load %arg6[%c0_12, %c0_13] : memref<1024x2048xbf16, #tpu.memory_space<vmem>>, vector<1024x2048xbf16>
    %cst_14 = arith.constant dense<0.000000e+00> : vector<8x2048xf32>
    %19 = tpu.matmul %17, %18, %cst_14 {dimension_numbers = #tpu.dot_dimension_numbers<[1], [0], [0], [1], [0, 0, 1, 1], [], []>} : vector<8x1024xbf16>, vector<1024x2048xbf16>, vector<8x2048xf32> -> vector<8x2048xf32>
    %c0_15 = arith.constant 0 : index
    %c0_16 = arith.constant 0 : index
    %20 = vector.load %arg7[%c0_15, %c0_16] : memref<1x2048xf32, #tpu.memory_space<vmem>>, vector<1x2048xf32>
    %21 = vector.broadcast %20 : vector<1x2048xf32> to vector<8x2048xf32>
    %22 = arith.addf %19, %21 : vector<8x2048xf32>
    %cst_17 = arith.constant 0.000000e+00 : f32
    %23 = vector.broadcast %cst_17 : f32 to vector<8x2048xf32>
    %24 = arith.maximumf %22, %23 : vector<8x2048xf32>
    %c0_18 = arith.constant 0 : index
    %25 = memref.load %arg8[%c0_18] : memref<33xf32, #tpu.memory_space<smem>>
    %c1 = arith.constant 1 : index
    %26 = memref.load %arg8[%c1] : memref<33xf32, #tpu.memory_space<smem>>
    %c2 = arith.constant 2 : index
    %27 = memref.load %arg8[%c2] : memref<33xf32, #tpu.memory_space<smem>>
    %c3 = arith.constant 3 : index
    %28 = memref.load %arg8[%c3] : memref<33xf32, #tpu.memory_space<smem>>
    %c4 = arith.constant 4 : index
    %29 = memref.load %arg8[%c4] : memref<33xf32, #tpu.memory_space<smem>>
    %c5 = arith.constant 5 : index
    %30 = memref.load %arg8[%c5] : memref<33xf32, #tpu.memory_space<smem>>
    %c6 = arith.constant 6 : index
    %31 = memref.load %arg8[%c6] : memref<33xf32, #tpu.memory_space<smem>>
    %c7 = arith.constant 7 : index
    %32 = memref.load %arg8[%c7] : memref<33xf32, #tpu.memory_space<smem>>
    %c8 = arith.constant 8 : index
    %33 = memref.load %arg8[%c8] : memref<33xf32, #tpu.memory_space<smem>>
    %c9 = arith.constant 9 : index
    %34 = memref.load %arg8[%c9] : memref<33xf32, #tpu.memory_space<smem>>
    %c10 = arith.constant 10 : index
    %35 = memref.load %arg8[%c10] : memref<33xf32, #tpu.memory_space<smem>>
    %c11 = arith.constant 11 : index
    %36 = memref.load %arg8[%c11] : memref<33xf32, #tpu.memory_space<smem>>
    %c12 = arith.constant 12 : index
    %37 = memref.load %arg8[%c12] : memref<33xf32, #tpu.memory_space<smem>>
    %c13 = arith.constant 13 : index
    %38 = memref.load %arg8[%c13] : memref<33xf32, #tpu.memory_space<smem>>
    %c14 = arith.constant 14 : index
    %39 = memref.load %arg8[%c14] : memref<33xf32, #tpu.memory_space<smem>>
    %c15 = arith.constant 15 : index
    %40 = memref.load %arg8[%c15] : memref<33xf32, #tpu.memory_space<smem>>
    %c16 = arith.constant 16 : index
    %41 = memref.load %arg8[%c16] : memref<33xf32, #tpu.memory_space<smem>>
    %c17 = arith.constant 17 : index
    %42 = memref.load %arg8[%c17] : memref<33xf32, #tpu.memory_space<smem>>
    %c18 = arith.constant 18 : index
    %43 = memref.load %arg8[%c18] : memref<33xf32, #tpu.memory_space<smem>>
    %c19 = arith.constant 19 : index
    %44 = memref.load %arg8[%c19] : memref<33xf32, #tpu.memory_space<smem>>
    %c20 = arith.constant 20 : index
    %45 = memref.load %arg8[%c20] : memref<33xf32, #tpu.memory_space<smem>>
    %c21 = arith.constant 21 : index
    %46 = memref.load %arg8[%c21] : memref<33xf32, #tpu.memory_space<smem>>
    %c22 = arith.constant 22 : index
    %47 = memref.load %arg8[%c22] : memref<33xf32, #tpu.memory_space<smem>>
    %c23 = arith.constant 23 : index
    %48 = memref.load %arg8[%c23] : memref<33xf32, #tpu.memory_space<smem>>
    %c24 = arith.constant 24 : index
    %49 = memref.load %arg8[%c24] : memref<33xf32, #tpu.memory_space<smem>>
    %c25 = arith.constant 25 : index
    %50 = memref.load %arg8[%c25] : memref<33xf32, #tpu.memory_space<smem>>
    %c26 = arith.constant 26 : index
    %51 = memref.load %arg8[%c26] : memref<33xf32, #tpu.memory_space<smem>>
    %c27 = arith.constant 27 : index
    %52 = memref.load %arg8[%c27] : memref<33xf32, #tpu.memory_space<smem>>
    %c28 = arith.constant 28 : index
    %53 = memref.load %arg8[%c28] : memref<33xf32, #tpu.memory_space<smem>>
    %c29 = arith.constant 29 : index
    %54 = memref.load %arg8[%c29] : memref<33xf32, #tpu.memory_space<smem>>
    %c30 = arith.constant 30 : index
    %55 = memref.load %arg8[%c30] : memref<33xf32, #tpu.memory_space<smem>>
    %c31 = arith.constant 31 : index
    %56 = memref.load %arg8[%c31] : memref<33xf32, #tpu.memory_space<smem>>
    %c32 = arith.constant 32 : index
    %57 = memref.load %arg8[%c32] : memref<33xf32, #tpu.memory_space<smem>>
    %58 = vector.extract_strided_slice %24 {offsets = [0, 0], sizes = [8, 256], strides = [1, 1]} : vector<8x2048xf32> to vector<8x256xf32>
    %59 = vector.broadcast %25 : f32 to vector<8x256xf32>
    %60 = arith.mulf %58, %59 : vector<8x256xf32>
    %61 = vector.broadcast %26 : f32 to vector<8x256xf32>
    %62 = arith.mulf %58, %61 : vector<8x256xf32>
    %63 = vector.broadcast %27 : f32 to vector<8x256xf32>
    %64 = arith.mulf %58, %63 : vector<8x256xf32>
    %65 = vector.broadcast %28 : f32 to vector<8x256xf32>
    %66 = arith.mulf %58, %65 : vector<8x256xf32>
    %67 = vector.extract_strided_slice %24 {offsets = [0, 256], sizes = [8, 256], strides = [1, 1]} : vector<8x2048xf32> to vector<8x256xf32>
    %68 = vector.broadcast %29 : f32 to vector<8x256xf32>
    %69 = arith.mulf %67, %68 : vector<8x256xf32>
    %70 = arith.addf %60, %69 : vector<8x256xf32>
    %71 = vector.broadcast %30 : f32 to vector<8x256xf32>
    %72 = arith.mulf %67, %71 : vector<8x256xf32>
    %73 = arith.addf %62, %72 : vector<8x256xf32>
    %74 = vector.broadcast %31 : f32 to vector<8x256xf32>
    %75 = arith.mulf %67, %74 : vector<8x256xf32>
    %76 = arith.addf %64, %75 : vector<8x256xf32>
    %77 = vector.broadcast %32 : f32 to vector<8x256xf32>
    %78 = arith.mulf %67, %77 : vector<8x256xf32>
    %79 = arith.addf %66, %78 : vector<8x256xf32>
    %80 = vector.extract_strided_slice %24 {offsets = [0, 512], sizes = [8, 256], strides = [1, 1]} : vector<8x2048xf32> to vector<8x256xf32>
    %81 = vector.broadcast %33 : f32 to vector<8x256xf32>
    %82 = arith.mulf %80, %81 : vector<8x256xf32>
    %83 = arith.addf %70, %82 : vector<8x256xf32>
    %84 = vector.broadcast %34 : f32 to vector<8x256xf32>
    %85 = arith.mulf %80, %84 : vector<8x256xf32>
    %86 = arith.addf %73, %85 : vector<8x256xf32>
    %87 = vector.broadcast %35 : f32 to vector<8x256xf32>
    %88 = arith.mulf %80, %87 : vector<8x256xf32>
    %89 = arith.addf %76, %88 : vector<8x256xf32>
    %90 = vector.broadcast %36 : f32 to vector<8x256xf32>
    %91 = arith.mulf %80, %90 : vector<8x256xf32>
    %92 = arith.addf %79, %91 : vector<8x256xf32>
    %93 = vector.extract_strided_slice %24 {offsets = [0, 768], sizes = [8, 256], strides = [1, 1]} : vector<8x2048xf32> to vector<8x256xf32>
    %94 = vector.broadcast %37 : f32 to vector<8x256xf32>
    %95 = arith.mulf %93, %94 : vector<8x256xf32>
    %96 = arith.addf %83, %95 : vector<8x256xf32>
    %97 = vector.broadcast %38 : f32 to vector<8x256xf32>
    %98 = arith.mulf %93, %97 : vector<8x256xf32>
    %99 = arith.addf %86, %98 : vector<8x256xf32>
    %100 = vector.broadcast %39 : f32 to vector<8x256xf32>
    %101 = arith.mulf %93, %100 : vector<8x256xf32>
    %102 = arith.addf %89, %101 : vector<8x256xf32>
    %103 = vector.broadcast %40 : f32 to vector<8x256xf32>
    %104 = arith.mulf %93, %103 : vector<8x256xf32>
    %105 = arith.addf %92, %104 : vector<8x256xf32>
    %106 = vector.extract_strided_slice %24 {offsets = [0, 1024], sizes = [8, 256], strides = [1, 1]} : vector<8x2048xf32> to vector<8x256xf32>
    %107 = vector.broadcast %41 : f32 to vector<8x256xf32>
    %108 = arith.mulf %106, %107 : vector<8x256xf32>
    %109 = arith.addf %96, %108 : vector<8x256xf32>
    %110 = vector.broadcast %42 : f32 to vector<8x256xf32>
    %111 = arith.mulf %106, %110 : vector<8x256xf32>
    %112 = arith.addf %99, %111 : vector<8x256xf32>
    %113 = vector.broadcast %43 : f32 to vector<8x256xf32>
    %114 = arith.mulf %106, %113 : vector<8x256xf32>
    %115 = arith.addf %102, %114 : vector<8x256xf32>
    %116 = vector.broadcast %44 : f32 to vector<8x256xf32>
    %117 = arith.mulf %106, %116 : vector<8x256xf32>
    %118 = arith.addf %105, %117 : vector<8x256xf32>
    %119 = vector.extract_strided_slice %24 {offsets = [0, 1280], sizes = [8, 256], strides = [1, 1]} : vector<8x2048xf32> to vector<8x256xf32>
    %120 = vector.broadcast %45 : f32 to vector<8x256xf32>
    %121 = arith.mulf %119, %120 : vector<8x256xf32>
    %122 = arith.addf %109, %121 : vector<8x256xf32>
    %123 = vector.broadcast %46 : f32 to vector<8x256xf32>
    %124 = arith.mulf %119, %123 : vector<8x256xf32>
    %125 = arith.addf %112, %124 : vector<8x256xf32>
    %126 = vector.broadcast %47 : f32 to vector<8x256xf32>
    %127 = arith.mulf %119, %126 : vector<8x256xf32>
    %128 = arith.addf %115, %127 : vector<8x256xf32>
    %129 = vector.broadcast %48 : f32 to vector<8x256xf32>
    %130 = arith.mulf %119, %129 : vector<8x256xf32>
    %131 = arith.addf %118, %130 : vector<8x256xf32>
    %132 = vector.extract_strided_slice %24 {offsets = [0, 1536], sizes = [8, 256], strides = [1, 1]} : vector<8x2048xf32> to vector<8x256xf32>
    %133 = vector.broadcast %49 : f32 to vector<8x256xf32>
    %134 = arith.mulf %132, %133 : vector<8x256xf32>
    %135 = arith.addf %122, %134 : vector<8x256xf32>
    %136 = vector.broadcast %50 : f32 to vector<8x256xf32>
    %137 = arith.mulf %132, %136 : vector<8x256xf32>
    %138 = arith.addf %125, %137 : vector<8x256xf32>
    %139 = vector.broadcast %51 : f32 to vector<8x256xf32>
    %140 = arith.mulf %132, %139 : vector<8x256xf32>
    %141 = arith.addf %128, %140 : vector<8x256xf32>
    %142 = vector.broadcast %52 : f32 to vector<8x256xf32>
    %143 = arith.mulf %132, %142 : vector<8x256xf32>
    %144 = arith.addf %131, %143 : vector<8x256xf32>
    %145 = vector.extract_strided_slice %24 {offsets = [0, 1792], sizes = [8, 256], strides = [1, 1]} : vector<8x2048xf32> to vector<8x256xf32>
    %146 = vector.broadcast %53 : f32 to vector<8x256xf32>
    %147 = arith.mulf %145, %146 : vector<8x256xf32>
    %148 = arith.addf %135, %147 : vector<8x256xf32>
    %149 = vector.broadcast %54 : f32 to vector<8x256xf32>
    %150 = arith.mulf %145, %149 : vector<8x256xf32>
    %151 = arith.addf %138, %150 : vector<8x256xf32>
    %152 = vector.broadcast %55 : f32 to vector<8x256xf32>
    %153 = arith.mulf %145, %152 : vector<8x256xf32>
    %154 = arith.addf %141, %153 : vector<8x256xf32>
    %155 = vector.broadcast %56 : f32 to vector<8x256xf32>
    %156 = arith.mulf %145, %155 : vector<8x256xf32>
    %157 = arith.addf %144, %156 : vector<8x256xf32>
    %158 = vector.broadcast %57 : f32 to vector<8x256xf32>
    %159 = arith.addf %148, %158 : vector<8x256xf32>
    %cst_19 = arith.constant 5.000000e-01 : f32
    %160 = vector.broadcast %cst_19 : f32 to vector<8x256xf32>
    %161 = arith.mulf %160, %159 : vector<8x256xf32>
    %162 = math.tanh %161 : vector<8x256xf32>
    %cst_20 = arith.constant 5.000000e-01 : f32
    %163 = vector.broadcast %cst_20 : f32 to vector<8x256xf32>
    %164 = arith.mulf %163, %162 : vector<8x256xf32>
    %cst_21 = arith.constant 5.000000e-01 : f32
    %165 = vector.broadcast %cst_21 : f32 to vector<8x256xf32>
    %166 = arith.addf %164, %165 : vector<8x256xf32>
    %c0_22 = arith.constant 0 : index
    %c0_23 = arith.constant 0 : index
    %167 = vector.load %arg9[%c0_22, %c0_23] : memref<8x1024xf32, #tpu.memory_space<vmem>>, vector<8x256xf32>
    tpu.vector_store %arg9[%c0_22, %c0_23], %166 {strides = array<i32>} : memref<8x1024xf32, #tpu.memory_space<vmem>>, vector<8x256xf32>,
    %168 = vector.broadcast %57 : f32 to vector<8x256xf32>
    %169 = arith.addf %151, %168 : vector<8x256xf32>
    %cst_24 = arith.constant 5.000000e-01 : f32
    %170 = vector.broadcast %cst_24 : f32 to vector<8x256xf32>
    %171 = arith.mulf %170, %169 : vector<8x256xf32>
    %172 = math.tanh %171 : vector<8x256xf32>
    %cst_25 = arith.constant 5.000000e-01 : f32
    %173 = vector.broadcast %cst_25 : f32 to vector<8x256xf32>
    %174 = arith.mulf %173, %172 : vector<8x256xf32>
    %cst_26 = arith.constant 5.000000e-01 : f32
    %175 = vector.broadcast %cst_26 : f32 to vector<8x256xf32>
    %176 = arith.addf %174, %175 : vector<8x256xf32>
    %c0_27 = arith.constant 0 : index
    %c256 = arith.constant 256 : index
    %177 = vector.load %arg9[%c0_27, %c256] : memref<8x1024xf32, #tpu.memory_space<vmem>>, vector<8x256xf32>
    tpu.vector_store %arg9[%c0_27, %c256], %176 {strides = array<i32>} : memref<8x1024xf32, #tpu.memory_space<vmem>>, vector<8x256xf32>,
    %178 = vector.broadcast %57 : f32 to vector<8x256xf32>
    %179 = arith.addf %154, %178 : vector<8x256xf32>
    %cst_28 = arith.constant 5.000000e-01 : f32
    %180 = vector.broadcast %cst_28 : f32 to vector<8x256xf32>
    %181 = arith.mulf %180, %179 : vector<8x256xf32>
    %182 = math.tanh %181 : vector<8x256xf32>
    %cst_29 = arith.constant 5.000000e-01 : f32
    %183 = vector.broadcast %cst_29 : f32 to vector<8x256xf32>
    %184 = arith.mulf %183, %182 : vector<8x256xf32>
    %cst_30 = arith.constant 5.000000e-01 : f32
    %185 = vector.broadcast %cst_30 : f32 to vector<8x256xf32>
    %186 = arith.addf %184, %185 : vector<8x256xf32>
    %c0_31 = arith.constant 0 : index
    %c512 = arith.constant 512 : index
    %187 = vector.load %arg9[%c0_31, %c512] : memref<8x1024xf32, #tpu.memory_space<vmem>>, vector<8x256xf32>
    tpu.vector_store %arg9[%c0_31, %c512], %186 {strides = array<i32>} : memref<8x1024xf32, #tpu.memory_space<vmem>>, vector<8x256xf32>,
    %188 = vector.broadcast %57 : f32 to vector<8x256xf32>
    %189 = arith.addf %157, %188 : vector<8x256xf32>
    %cst_32 = arith.constant 5.000000e-01 : f32
    %190 = vector.broadcast %cst_32 : f32 to vector<8x256xf32>
    %191 = arith.mulf %190, %189 : vector<8x256xf32>
    %192 = math.tanh %191 : vector<8x256xf32>
    %cst_33 = arith.constant 5.000000e-01 : f32
    %193 = vector.broadcast %cst_33 : f32 to vector<8x256xf32>
    %194 = arith.mulf %193, %192 : vector<8x256xf32>
    %cst_34 = arith.constant 5.000000e-01 : f32
    %195 = vector.broadcast %cst_34 : f32 to vector<8x256xf32>
    %196 = arith.addf %194, %195 : vector<8x256xf32>
    %c0_35 = arith.constant 0 : index
    %c768 = arith.constant 768 : index
    %197 = vector.load %arg9[%c0_35, %c768] : memref<8x1024xf32, #tpu.memory_space<vmem>>, vector<8x256xf32>
    tpu.vector_store %arg9[%c0_35, %c768], %196 {strides = array<i32>} : memref<8x1024xf32, #tpu.memory_space<vmem>>, vector<8x256xf32>,
    return
  }
  func.func @transform_0(%arg0: i32) -> (i32, i32) {
    %c0_i32 = arith.constant 0 : i32
    %c0_i32_0 = arith.constant 0 : i32
    return %arg0, %c0_i32 : i32, i32
  }
  func.func @transform_1(%arg0: i32) -> (i32, i32) {
    %c0_i32 = arith.constant 0 : i32
    %c0_i32_0 = arith.constant 0 : i32
    %c0_i32_1 = arith.constant 0 : i32
    return %c0_i32, %c0_i32_0 : i32, i32
  }
  func.func @transform_2(%arg0: i32) -> (i32, i32) {
    %c0_i32 = arith.constant 0 : i32
    %c0_i32_0 = arith.constant 0 : i32
    %c0_i32_1 = arith.constant 0 : i32
    return %c0_i32, %c0_i32_0 : i32, i32
  }
  func.func @transform_3(%arg0: i32) -> (i32, i32) {
    %c0_i32 = arith.constant 0 : i32
    %c0_i32_0 = arith.constant 0 : i32
    %c0_i32_1 = arith.constant 0 : i32
    return %c0_i32, %c0_i32_0 : i32, i32
  }
  func.func @transform_4(%arg0: i32) -> (i32, i32) {
    %c0_i32 = arith.constant 0 : i32
    %c0_i32_0 = arith.constant 0 : i32
    %c0_i32_1 = arith.constant 0 : i32
    return %c0_i32, %c0_i32_0 : i32, i32
  }
  func.func @transform_5(%arg0: i32) -> (i32, i32) {
    %c0_i32 = arith.constant 0 : i32
    %c0_i32_0 = arith.constant 0 : i32
    %c0_i32_1 = arith.constant 0 : i32
    return %c0_i32, %c0_i32_0 : i32, i32
  }
  func.func @transform_6(%arg0: i32) -> (i32, i32) {
    %c0_i32 = arith.constant 0 : i32
    %c0_i32_0 = arith.constant 0 : i32
    %c0_i32_1 = arith.constant 0 : i32
    return %c0_i32, %c0_i32_0 : i32, i32
  }
  func.func @transform_7(%arg0: i32) -> i32 {
    %c0_i32 = arith.constant 0 : i32
    %c0_i32_0 = arith.constant 0 : i32
    return %c0_i32 : i32
  }
  func.func @transform_8(%arg0: i32) -> (i32, i32) {
    %c0_i32 = arith.constant 0 : i32
    %c0_i32_0 = arith.constant 0 : i32
    return %arg0, %c0_i32 : i32, i32
  }
}

</mosaic_0001>

<bundles_post_ra>
// kernel: tpu_custom_call.1
= control target key start
LH: loop header
LB: loop body
LE: loop exit
PB: predicated region body
PF: predicated region fallthrough
CT: control target
= control target key end

     0   :  { %13 = vsyncpa [#allocation3], 0  ;;  %s12166_s0 = inlined_call_operand.hbm [shape: f32[8,8], index: 0, kind: input, shape index: {}]   ;;  %s12167_s1 = inlined_call_operand.hbm [shape: bf16[8,512], index: 1, kind: input, shape index: {}]   ;;  %s12168_s2 = inlined_call_operand.hbm [shape: f32[1,512], index: 2, kind: input, shape index: {}]   ;;  %s12169_s3 = inlined_call_operand.hbm [shape: bf16[512,1024], index: 3, kind: input, shape index: {}]   ;;  %s12170_s4 = inlined_call_operand.hbm [shape: f32[1,1024], index: 4, kind: input, shape index: {}]   ;;  %s12171_s5 = inlined_call_operand.hbm [shape: bf16[1024,2048], index: 5, kind: input, shape index: {}]   ;;  %s12172_s6 = inlined_call_operand.hbm [shape: f32[1,2048], index: 6, kind: input, shape index: {}]   ;;  %s12173_s7 = inlined_call_operand.hbm [shape: f32[33], index: 7, kind: input, shape index: {}]   ;;  %s12174_s8 = inlined_call_operand.hbm [shape: f32[8,1024], index: 8, kind: output, shape index: {}]  }
   0x1   :  { %14 = vsyncpa [#allocation7], 0 }
   0x2   :  { %15 = vsyncpa [#allocation10], 0 }
   0x3   :  { %16 = vsyncpa [#allocation13], 0 }
   0x4   :  { %17 = vsyncpa [#allocation5], 0 }
   0x5   :  { %18 = vsyncpa [#allocation4], 0  ;;  %s11539_s27 = smov [#allocation6]   ;;  %s11540_s29 = smov [#allocation9]  }
   0x6   :  { %s35_s28 = sshll.u32 %s11539_s27, 4  ;;  %s54_s30 = sshll.u32 %s11540_s29, 4  ;;  %s36_s28 = int_to_ptr.vmem [resolvable:$true] %s35_s28  ;;  %s55_s30 = int_to_ptr.vmem [resolvable:$true] %s54_s30 }
   0x7   :  { %s11367_s9 = scalar_lea.vmem %s36_s28, 256  ;;  %p11372_p1 = scmp.lt.s32.totalorder %s36_s28, %s36_s28 }
   0x8   :  { %p11368_p0 = scmp.ne.s32.totalorder %s36_s28, %s11367_s9  ;;  %p11373_p2 = scmp.lt.s32.totalorder %s11367_s9, %s11367_s9 }
   0xa   :  { %p11374_p3 = por %p11373_p2, %p11372_p1 }
   0xc   :  { %p11375_p4 = pnand %p11374_p3, %p11368_p0 }
   0xe   :  { %11378 = shalt.err (!%p11375_p4)
}
   0xf   :  { %38 = dma.hbm_to_vmem [thread:$0]  %s12167_s1, 256, %s36_s28, [#allocation7]  }
  0x10   :  { %s11387_s12 = scalar_lea.vmem %s55_s30, 32768  ;;  %p11392_p6 = scmp.lt.s32.totalorder %s55_s30, %s55_s30 }
  0x11   :  { %p11388_p5 = scmp.ne.s32.totalorder %s55_s30, %s11387_s12  ;;  %p11393_p7 = scmp.lt.s32.totalorder %s11387_s12, %s11387_s12 }
  0x13   :  { %p11394_p8 = por %p11393_p7, %p11392_p6 }
  0x15   :  { %p11395_p9 = pnand %p11394_p8, %p11388_p5 }
  0x17   :  { %11398 = shalt.err (!%p11395_p9)
}
  0x18   :  { %s11541_s13 = smov 512   ;;  %s11542_s14 = smov 32  }
  0x19   :  { %60 = dma.hbm_to_vmem [thread:$0]  %s12169_s3, 32768, %s55_s30, [#allocation10], %s11541_s13, %s11541_s13, %s11542_s14  }
  0x1a   :  { %s11543_s17 = smov [#allocation12]  }
  0x1b   :  { %s76_s18 = sshll.u32 %s11543_s17, 4  ;;  %s77_s18 = int_to_ptr.vmem [resolvable:$true] %s76_s18 }
  0x1c   :  { %s11407_s19 = scalar_lea.vmem %s77_s18, 131072  ;;  %p11412_p11 = scmp.lt.s32.totalorder %s77_s18, %s77_s18 }
  0x1d   :  { %p11408_p10 = scmp.ne.s32.totalorder %s77_s18, %s11407_s19  ;;  %p11413_p12 = scmp.lt.s32.totalorder %s11407_s19, %s11407_s19 }
  0x1f   :  { %p11414_p13 = por %p11413_p12, %p11412_p11 }
  0x21   :  { %p11415_p0 = pnand %p11414_p13, %p11408_p10 }
  0x23   :  { %11418 = shalt.err (!%p11415_p0)
}
  0x24   :  { %s11544_s1 = smov 1024   ;;  %s11545_s20 = smov 64  }
  0x25   :  { %82 = dma.hbm_to_vmem [thread:$0]  %s12171_s5, 131072, %s77_s18, [#allocation13], %s11544_s1, %s11544_s1, %s11545_s20  }
  0x26   :  { %s11546_s23 = smov [#allocation2]   ;;  %s11547_s3 = smov [#allocation8]  }
  0x27   :  { %s25_s24 = sshll.u32 %s11546_s23, 4  ;;  %s45_s25 = sshll.u32 %s11547_s3, 4  ;;  %s26_s24 = int_to_ptr.vmem [resolvable:$true] %s25_s24  ;;  %s46_s25 = int_to_ptr.vmem [resolvable:$true] %s45_s25 }
  0x28   :  { %s11427_s26 = scalar_lea.vmem %s26_s24, 128  ;;  %p11432_p2 = scmp.lt.s32.totalorder %s26_s24, %s26_s24 }
  0x29   :  { %p11428_p1 = scmp.ne.s32.totalorder %s26_s24, %s11427_s26  ;;  %p11433_p3 = scmp.lt.s32.totalorder %s11427_s26, %s11427_s26 }
  0x2b   :  { %p11434_p4 = por %p11433_p3, %p11432_p2 }
  0x2d   :  { %p11435_p5 = pnand %p11434_p4, %p11428_p1 }
  0x2f   :  { %11438 = shalt.err (!%p11435_p5)
}
  0x30   :  { %28 = dma.hbm_to_vmem [thread:$0]  %s12166_s0, 128, %s26_s24, [#allocation3]  }
  0x31   :  { %s11447_s29 = scalar_lea.vmem %s46_s25, 64  ;;  %p11452_p7 = scmp.lt.s32.totalorder %s46_s25, %s46_s25 }
  0x32   :  { %p11448_p6 = scmp.ne.s32.totalorder %s46_s25, %s11447_s29  ;;  %p11453_p8 = scmp.lt.s32.totalorder %s11447_s29, %s11447_s29 }
  0x34   :  { %p11454_p9 = por %p11453_p8, %p11452_p7 }
  0x36   :  { %p11455_p10 = pnand %p11454_p9, %p11448_p6 }
  0x38   :  { %11458 = shalt.err (!%p11455_p10)
}
  0x39   :  { %48 = dma.hbm_to_vmem [thread:$0]  %s12168_s2, 64, %s46_s25, [#allocation7]  }
  0x3a   :  { %s11548_s9 = smov [#allocation11]   ;;  %s11549_s11 = smov [#allocation14]  }
  0x3b   :  { %s67_s10 = sshll.u32 %s11548_s9, 4  ;;  %s89_s12 = sshll.u32 %s11549_s11, 4  ;;  %s68_s10 = int_to_ptr.vmem [resolvable:$true] %s67_s10  ;;  %s90_s12 = int_to_ptr.vmem [resolvable:$true] %s89_s12 }
  0x3c   :  { %s11467_s13 = scalar_lea.vmem %s68_s10, 128  ;;  %p11472_p12 = scmp.lt.s32.totalorder %s68_s10, %s68_s10 }
  0x3d   :  { %p11468_p11 = scmp.ne.s32.totalorder %s68_s10, %s11467_s13  ;;  %p11473_p13 = scmp.lt.s32.totalorder %s11467_s13, %s11467_s13 }
  0x3f   :  { %p11474_p0 = por %p11473_p13, %p11472_p12 }
  0x41   :  { %p11475_p1 = pnand %p11474_p0, %p11468_p11 }
  0x43   :  { %11478 = shalt.err (!%p11475_p1)
}
  0x44   :  { %70 = dma.hbm_to_vmem [thread:$0]  %s12170_s4, 128, %s68_s10, [#allocation10]  }
  0x45   :  { %s11487_s15 = scalar_lea.vmem %s90_s12, 256  ;;  %p11492_p3 = scmp.lt.s32.totalorder %s90_s12, %s90_s12 }
  0x46   :  { %p11488_p2 = scmp.ne.s32.totalorder %s90_s12, %s11487_s15  ;;  %p11493_p4 = scmp.lt.s32.totalorder %s11487_s15, %s11487_s15 }
  0x48   :  { %p11494_p5 = por %p11493_p4, %p11492_p3 }
  0x4a   :  { %p11495_p6 = pnand %p11494_p5, %p11488_p2 }
  0x4c   :  { %11498 = shalt.err (!%p11495_p6)
}
  0x4d   :  { %92 = dma.hbm_to_vmem [thread:$0]  %s12172_s6, 256, %s90_s12, [#allocation13]  }
  0x4e   :  { %s11550_s17 = smov [#allocation15]  }
  0x4f   :  { %100 = dma.hbm_to_smem %s12173_s7, 16, %s11550_s17, [#allocation5]  }
  0x50   :  { %11527 = dma.done.wait [#allocation3], 128  }
  0x51   :  { %11528 = vsyncadd [#allocation3], 4294967168 }
  0x52   :  { %11529 = dma.done.wait [#allocation7], 320  }
  0x53   :  { %11530 = vsyncadd [#allocation7], 4294966976 }
  0x54   :  { %11531 = dma.done.wait [#allocation10], 32896  }
  0x55   :  { %11532 = vsyncadd [#allocation10], 4294934400 }
  0x56   :  { %11533 = dma.done.wait [#allocation13], 131328  }
  0x57   :  { %11534 = vsyncadd [#allocation13], 4294835968 }
  0x58   :  { %11535 = dma.done.wait [#allocation5], 16  }
  0x59   :  { %11536 = vsyncadd [#allocation5], 4294967280 }
  0x5a   :  { %125 = sfence }
  0x5b   :  { %v129_v0 = vld [vmem:[#allocation6] sm:$0xff]  ;;  %vm167_vm0 = vcmask 1043456   ;;  %v130_v1 = vld [vmem:[#allocation6 + $0x8] sm:$0xff]  ;;  %v127_v2 = vld [vmem:[#allocation2] sm:$0xff]  ;;  %v11551_v7 = vmov 0   ;;  %vm163_vm1 = vcmask 64512  }
  0x5c   :  { %v10002_v3 = vcombine.high %v129_v0, %v129_v0  ;;  %v10004_v4 = vcombine.high %v130_v1, %v130_v1  ;;  %v10001_v5 = vcombine.low %v129_v0, %v129_v0  ;;  %v10003_v6 = vcombine.low %v130_v1, %v130_v1  ;;  %212 = vmatprep.mubr.bf16.mxu0 %v11551_v7  ;;  %v326_v8 = vld [vmem:[#allocation9 + $0x1c0] sm:$0xff]  ;;  %s11799_s4 = sld [smem:[#allocation15]] }
  0x5d   :  { %v330_v9 = vld [vmem:[#allocation9 + $0x1e0] sm:$0xff]  ;;  %253 = vmatprep.mubr.bf16.mxu1 %v11551_v7  ;;  %v128_v17 = vpack.c.bf16 %v127_v2, %v127_v2  ;;  %s11801_s6 = sld [smem:[#allocation15 + $0x1]] }
  0x5e   :  { %v454_v10 = vld [vmem:[#allocation9 + $0x5c0] sm:$0xff]  ;;  %v10066_v11 = vcombine.high %v326_v8, %v330_v9  ;;  %10005 = vmatprep.subr.msk.bf16.mxu0 %vm167_vm0, %v10002_v3  ;;  %10007 = vmatprep.subr.msk.bf16.mxu1 %vm167_vm0, %v10004_v4  ;;  %v169_v15 = vsel %vm167_vm0, %v10001_v5, 0  ;;  %v175_v16 = vsel %vm167_vm0, %v10003_v6, 0  ;;  %v10065_v21 = vcombine.low %v326_v8, %v330_v9  ;;  %s11803_s7 = sld [smem:[#allocation15 + $0x2]] }
  0x5f   :  { %v458_v12 = vld [vmem:[#allocation9 + $0x5e0] sm:$0xff]  ;;  %195 = vmatpush1.bf16.msra.mxu0 %v169_v15  ;;  %236 = vmatpush1.bf16.msra.mxu1 %v175_v16  ;;  %s11805_s1 = sld [smem:[#allocation15 + $0x3]] }
  0x60   :  { %v318_v13 = vld [vmem:[#allocation9 + $0x180] sm:$0xff]  ;;  %v10194_v18 = vcombine.high %v454_v10, %v458_v12  ;;  %v10193_v22 = vcombine.low %v454_v10, %v458_v12  ;;  %1848 = vmatprep.subr.bf16.mxu0 %v10066_v11  ;;  %s11807_s20 = sld [smem:[#allocation15 + $0x4]] }
  0x61   :  { %v322_v14 = vld [vmem:[#allocation9 + $0x1a0] sm:$0xff]  ;;  %s11809_s21 = sld [smem:[#allocation15 + $0x5]] }
  0x62   :  { %v446_v19 = vld [vmem:[#allocation9 + $0x580] sm:$0xff]  ;;  %1889 = vmatprep.subr.bf16.mxu1 %v10194_v18  ;;  %v10058_v23 = vcombine.high %v318_v13, %v322_v14  ;;  %10006 = vmatmul.mubr.msk.bf16.vlgmr.msra.gmra.mxu0 %vm163_vm1, %v128_v17  ;;  %v10057_v29 = vcombine.low %v318_v13, %v322_v14  ;;  %s11811_s22 = sld [smem:[#allocation15 + $0x6]] }
  0x63   :  { %v450_v20 = vld [vmem:[#allocation9 + $0x5a0] sm:$0xff]  ;;  %10008 = vmatmul.mubr.msk.bf16.vlgmr.msra.gmra.mxu1 %vm163_vm1, %v128_v17  ;;  %1849 = vmatpush1.bf16.msra.mxu0 %v10065_v21  ;;  %s11813_s23 = sld [smem:[#allocation15 + $0x7]] }
  0x64   :  { %v10186_v24 = vcombine.high %v446_v19, %v450_v20  ;;  %v310_v25 = vld [vmem:[#allocation9 + $0x140] sm:$0xff]  ;;  %1890 = vmatpush1.bf16.msra.mxu1 %v10193_v22  ;;  %v10185_v30 = vcombine.low %v446_v19, %v450_v20  ;;  %1850 = vmatprep.subr.bf16.mxu0 %v10058_v23  ;;  %s11881_s24 = sld [smem:[#allocation15 + $0x8]] }
  0x65   :  { %v314_v26 = vld [vmem:[#allocation9 + $0x160] sm:$0xff]  ;;  %s11883_s3 = sld [smem:[#allocation15 + $0x9]] }
  0x66   :  { %v438_v27 = vld [vmem:[#allocation9 + $0x540] sm:$0xff]  ;;  %1891 = vmatprep.subr.bf16.mxu1 %v10186_v24  ;;  %v10050_v31 = vcombine.high %v310_v25, %v314_v26  ;;  %v10049_v37 = vcombine.low %v310_v25, %v314_v26  ;;  %s11885_s25 = sld [smem:[#allocation15 + $0xa]] }
  0x67   :  { %v442_v28 = vld [vmem:[#allocation9 + $0x560] sm:$0xff]  ;;  %1851 = vmatpush1.bf16.msra.mxu0 %v10057_v29  ;;  %s11887_s26 = sld [smem:[#allocation15 + $0xb]] }
  0x68   :  { %v10178_v32 = vcombine.high %v438_v27, %v442_v28  ;;  %v302_v33 = vld [vmem:[#allocation9 + $0x100] sm:$0xff]  ;;  %1892 = vmatpush1.bf16.msra.mxu1 %v10185_v30  ;;  %v10177_v38 = vcombine.low %v438_v27, %v442_v28  ;;  %1852 = vmatprep.subr.bf16.mxu0 %v10050_v31  ;;  %s11947_s27 = sld [smem:[#allocation15 + $0xc]] }
  0x69   :  { %v306_v34 = vld [vmem:[#allocation9 + $0x120] sm:$0xff]  ;;  %s11949_s28 = sld [smem:[#allocation15 + $0xd]] }
  0x6a   :  { %v430_v35 = vld [vmem:[#allocation9 + $0x500] sm:$0xff]  ;;  %1893 = vmatprep.subr.bf16.mxu1 %v10178_v32  ;;  %v10042_v39 = vcombine.high %v302_v33, %v306_v34  ;;  %v10041_v45 = vcombine.low %v302_v33, %v306_v34  ;;  %s11951_s29 = sld [smem:[#allocation15 + $0xe]] }
  0x6b   :  { %v434_v36 = vld [vmem:[#allocation9 + $0x520] sm:$0xff]  ;;  %1853 = vmatpush1.bf16.msra.mxu0 %v10049_v37  ;;  %s11953_s5 = sld [smem:[#allocation15 + $0xf]] }
  0x6c   :  { %v10170_v40 = vcombine.high %v430_v35, %v434_v36  ;;  %v294_v41 = vld [vmem:[#allocation9 + $0xc0] sm:$0xff]  ;;  %1894 = vmatpush1.bf16.msra.mxu1 %v10177_v38  ;;  %v10169_v46 = vcombine.low %v430_v35, %v434_v36  ;;  %1854 = vmatprep.subr.bf16.mxu0 %v10042_v39  ;;  %s12017_s30 = sld [smem:[#allocation15 + $0x10]] }
  0x6d   :  { %v298_v42 = vld [vmem:[#allocation9 + $0xe0] sm:$0xff]  ;;  %s12019_s9 = sld [smem:[#allocation15 + $0x11]] }
  0x6e   :  { %v422_v43 = vld [vmem:[#allocation9 + $0x4c0] sm:$0xff]  ;;  %1895 = vmatprep.subr.bf16.mxu1 %v10170_v40  ;;  %v10034_v47 = vcombine.high %v294_v41, %v298_v42  ;;  %v10033_v53 = vcombine.low %v294_v41, %v298_v42  ;;  %s12021_s10 = sld [smem:[#allocation15 + $0x12]] }
  0x6f   :  { %v426_v44 = vld [vmem:[#allocation9 + $0x4e0] sm:$0xff]  ;;  %1855 = vmatpush1.bf16.msra.mxu0 %v10041_v45  ;;  %s12023_s11 = sld [smem:[#allocation15 + $0x13]] }
  0x70   :  { %v10162_v48 = vcombine.high %v422_v43, %v426_v44  ;;  %v286_v49 = vld [vmem:[#allocation9 + $0x80] sm:$0xff]  ;;  %1896 = vmatpush1.bf16.msra.mxu1 %v10169_v46  ;;  %v10161_v54 = vcombine.low %v422_v43, %v426_v44  ;;  %1856 = vmatprep.subr.bf16.mxu0 %v10034_v47  ;;  %s12085_s12 = sld [smem:[#allocation15 + $0x14]] }
  0x71   :  { %v290_v50 = vld [vmem:[#allocation9 + $0xa0] sm:$0xff]  ;;  %s12087_s13 = sld [smem:[#allocation15 + $0x15]] }
  0x72   :  { %v414_v51 = vld [vmem:[#allocation9 + $0x480] sm:$0xff]  ;;  %1897 = vmatprep.subr.bf16.mxu1 %v10162_v48  ;;  %v10026_v55 = vcombine.high %v286_v49, %v290_v50  ;;  %v10025_v61 = vcombine.low %v286_v49, %v290_v50  ;;  %s12089_s0 = sld [smem:[#allocation15 + $0x16]] }
  0x73   :  { %v418_v52 = vld [vmem:[#allocation9 + $0x4a0] sm:$0xff]  ;;  %1857 = vmatpush1.bf16.msra.mxu0 %v10033_v53  ;;  %s12091_s14 = sld [smem:[#allocation15 + $0x17]] }
  0x74   :  { %v10154_v56 = vcombine.high %v414_v51, %v418_v52  ;;  %v278_v57 = vld [vmem:[#allocation9 + $0x40] sm:$0xff]  ;;  %1898 = vmatpush1.bf16.msra.mxu1 %v10161_v54  ;;  %v10153_v62 = vcombine.low %v414_v51, %v418_v52  ;;  %1858 = vmatprep.subr.bf16.mxu0 %v10026_v55  ;;  %s11312_s15 = sld [smem:[#allocation15 + $0x18]] }
  0x75   :  { %v282_v58 = vld [vmem:[#allocation9 + $0x60] sm:$0xff]  ;;  %s11313_s2 = sld [smem:[#allocation15 + $0x19]] }
  0x76   :  { %v406_v59 = vld [vmem:[#allocation9 + $0x440] sm:$0xff]  ;;  %1899 = vmatprep.subr.bf16.mxu1 %v10154_v56  ;;  %v10018_v63 = vcombine.high %v278_v57, %v282_v58  ;;  %v10017_v5 = vcombine.low %v278_v57, %v282_v58  ;;  %s11314_s16 = sld [smem:[#allocation15 + $0x1a]] }
  0x77   :  { %v410_v60 = vld [vmem:[#allocation9 + $0x460] sm:$0xff]  ;;  %1859 = vmatpush1.bf16.msra.mxu0 %v10025_v61  ;;  %s11315_s17 = sld [smem:[#allocation15 + $0x1b]] }
  0x78   :  { %v10146_v0 = vcombine.high %v406_v59, %v410_v60  ;;  %v270_v1 = vld [vmem:[#allocation9] sm:$0xff]  ;;  %1900 = vmatpush1.bf16.msra.mxu1 %v10153_v62  ;;  %v10145_v6 = vcombine.low %v406_v59, %v410_v60  ;;  %1860 = vmatprep.subr.bf16.mxu0 %v10018_v63  ;;  %s12151_s18 = sld [smem:[#allocation15 + $0x1c]] }
  0x79   :  { %v274_v2 = vld [vmem:[#allocation9 + $0x20] sm:$0xff]  ;;  %s12153_s19 = sld [smem:[#allocation15 + $0x1d]] }
  0x7a   :  { %v398_v3 = vld [vmem:[#allocation9 + $0x400] sm:$0xff]  ;;  %1901 = vmatprep.subr.bf16.mxu1 %v10146_v0  ;;  %v10010_v7 = vcombine.high %v270_v1, %v274_v2  ;;  %v10009_v13 = vcombine.low %v270_v1, %v274_v2 }
  0x7b   :  { %v402_v4 = vld [vmem:[#allocation9 + $0x420] sm:$0xff]  ;;  %1861 = vmatpush1.bf16.msra.mxu0 %v10017_v5 }
  0x7c   :  { %v10138_v8 = vcombine.high %v398_v3, %v402_v4  ;;  %v390_v9 = vld [vmem:[#allocation9 + $0x3c0] sm:$0xff]  ;;  %1902 = vmatpush1.bf16.msra.mxu1 %v10145_v6  ;;  %v10137_v14 = vcombine.low %v398_v3, %v402_v4  ;;  %1862 = vmatprep.subr.bf16.mxu0 %v10010_v7 }
  0x7d   :  { %v394_v10 = vld [vmem:[#allocation9 + $0x3e0] sm:$0xff] }
  0x7e   :  { %v518_v11 = vld [vmem:[#allocation9 + $0x7c0] sm:$0xff]  ;;  %1903 = vmatprep.subr.bf16.mxu1 %v10138_v8  ;;  %v10130_v15 = vcombine.high %v390_v9, %v394_v10  ;;  %v10129_v21 = vcombine.low %v390_v9, %v394_v10 }
  0x7f   :  { %v522_v12 = vld [vmem:[#allocation9 + $0x7e0] sm:$0xff]  ;;  %1863 = vmatpush1.bf16.msra.mxu0 %v10009_v13  ;;  %v455_v13 = vld [vmem:[#allocation9 + $0x5c8] sm:$0xff] }
  0x80   :  { %v10258_v16 = vcombine.high %v518_v11, %v522_v12  ;;  %v382_v17 = vld [vmem:[#allocation9 + $0x380] sm:$0xff]  ;;  %1904 = vmatpush1.bf16.msra.mxu1 %v10137_v14  ;;  %v10257_v22 = vcombine.low %v518_v11, %v522_v12  ;;  %1864 = vmatprep.subr.bf16.mxu0 %v10130_v15  ;;  %v327_v11 = vld [vmem:[#allocation9 + $0x1c8] sm:$0xff] }
  0x81   :  { %v386_v18 = vld [vmem:[#allocation9 + $0x3a0] sm:$0xff]  ;;  %v331_v12 = vld [vmem:[#allocation9 + $0x1e8] sm:$0xff] }
  0x82   :  { %v510_v19 = vld [vmem:[#allocation9 + $0x780] sm:$0xff]  ;;  %1905 = vmatprep.subr.bf16.mxu1 %v10258_v16  ;;  %v10122_v23 = vcombine.high %v382_v17, %v386_v18  ;;  %v10121_v29 = vcombine.low %v382_v17, %v386_v18  ;;  %v10068_v14 = vcombine.high %v327_v11, %v331_v12  ;;  %v459_v15 = vld [vmem:[#allocation9 + $0x5e8] sm:$0xff]  ;;  %v10067_v16 = vcombine.low %v327_v11, %v331_v12 }
  0x83   :  { %v514_v20 = vld [vmem:[#allocation9 + $0x7a0] sm:$0xff]  ;;  %1865 = vmatpush2.bf16.msra.mxu0 %v10129_v21  ;;  %v10195_v17 = vcombine.low %v455_v13, %v459_v15  ;;  %v10196_v18 = vcombine.high %v455_v13, %v459_v15  ;;  %v427_v11 = vld [vmem:[#allocation9 + $0x4e8] sm:$0xff] }
  0x84   :  { %v10250_v24 = vcombine.high %v510_v19, %v514_v20  ;;  %v374_v25 = vld [vmem:[#allocation9 + $0x340] sm:$0xff]  ;;  %1906 = vmatpush2.bf16.msra.mxu1 %v10257_v22  ;;  %v10249_v30 = vcombine.low %v510_v19, %v514_v20  ;;  %1866 = vmatprep.subr.bf16.mxu0 %v10122_v23  ;;  %v133_v19 = vlaneseq  ;;  %v131_v23 = vld [vmem:[#allocation8] sm:$0xf] }
  0x85   :  { %v378_v26 = vld [vmem:[#allocation9 + $0x360] sm:$0xff] }
  0x86   :  { %v502_v27 = vld [vmem:[#allocation9 + $0x740] sm:$0xff]  ;;  %1907 = vmatprep.subr.bf16.mxu1 %v10250_v24  ;;  %v10114_v31 = vcombine.high %v374_v25, %v378_v26  ;;  %v10113_v37 = vcombine.low %v374_v25, %v378_v26  ;;  %v11626_v20 = vshrl.u32 %v133_v19, 7  ;;  %v419_v19 = vld [vmem:[#allocation9 + $0x4a8] sm:$0xff] }
  0x87   :  { %v506_v28 = vld [vmem:[#allocation9 + $0x760] sm:$0xff]  ;;  %1867 = vmatpush2.bf16.msra.mxu0 %v10121_v29 }
  0x88   :  { %v10242_v32 = vcombine.high %v502_v27, %v506_v28  ;;  %v366_v33 = vld [vmem:[#allocation9 + $0x300] sm:$0xff]  ;;  %1908 = vmatpush2.bf16.msra.mxu1 %v10249_v30  ;;  %v10241_v38 = vcombine.low %v502_v27, %v506_v28  ;;  %1868 = vmatprep.subr.bf16.mxu0 %v10114_v31  ;;  %v11629_v21 = vsub.s32 0, %v11626_v20  ;;  %v11632_v22 = vsub.s32 2, %v11626_v20 }
  0x89   :  { %v370_v34 = vld [vmem:[#allocation9 + $0x320] sm:$0xff]  ;;  %v11635_v24 = vsub.s32 1, %v11626_v20  ;;  %v11638_v25 = vsub.s32 3, %v11626_v20 }
  0x8a   :  { %v494_v35 = vld [vmem:[#allocation9 + $0x700] sm:$0xff]  ;;  %1909 = vmatprep.subr.bf16.mxu1 %v10242_v32  ;;  %v10106_v39 = vcombine.high %v366_v33, %v370_v34  ;;  %v10105_v45 = vcombine.low %v366_v33, %v370_v34  ;;  %v136_v26 = vrot.slane %v131_v23, %v11629_v21  ;;  %v144_v27 = vrot.slane %v131_v23, %v11632_v22 }
  0x8b   :  { %v498_v36 = vld [vmem:[#allocation9 + $0x720] sm:$0xff]  ;;  %1869 = vmatpush2.bf16.msra.mxu0 %v10113_v37  ;;  %v140_v28 = vrot.slane %v131_v23, %v11635_v24  ;;  %v148_v29 = vrot.slane %v131_v23, %v11638_v25 }
  0x8c   :  { %v10234_v40 = vcombine.high %v494_v35, %v498_v36  ;;  %v358_v41 = vld [vmem:[#allocation9 + $0x2c0] sm:$0xff]  ;;  %1910 = vmatpush2.bf16.msra.mxu1 %v10241_v38  ;;  %v10233_v46 = vcombine.low %v494_v35, %v498_v36  ;;  %1870 = vmatprep.subr.bf16.mxu0 %v10106_v39 }
  0x8d   :  { %v362_v42 = vld [vmem:[#allocation9 + $0x2e0] sm:$0xff] }
  0x8e   :  { %v486_v43 = vld [vmem:[#allocation9 + $0x6c0] sm:$0xff]  ;;  %1911 = vmatprep.subr.bf16.mxu1 %v10234_v40  ;;  %v10098_v47 = vcombine.high %v358_v41, %v362_v42  ;;  %v10097_v53 = vcombine.low %v358_v41, %v362_v42 }
  0x8f   :  { %v490_v44 = vld [vmem:[#allocation9 + $0x6e0] sm:$0xff]  ;;  %1871 = vmatpush2.bf16.msra.mxu0 %v10105_v45 }
  0x90   :  { %v10226_v48 = vcombine.high %v486_v43, %v490_v44  ;;  %v350_v49 = vld [vmem:[#allocation9 + $0x280] sm:$0xff]  ;;  %1912 = vmatpush2.bf16.msra.mxu1 %v10233_v46  ;;  %v10225_v54 = vcombine.low %v486_v43, %v490_v44  ;;  %1872 = vmatprep.subr.bf16.mxu0 %v10098_v47  ;;  %v319_v44 = vld [vmem:[#allocation9 + $0x188] sm:$0xff] }
  0x91   :  { %v354_v50 = vld [vmem:[#allocation9 + $0x2a0] sm:$0xff] }
  0x92   :  { %v478_v51 = vld [vmem:[#allocation9 + $0x680] sm:$0xff]  ;;  %1913 = vmatprep.subr.bf16.mxu1 %v10226_v48  ;;  %v10090_v55 = vcombine.high %v350_v49, %v354_v50  ;;  %v10089_v57 = vcombine.low %v350_v49, %v354_v50  ;;  %v323_v48 = vld [vmem:[#allocation9 + $0x1a8] sm:$0xff] }
  0x93   :  { %v482_v52 = vld [vmem:[#allocation9 + $0x6a0] sm:$0xff]  ;;  %1873 = vmatpush2.bf16.msra.mxu0 %v10097_v53  ;;  %v447_v49 = vld [vmem:[#allocation9 + $0x588] sm:$0xff] }
  0x94   :  { %v10218_v56 = vcombine.high %v478_v51, %v482_v52  ;;  %1914 = vmatpush2.bf16.msra.mxu1 %v10225_v54  ;;  %v10217_v58 = vcombine.low %v478_v51, %v482_v52  ;;  %1874 = vmatprep.subr.bf16.mxu0 %v10090_v55  ;;  %v342_v59 = vld [vmem:[#allocation9 + $0x240] sm:$0xff]  ;;  %v451_v50 = vld [vmem:[#allocation9 + $0x5a8] sm:$0xff]  ;;  %v10060_v55 = vcombine.high %v319_v44, %v323_v48 }
  0x95   :  { %v346_v60 = vld [vmem:[#allocation9 + $0x260] sm:$0xff]  ;;  %v311_v54 = vld [vmem:[#allocation9 + $0x148] sm:$0xff] }
  0x96   :  { %1915 = vmatprep.subr.bf16.mxu1 %v10218_v56  ;;  %v470_v61 = vld [vmem:[#allocation9 + $0x640] sm:$0xff]  ;;  %v10082_v62 = vcombine.high %v342_v59, %v346_v60  ;;  %v10081_v0 = vcombine.low %v342_v59, %v346_v60  ;;  %v10188_v56 = vcombine.high %v447_v49, %v451_v50  ;;  %v443_v59 = vld [vmem:[#allocation9 + $0x568] sm:$0xff]  ;;  %v10059_v60 = vcombine.low %v319_v44, %v323_v48 }
  0x97   :  { %1875 = vmatpush2.bf16.msra.mxu0 %v10089_v57  ;;  %v474_v63 = vld [vmem:[#allocation9 + $0x660] sm:$0xff]  ;;  %v315_v57 = vld [vmem:[#allocation9 + $0x168] sm:$0xff] }
  0x98   :  { %1916 = vmatpush2.bf16.msra.mxu1 %v10217_v58  ;;  %v10209_v1 = vcombine.low %v470_v61, %v474_v63  ;;  %v10210_v2 = vcombine.high %v470_v61, %v474_v63  ;;  %1876 = vmatprep.subr.bf16.mxu0 %v10082_v62  ;;  %v334_v3 = vld [vmem:[#allocation9 + $0x200] sm:$0xff]  ;;  %v439_v58 = vld [vmem:[#allocation9 + $0x548] sm:$0xff]  ;;  %v10187_v61 = vcombine.low %v447_v49, %v451_v50 }
  0x99   :  { %v338_v4 = vld [vmem:[#allocation9 + $0x220] sm:$0xff]  ;;  %v10052_v62 = vcombine.high %v311_v54, %v315_v57  ;;  %v10180_v63 = vcombine.high %v439_v58, %v443_v59  ;;  %v519_v48 = vld [vmem:[#allocation9 + $0x7c8] sm:$0xff] }
  0x9a   :  { %1917 = vmatprep.subr.bf16.mxu1 %v10210_v2  ;;  %v462_v5 = vld [vmem:[#allocation9 + $0x600] sm:$0xff]  ;;  %v10074_v6 = vcombine.high %v334_v3, %v338_v4  ;;  %v10073_v8 = vcombine.low %v334_v3, %v338_v4  ;;  %v431_v2 = vld [vmem:[#allocation9 + $0x508] sm:$0xff]  ;;  %v10051_v4 = vcombine.low %v311_v54, %v315_v57 }
  0x9b   :  { %1877 = vmatpush2.bf16.msra.mxu0 %v10081_v0  ;;  %v466_v7 = vld [vmem:[#allocation9 + $0x620] sm:$0xff]  ;;  %v303_v0 = vld [vmem:[#allocation9 + $0x108] sm:$0xff] }
  0x9c   :  { %1918 = vmatpush2.bf16.msra.mxu1 %v10209_v1  ;;  %v10201_v9 = vcombine.low %v462_v5, %v466_v7  ;;  %v10202_v10 = vcombine.high %v462_v5, %v466_v7  ;;  %1878 = vmatprep.subr.bf16.mxu0 %v10074_v6  ;;  %v307_v1 = vld [vmem:[#allocation9 + $0x128] sm:$0xff]  ;;  %v10179_v5 = vcombine.low %v439_v58, %v443_v59 }
  0x9d   :  { %v435_v3 = vld [vmem:[#allocation9 + $0x528] sm:$0xff]  ;;  %v10044_v6 = vcombine.high %v303_v0, %v307_v1  ;;  %v10043_v12 = vcombine.low %v303_v0, %v307_v1 }
  0x9e   :  { %1919 = vmatprep.subr.bf16.mxu1 %v10202_v10  ;;  %v10172_v7 = vcombine.high %v431_v2, %v435_v3  ;;  %v423_v10 = vld [vmem:[#allocation9 + $0x4c8] sm:$0xff]  ;;  %v10171_v13 = vcombine.low %v431_v2, %v435_v3 }
  0x9f   :  { %1879 = vmatpush2.bf16.msra.mxu0 %v10073_v8  ;;  %v295_v8 = vld [vmem:[#allocation9 + $0xc8] sm:$0xff]  ;;  %v10164_v15 = vcombine.high %v423_v10, %v427_v11 }
  0xa0   :  { %1920 = vmatpush2.bf16.msra.mxu1 %v10201_v9  ;;  %1930 = vmatprep.subr.bf16.mxu0 %v10068_v14  ;;  %v299_v9 = vld [vmem:[#allocation9 + $0xe8] sm:$0xff] }
  0xa1   :  { %1971 = vmatprep.subr.bf16.mxu1 %v10196_v18  ;;  %v10036_v14 = vcombine.high %v295_v8, %v299_v9  ;;  %v415_v18 = vld [vmem:[#allocation9 + $0x488] sm:$0xff]  ;;  %v10035_v23 = vcombine.low %v295_v8, %v299_v9 }
  0xa2   :  { %v523_v49 = vld [vmem:[#allocation9 + $0x7e8] sm:$0xff] }
  0xa3   :  { %v383_v57 = vld [vmem:[#allocation9 + $0x388] sm:$0xff] }
  0xa4   :  { %v387_v58 = vld [vmem:[#allocation9 + $0x3a8] sm:$0xff] }
  0xa5   :  { %v511_v59 = vld [vmem:[#allocation9 + $0x788] sm:$0xff] }
  0xa6   :  { %v375_v1 = vld [vmem:[#allocation9 + $0x348] sm:$0xff] }
  0xa7   :  { %v379_v2 = vld [vmem:[#allocation9 + $0x368] sm:$0xff] }
  0xa8   :  { %v503_v3 = vld [vmem:[#allocation9 + $0x748] sm:$0xff] }
  0xa9   :  { %v367_v9 = vld [vmem:[#allocation9 + $0x308] sm:$0xff] }
 0x122   :  { %v214_v30 = vpop.f32.mrf.mxu0 }
 0x123   :  { %v255_v31 = vpop.f32.mrf.mxu1  ;;  %v215_v32 = vadd.f32 %v214_v30, %v136_v26  ;;  %v10163_v26 = vcombine.low %v423_v10, %v427_v11  ;;  %v283_v30 = vld [vmem:[#allocation9 + $0x68] sm:$0xff] }
 0x124   :  { %v256_v33 = vadd.f32 %v255_v31, %v144_v27  ;;  %v216_v34 = vpop.f32.mrf.mxu0  ;;  %v407_v31 = vld [vmem:[#allocation9 + $0x448] sm:$0xff] }
 0x125   :  { %v257_v35 = vpop.f32.mrf.mxu1  ;;  %v217_v37 = vadd.f32 %v216_v34, %v140_v28  ;;  %v262_v39 = vmax.f32 %v215_v32, 0.0  ;;  %v10156_v28 = vcombine.high %v415_v18, %v419_v19  ;;  %v411_v32 = vld [vmem:[#allocation9 + $0x468] sm:$0xff]  ;;  %v10155_v34 = vcombine.low %v415_v18, %v419_v19 }
 0x126   :  { %v264_v36 = vmax.f32 %v256_v33, 0.0  ;;  %v258_v38 = vadd.f32 %v257_v35, %v148_v29  ;;  %v218_v40 = vpop.f32.mrf.mxu0  ;;  %v279_v29 = vld [vmem:[#allocation9 + $0x48] sm:$0xff] }
 0x127   :  { %v259_v41 = vpop.f32.mrf.mxu1  ;;  %v263_v42 = vmax.f32 %v217_v37, 0.0  ;;  %v11650_v53 = vpack.c.bf16 %v262_v39, %v262_v39  ;;  %v10020_v35 = vcombine.high %v279_v29, %v283_v30  ;;  %v271_v37 = vld [vmem:[#allocation9 + $0x8] sm:$0xff] }
 0x128   :  { %v265_v43 = vmax.f32 %v258_v38, 0.0  ;;  %v11644_v45 = vpack.c.bf16 %v264_v36, %v264_v36  ;;  %v219_v46 = vpop.f32.mrf.mxu0  ;;  %v10148_v36 = vcombine.high %v407_v31, %v411_v32  ;;  %v275_v38 = vld [vmem:[#allocation9 + $0x28] sm:$0xff]  ;;  %v10019_v41 = vcombine.low %v279_v29, %v283_v30 }
 0x129   :  { %v260_v47 = vpop.f32.mrf.mxu1  ;;  %v11646_v51 = vpack.c.bf16 %v263_v42, %v263_v42  ;;  %v399_v39 = vld [vmem:[#allocation9 + $0x408] sm:$0xff]  ;;  %v10147_v42 = vcombine.low %v407_v31, %v411_v32  ;;  %v10011_v50 = vcombine.low %v271_v37, %v275_v38 }
 0x12a   :  { %v11648_v52 = vpack.c.bf16 %v265_v43, %v265_v43  ;;  %v403_v40 = vld [vmem:[#allocation9 + $0x428] sm:$0xff]  ;;  %v10012_v43 = vcombine.high %v271_v37, %v275_v38 }
 0x12b   :  { %1880 = vmatprep.mubr.bf16.mxu0 %v11646_v51  ;;  %v10140_v44 = vcombine.high %v399_v39, %v403_v40  ;;  %v391_v46 = vld [vmem:[#allocation9 + $0x3c8] sm:$0xff]  ;;  %v10139_v54 = vcombine.low %v399_v39, %v403_v40 }
 0x12c   :  { %1921 = vmatprep.mubr.bf16.mxu1 %v11648_v52  ;;  %1881 = vmatmul.mubr.bf16.vlgmr.msra.gmra.mxu0 %v11650_v53  ;;  %v395_v47 = vld [vmem:[#allocation9 + $0x3e8] sm:$0xff] }
 0x12d   :  { %1922 = vmatmul.mubr.bf16.vlgmr.msra.gmra.mxu1 %v11644_v45  ;;  %1931 = vmatpush1.bf16.msra.mxu0 %v10067_v16  ;;  %v287_v16 = vld [vmem:[#allocation9 + $0x88] sm:$0xff] }
 0x12e   :  { %1972 = vmatpush1.bf16.msra.mxu1 %v10195_v17  ;;  %1962 = vmatprep.mubr.bf16.mxu0 %v11646_v51  ;;  %v291_v17 = vld [vmem:[#allocation9 + $0xa8] sm:$0xff] }
 0x12f   :  { %2003 = vmatprep.mubr.bf16.mxu1 %v11648_v52  ;;  %1932 = vmatprep.subr.bf16.mxu0 %v10060_v55  ;;  %v10028_v27 = vcombine.high %v287_v16, %v291_v17  ;;  %v10027_v33 = vcombine.low %v287_v16, %v291_v17  ;;  %v10132_v55 = vcombine.high %v391_v46, %v395_v47  ;;  %v371_v10 = vld [vmem:[#allocation9 + $0x328] sm:$0xff] }
 0x130   :  { %1973 = vmatprep.subr.bf16.mxu1 %v10188_v56  ;;  %v10260_v56 = vcombine.high %v519_v48, %v523_v49  ;;  %v495_v11 = vld [vmem:[#allocation9 + $0x708] sm:$0xff] }
 0x131   :  { %1933 = vmatpush1.bf16.msra.mxu0 %v10059_v60  ;;  %v515_v60 = vld [vmem:[#allocation9 + $0x7a8] sm:$0xff] }
 0x132   :  { %1974 = vmatpush1.bf16.msra.mxu1 %v10187_v61  ;;  %1934 = vmatprep.subr.bf16.mxu0 %v10052_v62  ;;  %v10131_v61 = vcombine.low %v391_v46, %v395_v47  ;;  %v10259_v62 = vcombine.low %v519_v48, %v523_v49  ;;  %v10252_v0 = vcombine.high %v511_v59, %v515_v60  ;;  %v359_v17 = vld [vmem:[#allocation9 + $0x2c8] sm:$0xff] }
 0x133   :  { %1975 = vmatprep.subr.bf16.mxu1 %v10180_v63  ;;  %v10124_v63 = vcombine.high %v383_v57, %v387_v58  ;;  %v363_v18 = vld [vmem:[#allocation9 + $0x2e8] sm:$0xff] }
 0x134   :  { %v487_v19 = vld [vmem:[#allocation9 + $0x6c8] sm:$0xff] }
 0x135   :  { %1935 = vmatpush1.bf16.msra.mxu0 %v10051_v4  ;;  %v507_v4 = vld [vmem:[#allocation9 + $0x768] sm:$0xff] }
 0x136   :  { %1976 = vmatpush1.bf16.msra.mxu1 %v10179_v5  ;;  %1936 = vmatprep.subr.bf16.mxu0 %v10044_v6  ;;  %v10123_v5 = vcombine.low %v383_v57, %v387_v58  ;;  %v10251_v6 = vcombine.low %v511_v59, %v515_v60  ;;  %v10244_v8 = vcombine.high %v503_v3, %v507_v4  ;;  %v351_v30 = vld [vmem:[#allocation9 + $0x288] sm:$0xff]  ;;  %v328_v58 = vld [vmem:[#allocation9 + $0x1d0] sm:$0xff] }
 0x137   :  { %1977 = vmatprep.subr.bf16.mxu1 %v10172_v7  ;;  %v10116_v7 = vcombine.high %v375_v1, %v379_v2  ;;  %v355_v31 = vld [vmem:[#allocation9 + $0x2a8] sm:$0xff]  ;;  %v332_v59 = vld [vmem:[#allocation9 + $0x1f0] sm:$0xff] }
 0x138   :  { %v479_v32 = vld [vmem:[#allocation9 + $0x688] sm:$0xff]  ;;  %v456_v60 = vld [vmem:[#allocation9 + $0x5d0] sm:$0xff] }
 0x139   :  { %1937 = vmatpush1.bf16.msra.mxu0 %v10043_v12  ;;  %v499_v12 = vld [vmem:[#allocation9 + $0x728] sm:$0xff] }
 0x13a   :  { %1978 = vmatpush1.bf16.msra.mxu1 %v10171_v13  ;;  %1938 = vmatprep.subr.bf16.mxu0 %v10036_v14  ;;  %v10115_v13 = vcombine.low %v375_v1, %v379_v2  ;;  %v10243_v14 = vcombine.low %v503_v3, %v507_v4  ;;  %v10236_v16 = vcombine.high %v495_v11, %v499_v12  ;;  %v343_v38 = vld [vmem:[#allocation9 + $0x248] sm:$0xff]  ;;  %v320_v2 = vld [vmem:[#allocation9 + $0x190] sm:$0xff] }
 0x13b   :  { %1979 = vmatprep.subr.bf16.mxu1 %v10164_v15  ;;  %v10108_v15 = vcombine.high %v367_v9, %v371_v10  ;;  %v347_v39 = vld [vmem:[#allocation9 + $0x268] sm:$0xff]  ;;  %v324_v3 = vld [vmem:[#allocation9 + $0x1b0] sm:$0xff] }
 0x13c   :  { %v471_v40 = vld [vmem:[#allocation9 + $0x648] sm:$0xff]  ;;  %v448_v4 = vld [vmem:[#allocation9 + $0x590] sm:$0xff] }
 0x13d   :  { %1939 = vmatpush1.bf16.msra.mxu0 %v10035_v23  ;;  %v491_v23 = vld [vmem:[#allocation9 + $0x6e8] sm:$0xff] }
 0x13e   :  { %1980 = vmatpush1.bf16.msra.mxu1 %v10163_v26  ;;  %1940 = vmatprep.subr.bf16.mxu0 %v10028_v27  ;;  %v10107_v26 = vcombine.low %v367_v9, %v371_v10  ;;  %v10235_v27 = vcombine.low %v495_v11, %v499_v12  ;;  %v10228_v29 = vcombine.high %v487_v19, %v491_v23  ;;  %v335_v47 = vld [vmem:[#allocation9 + $0x208] sm:$0xff]  ;;  %v312_v10 = vld [vmem:[#allocation9 + $0x150] sm:$0xff] }
 0x13f   :  { %1981 = vmatprep.subr.bf16.mxu1 %v10156_v28  ;;  %v10100_v28 = vcombine.high %v359_v17, %v363_v18  ;;  %v339_v48 = vld [vmem:[#allocation9 + $0x228] sm:$0xff]  ;;  %v316_v11 = vld [vmem:[#allocation9 + $0x170] sm:$0xff] }
 0x140   :  { %v463_v49 = vld [vmem:[#allocation9 + $0x608] sm:$0xff]  ;;  %v440_v12 = vld [vmem:[#allocation9 + $0x550] sm:$0xff] }
 0x141   :  { %1941 = vmatpush1.bf16.msra.mxu0 %v10027_v33  ;;  %v483_v33 = vld [vmem:[#allocation9 + $0x6a8] sm:$0xff] }
 0x142   :  { %1982 = vmatpush1.bf16.msra.mxu1 %v10155_v34  ;;  %1942 = vmatprep.subr.bf16.mxu0 %v10020_v35  ;;  %v10099_v34 = vcombine.low %v359_v17, %v363_v18  ;;  %v10227_v35 = vcombine.low %v487_v19, %v491_v23  ;;  %v10220_v37 = vcombine.high %v479_v32, %v483_v33  ;;  %v304_v18 = vld [vmem:[#allocation9 + $0x110] sm:$0xff] }
 0x143   :  { %1983 = vmatprep.subr.bf16.mxu1 %v10148_v36  ;;  %v10092_v36 = vcombine.high %v351_v30, %v355_v31  ;;  %v308_v19 = vld [vmem:[#allocation9 + $0x130] sm:$0xff] }
 0x144   :  { %v432_v23 = vld [vmem:[#allocation9 + $0x510] sm:$0xff] }
 0x145   :  { %1943 = vmatpush1.bf16.msra.mxu0 %v10019_v41  ;;  %v475_v41 = vld [vmem:[#allocation9 + $0x668] sm:$0xff] }
 0x146   :  { %1984 = vmatpush1.bf16.msra.mxu1 %v10147_v42  ;;  %1944 = vmatprep.subr.bf16.mxu0 %v10012_v43  ;;  %v10091_v42 = vcombine.low %v351_v30, %v355_v31  ;;  %v10219_v43 = vcombine.low %v479_v32, %v483_v33  ;;  %v10212_v46 = vcombine.high %v471_v40, %v475_v41  ;;  %v296_v31 = vld [vmem:[#allocation9 + $0xd0] sm:$0xff] }
 0x147   :  { %1985 = vmatprep.subr.bf16.mxu1 %v10140_v44  ;;  %v10084_v44 = vcombine.high %v343_v38, %v347_v39  ;;  %v300_v32 = vld [vmem:[#allocation9 + $0xf0] sm:$0xff] }
 0x148   :  { %v424_v33 = vld [vmem:[#allocation9 + $0x4d0] sm:$0xff] }
 0x149   :  { %1945 = vmatpush1.bf16.msra.mxu0 %v10011_v50  ;;  %v467_v50 = vld [vmem:[#allocation9 + $0x628] sm:$0xff] }
 0x14a   :  { %1986 = vmatpush1.bf16.msra.mxu1 %v10139_v54  ;;  %1946 = vmatprep.subr.bf16.mxu0 %v10132_v55  ;;  %v10083_v54 = vcombine.low %v343_v38, %v347_v39  ;;  %v10211_v55 = vcombine.low %v471_v40, %v475_v41  ;;  %v10204_v57 = vcombine.high %v463_v49, %v467_v50  ;;  %v288_v39 = vld [vmem:[#allocation9 + $0x90] sm:$0xff] }
 0x14b   :  { %1987 = vmatprep.subr.bf16.mxu1 %v10260_v56  ;;  %v10076_v56 = vcombine.high %v335_v47, %v339_v48  ;;  %v292_v40 = vld [vmem:[#allocation9 + $0xb0] sm:$0xff] }
 0x14c   :  { %v416_v41 = vld [vmem:[#allocation9 + $0x490] sm:$0xff] }
 0x14d   :  { %1947 = vmatpush2.bf16.msra.mxu0 %v10131_v61  ;;  %v460_v61 = vld [vmem:[#allocation9 + $0x5f0] sm:$0xff] }
 0x14e   :  { %1988 = vmatpush2.bf16.msra.mxu1 %v10259_v62  ;;  %1948 = vmatprep.subr.bf16.mxu0 %v10124_v63  ;;  %v10075_v62 = vcombine.low %v335_v47, %v339_v48  ;;  %v10203_v63 = vcombine.low %v463_v49, %v467_v50  ;;  %v10198_v1 = vcombine.high %v456_v60, %v460_v61  ;;  %v280_v48 = vld [vmem:[#allocation9 + $0x50] sm:$0xff] }
 0x14f   :  { %1989 = vmatprep.subr.bf16.mxu1 %v10252_v0  ;;  %v10070_v0 = vcombine.high %v328_v58, %v332_v59  ;;  %v284_v49 = vld [vmem:[#allocation9 + $0x70] sm:$0xff] }
 0x150   :  { %v408_v50 = vld [vmem:[#allocation9 + $0x450] sm:$0xff] }
 0x151   :  { %1949 = vmatpush2.bf16.msra.mxu0 %v10123_v5  ;;  %v452_v5 = vld [vmem:[#allocation9 + $0x5b0] sm:$0xff] }
 0x152   :  { %1990 = vmatpush2.bf16.msra.mxu1 %v10251_v6  ;;  %1950 = vmatprep.subr.bf16.mxu0 %v10116_v7  ;;  %v10069_v6 = vcombine.low %v328_v58, %v332_v59  ;;  %v10197_v7 = vcombine.low %v456_v60, %v460_v61  ;;  %v10190_v9 = vcombine.high %v448_v4, %v452_v5  ;;  %v272_v59 = vld [vmem:[#allocation9 + $0x10] sm:$0xff] }
 0x153   :  { %1991 = vmatprep.subr.bf16.mxu1 %v10244_v8  ;;  %v10062_v8 = vcombine.high %v320_v2, %v324_v3  ;;  %v276_v60 = vld [vmem:[#allocation9 + $0x30] sm:$0xff] }
 0x154   :  { %v400_v61 = vld [vmem:[#allocation9 + $0x410] sm:$0xff] }
 0x155   :  { %1951 = vmatpush2.bf16.msra.mxu0 %v10115_v13  ;;  %v444_v13 = vld [vmem:[#allocation9 + $0x570] sm:$0xff] }
 0x156   :  { %1992 = vmatpush2.bf16.msra.mxu1 %v10243_v14  ;;  %1952 = vmatprep.subr.bf16.mxu0 %v10108_v15  ;;  %v10061_v14 = vcombine.low %v320_v2, %v324_v3  ;;  %v10189_v15 = vcombine.low %v448_v4, %v452_v5  ;;  %v10182_v17 = vcombine.high %v440_v12, %v444_v13  ;;  %v392_v3 = vld [vmem:[#allocation9 + $0x3d0] sm:$0xff] }
 0x157   :  { %1993 = vmatprep.subr.bf16.mxu1 %v10236_v16  ;;  %v10054_v16 = vcombine.high %v312_v10, %v316_v11  ;;  %v396_v4 = vld [vmem:[#allocation9 + $0x3f0] sm:$0xff] }
 0x158   :  { %v520_v5 = vld [vmem:[#allocation9 + $0x7d0] sm:$0xff] }
 0x159   :  { %1953 = vmatpush2.bf16.msra.mxu0 %v10107_v26  ;;  %v436_v26 = vld [vmem:[#allocation9 + $0x530] sm:$0xff] }
 0x15a   :  { %1994 = vmatpush2.bf16.msra.mxu1 %v10235_v27  ;;  %1954 = vmatprep.subr.bf16.mxu0 %v10100_v28  ;;  %v10053_v27 = vcombine.low %v312_v10, %v316_v11  ;;  %v10181_v28 = vcombine.low %v440_v12, %v444_v13  ;;  %v10174_v30 = vcombine.high %v432_v23, %v436_v26  ;;  %v384_v11 = vld [vmem:[#allocation9 + $0x390] sm:$0xff] }
 0x15b   :  { %1995 = vmatprep.subr.bf16.mxu1 %v10228_v29  ;;  %v10046_v29 = vcombine.high %v304_v18, %v308_v19  ;;  %v388_v12 = vld [vmem:[#allocation9 + $0x3b0] sm:$0xff] }
 0x15c   :  { %v512_v13 = vld [vmem:[#allocation9 + $0x790] sm:$0xff] }
 0x15d   :  { %1955 = vmatpush2.bf16.msra.mxu0 %v10099_v34  ;;  %v428_v34 = vld [vmem:[#allocation9 + $0x4f0] sm:$0xff] }
 0x15e   :  { %1996 = vmatpush2.bf16.msra.mxu1 %v10227_v35  ;;  %1956 = vmatprep.subr.bf16.mxu0 %v10092_v36  ;;  %v10045_v35 = vcombine.low %v304_v18, %v308_v19  ;;  %v10173_v36 = vcombine.low %v432_v23, %v436_v26  ;;  %v10166_v38 = vcombine.high %v424_v33, %v428_v34  ;;  %v376_v19 = vld [vmem:[#allocation9 + $0x350] sm:$0xff] }
 0x15f   :  { %1997 = vmatprep.subr.bf16.mxu1 %v10220_v37  ;;  %v10038_v37 = vcombine.high %v296_v31, %v300_v32  ;;  %v380_v23 = vld [vmem:[#allocation9 + $0x370] sm:$0xff] }
 0x160   :  { %v504_v26 = vld [vmem:[#allocation9 + $0x750] sm:$0xff] }
 0x161   :  { %1957 = vmatpush2.bf16.msra.mxu0 %v10091_v42  ;;  %v420_v42 = vld [vmem:[#allocation9 + $0x4b0] sm:$0xff] }
 0x162   :  { %1998 = vmatpush2.bf16.msra.mxu1 %v10219_v43  ;;  %1958 = vmatprep.subr.bf16.mxu0 %v10084_v44  ;;  %v10037_v43 = vcombine.low %v296_v31, %v300_v32  ;;  %v10165_v44 = vcombine.low %v424_v33, %v428_v34  ;;  %v10158_v47 = vcombine.high %v416_v41, %v420_v42  ;;  %v368_v32 = vld [vmem:[#allocation9 + $0x310] sm:$0xff] }
 0x163   :  { %1999 = vmatprep.subr.bf16.mxu1 %v10212_v46  ;;  %v10030_v46 = vcombine.high %v288_v39, %v292_v40  ;;  %v372_v33 = vld [vmem:[#allocation9 + $0x330] sm:$0xff] }
 0x164   :  { %v496_v34 = vld [vmem:[#allocation9 + $0x710] sm:$0xff] }
 0x165   :  { %1959 = vmatpush2.bf16.msra.mxu0 %v10083_v54  ;;  %v412_v54 = vld [vmem:[#allocation9 + $0x470] sm:$0xff] }
 0x166   :  { %2000 = vmatpush2.bf16.msra.mxu1 %v10211_v55  ;;  %1960 = vmatprep.subr.bf16.mxu0 %v10076_v56  ;;  %v10029_v55 = vcombine.low %v288_v39, %v292_v40  ;;  %v10157_v56 = vcombine.low %v416_v41, %v420_v42  ;;  %v10150_v58 = vcombine.high %v408_v50, %v412_v54  ;;  %v360_v40 = vld [vmem:[#allocation9 + $0x2d0] sm:$0xff] }
 0x167   :  { %2001 = vmatprep.subr.bf16.mxu1 %v10204_v57  ;;  %v10022_v57 = vcombine.high %v280_v48, %v284_v49  ;;  %v364_v41 = vld [vmem:[#allocation9 + $0x2f0] sm:$0xff] }
 0x168   :  { %v488_v42 = vld [vmem:[#allocation9 + $0x6d0] sm:$0xff] }
 0x169   :  { %1961 = vmatpush2.bf16.msra.mxu0 %v10075_v62  ;;  %v404_v62 = vld [vmem:[#allocation9 + $0x430] sm:$0xff] }
 0x16a   :  { %2002 = vmatpush2.bf16.msra.mxu1 %v10203_v63  ;;  %2012 = vmatprep.subr.bf16.mxu0 %v10070_v0  ;;  %v10021_v63 = vcombine.low %v280_v48, %v284_v49  ;;  %v10149_v0 = vcombine.low %v408_v50, %v412_v54  ;;  %v10142_v2 = vcombine.high %v400_v61, %v404_v62  ;;  %v352_v49 = vld [vmem:[#allocation9 + $0x290] sm:$0xff] }
 0x16b   :  { %2053 = vmatprep.subr.bf16.mxu1 %v10198_v1  ;;  %v10014_v1 = vcombine.high %v272_v59, %v276_v60  ;;  %v356_v50 = vld [vmem:[#allocation9 + $0x2b0] sm:$0xff] }
 0x16c   :  { %1963 = vmatmul.mubr.bf16.vlgmr.msra.gmra.mxu0 %v11650_v53  ;;  %v480_v54 = vld [vmem:[#allocation9 + $0x690] sm:$0xff] }
 0x16d   :  { %2004 = vmatmul.mubr.bf16.vlgmr.msra.gmra.mxu1 %v11644_v45  ;;  %2013 = vmatpush1.bf16.msra.mxu0 %v10069_v6  ;;  %v524_v6 = vld [vmem:[#allocation9 + $0x7f0] sm:$0xff] }
 0x16e   :  { %2044 = vmatprep.mubr.bf16.mxu0 %v11646_v51  ;;  %2054 = vmatpush1.bf16.msra.mxu1 %v10197_v7  ;;  %v10013_v7 = vcombine.low %v272_v59, %v276_v60  ;;  %v10262_v10 = vcombine.high %v520_v5, %v524_v6  ;;  %v344_v60 = vld [vmem:[#allocation9 + $0x250] sm:$0xff] }
 0x16f   :  { %2085 = vmatprep.mubr.bf16.mxu1 %v11648_v52  ;;  %2014 = vmatprep.subr.bf16.mxu0 %v10062_v8  ;;  %v10141_v8 = vcombine.low %v400_v61, %v404_v62  ;;  %v348_v61 = vld [vmem:[#allocation9 + $0x270] sm:$0xff] }
 0x170   :  { %2055 = vmatprep.subr.bf16.mxu1 %v10190_v9  ;;  %v10134_v9 = vcombine.high %v392_v3, %v396_v4  ;;  %v472_v62 = vld [vmem:[#allocation9 + $0x650] sm:$0xff] }
 0x171   :  { %2015 = vmatpush1.bf16.msra.mxu0 %v10061_v14  ;;  %v516_v14 = vld [vmem:[#allocation9 + $0x7b0] sm:$0xff] }
 0x172   :  { %2056 = vmatpush1.bf16.msra.mxu1 %v10189_v15  ;;  %2016 = vmatprep.subr.bf16.mxu0 %v10054_v16  ;;  %v10133_v15 = vcombine.low %v392_v3, %v396_v4  ;;  %v10261_v16 = vcombine.low %v520_v5, %v524_v6  ;;  %v10254_v18 = vcombine.high %v512_v13, %v516_v14  ;;  %v336_v4 = vld [vmem:[#allocation9 + $0x210] sm:$0xff] }
 0x173   :  { %2057 = vmatprep.subr.bf16.mxu1 %v10182_v17  ;;  %v10126_v17 = vcombine.high %v384_v11, %v388_v12  ;;  %v340_v5 = vld [vmem:[#allocation9 + $0x230] sm:$0xff] }
 0x174   :  { %v464_v6 = vld [vmem:[#allocation9 + $0x610] sm:$0xff] }
 0x175   :  { %2017 = vmatpush1.bf16.msra.mxu0 %v10053_v27  ;;  %v508_v27 = vld [vmem:[#allocation9 + $0x770] sm:$0xff] }
 0x176   :  { %2058 = vmatpush1.bf16.msra.mxu1 %v10181_v28  ;;  %2018 = vmatprep.subr.bf16.mxu0 %v10046_v29  ;;  %v10125_v28 = vcombine.low %v384_v11, %v388_v12  ;;  %v10253_v29 = vcombine.low %v512_v13, %v516_v14  ;;  %v10246_v31 = vcombine.high %v504_v26, %v508_v27  ;;  %v329_v12 = vld [vmem:[#allocation9 + $0x1d8] sm:$0xff] }
 0x177   :  { %2059 = vmatprep.subr.bf16.mxu1 %v10174_v30  ;;  %v10118_v30 = vcombine.high %v376_v19, %v380_v23  ;;  %v333_v13 = vld [vmem:[#allocation9 + $0x1f8] sm:$0xff] }
 0x178   :  { %v457_v14 = vld [vmem:[#allocation9 + $0x5d8] sm:$0xff] }
 0x179   :  { %2019 = vmatpush1.bf16.msra.mxu0 %v10045_v35  ;;  %v500_v35 = vld [vmem:[#allocation9 + $0x730] sm:$0xff] }
 0x17a   :  { %2060 = vmatpush1.bf16.msra.mxu1 %v10173_v36  ;;  %2020 = vmatprep.subr.bf16.mxu0 %v10038_v37  ;;  %v10117_v36 = vcombine.low %v376_v19, %v380_v23  ;;  %v10245_v37 = vcombine.low %v504_v26, %v508_v27  ;;  %v10238_v39 = vcombine.high %v496_v34, %v500_v35  ;;  %v321_v23 = vld [vmem:[#allocation9 + $0x198] sm:$0xff] }
 0x17b   :  { %2061 = vmatprep.subr.bf16.mxu1 %v10166_v38  ;;  %v10110_v38 = vcombine.high %v368_v32, %v372_v33  ;;  %v325_v26 = vld [vmem:[#allocation9 + $0x1b8] sm:$0xff]  ;;  %v10071_v27 = vcombine.low %v329_v12, %v333_v13 }
 0x17d   :  { %2021 = vmatpush1.bf16.msra.mxu0 %v10037_v43  ;;  %v492_v43 = vld [vmem:[#allocation9 + $0x6f0] sm:$0xff] }
 0x17e   :  { %2062 = vmatpush1.bf16.msra.mxu1 %v10165_v44  ;;  %2022 = vmatprep.subr.bf16.mxu0 %v10030_v46  ;;  %v10109_v44 = vcombine.low %v368_v32, %v372_v33  ;;  %v10237_v46 = vcombine.low %v496_v34, %v500_v35  ;;  %v10230_v48 = vcombine.high %v488_v42, %v492_v43  ;;  %v313_v32 = vld [vmem:[#allocation9 + $0x158] sm:$0xff] }
 0x17f   :  { %2063 = vmatprep.subr.bf16.mxu1 %v10158_v47  ;;  %v10102_v47 = vcombine.high %v360_v40, %v364_v41  ;;  %v317_v33 = vld [vmem:[#allocation9 + $0x178] sm:$0xff] }
 0x180   :  { %v441_v35 = vld [vmem:[#allocation9 + $0x558] sm:$0xff] }
 0x181   :  { %2023 = vmatpush1.bf16.msra.mxu0 %v10029_v55  ;;  %v484_v55 = vld [vmem:[#allocation9 + $0x6b0] sm:$0xff] }
 0x182   :  { %2064 = vmatpush1.bf16.msra.mxu1 %v10157_v56  ;;  %2024 = vmatprep.subr.bf16.mxu0 %v10022_v57  ;;  %v10101_v56 = vcombine.low %v360_v40, %v364_v41  ;;  %v10229_v57 = vcombine.low %v488_v42, %v492_v43  ;;  %v10222_v59 = vcombine.high %v480_v54, %v484_v55  ;;  %v305_v41 = vld [vmem:[#allocation9 + $0x118] sm:$0xff] }
 0x183   :  { %2065 = vmatprep.subr.bf16.mxu1 %v10150_v58  ;;  %v10094_v58 = vcombine.high %v352_v49, %v356_v50  ;;  %v309_v42 = vld [vmem:[#allocation9 + $0x138] sm:$0xff] }
 0x184   :  { %v433_v43 = vld [vmem:[#allocation9 + $0x518] sm:$0xff] }
 0x185   :  { %2025 = vmatpush1.bf16.msra.mxu0 %v10021_v63  ;;  %v476_v63 = vld [vmem:[#allocation9 + $0x670] sm:$0xff] }
 0x186   :  { %2066 = vmatpush1.bf16.msra.mxu1 %v10149_v0  ;;  %2026 = vmatprep.subr.bf16.mxu0 %v10014_v1  ;;  %v10093_v0 = vcombine.low %v352_v49, %v356_v50  ;;  %v10221_v1 = vcombine.low %v480_v54, %v484_v55  ;;  %v10214_v3 = vcombine.high %v472_v62, %v476_v63  ;;  %v297_v49 = vld [vmem:[#allocation9 + $0xd8] sm:$0xff] }
 0x187   :  { %2067 = vmatprep.subr.bf16.mxu1 %v10142_v2  ;;  %v10086_v2 = vcombine.high %v344_v60, %v348_v61  ;;  %v301_v50 = vld [vmem:[#allocation9 + $0xf8] sm:$0xff] }
 0x188   :  { %v425_v54 = vld [vmem:[#allocation9 + $0x4d8] sm:$0xff] }
 0x189   :  { %2027 = vmatpush1.bf16.msra.mxu0 %v10013_v7  ;;  %v468_v7 = vld [vmem:[#allocation9 + $0x630] sm:$0xff]  ;;  %v429_v55 = vld [vmem:[#allocation9 + $0x4f8] sm:$0xff] }
 0x18a   :  { %2068 = vmatpush1.bf16.msra.mxu1 %v10141_v8  ;;  %2028 = vmatprep.subr.bf16.mxu0 %v10134_v9  ;;  %v10085_v8 = vcombine.low %v344_v60, %v348_v61  ;;  %v10213_v9 = vcombine.low %v472_v62, %v476_v63  ;;  %v10206_v11 = vcombine.high %v464_v6, %v468_v7  ;;  %v293_v60 = vld [vmem:[#allocation9 + $0xb8] sm:$0xff] }
 0x18b   :  { %2069 = vmatprep.subr.bf16.mxu1 %v10262_v10  ;;  %v10078_v10 = vcombine.high %v336_v4, %v340_v5  ;;  %v417_v61 = vld [vmem:[#allocation9 + $0x498] sm:$0xff]  ;;  %v10039_v63 = vcombine.low %v297_v49, %v301_v50 }
 0x18c   :  { %v421_v62 = vld [vmem:[#allocation9 + $0x4b8] sm:$0xff] }
 0x18d   :  { %2029 = vmatpush2.bf16.msra.mxu0 %v10133_v15  ;;  %v461_v15 = vld [vmem:[#allocation9 + $0x5f8] sm:$0xff] }
 0x18e   :  { %2070 = vmatpush2.bf16.msra.mxu1 %v10261_v16  ;;  %2030 = vmatprep.subr.bf16.mxu0 %v10126_v17  ;;  %v10077_v16 = vcombine.low %v336_v4, %v340_v5  ;;  %v10205_v17 = vcombine.low %v464_v6, %v468_v7  ;;  %v10200_v19 = vcombine.high %v457_v14, %v461_v15  ;;  %v285_v4 = vld [vmem:[#allocation9 + $0x78] sm:$0xff] }
 0x18f   :  { %2071 = vmatprep.subr.bf16.mxu1 %v10254_v18  ;;  %v10072_v18 = vcombine.high %v329_v12, %v333_v13  ;;  %v409_v5 = vld [vmem:[#allocation9 + $0x458] sm:$0xff] }
 0x190   :  { %v413_v6 = vld [vmem:[#allocation9 + $0x478] sm:$0xff] }
 0x191   :  { %2031 = vmatpush2.bf16.msra.mxu0 %v10125_v28  ;;  %v449_v28 = vld [vmem:[#allocation9 + $0x598] sm:$0xff] }
 0x192   :  { %2072 = vmatpush2.bf16.msra.mxu1 %v10253_v29  ;;  %2032 = vmatprep.subr.bf16.mxu0 %v10118_v30  ;;  %v453_v29 = vld [vmem:[#allocation9 + $0x5b8] sm:$0xff]  ;;  %v10199_v30 = vcombine.low %v457_v14, %v461_v15 }
 0x193   :  { %2073 = vmatprep.subr.bf16.mxu1 %v10246_v31  ;;  %v10064_v31 = vcombine.high %v321_v23, %v325_v26  ;;  %v10192_v34 = vcombine.high %v449_v28, %v453_v29  ;;  %v277_v12 = vld [vmem:[#allocation9 + $0x38] sm:$0xff] }
 0x194   :  { %v401_v13 = vld [vmem:[#allocation9 + $0x418] sm:$0xff] }
 0x195   :  { %2033 = vmatpush2.bf16.msra.mxu0 %v10117_v36  ;;  %v445_v36 = vld [vmem:[#allocation9 + $0x578] sm:$0xff] }
 0x196   :  { %2074 = vmatpush2.bf16.msra.mxu1 %v10245_v37  ;;  %2034 = vmatprep.subr.bf16.mxu0 %v10110_v38  ;;  %v10063_v37 = vcombine.low %v321_v23, %v325_v26  ;;  %v10191_v38 = vcombine.low %v449_v28, %v453_v29  ;;  %v10184_v40 = vcombine.high %v441_v35, %v445_v36  ;;  %v405_v14 = vld [vmem:[#allocation9 + $0x438] sm:$0xff] }
 0x197   :  { %2075 = vmatprep.subr.bf16.mxu1 %v10238_v39  ;;  %v10056_v39 = vcombine.high %v313_v32, %v317_v33  ;;  %v397_v23 = vld [vmem:[#allocation9 + $0x3f8] sm:$0xff]  ;;  %v10143_v29 = vcombine.low %v401_v13, %v405_v14 }
 0x198   :  { %v521_v26 = vld [vmem:[#allocation9 + $0x7d8] sm:$0xff] }
 0x199   :  { %2035 = vmatpush2.bf16.msra.mxu0 %v10109_v44  ;;  %v437_v44 = vld [vmem:[#allocation9 + $0x538] sm:$0xff] }
 0x19a   :  { %2076 = vmatpush2.bf16.msra.mxu1 %v10237_v46  ;;  %2036 = vmatprep.subr.bf16.mxu0 %v10102_v47  ;;  %v10055_v46 = vcombine.low %v313_v32, %v317_v33  ;;  %v10183_v47 = vcombine.low %v441_v35, %v445_v36  ;;  %v385_v32 = vld [vmem:[#allocation9 + $0x398] sm:$0xff] }
 0x19b   :  { %2077 = vmatprep.subr.bf16.mxu1 %v10230_v48  ;;  %v10048_v48 = vcombine.high %v305_v41, %v309_v42  ;;  %v389_v33 = vld [vmem:[#allocation9 + $0x3b8] sm:$0xff] }
 0x19c   :  { %v517_v35 = vld [vmem:[#allocation9 + $0x7b8] sm:$0xff] }
 0x19d   :  { %2037 = vmatpush2.bf16.msra.mxu0 %v10101_v56  ;;  %v10175_v56 = vcombine.low %v433_v43, %v437_v44 }
 0x19e   :  { %2078 = vmatpush2.bf16.msra.mxu1 %v10229_v57  ;;  %2038 = vmatprep.subr.bf16.mxu0 %v10094_v58  ;;  %v10040_v57 = vcombine.high %v297_v49, %v301_v50  ;;  %v10168_v58 = vcombine.high %v425_v54, %v429_v55  ;;  %v373_v49 = vld [vmem:[#allocation9 + $0x338] sm:$0xff] }
 0x19f   :  { %2079 = vmatprep.subr.bf16.mxu1 %v10222_v59  ;;  %v289_v59 = vld [vmem:[#allocation9 + $0x98] sm:$0xff] }
 0x1a0   :  { %v10031_v7 = vcombine.low %v289_v59, %v293_v60  ;;  %v497_v50 = vld [vmem:[#allocation9 + $0x718] sm:$0xff] }
 0x1a1   :  { %2039 = vmatpush2.bf16.msra.mxu0 %v10093_v0  ;;  %v10167_v0 = vcombine.low %v425_v54, %v429_v55  ;;  %v501_v54 = vld [vmem:[#allocation9 + $0x738] sm:$0xff] }
 0x1a2   :  { %2080 = vmatpush2.bf16.msra.mxu1 %v10221_v1  ;;  %2040 = vmatprep.subr.bf16.mxu0 %v10086_v2  ;;  %v10032_v1 = vcombine.high %v289_v59, %v293_v60  ;;  %v10160_v2 = vcombine.high %v417_v61, %v421_v62  ;;  %v365_v59 = vld [vmem:[#allocation9 + $0x2f8] sm:$0xff] }
 0x1a3   :  { %2081 = vmatprep.subr.bf16.mxu1 %v10214_v3  ;;  %v281_v3 = vld [vmem:[#allocation9 + $0x58] sm:$0xff] }
 0x1a4   :  { %v10023_v15 = vcombine.low %v281_v3, %v285_v4  ;;  %v489_v60 = vld [vmem:[#allocation9 + $0x6d8] sm:$0xff] }
 0x1a5   :  { %2041 = vmatpush2.bf16.msra.mxu0 %v10085_v8  ;;  %v10159_v8 = vcombine.low %v417_v61, %v421_v62  ;;  %v493_v61 = vld [vmem:[#allocation9 + $0x6f8] sm:$0xff] }
 0x1a6   :  { %2082 = vmatpush2.bf16.msra.mxu1 %v10213_v9  ;;  %2042 = vmatprep.subr.bf16.mxu0 %v10078_v10  ;;  %v10024_v9 = vcombine.high %v281_v3, %v285_v4  ;;  %v10152_v10 = vcombine.high %v409_v5, %v413_v6  ;;  %v357_v3 = vld [vmem:[#allocation9 + $0x2b8] sm:$0xff] }
 0x1a7   :  { %2083 = vmatprep.subr.bf16.mxu1 %v10206_v11  ;;  %v273_v11 = vld [vmem:[#allocation9 + $0x18] sm:$0xff] }
 0x1a8   :  { %v10015_v28 = vcombine.low %v273_v11, %v277_v12  ;;  %v481_v4 = vld [vmem:[#allocation9 + $0x698] sm:$0xff] }
 0x1a9   :  { %2043 = vmatpush2.bf16.msra.mxu0 %v10077_v16  ;;  %v10151_v16 = vcombine.low %v409_v5, %v413_v6  ;;  %v485_v5 = vld [vmem:[#allocation9 + $0x6b8] sm:$0xff] }
 0x1aa   :  { %2084 = vmatpush2.bf16.msra.mxu1 %v10205_v17  ;;  %2094 = vmatprep.subr.bf16.mxu0 %v10072_v18  ;;  %v10016_v17 = vcombine.high %v273_v11, %v277_v12  ;;  %v10144_v18 = vcombine.high %v401_v13, %v405_v14  ;;  %v349_v11 = vld [vmem:[#allocation9 + $0x278] sm:$0xff] }
 0x1ab   :  { %2135 = vmatprep.subr.bf16.mxu1 %v10200_v19  ;;  %v393_v19 = vld [vmem:[#allocation9 + $0x3d8] sm:$0xff] }
 0x1ac   :  { %2045 = vmatmul.mubr.bf16.vlgmr.msra.gmra.mxu0 %v11650_v53  ;;  %v10135_v36 = vcombine.low %v393_v19, %v397_v23  ;;  %v473_v12 = vld [vmem:[#allocation9 + $0x658] sm:$0xff] }
 0x1ad   :  { %2086 = vmatmul.mubr.bf16.vlgmr.msra.gmra.mxu1 %v11644_v45  ;;  %2095 = vmatpush1.bf16.msra.mxu0 %v10071_v27  ;;  %v525_v27 = vld [vmem:[#allocation9 + $0x7f8] sm:$0xff] }
 0x1ae   :  { %2126 = vmatprep.mubr.bf16.mxu0 %v11646_v51  ;;  %2136 = vmatpush1.bf16.msra.mxu1 %v10199_v30  ;;  %v10176_v51 = vcombine.high %v433_v43, %v437_v44  ;;  %v10136_v30 = vcombine.high %v393_v19, %v397_v23  ;;  %v509_v43 = vld [vmem:[#allocation9 + $0x778] sm:$0xff]  ;;  %v10127_v44 = vcombine.low %v385_v32, %v389_v33 }
 0x1af   :  { %2167 = vmatprep.mubr.bf16.mxu1 %v11648_v52  ;;  %2096 = vmatprep.subr.bf16.mxu0 %v10064_v31  ;;  %v10047_v52 = vcombine.low %v305_v41, %v309_v42  ;;  %v10264_v31 = vcombine.high %v521_v26, %v525_v27  ;;  %v381_v41 = vld [vmem:[#allocation9 + $0x378] sm:$0xff] }
 0x1b0   :  { %2137 = vmatprep.subr.bf16.mxu1 %v10192_v34  ;;  %v513_v34 = vld [vmem:[#allocation9 + $0x798] sm:$0xff] }
 0x1b1   :  { %2097 = vmatpush1.bf16.msra.mxu0 %v10063_v37  ;;  %v10263_v37 = vcombine.low %v521_v26, %v525_v27  ;;  %v505_v42 = vld [vmem:[#allocation9 + $0x758] sm:$0xff] }
 0x1b2   :  { %2138 = vmatpush1.bf16.msra.mxu1 %v10191_v38  ;;  %2098 = vmatprep.subr.bf16.mxu0 %v10056_v39  ;;  %v10128_v38 = vcombine.high %v385_v32, %v389_v33  ;;  %v10256_v39 = vcombine.high %v513_v34, %v517_v35  ;;  %v477_v13 = vld [vmem:[#allocation9 + $0x678] sm:$0xff]  ;;  %v2312_v32 = vld [vmem:[#allocation12 + $0x3c0] sm:$0xff] }
 0x1b3   :  { %2139 = vmatprep.subr.bf16.mxu1 %v10184_v40  ;;  %v377_v40 = vld [vmem:[#allocation9 + $0x358] sm:$0xff]  ;;  %v2560_v33 = vld [vmem:[#allocation12 + $0xb80] sm:$0xff] }
 0x1b4   :  { %v10119_v55 = vcombine.low %v377_v40, %v381_v41  ;;  %v341_v19 = vld [vmem:[#allocation9 + $0x238] sm:$0xff] }
 0x1b5   :  { %2099 = vmatpush1.bf16.msra.mxu0 %v10055_v46  ;;  %v10255_v46 = vcombine.low %v513_v34, %v517_v35  ;;  %v465_v23 = vld [vmem:[#allocation9 + $0x618] sm:$0xff]  ;;  %v2568_v34 = vld [vmem:[#allocation12 + $0xbc0] sm:$0xff] }
 0x1b6   :  { %2140 = vmatpush1.bf16.msra.mxu1 %v10183_v47  ;;  %2100 = vmatprep.subr.bf16.mxu0 %v10048_v48  ;;  %v10120_v47 = vcombine.high %v377_v40, %v381_v41  ;;  %v10248_v48 = vcombine.high %v505_v42, %v509_v43  ;;  %v469_v26 = vld [vmem:[#allocation9 + $0x638] sm:$0xff]  ;;  %v10634_v40 = vcombine.high %v2560_v33, %v2568_v34  ;;  %v2544_v41 = vld [vmem:[#allocation12 + $0xb00] sm:$0xff] }
 0x1b7   :  { %2141 = vmatprep.subr.bf16.mxu1 %v10176_v51  ;;  %v369_v51 = vld [vmem:[#allocation9 + $0x318] sm:$0xff] }
 0x1b8   :  { %v10111_v62 = vcombine.low %v369_v51, %v373_v49 }
 0x1b9   :  { %2101 = vmatpush1.bf16.msra.mxu0 %v10047_v52  ;;  %v10247_v52 = vcombine.low %v505_v42, %v509_v43  ;;  %v2552_v42 = vld [vmem:[#allocation12 + $0xb40] sm:$0xff] }
 0x1ba   :  { %2142 = vmatpush1.bf16.msra.mxu1 %v10175_v56  ;;  %2102 = vmatprep.subr.bf16.mxu0 %v10040_v57  ;;  %v10112_v56 = vcombine.high %v369_v51, %v373_v49  ;;  %v10240_v57 = vcombine.high %v497_v50, %v501_v54  ;;  %v2272_v51 = vld [vmem:[#allocation12 + $0x280] sm:$0xff] }
 0x1bb   :  { %2143 = vmatprep.subr.bf16.mxu1 %v10168_v58  ;;  %v361_v58 = vld [vmem:[#allocation9 + $0x2d8] sm:$0xff]  ;;  %v2280_v49 = vld [vmem:[#allocation12 + $0x2c0] sm:$0xff] }
 0x1bc   :  { %v10103_v6 = vcombine.low %v361_v58, %v365_v59 }
 0x1bd   :  { %2103 = vmatpush1.bf16.msra.mxu0 %v10039_v63  ;;  %v10239_v63 = vcombine.low %v497_v50, %v501_v54  ;;  %v10618_v50 = vcombine.high %v2544_v41, %v2552_v42 }
 0x1be   :  { %2144 = vmatpush1.bf16.msra.mxu1 %v10167_v0  ;;  %2104 = vmatprep.subr.bf16.mxu0 %v10032_v1  ;;  %v10104_v0 = vcombine.high %v361_v58, %v365_v59  ;;  %v10232_v1 = vcombine.high %v489_v60, %v493_v61 }
 0x1bf   :  { %2145 = vmatprep.subr.bf16.mxu1 %v10160_v2  ;;  %v353_v2 = vld [vmem:[#allocation9 + $0x298] sm:$0xff] }
 0x1c0   :  { %v10095_v14 = vcombine.low %v353_v2, %v357_v3 }
 0x1c1   :  { %2105 = vmatpush1.bf16.msra.mxu0 %v10031_v7  ;;  %v10231_v7 = vcombine.low %v489_v60, %v493_v61  ;;  %v10346_v60 = vcombine.high %v2272_v51, %v2280_v49  ;;  %v10617_v61 = vcombine.low %v2544_v41, %v2552_v42  ;;  %v2192_v41 = vld [vmem:[#allocation12] sm:$0xff] }
 0x1c2   :  { %2146 = vmatpush1.bf16.msra.mxu1 %v10159_v8  ;;  %2106 = vmatprep.subr.bf16.mxu0 %v10024_v9  ;;  %v10096_v8 = vcombine.high %v353_v2, %v357_v3  ;;  %v10224_v9 = vcombine.high %v481_v4, %v485_v5  ;;  %v2512_v3 = vld [vmem:[#allocation12 + $0xa00] sm:$0xff] }
 0x1c3   :  { %2147 = vmatprep.subr.bf16.mxu1 %v10152_v10  ;;  %v345_v10 = vld [vmem:[#allocation9 + $0x258] sm:$0xff]  ;;  %v2200_v42 = vld [vmem:[#allocation12 + $0x40] sm:$0xff] }
 0x1c4   :  { %v10087_v27 = vcombine.low %v345_v10, %v349_v11 }
 0x1c5   :  { %2107 = vmatpush1.bf16.msra.mxu0 %v10023_v15  ;;  %v10223_v15 = vcombine.low %v481_v4, %v485_v5  ;;  %v2520_v4 = vld [vmem:[#allocation12 + $0xa40] sm:$0xff] }
 0x1c6   :  { %2148 = vmatpush1.bf16.msra.mxu1 %v10151_v16  ;;  %2108 = vmatprep.subr.bf16.mxu0 %v10016_v17  ;;  %v10088_v16 = vcombine.high %v345_v10, %v349_v11  ;;  %v10216_v17 = vcombine.high %v473_v12, %v477_v13  ;;  %v2240_v11 = vld [vmem:[#allocation12 + $0x180] sm:$0xff] }
 0x1c7   :  { %2149 = vmatprep.subr.bf16.mxu1 %v10144_v18  ;;  %v337_v18 = vld [vmem:[#allocation9 + $0x218] sm:$0xff] }
 0x1c8   :  { %v10079_v35 = vcombine.low %v337_v18, %v341_v19 }
 0x1c9   :  { %2109 = vmatpush1.bf16.msra.mxu0 %v10015_v28  ;;  %v10215_v28 = vcombine.low %v473_v12, %v477_v13  ;;  %v2248_v12 = vld [vmem:[#allocation12 + $0x1c0] sm:$0xff]  ;;  %v10586_v13 = vcombine.high %v2512_v3, %v2520_v4 }
 0x1ca   :  { %2150 = vmatpush1.bf16.msra.mxu1 %v10143_v29  ;;  %2110 = vmatprep.subr.bf16.mxu0 %v10136_v30  ;;  %v10080_v29 = vcombine.high %v337_v18, %v341_v19  ;;  %v10208_v30 = vcombine.high %v465_v23, %v469_v26  ;;  %v10314_v18 = vcombine.high %v2240_v11, %v2248_v12 }
 0x1cb   :  { %2151 = vmatprep.subr.bf16.mxu1 %v10264_v31  ;;  %v2304_v31 = vld [vmem:[#allocation12 + $0x380] sm:$0xff]  ;;  %v10585_v19 = vcombine.low %v2512_v3, %v2520_v4 }
 0x1cc   :  { %v10377_v43 = vcombine.low %v2304_v31, %v2312_v32 }
 0x1cd   :  { %2111 = vmatpush2.bf16.msra.mxu0 %v10135_v36  ;;  %v10207_v36 = vcombine.low %v465_v23, %v469_v26  ;;  %v2224_v23 = vld [vmem:[#allocation12 + $0x100] sm:$0xff] }
 0x1ce   :  { %2152 = vmatpush2.bf16.msra.mxu1 %v10263_v37  ;;  %2112 = vmatprep.subr.bf16.mxu0 %v10128_v38  ;;  %v10378_v37 = vcombine.high %v2304_v31, %v2312_v32  ;;  %v2288_v38 = vld [vmem:[#allocation12 + $0x300] sm:$0xff] }
 0x1cf   :  { %2153 = vmatprep.subr.bf16.mxu1 %v10256_v39  ;;  %v2296_v39 = vld [vmem:[#allocation12 + $0x340] sm:$0xff] }
 0x1d0   :  { %v2232_v26 = vld [vmem:[#allocation12 + $0x140] sm:$0xff] }
 0x1d1   :  { %2113 = vmatpush2.bf16.msra.mxu0 %v10127_v44  ;;  %v11666_v44 = vld [vmem:[#allocation11] sm:$0xff]  ;;  %v10298_v31 = vcombine.high %v2224_v23, %v2232_v26 }
 0x1d2   :  { %2154 = vmatpush2.bf16.msra.mxu1 %v10255_v46  ;;  %2114 = vmatprep.subr.bf16.mxu0 %v10120_v47  ;;  %v10362_v46 = vcombine.high %v2288_v38, %v2296_v39  ;;  %v10633_v47 = vcombine.low %v2560_v33, %v2568_v34  ;;  %v2208_v33 = vld [vmem:[#allocation12 + $0x80] sm:$0xff] }
 0x1d3   :  { %2155 = vmatprep.subr.bf16.mxu1 %v10248_v48  ;;  %v535_v48 = vrot.slane %v11666_v44, %v11635_v24  ;;  %v2216_v34 = vld [vmem:[#allocation12 + $0xc0] sm:$0xff] }
 0x1d5   :  { %2115 = vmatpush2.bf16.msra.mxu0 %v10119_v55 }
 0x1d6   :  { %2156 = vmatpush2.bf16.msra.mxu1 %v10247_v52  ;;  %2116 = vmatprep.subr.bf16.mxu0 %v10112_v56  ;;  %v2528_v52 = vld [vmem:[#allocation12 + $0xa80] sm:$0xff] }
 0x1d7   :  { %2157 = vmatprep.subr.bf16.mxu1 %v10240_v57  ;;  %v2536_v56 = vld [vmem:[#allocation12 + $0xac0] sm:$0xff]  ;;  %v10361_v57 = vcombine.low %v2288_v38, %v2296_v39  ;;  %v10297_v38 = vcombine.low %v2224_v23, %v2232_v26  ;;  %v10282_v39 = vcombine.high %v2208_v33, %v2216_v34 }
 0x1d8   :  { %v2368_v26 = vld [vmem:[#allocation12 + $0x580] sm:$0xff] }
 0x1d9   :  { %2117 = vmatpush2.bf16.msra.mxu0 %v10111_v62 }
 0x1da   :  { %2158 = vmatpush2.bf16.msra.mxu1 %v10239_v63  ;;  %2118 = vmatprep.subr.bf16.mxu0 %v10104_v0  ;;  %v2256_v63 = vld [vmem:[#allocation12 + $0x200] sm:$0xff] }
 0x1db   :  { %2159 = vmatprep.subr.bf16.mxu1 %v10232_v1  ;;  %v2264_v0 = vld [vmem:[#allocation12 + $0x240] sm:$0xff] }
 0x1dd   :  { %2119 = vmatpush2.bf16.msra.mxu0 %v10103_v6 }
 0x1de   :  { %2160 = vmatpush2.bf16.msra.mxu1 %v10231_v7  ;;  %2120 = vmatprep.subr.bf16.mxu0 %v10096_v8  ;;  %v10330_v8 = vcombine.high %v2256_v63, %v2264_v0 }
 0x1df   :  { %2161 = vmatprep.subr.bf16.mxu1 %v10224_v9  ;;  %v10601_v9 = vcombine.low %v2528_v52, %v2536_v56 }
 0x1e1   :  { %2121 = vmatpush2.bf16.msra.mxu0 %v10095_v14  ;;  %v2496_v14 = vld [vmem:[#allocation12 + $0x980] sm:$0xff] }
 0x1e2   :  { %2162 = vmatpush2.bf16.msra.mxu1 %v10223_v15  ;;  %2122 = vmatprep.subr.bf16.mxu0 %v10088_v16  ;;  %v2504_v15 = vld [vmem:[#allocation12 + $0x9c0] sm:$0xff] }
 0x1e3   :  { %2163 = vmatprep.subr.bf16.mxu1 %v10216_v17  ;;  %v10329_v17 = vcombine.low %v2256_v63, %v2264_v0  ;;  %v10569_v32 = vcombine.low %v2496_v14, %v2504_v15  ;;  %v2424_v63 = vld [vmem:[#allocation12 + $0x740] sm:$0xff] }
 0x1e5   :  { %2123 = vmatpush2.bf16.msra.mxu0 %v10087_v27  ;;  %v10570_v27 = vcombine.high %v2496_v14, %v2504_v15  ;;  %v2640_v15 = vld [vmem:[#allocation12 + $0xe00] sm:$0xff] }
 0x1e6   :  { %2164 = vmatpush2.bf16.msra.mxu1 %v10215_v28  ;;  %2124 = vmatprep.subr.bf16.mxu0 %v10080_v29  ;;  %v2480_v28 = vld [vmem:[#allocation12 + $0x900] sm:$0xff] }
 0x1e7   :  { %2165 = vmatprep.subr.bf16.mxu1 %v10208_v30  ;;  %v2488_v29 = vld [vmem:[#allocation12 + $0x940] sm:$0xff]  ;;  %v10313_v30 = vcombine.low %v2240_v11, %v2248_v12 }
 0x1e8   :  { %v2384_v12 = vld [vmem:[#allocation12 + $0x600] sm:$0xff] }
 0x1e9   :  { %2125 = vmatpush2.bf16.msra.mxu0 %v10079_v35  ;;  %v10554_v35 = vcombine.high %v2480_v28, %v2488_v29 }
 0x1ea   :  { %2166 = vmatpush2.bf16.msra.mxu1 %v10207_v36  ;;  %8420 = vmatprep.subr.bf16.mxu0 %v10378_v37  ;;  %v2464_v36 = vld [vmem:[#allocation12 + $0x880] sm:$0xff] }
 0x1eb   :  { %8461 = vmatprep.subr.bf16.mxu1 %v10634_v40  ;;  %v2472_v37 = vld [vmem:[#allocation12 + $0x8c0] sm:$0xff]  ;;  %v10553_v40 = vcombine.low %v2480_v28, %v2488_v29 }
 0x1ec   :  { %2127 = vmatmul.mubr.bf16.vlgmr.msra.gmra.mxu0 %v11650_v53  ;;  %v11671_v54 = vpop.f32.mrf.mxu0  ;;  %v10602_v53 = vcombine.high %v2528_v52, %v2536_v56  ;;  %v2440_v52 = vld [vmem:[#allocation12 + $0x7c0] sm:$0xff] }
 0x1ed   :  { %v11673_v55 = vpop.f32.mrf.mxu1  ;;  %2168 = vmatmul.mubr.bf16.vlgmr.msra.gmra.mxu1 %v11644_v45  ;;  %8421 = vmatpush1.bf16.msra.mxu0 %v10377_v43  ;;  %v10345_v45 = vcombine.low %v2272_v51, %v2280_v49  ;;  %v10538_v43 = vcombine.high %v2464_v36, %v2472_v37  ;;  %v10266_v51 = vcombine.high %v2192_v41, %v2200_v42  ;;  %v2624_v29 = vld [vmem:[#allocation12 + $0xd80] sm:$0xff] }
 0x1ee   :  { %v1884_v58 = vpop.f32.mrf.mxu0  ;;  %8422 = vmatprep.subr.bf16.mxu0 %v10362_v46  ;;  %8462 = vmatpush1.bf16.msra.mxu1 %v10633_v47  ;;  %v2448_v46 = vld [vmem:[#allocation12 + $0x800] sm:$0xff]  ;;  %v10537_v49 = vcombine.low %v2464_v36, %v2472_v37 }
 0x1ef   :  { %v1925_v59 = vpop.f32.mrf.mxu1  ;;  %v1885_v62 = vadd.f32 %v1884_v58, %v535_v48  ;;  %8463 = vmatprep.subr.bf16.mxu1 %v10618_v50  ;;  %v2456_v47 = vld [vmem:[#allocation12 + $0x840] sm:$0xff]  ;;  %v10281_v48 = vcombine.low %v2208_v33, %v2216_v34 }
 0x1f0   :  { %v1886_v1 = vpop.f32.mrf.mxu0  ;;  %v2432_v50 = vld [vmem:[#allocation12 + $0x780] sm:$0xff]  ;;  %v10522_v56 = vcombine.high %v2448_v46, %v2456_v47 }
 0x1f1   :  { %v1927_v2 = vpop.f32.mrf.mxu1  ;;  %v1926_v5 = vadd.f32 %v1925_v59, %v1885_v62  ;;  %8423 = vmatpush1.bf16.msra.mxu0 %v10361_v57  ;;  %v2688_v57 = vld [vmem:[#allocation12 + $0xf80] sm:$0xff]  ;;  %v10265_v59 = vcombine.low %v2192_v41, %v2200_v42 }
 0x1f2   :  { %v1887_v6 = vpop.f32.mrf.mxu0  ;;  %8424 = vmatprep.subr.bf16.mxu0 %v10346_v60  ;;  %8464 = vmatpush1.bf16.msra.mxu1 %v10617_v61  ;;  %v2696_v58 = vld [vmem:[#allocation12 + $0xfc0] sm:$0xff]  ;;  %v10506_v60 = vcombine.high %v2432_v50, %v2440_v52  ;;  %v10521_v61 = vcombine.low %v2448_v46, %v2456_v47  ;;  %v10505_v2 = vcombine.low %v2432_v50, %v2440_v52 }
 0x1f3   :  { %v1928_v7 = vpop.f32.mrf.mxu1  ;;  %v2177_v10 = vmax.f32 %v1926_v5, 0.0  ;;  %8465 = vmatprep.subr.bf16.mxu1 %v10602_v53  ;;  %v2416_v62 = vld [vmem:[#allocation12 + $0x700] sm:$0xff]  ;;  %v10762_v0 = vcombine.high %v2688_v57, %v2696_v58  ;;  %v10761_v4 = vcombine.low %v2688_v57, %v2696_v58 }
 0x1f4   :  { %v2672_v53 = vld [vmem:[#allocation12 + $0xf00] sm:$0xff]  ;;  %v10490_v3 = vcombine.high %v2416_v62, %v2424_v63 }
 0x1f5   :  { %v11676_v16 = vpack.c.bf16 %v2177_v10, %v2177_v10  ;;  %8425 = vmatpush1.bf16.msra.mxu0 %v10345_v45  ;;  %v2680_v1 = vld [vmem:[#allocation12 + $0xf40] sm:$0xff] }
 0x1f6   :  { %8426 = vmatprep.subr.bf16.mxu0 %v10330_v8  ;;  %8466 = vmatpush1.bf16.msra.mxu1 %v10601_v9  ;;  %v2400_v5 = vld [vmem:[#allocation12 + $0x680] sm:$0xff]  ;;  %v10746_v6 = vcombine.high %v2672_v53, %v2680_v1  ;;  %v10489_v9 = vcombine.low %v2416_v62, %v2424_v63  ;;  %v10745_v11 = vcombine.low %v2672_v53, %v2680_v1 }
 0x1f7   :  { %8452 = vmatprep.mubr.bf16.mxu0 %v11676_v16  ;;  %8467 = vmatprep.subr.bf16.mxu1 %v10586_v13  ;;  %v2408_v45 = vld [vmem:[#allocation12 + $0x6c0] sm:$0xff] }
 0x1f8   :  { %v2656_v7 = vld [vmem:[#allocation12 + $0xe80] sm:$0xff]  ;;  %v10474_v10 = vcombine.high %v2400_v5, %v2408_v45 }
 0x1f9   :  { %8427 = vmatpush1.bf16.msra.mxu0 %v10329_v17  ;;  %v2664_v8 = vld [vmem:[#allocation12 + $0xec0] sm:$0xff] }
 0x1fa   :  { %8428 = vmatprep.subr.bf16.mxu0 %v10314_v18  ;;  %8468 = vmatpush1.bf16.msra.mxu1 %v10585_v19  ;;  %v2392_v13 = vld [vmem:[#allocation12 + $0x640] sm:$0xff]  ;;  %v10730_v14 = vcombine.high %v2656_v7, %v2664_v8  ;;  %v10473_v18 = vcombine.low %v2400_v5, %v2408_v45  ;;  %v10729_v23 = vcombine.low %v2656_v7, %v2664_v8 }
 0x1fb   :  { %8469 = vmatprep.subr.bf16.mxu1 %v10570_v27  ;;  %v2648_v17 = vld [vmem:[#allocation12 + $0xe40] sm:$0xff]  ;;  %v10458_v19 = vcombine.high %v2384_v12, %v2392_v13 }
 0x1fc   :  { %v2376_v27 = vld [vmem:[#allocation12 + $0x5c0] sm:$0xff]  ;;  %v10714_v28 = vcombine.high %v2640_v15, %v2648_v17  ;;  %v10713_v33 = vcombine.low %v2640_v15, %v2648_v17 }
 0x1fd   :  { %8429 = vmatpush1.bf16.msra.mxu0 %v10313_v30  ;;  %v2632_v30 = vld [vmem:[#allocation12 + $0xdc0] sm:$0xff] }
 0x1fe   :  { %8430 = vmatprep.subr.bf16.mxu0 %v10298_v31  ;;  %8470 = vmatpush1.bf16.msra.mxu1 %v10569_v32  ;;  %v10457_v31 = vcombine.low %v2384_v12, %v2392_v13  ;;  %v10442_v32 = vcombine.high %v2368_v26, %v2376_v27  ;;  %v2352_v34 = vld [vmem:[#allocation12 + $0x500] sm:$0xff]  ;;  %v10698_v36 = vcombine.high %v2624_v29, %v2632_v30 }
 0x1ff   :  { %8471 = vmatprep.subr.bf16.mxu1 %v10554_v35  ;;  %v2360_v35 = vld [vmem:[#allocation12 + $0x540] sm:$0xff]  ;;  %v10697_v42 = vcombine.low %v2624_v29, %v2632_v30 }
 0x200   :  { %v2608_v37 = vld [vmem:[#allocation12 + $0xd00] sm:$0xff]  ;;  %v10426_v41 = vcombine.high %v2352_v34, %v2360_v35 }
 0x201   :  { %8431 = vmatpush1.bf16.msra.mxu0 %v10297_v38  ;;  %v2616_v38 = vld [vmem:[#allocation12 + $0xd40] sm:$0xff] }
 0x202   :  { %8432 = vmatprep.subr.bf16.mxu0 %v10282_v39  ;;  %8472 = vmatpush1.bf16.msra.mxu1 %v10553_v40  ;;  %v10441_v39 = vcombine.low %v2368_v26, %v2376_v27  ;;  %v531_v40 = vrot.slane %v11666_v44, %v11629_v21  ;;  %v2344_v46 = vld [vmem:[#allocation12 + $0x4c0] sm:$0xff]  ;;  %v10682_v47 = vcombine.high %v2608_v37, %v2616_v38 }
 0x203   :  { %8473 = vmatprep.subr.bf16.mxu1 %v10538_v43  ;;  %v2336_v43 = vld [vmem:[#allocation12 + $0x480] sm:$0xff] }
 0x204   :  { %v1883_v50 = vadd.f32 %v11671_v54, %v531_v40  ;;  %v10410_v52 = vcombine.high %v2336_v43, %v2344_v46  ;;  %v2320_v57 = vld [vmem:[#allocation12 + $0x400] sm:$0xff]  ;;  %v10409_v62 = vcombine.low %v2336_v43, %v2344_v46 }
 0x205   :  { %8433 = vmatpush1.bf16.msra.mxu0 %v10281_v48  ;;  %v2592_v48 = vld [vmem:[#allocation12 + $0xc80] sm:$0xff] }
 0x206   :  { %8434 = vmatprep.subr.bf16.mxu0 %v10266_v51  ;;  %8474 = vmatpush1.bf16.msra.mxu1 %v10537_v49  ;;  %v2600_v51 = vld [vmem:[#allocation12 + $0xcc0] sm:$0xff]  ;;  %v10425_v49 = vcombine.low %v2352_v34, %v2360_v35  ;;  %v1924_v63 = vadd.f32 %v11673_v55, %v1883_v50 }
 0x207   :  { %8475 = vmatprep.subr.bf16.mxu1 %v10522_v56  ;;  %v10681_v56 = vcombine.low %v2608_v37, %v2616_v38  ;;  %v2328_v58 = vld [vmem:[#allocation12 + $0x440] sm:$0xff]  ;;  %v10665_v53 = vcombine.low %v2592_v48, %v2600_v51 }
 0x208   :  { %v2816_v1 = vld [vmem:[#allocation12 + $0x1380] sm:$0xff]  ;;  %v10393_v5 = vcombine.low %v2320_v57, %v2328_v58  ;;  %v2176_v45 = vmax.f32 %v1924_v63, 0.0 }
 0x209   :  { %8435 = vmatpush1.bf16.msra.mxu0 %v10265_v59  ;;  %v10666_v59 = vcombine.high %v2592_v48, %v2600_v51  ;;  %v2800_v55 = vld [vmem:[#allocation12 + $0x1300] sm:$0xff] }
 0x20a   :  { %8436 = vmatprep.subr.bf16.mxu0 %v10506_v60  ;;  %8476 = vmatpush1.bf16.msra.mxu1 %v10521_v61  ;;  %v2576_v60 = vld [vmem:[#allocation12 + $0xc00] sm:$0xff]  ;;  %v11691_v12 = vpack.c.bf16 %v2176_v45, %v2176_v45 }
 0x20b   :  { %8477 = vmatprep.subr.bf16.mxu1 %v10762_v0  ;;  %v2584_v61 = vld [vmem:[#allocation12 + $0xc40] sm:$0xff]  ;;  %v10394_v0 = vcombine.high %v2320_v57, %v2328_v58 }
 0x20c   :  { %v10650_v54 = vcombine.high %v2576_v60, %v2584_v61  ;;  %v2808_v8 = vld [vmem:[#allocation12 + $0x1340] sm:$0xff] }
 0x20d   :  { %8437 = vmatpush2.bf16.msra.mxu0 %v10505_v2  ;;  %v2824_v2 = vld [vmem:[#allocation12 + $0x13c0] sm:$0xff]  ;;  %v10874_v13 = vcombine.high %v2800_v55, %v2808_v8  ;;  %v10873_v26 = vcombine.low %v2800_v55, %v2808_v8 }
 0x20e   :  { %8438 = vmatprep.subr.bf16.mxu0 %v10490_v3  ;;  %8478 = vmatpush2.bf16.msra.mxu1 %v10761_v4  ;;  %v11683_v3 = vld [vmem:[#allocation12 + $0x1b80] sm:$0xff]  ;;  %v10890_v7 = vcombine.high %v2816_v1, %v2824_v2 }
 0x20f   :  { %8479 = vmatprep.subr.bf16.mxu1 %v10746_v6  ;;  %v11685_v4 = vld [vmem:[#allocation12 + $0x1bc0] sm:$0xff]  ;;  %v10649_v6 = vcombine.low %v2576_v60, %v2584_v61  ;;  %v11704_v60 = vld [vmem:[#allocation12 + $0xbc8] sm:$0xff] }
 0x210   :  { %v2784_v15 = vld [vmem:[#allocation12 + $0x1280] sm:$0xff]  ;;  %v11145_v50 = vcombine.low %v11683_v3, %v11685_v4 }
 0x211   :  { %8439 = vmatpush2.bf16.msra.mxu0 %v10489_v9  ;;  %v11146_v9 = vcombine.high %v11683_v3, %v11685_v4  ;;  %v2792_v17 = vld [vmem:[#allocation12 + $0x12c0] sm:$0xff] }
 0x212   :  { %8440 = vmatprep.subr.bf16.mxu0 %v10474_v10  ;;  %8480 = vmatpush2.bf16.msra.mxu1 %v10745_v11  ;;  %v539_v10 = vrot.slane %v11666_v44, %v11632_v22  ;;  %v10889_v11 = vcombine.low %v2816_v1, %v2824_v2  ;;  %v10858_v29 = vcombine.high %v2784_v15, %v2792_v17  ;;  %v2760_v46 = vld [vmem:[#allocation12 + $0x11c0] sm:$0xff] }
 0x213   :  { %8481 = vmatprep.subr.bf16.mxu1 %v10730_v14  ;;  %v543_v14 = vrot.slane %v11666_v44, %v11638_v25  ;;  %v10857_v37 = vcombine.low %v2784_v15, %v2792_v17  ;;  %v3064_v48 = vld [vmem:[#allocation12 + $0x1b40] sm:$0xff] }
 0x214   :  { %v2736_v57 = vld [vmem:[#allocation12 + $0x1100] sm:$0xff] }
 0x215   :  { %8441 = vmatpush2.bf16.msra.mxu0 %v10473_v18  ;;  %v2744_v61 = vld [vmem:[#allocation12 + $0x1140] sm:$0xff] }
 0x216   :  { %8442 = vmatprep.subr.bf16.mxu0 %v10458_v19  ;;  %8482 = vmatpush2.bf16.msra.mxu1 %v10729_v23  ;;  %v3048_v63 = vld [vmem:[#allocation12 + $0x1ac0] sm:$0xff]  ;;  %v10810_v1 = vcombine.high %v2736_v57, %v2744_v61 }
 0x217   :  { %8483 = vmatprep.subr.bf16.mxu1 %v10714_v28  ;;  %v2720_v2 = vld [vmem:[#allocation12 + $0x1080] sm:$0xff] }
 0x218   :  { %v2728_v4 = vld [vmem:[#allocation12 + $0x10c0] sm:$0xff] }
 0x219   :  { %8443 = vmatpush2.bf16.msra.mxu0 %v10457_v31  ;;  %v3032_v45 = vld [vmem:[#allocation12 + $0x1a40] sm:$0xff]  ;;  %v10794_v55 = vcombine.high %v2720_v2, %v2728_v4 }
 0x21a   :  { %8444 = vmatprep.subr.bf16.mxu0 %v10442_v32  ;;  %8484 = vmatpush2.bf16.msra.mxu1 %v10713_v33  ;;  %v2768_v32 = vld [vmem:[#allocation12 + $0x1200] sm:$0xff] }
 0x21b   :  { %8485 = vmatprep.subr.bf16.mxu1 %v10698_v36  ;;  %v2776_v33 = vld [vmem:[#allocation12 + $0x1240] sm:$0xff] }
 0x21c   :  { %v2704_v8 = vld [vmem:[#allocation12 + $0x1000] sm:$0xff] }
 0x21d   :  { %8445 = vmatpush2.bf16.msra.mxu0 %v10441_v39 }
 0x21e   :  { %8446 = vmatprep.subr.bf16.mxu0 %v10426_v41  ;;  %8486 = vmatpush2.bf16.msra.mxu1 %v10697_v42  ;;  %v10842_v41 = vcombine.high %v2768_v32, %v2776_v33  ;;  %v2752_v42 = vld [vmem:[#allocation12 + $0x1180] sm:$0xff] }
 0x21f   :  { %8487 = vmatprep.subr.bf16.mxu1 %v10682_v47  ;;  %v3056_v47 = vld [vmem:[#allocation12 + $0x1b00] sm:$0xff] }
 0x220   :  { %v11130_v58 = vcombine.high %v3056_v47, %v3064_v48 }
 0x221   :  { %8447 = vmatpush2.bf16.msra.mxu0 %v10425_v49  ;;  %v10841_v49 = vcombine.low %v2768_v32, %v2776_v33  ;;  %v2936_v33 = vld [vmem:[#allocation12 + $0x1740] sm:$0xff] }
 0x222   :  { %8448 = vmatprep.subr.bf16.mxu0 %v10410_v52  ;;  %8488 = vmatpush2.bf16.msra.mxu1 %v10681_v56  ;;  %v10826_v56 = vcombine.high %v2752_v42, %v2760_v46 }
 0x223   :  { %8489 = vmatprep.subr.bf16.mxu1 %v10666_v59  ;;  %v11702_v59 = vld [vmem:[#allocation12 + $0xb88] sm:$0xff] }
 0x225   :  { %8449 = vmatpush2.bf16.msra.mxu0 %v10409_v62  ;;  %v3040_v62 = vld [vmem:[#allocation12 + $0x1a80] sm:$0xff] }
 0x226   :  { %8450 = vmatprep.subr.bf16.mxu0 %v10394_v0  ;;  %8490 = vmatpush2.bf16.msra.mxu1 %v10665_v53  ;;  %v10635_v0 = vcombine.low %v11702_v59, %v11704_v60  ;;  %v10825_v53 = vcombine.low %v2752_v42, %v2760_v46  ;;  %v11114_v3 = vcombine.high %v3040_v62, %v3048_v63  ;;  %v2960_v42 = vld [vmem:[#allocation12 + $0x1800] sm:$0xff] }
 0x227   :  { %8491 = vmatprep.subr.bf16.mxu1 %v10650_v54  ;;  %v11129_v54 = vcombine.low %v3056_v47, %v3064_v48 }
 0x229   :  { %8451 = vmatpush2.bf16.msra.mxu0 %v10393_v5  ;;  %v3024_v5 = vld [vmem:[#allocation12 + $0x1a00] sm:$0xff] }
 0x22a   :  { %8492 = vmatpush2.bf16.msra.mxu1 %v10649_v6  ;;  %8502 = vmatprep.subr.bf16.mxu0 %v10890_v7  ;;  %v10809_v6 = vcombine.low %v2736_v57, %v2744_v61  ;;  %v11113_v7 = vcombine.low %v3040_v62, %v3048_v63  ;;  %v11097_v15 = vcombine.low %v3024_v5, %v3032_v45  ;;  %v3200_v57 = vld [vmem:[#allocation12 + $0x1f80] sm:$0xff] }
 0x22b   :  { %8543 = vmatprep.subr.bf16.mxu1 %v11146_v9  ;;  %v11098_v9 = vcombine.high %v3024_v5, %v3032_v45 }
 0x22c   :  { %v1964_v18 = vpop.f32.mrf.mxu0  ;;  %8453 = vmatmul.mubr.bf16.vlgmr.msra.gmra.mxu0 %v11691_v12 }
 0x22d   :  { %v2005_v19 = vpop.f32.mrf.mxu1  ;;  %v1965_v23 = vadd.f32 %v1964_v18, %v539_v10  ;;  %8503 = vmatpush1.bf16.msra.mxu0 %v10889_v11  ;;  %v2712_v10 = vld [vmem:[#allocation12 + $0x1040] sm:$0xff] }
 0x22e   :  { %v1966_v27 = vpop.f32.mrf.mxu0  ;;  %8504 = vmatprep.subr.bf16.mxu0 %v10874_v13  ;;  %v3008_v11 = vld [vmem:[#allocation12 + $0x1980] sm:$0xff]  ;;  %v10778_v17 = vcombine.high %v2704_v8, %v2712_v10 }
 0x22f   :  { %v2007_v28 = vpop.f32.mrf.mxu1  ;;  %v2006_v30 = vadd.f32 %v2005_v19, %v1965_v23  ;;  %v1967_v31 = vadd.f32 %v1966_v27, %v543_v14  ;;  %v3016_v13 = vld [vmem:[#allocation12 + $0x19c0] sm:$0xff]  ;;  %v10793_v14 = vcombine.low %v2720_v2, %v2728_v4 }
 0x230   :  { %v1968_v34 = vpop.f32.mrf.mxu0  ;;  %v2944_v18 = vld [vmem:[#allocation12 + $0x1780] sm:$0xff]  ;;  %v11082_v19 = vcombine.high %v3008_v11, %v3016_v13 }
 0x231   :  { %v2009_v35 = vpop.f32.mrf.mxu1  ;;  %v2008_v36 = vadd.f32 %v2007_v28, %v1967_v31  ;;  %8505 = vmatpush1.bf16.msra.mxu0 %v10873_v26  ;;  %v2178_v38 = vmax.f32 %v2006_v30, 0.0  ;;  %v2952_v23 = vld [vmem:[#allocation12 + $0x17c0] sm:$0xff]  ;;  %v10777_v28 = vcombine.low %v2704_v8, %v2712_v10 }
 0x232   :  { %v1969_v39 = vpop.f32.mrf.mxu0  ;;  %8506 = vmatprep.subr.bf16.mxu0 %v10858_v29  ;;  %v2992_v26 = vld [vmem:[#allocation12 + $0x1900] sm:$0xff]  ;;  %v11081_v29 = vcombine.low %v3008_v11, %v3016_v13  ;;  %v11018_v30 = vcombine.high %v2944_v18, %v2952_v23 }
 0x233   :  { %v2010_v40 = vpop.f32.mrf.mxu1  ;;  %v2179_v43 = vmax.f32 %v2008_v36, 0.0  ;;  %v11700_v52 = vpack.c.bf16 %v2178_v38, %v2178_v38  ;;  %v3000_v27 = vld [vmem:[#allocation12 + $0x1940] sm:$0xff]  ;;  %v11017_v36 = vcombine.low %v2944_v18, %v2952_v23 }
 0x234   :  { %v2928_v31 = vld [vmem:[#allocation12 + $0x1700] sm:$0xff]  ;;  %v11066_v32 = vcombine.high %v2992_v26, %v3000_v27 }
 0x235   :  { %v11696_v51 = vpack.c.bf16 %v2179_v43, %v2179_v43  ;;  %8507 = vmatpush1.bf16.msra.mxu0 %v10857_v37  ;;  %v2976_v34 = vld [vmem:[#allocation12 + $0x1880] sm:$0xff]  ;;  %v11065_v37 = vcombine.low %v2992_v26, %v3000_v27  ;;  %v11002_v38 = vcombine.high %v2928_v31, %v2936_v33  ;;  %v11001_v46 = vcombine.low %v2928_v31, %v2936_v33 }
 0x236   :  { %8508 = vmatprep.subr.bf16.mxu0 %v10842_v41  ;;  %v2984_v35 = vld [vmem:[#allocation12 + $0x18c0] sm:$0xff] }
 0x237   :  { %8493 = vmatprep.mubr.bf16.mxu1 %v11696_v51  ;;  %v2912_v39 = vld [vmem:[#allocation12 + $0x1680] sm:$0xff]  ;;  %v11050_v40 = vcombine.high %v2976_v34, %v2984_v35  ;;  %v11049_v47 = vcombine.low %v2976_v34, %v2984_v35 }
 0x238   :  { %8494 = vmatmul.mubr.bf16.vlgmr.msra.gmra.mxu1 %v11700_v52  ;;  %v2920_v41 = vld [vmem:[#allocation12 + $0x16c0] sm:$0xff] }
 0x239   :  { %8509 = vmatpush1.bf16.msra.mxu0 %v10841_v49  ;;  %8544 = vmatpush1.bf16.msra.mxu1 %v11145_v50  ;;  %v2968_v43 = vld [vmem:[#allocation12 + $0x1840] sm:$0xff]  ;;  %v10986_v48 = vcombine.high %v2912_v39, %v2920_v41  ;;  %v10985_v61 = vcombine.low %v2912_v39, %v2920_v41  ;;  %v11711_v41 = vsub.s32 4, %v11626_v20 }
 0x23a   :  { %8510 = vmatprep.subr.bf16.mxu0 %v10826_v56  ;;  %8545 = vmatprep.subr.bf16.mxu1 %v11130_v58  ;;  %v2896_v49 = vld [vmem:[#allocation12 + $0x1600] sm:$0xff]  ;;  %v11034_v50 = vcombine.high %v2960_v42, %v2968_v43  ;;  %v11033_v62 = vcombine.low %v2960_v42, %v2968_v43 }
 0x23b   :  { %v2904_v56 = vld [vmem:[#allocation12 + $0x1640] sm:$0xff] }
 0x23c   :  { %v3208_v58 = vld [vmem:[#allocation12 + $0x1fc0] sm:$0xff]  ;;  %v10970_v63 = vcombine.high %v2896_v49, %v2904_v56  ;;  %v10969_v4 = vcombine.low %v2896_v49, %v2904_v56  ;;  %v547_v56 = vrot.slane %v11666_v44, %v11711_v41 }
 0x23d   :  { %8511 = vmatpush1.bf16.msra.mxu0 %v10825_v53  ;;  %8546 = vmatpush1.bf16.msra.mxu1 %v11129_v54  ;;  %v2880_v53 = vld [vmem:[#allocation12 + $0x1580] sm:$0xff]  ;;  %v11274_v54 = vcombine.high %v3200_v57, %v3208_v58  ;;  %v11273_v5 = vcombine.low %v3200_v57, %v3208_v58 }
 0x23e   :  { %8512 = vmatprep.subr.bf16.mxu0 %v10810_v1  ;;  %8547 = vmatprep.subr.bf16.mxu1 %v11114_v3  ;;  %v2888_v1 = vld [vmem:[#allocation12 + $0x15c0] sm:$0xff] }
 0x23f   :  { %v3184_v2 = vld [vmem:[#allocation12 + $0x1f00] sm:$0xff]  ;;  %v10954_v45 = vcombine.high %v2880_v53, %v2888_v1  ;;  %v10953_v10 = vcombine.low %v2880_v53, %v2888_v1 }
 0x240   :  { %v3192_v3 = vld [vmem:[#allocation12 + $0x1f40] sm:$0xff] }
 0x241   :  { %8513 = vmatpush1.bf16.msra.mxu0 %v10809_v6  ;;  %8548 = vmatpush1.bf16.msra.mxu1 %v11113_v7  ;;  %v2864_v6 = vld [vmem:[#allocation12 + $0x1500] sm:$0xff]  ;;  %v11258_v7 = vcombine.high %v3184_v2, %v3192_v3  ;;  %v11257_v11 = vcombine.low %v3184_v2, %v3192_v3 }
 0x242   :  { %8514 = vmatprep.subr.bf16.mxu0 %v10794_v55  ;;  %8549 = vmatprep.subr.bf16.mxu1 %v11098_v9  ;;  %v2872_v55 = vld [vmem:[#allocation12 + $0x1540] sm:$0xff] }
 0x243   :  { %v3168_v8 = vld [vmem:[#allocation12 + $0x1e80] sm:$0xff]  ;;  %v10938_v13 = vcombine.high %v2864_v6, %v2872_v55  ;;  %v10937_v23 = vcombine.low %v2864_v6, %v2872_v55 }
 0x244   :  { %v3176_v9 = vld [vmem:[#allocation12 + $0x1ec0] sm:$0xff] }
 0x245   :  { %8515 = vmatpush1.bf16.msra.mxu0 %v10793_v14  ;;  %8550 = vmatpush1.bf16.msra.mxu1 %v11097_v15  ;;  %v2848_v14 = vld [vmem:[#allocation12 + $0x1480] sm:$0xff]  ;;  %v11242_v15 = vcombine.high %v3168_v8, %v3176_v9  ;;  %v11241_v26 = vcombine.low %v3168_v8, %v3176_v9 }
 0x246   :  { %8516 = vmatprep.subr.bf16.mxu0 %v10778_v17  ;;  %8551 = vmatprep.subr.bf16.mxu1 %v11082_v19  ;;  %v2856_v17 = vld [vmem:[#allocation12 + $0x14c0] sm:$0xff] }
 0x247   :  { %v3152_v18 = vld [vmem:[#allocation12 + $0x1e00] sm:$0xff]  ;;  %v10922_v27 = vcombine.high %v2848_v14, %v2856_v17  ;;  %v10921_v33 = vcombine.low %v2848_v14, %v2856_v17  ;;  %v2297_v17 = vld [vmem:[#allocation12 + $0x348] sm:$0xff] }
 0x248   :  { %v3160_v19 = vld [vmem:[#allocation12 + $0x1e40] sm:$0xff] }
 0x249   :  { %8517 = vmatpush1.bf16.msra.mxu0 %v10777_v28  ;;  %8552 = vmatpush1.bf16.msra.mxu1 %v11081_v29  ;;  %v2832_v28 = vld [vmem:[#allocation12 + $0x1400] sm:$0xff]  ;;  %v11226_v29 = vcombine.high %v3152_v18, %v3160_v19  ;;  %v11225_v34 = vcombine.low %v3152_v18, %v3160_v19 }
 0x24a   :  { %8518 = vmatprep.subr.bf16.mxu0 %v11018_v30  ;;  %8553 = vmatprep.subr.bf16.mxu1 %v11066_v32  ;;  %v2840_v30 = vld [vmem:[#allocation12 + $0x1440] sm:$0xff] }
 0x24b   :  { %v3136_v31 = vld [vmem:[#allocation12 + $0x1d80] sm:$0xff]  ;;  %v10906_v35 = vcombine.high %v2832_v28, %v2840_v30  ;;  %v10905_v42 = vcombine.low %v2832_v28, %v2840_v30  ;;  %v2281_v28 = vld [vmem:[#allocation12 + $0x2c8] sm:$0xff] }
 0x24c   :  { %v3144_v32 = vld [vmem:[#allocation12 + $0x1dc0] sm:$0xff] }
 0x24d   :  { %8519 = vmatpush2.bf16.msra.mxu0 %v11017_v36  ;;  %8554 = vmatpush1.bf16.msra.mxu1 %v11065_v37  ;;  %v2305_v36 = vld [vmem:[#allocation12 + $0x388] sm:$0xff]  ;;  %v11210_v37 = vcombine.high %v3136_v31, %v3144_v32  ;;  %v3120_v39 = vld [vmem:[#allocation12 + $0x1d00] sm:$0xff]  ;;  %v11209_v43 = vcombine.low %v3136_v31, %v3144_v32 }
 0x24e   :  { %8520 = vmatprep.subr.bf16.mxu0 %v11002_v38  ;;  %8555 = vmatprep.subr.bf16.mxu1 %v11050_v40  ;;  %v2313_v38 = vld [vmem:[#allocation12 + $0x3c8] sm:$0xff]  ;;  %v3128_v40 = vld [vmem:[#allocation12 + $0x1d40] sm:$0xff] }
 0x24f   :  { %v3104_v49 = vld [vmem:[#allocation12 + $0x1c80] sm:$0xff]  ;;  %v11193_v57 = vcombine.low %v3120_v39, %v3128_v40  ;;  %v10379_v19 = vcombine.low %v2305_v36, %v2313_v38  ;;  %v2257_v31 = vld [vmem:[#allocation12 + $0x208] sm:$0xff] }
 0x250   :  { %v2265_v32 = vld [vmem:[#allocation12 + $0x248] sm:$0xff] }
 0x251   :  { %8521 = vmatpush2.bf16.msra.mxu0 %v11001_v46  ;;  %8556 = vmatpush1.bf16.msra.mxu1 %v11049_v47  ;;  %v10380_v46 = vcombine.high %v2305_v36, %v2313_v38  ;;  %v11194_v47 = vcombine.high %v3120_v39, %v3128_v40  ;;  %v2249_v36 = vld [vmem:[#allocation12 + $0x1c8] sm:$0xff] }
 0x252   :  { %8522 = vmatprep.subr.bf16.mxu0 %v10986_v48  ;;  %8557 = vmatprep.subr.bf16.mxu1 %v11034_v50  ;;  %v11714_v48 = vsub.s32 5, %v11626_v20  ;;  %v3112_v50 = vld [vmem:[#allocation12 + $0x1cc0] sm:$0xff]  ;;  %v2225_v39 = vld [vmem:[#allocation12 + $0x108] sm:$0xff] }
 0x253   :  { %v11178_v58 = vcombine.high %v3104_v49, %v3112_v50  ;;  %v11177_v2 = vcombine.low %v3104_v49, %v3112_v50  ;;  %v2233_v40 = vld [vmem:[#allocation12 + $0x148] sm:$0xff] }
 0x254   :  { %v10299_v49 = vcombine.low %v2225_v39, %v2233_v40 }
 0x255   :  { %8523 = vmatpush2.bf16.msra.mxu0 %v10985_v61  ;;  %8558 = vmatpush1.bf16.msra.mxu1 %v11033_v62  ;;  %v551_v61 = vrot.slane %v11666_v44, %v11714_v48  ;;  %v3088_v62 = vld [vmem:[#allocation12 + $0x1c00] sm:$0xff] }
 0x256   :  { %8524 = vmatprep.subr.bf16.mxu0 %v10970_v63  ;;  %8559 = vmatprep.subr.bf16.mxu1 %v11274_v54  ;;  %v3096_v63 = vld [vmem:[#allocation12 + $0x1c40] sm:$0xff] }
 0x257   :  { %v11161_v9 = vcombine.low %v3088_v62, %v3096_v63 }
 0x259   :  { %8525 = vmatpush2.bf16.msra.mxu0 %v10969_v4  ;;  %8560 = vmatpush2.bf16.msra.mxu1 %v11273_v5  ;;  %v11162_v4 = vcombine.high %v3088_v62, %v3096_v63  ;;  %v2433_v62 = vld [vmem:[#allocation12 + $0x788] sm:$0xff] }
 0x25a   :  { %8526 = vmatprep.subr.bf16.mxu0 %v10954_v45  ;;  %8561 = vmatprep.subr.bf16.mxu1 %v11258_v7  ;;  %v2441_v63 = vld [vmem:[#allocation12 + $0x7c8] sm:$0xff] }
 0x25d   :  { %8527 = vmatpush2.bf16.msra.mxu0 %v10953_v10  ;;  %8562 = vmatpush2.bf16.msra.mxu1 %v11257_v11  ;;  %v10636_v11 = vcombine.high %v11702_v59, %v11704_v60 }
 0x25e   :  { %8528 = vmatprep.subr.bf16.mxu0 %v10938_v13  ;;  %8563 = vmatprep.subr.bf16.mxu1 %v11242_v15  ;;  %v2289_v15 = vld [vmem:[#allocation12 + $0x308] sm:$0xff] }
 0x261   :  { %8529 = vmatpush2.bf16.msra.mxu0 %v10937_v23  ;;  %8564 = vmatpush2.bf16.msra.mxu1 %v11241_v26  ;;  %v10364_v26 = vcombine.high %v2289_v15, %v2297_v17 }
 0x262   :  { %8530 = vmatprep.subr.bf16.mxu0 %v10922_v27  ;;  %8565 = vmatprep.subr.bf16.mxu1 %v11226_v29  ;;  %v2273_v27 = vld [vmem:[#allocation12 + $0x288] sm:$0xff]  ;;  %v10363_v29 = vcombine.low %v2289_v15, %v2297_v17 }
 0x263   :  { %v10348_v30 = vcombine.high %v2273_v27, %v2281_v28  ;;  %v2353_v15 = vld [vmem:[#allocation12 + $0x508] sm:$0xff] }
 0x264   :  { %v2361_v17 = vld [vmem:[#allocation12 + $0x548] sm:$0xff] }
 0x265   :  { %8531 = vmatpush2.bf16.msra.mxu0 %v10921_v33  ;;  %8566 = vmatpush2.bf16.msra.mxu1 %v11225_v34  ;;  %v10347_v33 = vcombine.low %v2273_v27, %v2281_v28  ;;  %v10332_v34 = vcombine.high %v2257_v31, %v2265_v32  ;;  %v10428_v27 = vcombine.high %v2353_v15, %v2361_v17  ;;  %v11733_v28 = vsub.s32 7, %v11626_v20 }
 0x266   :  { %8532 = vmatprep.subr.bf16.mxu0 %v10906_v35  ;;  %8567 = vmatprep.subr.bf16.mxu1 %v11210_v37  ;;  %v2241_v35 = vld [vmem:[#allocation12 + $0x188] sm:$0xff]  ;;  %v10331_v37 = vcombine.low %v2257_v31, %v2265_v32  ;;  %v10427_v31 = vcombine.low %v2353_v15, %v2361_v17  ;;  %v11355_v32 = vld [vmem:[#allocation11] sm:$0xff] }
 0x267   :  { %v10316_v38 = vcombine.high %v2241_v35, %v2249_v36 }
 0x269   :  { %8533 = vmatpush2.bf16.msra.mxu0 %v10905_v42  ;;  %8568 = vmatpush2.bf16.msra.mxu1 %v11209_v43  ;;  %v10315_v42 = vcombine.low %v2241_v35, %v2249_v36  ;;  %v10300_v43 = vcombine.high %v2225_v39, %v2233_v40  ;;  %v559_v35 = vrot.slane %v11355_v32, %v11733_v28  ;;  %v2321_v36 = vld [vmem:[#allocation12 + $0x408] sm:$0xff] }
 0x26a   :  { %8584 = vmatprep.subr.bf16.mxu0 %v10380_v46  ;;  %8569 = vmatprep.subr.bf16.mxu1 %v11194_v47  ;;  %v2209_v46 = vld [vmem:[#allocation12 + $0x88] sm:$0xff] }
 0x26b   :  { %v2217_v47 = vld [vmem:[#allocation12 + $0xc8] sm:$0xff] }
 0x26c   :  { %v2046_v53 = vpop.f32.mrf.mxu0  ;;  %v10284_v50 = vcombine.high %v2209_v46, %v2217_v47 }
 0x26d   :  { %v2047_v54 = vadd.f32 %v2046_v53, %v547_v56  ;;  %v2087_v1 = vpop.f32.mrf.mxu1  ;;  %8570 = vmatpush2.bf16.msra.mxu1 %v11193_v57  ;;  %v2193_v56 = vld [vmem:[#allocation12 + $0x8] sm:$0xff] }
 0x26e   :  { %v2048_v3 = vpop.f32.mrf.mxu0  ;;  %8571 = vmatprep.subr.bf16.mxu1 %v11178_v58  ;;  %v2201_v57 = vld [vmem:[#allocation12 + $0x48] sm:$0xff]  ;;  %v10283_v58 = vcombine.low %v2209_v46, %v2217_v47 }
 0x26f   :  { %v2088_v5 = vadd.f32 %v2087_v1, %v2047_v54  ;;  %v2049_v45 = vadd.f32 %v2048_v3, %v551_v61  ;;  %v2089_v6 = vpop.f32.mrf.mxu1  ;;  %v10268_v61 = vcombine.high %v2193_v56, %v2201_v57  ;;  %v10267_v53 = vcombine.low %v2193_v56, %v2201_v57  ;;  %v2417_v1 = vld [vmem:[#allocation12 + $0x708] sm:$0xff] }
 0x270   :  { %v2050_v7 = vpop.f32.mrf.mxu0  ;;  %v10508_v54 = vcombine.high %v2433_v62, %v2441_v63  ;;  %v10507_v3 = vcombine.low %v2433_v62, %v2441_v63  ;;  %v2825_v56 = vld [vmem:[#allocation12 + $0x13c8] sm:$0xff] }
 0x271   :  { %v2090_v55 = vadd.f32 %v2089_v6, %v2049_v45  ;;  %v2091_v8 = vpop.f32.mrf.mxu1  ;;  %8572 = vmatpush2.bf16.msra.mxu1 %v11177_v2  ;;  %v2180_v10 = vmax.f32 %v2088_v5, 0.0  ;;  %v2425_v2 = vld [vmem:[#allocation12 + $0x748] sm:$0xff] }
 0x272   :  { %v2051_v44 = vpop.f32.mrf.mxu0  ;;  %8573 = vmatprep.subr.bf16.mxu1 %v11162_v4  ;;  %v10492_v4 = vcombine.high %v2417_v1, %v2425_v2  ;;  %v2401_v5 = vld [vmem:[#allocation12 + $0x688] sm:$0xff]  ;;  %v10491_v6 = vcombine.low %v2417_v1, %v2425_v2 }
 0x273   :  { %v2181_v13 = vmax.f32 %v2090_v55, 0.0  ;;  %v2092_v14 = vpop.f32.mrf.mxu1  ;;  %v11724_v23 = vpack.c.bf16 %v2180_v10, %v2180_v10  ;;  %v2409_v45 = vld [vmem:[#allocation12 + $0x6c8] sm:$0xff] }
 0x274   :  { %v10476_v7 = vcombine.high %v2401_v5, %v2409_v45  ;;  %v2385_v55 = vld [vmem:[#allocation12 + $0x608] sm:$0xff] }
 0x275   :  { %v11722_v18 = vpack.c.bf16 %v2181_v13, %v2181_v13  ;;  %8574 = vmatpush2.bf16.msra.mxu1 %v11161_v9  ;;  %v2393_v8 = vld [vmem:[#allocation12 + $0x648] sm:$0xff]  ;;  %v10475_v9 = vcombine.low %v2401_v5, %v2409_v45 }
 0x276   :  { %8625 = vmatprep.subr.bf16.mxu1 %v10636_v11  ;;  %v10460_v10 = vcombine.high %v2385_v55, %v2393_v8  ;;  %v2369_v44 = vld [vmem:[#allocation12 + $0x588] sm:$0xff]  ;;  %v10459_v13 = vcombine.low %v2385_v55, %v2393_v8 }
 0x277   :  { %8534 = vmatprep.mubr.bf16.mxu0 %v11722_v18  ;;  %v2377_v11 = vld [vmem:[#allocation12 + $0x5c8] sm:$0xff] }
 0x278   :  { %8535 = vmatmul.mubr.bf16.vlgmr.msra.gmra.mxu0 %v11724_v23  ;;  %v10444_v14 = vcombine.high %v2369_v44, %v2377_v11  ;;  %v2801_v5 = vld [vmem:[#allocation12 + $0x1308] sm:$0xff] }
 0x279   :  { %8585 = vmatpush1.bf16.msra.mxu0 %v10379_v19  ;;  %8616 = vmatprep.mubr.bf16.mxu0 %v11676_v16  ;;  %v10443_v19 = vcombine.low %v2369_v44, %v2377_v11  ;;  %v2809_v45 = vld [vmem:[#allocation12 + $0x1348] sm:$0xff] }
 0x27a   :  { %8586 = vmatprep.subr.bf16.mxu0 %v10364_v26  ;;  %v11730_v26 = vsub.s32 6, %v11626_v20  ;;  %v2529_v8 = vld [vmem:[#allocation12 + $0xa88] sm:$0xff]  ;;  %v10875_v15 = vcombine.low %v2801_v5, %v2809_v45 }
 0x27b   :  { %v2537_v44 = vld [vmem:[#allocation12 + $0xac8] sm:$0xff] }
 0x27c   :  { %v2785_v11 = vld [vmem:[#allocation12 + $0x1288] sm:$0xff]  ;;  %v10604_v17 = vcombine.high %v2529_v8, %v2537_v44 }
 0x27d   :  { %8587 = vmatpush1.bf16.msra.mxu0 %v10363_v29  ;;  %v2337_v29 = vld [vmem:[#allocation12 + $0x488] sm:$0xff] }
 0x27e   :  { %8588 = vmatprep.subr.bf16.mxu0 %v10348_v30  ;;  %v2345_v30 = vld [vmem:[#allocation12 + $0x4c8] sm:$0xff] }
 0x281   :  { %8589 = vmatpush1.bf16.msra.mxu0 %v10347_v33  ;;  %v555_v33 = vrot.slane %v11355_v32, %v11730_v26  ;;  %v10603_v32 = vcombine.low %v2529_v8, %v2537_v44  ;;  %v2697_v44 = vld [vmem:[#allocation12 + $0xfc8] sm:$0xff] }
 0x282   :  { %8590 = vmatprep.subr.bf16.mxu0 %v10332_v34  ;;  %v10412_v34 = vcombine.high %v2337_v29, %v2345_v30 }
 0x285   :  { %8591 = vmatpush1.bf16.msra.mxu0 %v10331_v37  ;;  %v2329_v37 = vld [vmem:[#allocation12 + $0x448] sm:$0xff] }
 0x286   :  { %8592 = vmatprep.subr.bf16.mxu0 %v10316_v38  ;;  %v10395_v62 = vcombine.low %v2321_v36, %v2329_v37 }
 0x289   :  { %8593 = vmatpush1.bf16.msra.mxu0 %v10315_v42  ;;  %v10411_v42 = vcombine.low %v2337_v29, %v2345_v30  ;;  %v2521_v29 = vld [vmem:[#allocation12 + $0xa48] sm:$0xff] }
 0x28a   :  { %8594 = vmatprep.subr.bf16.mxu0 %v10300_v43  ;;  %v10396_v43 = vcombine.high %v2321_v36, %v2329_v37  ;;  %v2769_v30 = vld [vmem:[#allocation12 + $0x1208] sm:$0xff] }
 0x28b   :  { %v2761_v36 = vld [vmem:[#allocation12 + $0x11c8] sm:$0xff] }
 0x28d   :  { %8595 = vmatpush1.bf16.msra.mxu0 %v10299_v49 }
 0x28e   :  { %8596 = vmatprep.subr.bf16.mxu0 %v10284_v50  ;;  %v2817_v50 = vld [vmem:[#allocation12 + $0x1388] sm:$0xff] }
 0x291   :  { %8597 = vmatpush1.bf16.msra.mxu0 %v10283_v58 }
 0x292   :  { %8598 = vmatprep.subr.bf16.mxu0 %v10268_v61 }
 0x295   :  { %8599 = vmatpush1.bf16.msra.mxu0 %v10267_v53 }
 0x296   :  { %8600 = vmatprep.subr.bf16.mxu0 %v10508_v54  ;;  %v10892_v54 = vcombine.high %v2817_v50, %v2825_v56 }
 0x299   :  { %8601 = vmatpush2.bf16.msra.mxu0 %v10507_v3  ;;  %v2545_v3 = vld [vmem:[#allocation12 + $0xb08] sm:$0xff] }
 0x29a   :  { %8602 = vmatprep.subr.bf16.mxu0 %v10492_v4  ;;  %v2553_v4 = vld [vmem:[#allocation12 + $0xb48] sm:$0xff] }
 0x29d   :  { %8603 = vmatpush2.bf16.msra.mxu0 %v10491_v6 }
 0x29e   :  { %8604 = vmatprep.subr.bf16.mxu0 %v10476_v7  ;;  %v10891_v7 = vcombine.low %v2817_v50, %v2825_v56 }
 0x2a1   :  { %8605 = vmatpush2.bf16.msra.mxu0 %v10475_v9  ;;  %v10620_v9 = vcombine.high %v2545_v3, %v2553_v4 }
 0x2a2   :  { %8606 = vmatprep.subr.bf16.mxu0 %v10460_v10  ;;  %v10876_v10 = vcombine.high %v2801_v5, %v2809_v45  ;;  %v2713_v5 = vld [vmem:[#allocation12 + $0x1048] sm:$0xff] }
 0x2a5   :  { %8607 = vmatpush2.bf16.msra.mxu0 %v10459_v13  ;;  %v2793_v13 = vld [vmem:[#allocation12 + $0x12c8] sm:$0xff] }
 0x2a6   :  { %8608 = vmatprep.subr.bf16.mxu0 %v10444_v14  ;;  %v10619_v14 = vcombine.low %v2545_v3, %v2553_v4  ;;  %v10859_v59 = vcombine.low %v2785_v11, %v2793_v13  ;;  %v2457_v3 = vld [vmem:[#allocation12 + $0x848] sm:$0xff] }
 0x2a7   :  { %v2705_v4 = vld [vmem:[#allocation12 + $0x1008] sm:$0xff] }
 0x2a9   :  { %8609 = vmatpush2.bf16.msra.mxu0 %v10443_v19  ;;  %v10860_v19 = vcombine.high %v2785_v11, %v2793_v13  ;;  %v2945_v11 = vld [vmem:[#allocation12 + $0x1788] sm:$0xff] }
 0x2aa   :  { %8610 = vmatprep.subr.bf16.mxu0 %v10428_v27  ;;  %v2513_v27 = vld [vmem:[#allocation12 + $0xa08] sm:$0xff] }
 0x2ab   :  { %v10588_v60 = vcombine.high %v2513_v27, %v2521_v29  ;;  %v10587_v37 = vcombine.low %v2513_v27, %v2521_v29  ;;  %v2953_v13 = vld [vmem:[#allocation12 + $0x17c8] sm:$0xff] }
 0x2ac   :  { %v2128_v38 = vpop.f32.mrf.mxu0  ;;  %v2673_v27 = vld [vmem:[#allocation12 + $0xf08] sm:$0xff] }
 0x2ad   :  { %v2129_v39 = vadd.f32 %v2128_v38, %v555_v33  ;;  %v2169_v40 = vpop.f32.mrf.mxu1  ;;  %8611 = vmatpush2.bf16.msra.mxu0 %v10427_v31  ;;  %v2777_v31 = vld [vmem:[#allocation12 + $0x1248] sm:$0xff] }
 0x2ae   :  { %v2130_v20 = vpop.f32.mrf.mxu0  ;;  %8612 = vmatprep.subr.bf16.mxu0 %v10412_v34  ;;  %v2497_v33 = vld [vmem:[#allocation12 + $0x988] sm:$0xff]  ;;  %v10843_v38 = vcombine.low %v2769_v30, %v2777_v31 }
 0x2af   :  { %v2170_v46 = vadd.f32 %v2169_v40, %v2129_v39  ;;  %v2131_v47 = vadd.f32 %v2130_v20, %v559_v35  ;;  %v2171_v49 = vpop.f32.mrf.mxu1  ;;  %v2505_v34 = vld [vmem:[#allocation12 + $0x9c8] sm:$0xff] }
 0x2b0   :  { %v2132_v57 = vpop.f32.mrf.mxu0  ;;  %v2753_v35 = vld [vmem:[#allocation12 + $0x1188] sm:$0xff]  ;;  %v10572_v39 = vcombine.high %v2497_v33, %v2505_v34 }
 0x2b1   :  { %v2172_v58 = vadd.f32 %v2171_v49, %v2131_v47  ;;  %v2173_v61 = vpop.f32.mrf.mxu1  ;;  %8613 = vmatpush2.bf16.msra.mxu0 %v10411_v42  ;;  %v2182_v63 = vmax.f32 %v2170_v46, 0.0  ;;  %v10828_v40 = vcombine.high %v2753_v35, %v2761_v36  ;;  %v2481_v42 = vld [vmem:[#allocation12 + $0x908] sm:$0xff]  ;;  %v10571_v47 = vcombine.low %v2497_v33, %v2505_v34 }
 0x2b2   :  { %v2133_v53 = vpop.f32.mrf.mxu0  ;;  %8614 = vmatprep.subr.bf16.mxu0 %v10396_v43  ;;  %v2489_v20 = vld [vmem:[#allocation12 + $0x948] sm:$0xff]  ;;  %v10827_v49 = vcombine.low %v2753_v35, %v2761_v36 }
 0x2b3   :  { %v2183_v1 = vmax.f32 %v2172_v58, 0.0  ;;  %v2174_v2 = vpop.f32.mrf.mxu1  ;;  %v11739_v55 = vpack.c.bf16 %v2182_v63, %v2182_v63  ;;  %v2737_v43 = vld [vmem:[#allocation12 + $0x1108] sm:$0xff]  ;;  %v10556_v50 = vcombine.high %v2481_v42, %v2489_v20  ;;  %v10555_v63 = vcombine.low %v2481_v42, %v2489_v20 }
 0x2b4   :  { %v2745_v46 = vld [vmem:[#allocation12 + $0x1148] sm:$0xff] }
 0x2b5   :  { %v11737_v6 = vpack.c.bf16 %v2183_v1, %v2183_v1  ;;  %8615 = vmatpush2.bf16.msra.mxu0 %v10395_v62  ;;  %v10812_v56 = vcombine.high %v2737_v43, %v2745_v46  ;;  %v2465_v57 = vld [vmem:[#allocation12 + $0x888] sm:$0xff]  ;;  %v10811_v53 = vcombine.low %v2737_v43, %v2745_v46 }
 0x2b6   :  { %8666 = vmatprep.subr.bf16.mxu0 %v10892_v54  ;;  %v2473_v58 = vld [vmem:[#allocation12 + $0x8c8] sm:$0xff] }
 0x2b7   :  { %8575 = vmatprep.mubr.bf16.mxu1 %v11737_v6  ;;  %v2721_v61 = vld [vmem:[#allocation12 + $0x1088] sm:$0xff]  ;;  %v10540_v54 = vcombine.high %v2465_v57, %v2473_v58  ;;  %v10539_v45 = vcombine.low %v2465_v57, %v2473_v58 }
 0x2b8   :  { %8617 = vmatmul.mubr.bf16.vlgmr.msra.gmra.mxu0 %v11691_v12  ;;  %8576 = vmatmul.mubr.bf16.vlgmr.msra.gmra.mxu1 %v11739_v55  ;;  %v2729_v62 = vld [vmem:[#allocation12 + $0x10c8] sm:$0xff] }
 0x2b9   :  { %8626 = vmatpush1.bf16.msra.mxu1 %v10635_v0  ;;  %8667 = vmatpush1.bf16.msra.mxu0 %v10891_v7  ;;  %v10844_v0 = vcombine.high %v2769_v30, %v2777_v31  ;;  %v10796_v1 = vcombine.high %v2721_v61, %v2729_v62  ;;  %v2449_v2 = vld [vmem:[#allocation12 + $0x808] sm:$0xff]  ;;  %v10795_v7 = vcombine.low %v2721_v61, %v2729_v62 }
 0x2ba   :  { %8698 = vmatprep.mubr.bf16.mxu0 %v11722_v18  ;;  %8657 = vmatprep.mubr.bf16.mxu1 %v11696_v51  ;;  %v10524_v8 = vcombine.high %v2449_v2, %v2457_v3  ;;  %v2681_v29 = vld [vmem:[#allocation12 + $0xf48] sm:$0xff] }
 0x2bb   :  { %8627 = vmatprep.subr.bf16.mxu1 %v10620_v9  ;;  %8668 = vmatprep.subr.bf16.mxu0 %v10876_v10  ;;  %v10780_v9 = vcombine.high %v2705_v4, %v2713_v5  ;;  %v2689_v10 = vld [vmem:[#allocation12 + $0xf88] sm:$0xff] }
 0x2bc   :  { %v2929_v30 = vld [vmem:[#allocation12 + $0x1708] sm:$0xff] }
 0x2bd   :  { %8628 = vmatpush1.bf16.msra.mxu1 %v10619_v14  ;;  %8669 = vmatpush1.bf16.msra.mxu0 %v10875_v15  ;;  %v10523_v14 = vcombine.low %v2449_v2, %v2457_v3  ;;  %v10779_v15 = vcombine.low %v2705_v4, %v2713_v5  ;;  %v2937_v31 = vld [vmem:[#allocation12 + $0x1748] sm:$0xff] }
 0x2be   :  { %8629 = vmatprep.subr.bf16.mxu1 %v10604_v17  ;;  %8670 = vmatprep.subr.bf16.mxu0 %v10860_v19  ;;  %v10764_v17 = vcombine.high %v2689_v10, %v2697_v44  ;;  %v11020_v19 = vcombine.high %v2945_v11, %v2953_v13  ;;  %v2657_v33 = vld [vmem:[#allocation12 + $0xe88] sm:$0xff] }
 0x2bf   :  { %v2665_v34 = vld [vmem:[#allocation12 + $0xec8] sm:$0xff] }
 0x2c0   :  { %v2913_v35 = vld [vmem:[#allocation12 + $0x1688] sm:$0xff] }
 0x2c1   :  { %8630 = vmatpush1.bf16.msra.mxu1 %v10603_v32  ;;  %8671 = vmatpush1.bf16.msra.mxu0 %v10859_v59  ;;  %v10763_v32 = vcombine.low %v2689_v10, %v2697_v44  ;;  %v11019_v59 = vcombine.low %v2945_v11, %v2953_v13  ;;  %v2921_v36 = vld [vmem:[#allocation12 + $0x16c8] sm:$0xff] }
 0x2c2   :  { %8631 = vmatprep.subr.bf16.mxu1 %v10588_v60  ;;  %8672 = vmatprep.subr.bf16.mxu0 %v10844_v0  ;;  %v10748_v60 = vcombine.high %v2673_v27, %v2681_v29  ;;  %v11004_v0 = vcombine.high %v2929_v30, %v2937_v31  ;;  %v2641_v42 = vld [vmem:[#allocation12 + $0xe08] sm:$0xff] }
 0x2c3   :  { %v2649_v20 = vld [vmem:[#allocation12 + $0xe48] sm:$0xff] }
 0x2c4   :  { %v2897_v43 = vld [vmem:[#allocation12 + $0x1608] sm:$0xff] }
 0x2c5   :  { %8632 = vmatpush1.bf16.msra.mxu1 %v10587_v37  ;;  %8673 = vmatpush1.bf16.msra.mxu0 %v10843_v38  ;;  %v10747_v37 = vcombine.low %v2673_v27, %v2681_v29  ;;  %v11003_v38 = vcombine.low %v2929_v30, %v2937_v31  ;;  %v2905_v46 = vld [vmem:[#allocation12 + $0x1648] sm:$0xff] }
 0x2c6   :  { %8633 = vmatprep.subr.bf16.mxu1 %v10572_v39  ;;  %8674 = vmatprep.subr.bf16.mxu0 %v10828_v40  ;;  %v10732_v39 = vcombine.high %v2657_v33, %v2665_v34  ;;  %v10988_v40 = vcombine.high %v2913_v35, %v2921_v36  ;;  %v2625_v57 = vld [vmem:[#allocation12 + $0xd88] sm:$0xff] }
 0x2c7   :  { %v2633_v58 = vld [vmem:[#allocation12 + $0xdc8] sm:$0xff] }
 0x2c8   :  { %v2881_v61 = vld [vmem:[#allocation12 + $0x1588] sm:$0xff] }
 0x2c9   :  { %8634 = vmatpush1.bf16.msra.mxu1 %v10571_v47  ;;  %8675 = vmatpush1.bf16.msra.mxu0 %v10827_v49  ;;  %v10731_v47 = vcombine.low %v2657_v33, %v2665_v34  ;;  %v10987_v49 = vcombine.low %v2913_v35, %v2921_v36  ;;  %v2889_v62 = vld [vmem:[#allocation12 + $0x15c8] sm:$0xff] }
 0x2ca   :  { %8635 = vmatprep.subr.bf16.mxu1 %v10556_v50  ;;  %8676 = vmatprep.subr.bf16.mxu0 %v10812_v56  ;;  %v10716_v50 = vcombine.high %v2641_v42, %v2649_v20  ;;  %v10972_v56 = vcombine.high %v2897_v43, %v2905_v46  ;;  %v2609_v2 = vld [vmem:[#allocation12 + $0xd08] sm:$0xff] }
 0x2cb   :  { %v2617_v3 = vld [vmem:[#allocation12 + $0xd48] sm:$0xff] }
 0x2cc   :  { %v2865_v4 = vld [vmem:[#allocation12 + $0x1508] sm:$0xff] }
 0x2cd   :  { %8636 = vmatpush1.bf16.msra.mxu1 %v10555_v63  ;;  %8677 = vmatpush1.bf16.msra.mxu0 %v10811_v53  ;;  %v10715_v63 = vcombine.low %v2641_v42, %v2649_v20  ;;  %v10971_v53 = vcombine.low %v2897_v43, %v2905_v46  ;;  %v2873_v5 = vld [vmem:[#allocation12 + $0x1548] sm:$0xff] }
 0x2ce   :  { %8637 = vmatprep.subr.bf16.mxu1 %v10540_v54  ;;  %8678 = vmatprep.subr.bf16.mxu0 %v10796_v1  ;;  %v10700_v54 = vcombine.high %v2625_v57, %v2633_v58  ;;  %v10956_v1 = vcombine.high %v2881_v61, %v2889_v62  ;;  %v2593_v10 = vld [vmem:[#allocation12 + $0xc88] sm:$0xff] }
 0x2cf   :  { %v2601_v44 = vld [vmem:[#allocation12 + $0xcc8] sm:$0xff] }
 0x2d0   :  { %v2849_v11 = vld [vmem:[#allocation12 + $0x1488] sm:$0xff] }
 0x2d1   :  { %8638 = vmatpush1.bf16.msra.mxu1 %v10539_v45  ;;  %8679 = vmatpush1.bf16.msra.mxu0 %v10795_v7  ;;  %v10699_v45 = vcombine.low %v2625_v57, %v2633_v58  ;;  %v10955_v7 = vcombine.low %v2881_v61, %v2889_v62  ;;  %v2857_v13 = vld [vmem:[#allocation12 + $0x14c8] sm:$0xff]  ;;  %v2290_v57 = vld [vmem:[#allocation12 + $0x310] sm:$0xff] }
 0x2d2   :  { %8639 = vmatprep.subr.bf16.mxu1 %v10524_v8  ;;  %8680 = vmatprep.subr.bf16.mxu0 %v10780_v9  ;;  %v10684_v8 = vcombine.high %v2609_v2, %v2617_v3  ;;  %v10940_v9 = vcombine.high %v2865_v4, %v2873_v5  ;;  %v2577_v27 = vld [vmem:[#allocation12 + $0xc08] sm:$0xff]  ;;  %v2298_v58 = vld [vmem:[#allocation12 + $0x350] sm:$0xff] }
 0x2d3   :  { %v2585_v29 = vld [vmem:[#allocation12 + $0xc48] sm:$0xff] }
 0x2d4   :  { %v2833_v30 = vld [vmem:[#allocation12 + $0x1408] sm:$0xff]  ;;  %v10652_v33 = vcombine.high %v2577_v27, %v2585_v29  ;;  %v10651_v42 = vcombine.low %v2577_v27, %v2585_v29  ;;  %v2258_v27 = vld [vmem:[#allocation12 + $0x210] sm:$0xff] }
 0x2d5   :  { %8640 = vmatpush1.bf16.msra.mxu1 %v10523_v14  ;;  %8681 = vmatpush1.bf16.msra.mxu0 %v10779_v15  ;;  %v10683_v14 = vcombine.low %v2609_v2, %v2617_v3  ;;  %v10939_v15 = vcombine.low %v2865_v4, %v2873_v5  ;;  %v2841_v31 = vld [vmem:[#allocation12 + $0x1448] sm:$0xff]  ;;  %v2274_v5 = vld [vmem:[#allocation12 + $0x290] sm:$0xff] }
 0x2d6   :  { %8641 = vmatprep.subr.bf16.mxu1 %v10764_v17  ;;  %8682 = vmatprep.subr.bf16.mxu0 %v11020_v19  ;;  %v10668_v17 = vcombine.high %v2593_v10, %v2601_v44  ;;  %v10924_v19 = vcombine.high %v2849_v11, %v2857_v13  ;;  %v10908_v34 = vcombine.high %v2833_v30, %v2841_v31  ;;  %v3073_v35 = vld [vmem:[#allocation12 + $0x1b88] sm:$0xff]  ;;  %v2266_v29 = vld [vmem:[#allocation12 + $0x250] sm:$0xff] }
 0x2d7   :  { %v3081_v36 = vld [vmem:[#allocation12 + $0x1bc8] sm:$0xff]  ;;  %v10907_v20 = vcombine.low %v2833_v30, %v2841_v31 }
 0x2d8   :  { %v11148_v46 = vcombine.high %v3073_v35, %v3081_v36  ;;  %v11147_v62 = vcombine.low %v3073_v35, %v3081_v36  ;;  %v3041_v2 = vld [vmem:[#allocation12 + $0x1a88] sm:$0xff]  ;;  %v2250_v35 = vld [vmem:[#allocation12 + $0x1d0] sm:$0xff] }
 0x2d9   :  { %8642 = vmatpush2.bf16.msra.mxu1 %v10763_v32  ;;  %8683 = vmatpush2.bf16.msra.mxu0 %v11019_v59  ;;  %v10667_v59 = vcombine.low %v2593_v10, %v2601_v44  ;;  %v3049_v3 = vld [vmem:[#allocation12 + $0x1ac8] sm:$0xff]  ;;  %v10365_v44 = vcombine.low %v2290_v57, %v2298_v58 }
 0x2da   :  { %8643 = vmatprep.subr.bf16.mxu1 %v10748_v60  ;;  %8684 = vmatprep.subr.bf16.mxu0 %v11004_v0  ;;  %v10923_v60 = vcombine.low %v2849_v11, %v2857_v13  ;;  %v11116_v11 = vcombine.high %v3041_v2, %v3049_v3  ;;  %v11115_v30 = vcombine.low %v3041_v2, %v3049_v3  ;;  %v2969_v2 = vld [vmem:[#allocation12 + $0x1848] sm:$0xff]  ;;  %v2194_v3 = vld [vmem:[#allocation12 + $0x10] sm:$0xff] }
 0x2dd   :  { %8644 = vmatpush2.bf16.msra.mxu1 %v10747_v37  ;;  %8685 = vmatpush2.bf16.msra.mxu0 %v11003_v38  ;;  %v2306_v37 = vld [vmem:[#allocation12 + $0x390] sm:$0xff] }
 0x2de   :  { %8645 = vmatprep.subr.bf16.mxu1 %v10732_v39  ;;  %8686 = vmatprep.subr.bf16.mxu0 %v10988_v40  ;;  %v2314_v38 = vld [vmem:[#allocation12 + $0x3d0] sm:$0xff]  ;;  %v3216_v39 = vld [vmem:[#allocation14] sm:$0xff] }
 0x2df   :  { %v3227_v61 = vrot.slane %v3216_v39, %v11635_v24 }
 0x2e1   :  { %8646 = vmatpush2.bf16.msra.mxu1 %v10731_v47  ;;  %8687 = vmatpush2.bf16.msra.mxu0 %v10987_v49  ;;  %v10382_v47 = vcombine.high %v2306_v37, %v2314_v38  ;;  %v3223_v49 = vrot.slane %v3216_v39, %v11629_v21 }
 0x2e2   :  { %8647 = vmatprep.subr.bf16.mxu1 %v10716_v50  ;;  %8688 = vmatprep.subr.bf16.mxu0 %v10972_v56  ;;  %v3057_v50 = vld [vmem:[#allocation12 + $0x1b08] sm:$0xff] }
 0x2e3   :  { %v3065_v56 = vld [vmem:[#allocation12 + $0x1b48] sm:$0xff] }
 0x2e5   :  { %8648 = vmatpush2.bf16.msra.mxu1 %v10715_v63  ;;  %8689 = vmatpush2.bf16.msra.mxu0 %v10971_v53  ;;  %v10381_v63 = vcombine.low %v2306_v37, %v2314_v38  ;;  %v10333_v37 = vcombine.low %v2258_v27, %v2266_v29 }
 0x2e6   :  { %8649 = vmatprep.subr.bf16.mxu1 %v10700_v54  ;;  %8690 = vmatprep.subr.bf16.mxu0 %v10956_v1  ;;  %v11132_v54 = vcombine.high %v3057_v50, %v3065_v56  ;;  %v10366_v1 = vcombine.high %v2290_v57, %v2298_v58  ;;  %v2985_v57 = vld [vmem:[#allocation12 + $0x18c8] sm:$0xff]  ;;  %v2210_v58 = vld [vmem:[#allocation12 + $0x90] sm:$0xff] }
 0x2e9   :  { %8650 = vmatpush2.bf16.msra.mxu1 %v10699_v45  ;;  %8691 = vmatpush2.bf16.msra.mxu0 %v10955_v7  ;;  %v2282_v45 = vld [vmem:[#allocation12 + $0x2d0] sm:$0xff] }
 0x2ea   :  { %8651 = vmatprep.subr.bf16.mxu1 %v10684_v8  ;;  %8692 = vmatprep.subr.bf16.mxu0 %v10940_v9  ;;  %v11131_v9 = vcombine.low %v3057_v50, %v3065_v56  ;;  %v2977_v56 = vld [vmem:[#allocation12 + $0x1888] sm:$0xff] }
 0x2ec   :  { %v8454_v32 = vpop.f32.mrf.mxu0 }
 0x2ed   :  { %8652 = vmatpush2.bf16.msra.mxu1 %v10683_v14  ;;  %8693 = vmatpush2.bf16.msra.mxu0 %v10939_v15  ;;  %v8455_v53 = vadd.f32 %v8454_v32, %v3223_v49  ;;  %v10350_v14 = vcombine.high %v2274_v5, %v2282_v45  ;;  %v3025_v15 = vld [vmem:[#allocation12 + $0x1a08] sm:$0xff]  ;;  %v10349_v32 = vcombine.low %v2274_v5, %v2282_v45 }
 0x2ee   :  { %v8456_v0 = vpop.f32.mrf.mxu0  ;;  %8653 = vmatprep.subr.bf16.mxu1 %v10668_v17  ;;  %8694 = vmatprep.subr.bf16.mxu0 %v10924_v19  ;;  %v3033_v17 = vld [vmem:[#allocation12 + $0x1a48] sm:$0xff]  ;;  %v11051_v5 = vcombine.low %v2977_v56, %v2985_v57 }
 0x2ef   :  { %v8457_v7 = vadd.f32 %v8456_v0, %v3227_v61  ;;  %v3009_v0 = vld [vmem:[#allocation12 + $0x1988] sm:$0xff]  ;;  %v11099_v36 = vcombine.low %v3025_v15, %v3033_v17  ;;  %v2218_v61 = vld [vmem:[#allocation12 + $0xd0] sm:$0xff] }
 0x2f0   :  { %v8458_v40 = vpop.f32.mrf.mxu0  ;;  %v10285_v45 = vcombine.low %v2210_v58, %v2218_v61 }
 0x2f1   :  { %8654 = vmatpush2.bf16.msra.mxu1 %v10667_v59  ;;  %8695 = vmatpush2.bf16.msra.mxu0 %v10923_v60  ;;  %v11100_v59 = vcombine.high %v3025_v15, %v3033_v17  ;;  %v10334_v60 = vcombine.high %v2258_v27, %v2266_v29  ;;  %v2993_v40 = vld [vmem:[#allocation12 + $0x1908] sm:$0xff] }
 0x2f2   :  { %v8459_v43 = vpop.f32.mrf.mxu0  ;;  %8655 = vmatprep.subr.bf16.mxu1 %v10652_v33  ;;  %8696 = vmatprep.subr.bf16.mxu0 %v10908_v34  ;;  %v3017_v33 = vld [vmem:[#allocation12 + $0x19c8] sm:$0xff]  ;;  %v2242_v34 = vld [vmem:[#allocation12 + $0x190] sm:$0xff] }
 0x2f3   :  { %v11084_v38 = vcombine.high %v3009_v0, %v3017_v33  ;;  %v10318_v39 = vcombine.high %v2242_v34, %v2250_v35  ;;  %v2234_v43 = vld [vmem:[#allocation12 + $0x150] sm:$0xff]  ;;  %v3185_v29 = vld [vmem:[#allocation12 + $0x1f08] sm:$0xff] }
 0x2f5   :  { %8656 = vmatpush2.bf16.msra.mxu1 %v10651_v42  ;;  %8697 = vmatpush2.bf16.msra.mxu0 %v10907_v20  ;;  %v3001_v42 = vld [vmem:[#allocation12 + $0x1948] sm:$0xff]  ;;  %v2226_v20 = vld [vmem:[#allocation12 + $0x110] sm:$0xff] }
 0x2f6   :  { %8707 = vmatprep.subr.bf16.mxu1 %v11148_v46  ;;  %8748 = vmatprep.subr.bf16.mxu0 %v10382_v47  ;;  %v11083_v46 = vcombine.low %v3009_v0, %v3017_v33  ;;  %v10317_v47 = vcombine.low %v2242_v34, %v2250_v35  ;;  %v11068_v49 = vcombine.high %v2993_v40, %v3001_v42  ;;  %v3169_v34 = vld [vmem:[#allocation12 + $0x1e88] sm:$0xff] }
 0x2f7   :  { %v10302_v50 = vcombine.high %v2226_v20, %v2234_v43  ;;  %v3177_v35 = vld [vmem:[#allocation12 + $0x1ec8] sm:$0xff] }
 0x2f8   :  { %8658 = vmatmul.mubr.bf16.vlgmr.msra.gmra.mxu1 %v11700_v52  ;;  %8699 = vmatmul.mubr.bf16.vlgmr.msra.gmra.mxu0 %v11724_v23  ;;  %v8495_v4 = vpop.f32.mrf.mxu1 }
 0x2f9   :  { %v11753_v8 = vadd.f32 %v8495_v4, %v8455_v53  ;;  %8708 = vmatpush1.bf16.msra.mxu1 %v11147_v62  ;;  %8739 = vmatprep.mubr.bf16.mxu1 %v11737_v6  ;;  %v11067_v62 = vcombine.low %v2993_v40, %v3001_v42  ;;  %v11052_v53 = vcombine.high %v2977_v56, %v2985_v57  ;;  %v2202_v4 = vld [vmem:[#allocation12 + $0x50] sm:$0xff] }
 0x2fa   :  { %8749 = vmatpush1.bf16.msra.mxu0 %v10381_v63  ;;  %8780 = vmatprep.mubr.bf16.mxu0 %v11676_v16  ;;  %v8497_v10 = vpop.f32.mrf.mxu1  ;;  %v10301_v63 = vcombine.low %v2226_v20, %v2234_v43  ;;  %v10269_v17 = vcombine.low %v2194_v3, %v2202_v4  ;;  %v11244_v40 = vcombine.high %v3169_v34, %v3177_v35  ;;  %v3153_v20 = vld [vmem:[#allocation12 + $0x1e08] sm:$0xff] }
 0x2fb   :  { %v11757_v13 = vadd.f32 %v8497_v10, %v8457_v7  ;;  %8709 = vmatprep.subr.bf16.mxu1 %v11132_v54  ;;  %8750 = vmatprep.subr.bf16.mxu0 %v10366_v1  ;;  %v10286_v54 = vcombine.high %v2210_v58, %v2218_v61  ;;  %v2961_v1 = vld [vmem:[#allocation12 + $0x1808] sm:$0xff] }
 0x2fc   :  { %v8499_v19 = vpop.f32.mrf.mxu1  ;;  %v11036_v7 = vcombine.high %v2961_v1, %v2969_v2  ;;  %v3201_v10 = vld [vmem:[#allocation12 + $0x1f88] sm:$0xff]  ;;  %v11035_v15 = vcombine.low %v2961_v1, %v2969_v2 }
 0x2fd   :  { %8710 = vmatpush1.bf16.msra.mxu1 %v11131_v9  ;;  %v10270_v9 = vcombine.high %v2194_v3, %v2202_v4  ;;  %v3161_v43 = vld [vmem:[#allocation12 + $0x1e48] sm:$0xff] }
 0x2fe   :  { %8751 = vmatpush1.bf16.msra.mxu0 %v10365_v44  ;;  %v8500_v31 = vpop.f32.mrf.mxu1  ;;  %8711 = vmatprep.subr.bf16.mxu1 %v11116_v11  ;;  %v3209_v44 = vld [vmem:[#allocation12 + $0x1fc8] sm:$0xff]  ;;  %v2434_v11 = vld [vmem:[#allocation12 + $0x790] sm:$0xff]  ;;  %v11228_v56 = vcombine.high %v3153_v20, %v3161_v43 }
 0x2ff   :  { %8752 = vmatprep.subr.bf16.mxu0 %v10350_v14  ;;  %v2442_v14 = vld [vmem:[#allocation12 + $0x7d0] sm:$0xff]  ;;  %v11276_v19 = vcombine.high %v3201_v10, %v3209_v44  ;;  %v3137_v58 = vld [vmem:[#allocation12 + $0x1d88] sm:$0xff] }
 0x300   :  { %v10510_v27 = vcombine.high %v2434_v11, %v2442_v14  ;;  %v2418_v31 = vld [vmem:[#allocation12 + $0x710] sm:$0xff]  ;;  %v3145_v61 = vld [vmem:[#allocation12 + $0x1dc8] sm:$0xff] }
 0x301   :  { %8712 = vmatpush1.bf16.msra.mxu1 %v11115_v30  ;;  %v3193_v30 = vld [vmem:[#allocation12 + $0x1f48] sm:$0xff]  ;;  %v11212_v1 = vcombine.high %v3137_v58, %v3145_v61 }
 0x302   :  { %8753 = vmatpush1.bf16.msra.mxu0 %v10349_v32  ;;  %8713 = vmatprep.subr.bf16.mxu1 %v11100_v59  ;;  %v2426_v32 = vld [vmem:[#allocation12 + $0x750] sm:$0xff]  ;;  %v11275_v59 = vcombine.low %v3201_v10, %v3209_v44  ;;  %v11260_v0 = vcombine.high %v3185_v29, %v3193_v30  ;;  %v3121_v3 = vld [vmem:[#allocation12 + $0x1d08] sm:$0xff] }
 0x303   :  { %8754 = vmatprep.subr.bf16.mxu0 %v10334_v60  ;;  %v10509_v60 = vcombine.low %v2434_v11, %v2442_v14  ;;  %v10494_v33 = vcombine.high %v2418_v31, %v2426_v32  ;;  %v3129_v4 = vld [vmem:[#allocation12 + $0x1d48] sm:$0xff] }
 0x304   :  { %v11196_v10 = vcombine.high %v3121_v3, %v3129_v4  ;;  %v3105_v11 = vld [vmem:[#allocation12 + $0x1c88] sm:$0xff] }
 0x305   :  { %8714 = vmatpush1.bf16.msra.mxu1 %v11099_v36  ;;  %v2402_v36 = vld [vmem:[#allocation12 + $0x690] sm:$0xff]  ;;  %v3113_v14 = vld [vmem:[#allocation12 + $0x1cc8] sm:$0xff] }
 0x306   :  { %8755 = vmatpush1.bf16.msra.mxu0 %v10333_v37  ;;  %8715 = vmatprep.subr.bf16.mxu1 %v11084_v38  ;;  %v2410_v37 = vld [vmem:[#allocation12 + $0x6d0] sm:$0xff]  ;;  %v11259_v38 = vcombine.low %v3185_v29, %v3193_v30  ;;  %v11180_v29 = vcombine.high %v3105_v11, %v3113_v14 }
 0x307   :  { %8756 = vmatprep.subr.bf16.mxu0 %v10318_v39  ;;  %v10493_v39 = vcombine.low %v2418_v31, %v2426_v32  ;;  %v10478_v42 = vcombine.high %v2402_v36, %v2410_v37  ;;  %v3089_v31 = vld [vmem:[#allocation12 + $0x1c08] sm:$0xff] }
 0x308   :  { %v3097_v32 = vld [vmem:[#allocation12 + $0x1c48] sm:$0xff] }
 0x309   :  { %8716 = vmatpush1.bf16.msra.mxu1 %v11083_v46  ;;  %v2386_v46 = vld [vmem:[#allocation12 + $0x610] sm:$0xff] }
 0x30a   :  { %8757 = vmatpush1.bf16.msra.mxu0 %v10317_v47  ;;  %8717 = vmatprep.subr.bf16.mxu1 %v11068_v49  ;;  %v2394_v47 = vld [vmem:[#allocation12 + $0x650] sm:$0xff]  ;;  %v11243_v49 = vcombine.low %v3169_v34, %v3177_v35  ;;  %v11164_v34 = vcombine.high %v3089_v31, %v3097_v32 }
 0x30b   :  { %8758 = vmatprep.subr.bf16.mxu0 %v10302_v50  ;;  %v10477_v50 = vcombine.low %v2402_v36, %v2410_v37  ;;  %v10462_v57 = vcombine.high %v2386_v46, %v2394_v47  ;;  %v2562_v36 = vld [vmem:[#allocation12 + $0xb90] sm:$0xff] }
 0x30c   :  { %v2570_v37 = vld [vmem:[#allocation12 + $0xbd0] sm:$0xff] }
 0x30d   :  { %8718 = vmatpush1.bf16.msra.mxu1 %v11067_v62  ;;  %v2370_v62 = vld [vmem:[#allocation12 + $0x590] sm:$0xff] }
 0x30e   :  { %8759 = vmatpush1.bf16.msra.mxu0 %v10301_v63  ;;  %8719 = vmatprep.subr.bf16.mxu1 %v11052_v53  ;;  %v2378_v63 = vld [vmem:[#allocation12 + $0x5d0] sm:$0xff]  ;;  %v11227_v53 = vcombine.low %v3153_v20, %v3161_v43  ;;  %v10638_v20 = vcombine.high %v2562_v36, %v2570_v37 }
 0x30f   :  { %8760 = vmatprep.subr.bf16.mxu0 %v10286_v54  ;;  %v10461_v54 = vcombine.low %v2386_v46, %v2394_v47  ;;  %v10446_v2 = vcombine.high %v2370_v62, %v2378_v63  ;;  %v2546_v46 = vld [vmem:[#allocation12 + $0xb10] sm:$0xff] }
 0x310   :  { %v2554_v47 = vld [vmem:[#allocation12 + $0xb50] sm:$0xff] }
 0x311   :  { %8720 = vmatpush1.bf16.msra.mxu1 %v11051_v5  ;;  %v2354_v5 = vld [vmem:[#allocation12 + $0x510] sm:$0xff] }
 0x312   :  { %8761 = vmatpush1.bf16.msra.mxu0 %v10285_v45  ;;  %8721 = vmatprep.subr.bf16.mxu1 %v11036_v7  ;;  %v2362_v45 = vld [vmem:[#allocation12 + $0x550] sm:$0xff]  ;;  %v11211_v7 = vcombine.low %v3137_v58, %v3145_v61  ;;  %v10622_v58 = vcombine.high %v2546_v46, %v2554_v47 }
 0x313   :  { %8762 = vmatprep.subr.bf16.mxu0 %v10270_v9  ;;  %v10445_v9 = vcombine.low %v2370_v62, %v2378_v63  ;;  %v10430_v44 = vcombine.high %v2354_v5, %v2362_v45  ;;  %v2530_v61 = vld [vmem:[#allocation12 + $0xa90] sm:$0xff] }
 0x314   :  { %v2538_v62 = vld [vmem:[#allocation12 + $0xad0] sm:$0xff] }
 0x315   :  { %8722 = vmatpush1.bf16.msra.mxu1 %v11035_v15  ;;  %v2338_v15 = vld [vmem:[#allocation12 + $0x490] sm:$0xff] }
 0x316   :  { %8763 = vmatpush1.bf16.msra.mxu0 %v10269_v17  ;;  %8723 = vmatprep.subr.bf16.mxu1 %v11276_v19  ;;  %v2346_v17 = vld [vmem:[#allocation12 + $0x4d0] sm:$0xff]  ;;  %v11195_v19 = vcombine.low %v3121_v3, %v3129_v4  ;;  %v10621_v3 = vcombine.low %v2546_v46, %v2554_v47 }
 0x317   :  { %8764 = vmatprep.subr.bf16.mxu0 %v10510_v27  ;;  %v10429_v27 = vcombine.low %v2354_v5, %v2362_v45  ;;  %v10414_v30 = vcombine.high %v2338_v15, %v2346_v17  ;;  %v10606_v45 = vcombine.high %v2530_v61, %v2538_v62  ;;  %v2722_v46 = vld [vmem:[#allocation12 + $0x1090] sm:$0xff] }
 0x318   :  { %v2730_v47 = vld [vmem:[#allocation12 + $0x10d0] sm:$0xff] }
 0x319   :  { %8724 = vmatpush2.bf16.msra.mxu1 %v11275_v59  ;;  %v2322_v59 = vld [vmem:[#allocation12 + $0x410] sm:$0xff] }
 0x31a   :  { %8765 = vmatpush2.bf16.msra.mxu0 %v10509_v60  ;;  %8725 = vmatprep.subr.bf16.mxu1 %v11260_v0  ;;  %v2330_v60 = vld [vmem:[#allocation12 + $0x450] sm:$0xff]  ;;  %v11179_v0 = vcombine.low %v3105_v11, %v3113_v14 }
 0x31b   :  { %8766 = vmatprep.subr.bf16.mxu0 %v10494_v33  ;;  %v10413_v33 = vcombine.low %v2338_v15, %v2346_v17  ;;  %v10398_v35 = vcombine.high %v2322_v59, %v2330_v60  ;;  %v2770_v11 = vld [vmem:[#allocation12 + $0x1210] sm:$0xff]  ;;  %v10605_v15 = vcombine.low %v2530_v61, %v2538_v62 }
 0x31c   :  { %v2778_v14 = vld [vmem:[#allocation12 + $0x1250] sm:$0xff] }
 0x31d   :  { %8726 = vmatpush2.bf16.msra.mxu1 %v11259_v38  ;;  %v2818_v38 = vld [vmem:[#allocation12 + $0x1390] sm:$0xff] }
 0x31e   :  { %8767 = vmatpush2.bf16.msra.mxu0 %v10493_v39  ;;  %8727 = vmatprep.subr.bf16.mxu1 %v11244_v40  ;;  %v2826_v39 = vld [vmem:[#allocation12 + $0x13d0] sm:$0xff]  ;;  %v11163_v40 = vcombine.low %v3089_v31, %v3097_v32 }
 0x31f   :  { %8768 = vmatprep.subr.bf16.mxu0 %v10478_v42  ;;  %v10397_v42 = vcombine.low %v2322_v59, %v2330_v60  ;;  %v10894_v43 = vcombine.high %v2818_v38, %v2826_v39  ;;  %v2754_v31 = vld [vmem:[#allocation12 + $0x1190] sm:$0xff]  ;;  %v10845_v60 = vcombine.low %v2770_v11, %v2778_v14 }
 0x320   :  { %v2762_v32 = vld [vmem:[#allocation12 + $0x11d0] sm:$0xff] }
 0x321   :  { %8728 = vmatpush2.bf16.msra.mxu1 %v11243_v49  ;;  %v10637_v49 = vcombine.low %v2562_v36, %v2570_v37  ;;  %v2738_v36 = vld [vmem:[#allocation12 + $0x1110] sm:$0xff] }
 0x322   :  { %8769 = vmatpush2.bf16.msra.mxu0 %v10477_v50  ;;  %8729 = vmatprep.subr.bf16.mxu1 %v11228_v56  ;;  %v2802_v50 = vld [vmem:[#allocation12 + $0x1310] sm:$0xff] }
 0x323   :  { %8770 = vmatprep.subr.bf16.mxu0 %v10462_v57  ;;  %v2810_v56 = vld [vmem:[#allocation12 + $0x1350] sm:$0xff]  ;;  %v10893_v57 = vcombine.low %v2818_v38, %v2826_v39  ;;  %v10829_v39 = vcombine.low %v2754_v31, %v2762_v32 }
 0x324   :  { %v10877_v5 = vcombine.low %v2802_v50, %v2810_v56  ;;  %v2746_v37 = vld [vmem:[#allocation12 + $0x1150] sm:$0xff] }
 0x325   :  { %8730 = vmatpush2.bf16.msra.mxu1 %v11227_v53  ;;  %v10878_v53 = vcombine.high %v2802_v50, %v2810_v56  ;;  %v10813_v50 = vcombine.low %v2738_v36, %v2746_v37  ;;  %v2458_v61 = vld [vmem:[#allocation12 + $0x850] sm:$0xff] }
 0x326   :  { %8771 = vmatpush2.bf16.msra.mxu0 %v10461_v54  ;;  %8731 = vmatprep.subr.bf16.mxu1 %v11212_v1  ;;  %v2786_v54 = vld [vmem:[#allocation12 + $0x1290] sm:$0xff] }
 0x327   :  { %8772 = vmatprep.subr.bf16.mxu0 %v10446_v2  ;;  %v2794_v1 = vld [vmem:[#allocation12 + $0x12d0] sm:$0xff] }
 0x328   :  { %v2706_v62 = vld [vmem:[#allocation12 + $0x1010] sm:$0xff] }
 0x329   :  { %8732 = vmatpush2.bf16.msra.mxu1 %v11211_v7 }
 0x32a   :  { %8773 = vmatpush2.bf16.msra.mxu0 %v10445_v9  ;;  %8733 = vmatprep.subr.bf16.mxu1 %v11196_v10  ;;  %v10862_v9 = vcombine.high %v2786_v54, %v2794_v1  ;;  %v2514_v10 = vld [vmem:[#allocation12 + $0xa10] sm:$0xff] }
 0x32b   :  { %8774 = vmatprep.subr.bf16.mxu0 %v10430_v44  ;;  %v2522_v44 = vld [vmem:[#allocation12 + $0xa50] sm:$0xff] }
 0x32c   :  { %v10589_v59 = vcombine.low %v2514_v10, %v2522_v44 }
 0x32d   :  { %8734 = vmatpush2.bf16.msra.mxu1 %v11195_v19  ;;  %v10861_v19 = vcombine.low %v2786_v54, %v2794_v1  ;;  %v10797_v54 = vcombine.low %v2722_v46, %v2730_v47 }
 0x32e   :  { %8775 = vmatpush2.bf16.msra.mxu0 %v10429_v27  ;;  %8735 = vmatprep.subr.bf16.mxu1 %v11180_v29  ;;  %v10590_v27 = vcombine.high %v2514_v10, %v2522_v44  ;;  %v10846_v29 = vcombine.high %v2770_v11, %v2778_v14  ;;  %v2674_v14 = vld [vmem:[#allocation12 + $0xf10] sm:$0xff] }
 0x32f   :  { %8776 = vmatprep.subr.bf16.mxu0 %v10414_v30  ;;  %v2498_v30 = vld [vmem:[#allocation12 + $0x990] sm:$0xff] }
 0x331   :  { %8736 = vmatpush2.bf16.msra.mxu1 %v11179_v0 }
 0x332   :  { %8777 = vmatpush2.bf16.msra.mxu0 %v10413_v33  ;;  %8737 = vmatprep.subr.bf16.mxu1 %v11164_v34  ;;  %v10830_v33 = vcombine.high %v2754_v31, %v2762_v32  ;;  %v2482_v34 = vld [vmem:[#allocation12 + $0x910] sm:$0xff] }
 0x333   :  { %8778 = vmatprep.subr.bf16.mxu0 %v10398_v35  ;;  %v2490_v35 = vld [vmem:[#allocation12 + $0x950] sm:$0xff] }
 0x334   :  { %v2658_v31 = vld [vmem:[#allocation12 + $0xe90] sm:$0xff] }
 0x335   :  { %8738 = vmatpush2.bf16.msra.mxu1 %v11163_v40  ;;  %v10558_v40 = vcombine.high %v2482_v34, %v2490_v35  ;;  %v2666_v32 = vld [vmem:[#allocation12 + $0xed0] sm:$0xff] }
 0x336   :  { %8779 = vmatpush2.bf16.msra.mxu0 %v10397_v42  ;;  %8789 = vmatprep.subr.bf16.mxu1 %v10638_v20  ;;  %v10814_v42 = vcombine.high %v2738_v36, %v2746_v37  ;;  %v2466_v20 = vld [vmem:[#allocation12 + $0x890] sm:$0xff] }
 0x337   :  { %8830 = vmatprep.subr.bf16.mxu0 %v10894_v43  ;;  %v2474_v43 = vld [vmem:[#allocation12 + $0x8d0] sm:$0xff] }
 0x338   :  { %8740 = vmatmul.mubr.bf16.vlgmr.msra.gmra.mxu1 %v11739_v55  ;;  %v8536_v63 = vpop.f32.mrf.mxu0  ;;  %v10542_v56 = vcombine.high %v2466_v20, %v2474_v43  ;;  %v2642_v36 = vld [vmem:[#allocation12 + $0xe10] sm:$0xff] }
 0x339   :  { %8781 = vmatmul.mubr.bf16.vlgmr.msra.gmra.mxu0 %v11691_v12  ;;  %v11762_v2 = vadd.f32 %v8536_v63, %v11753_v8  ;;  %8790 = vmatpush1.bf16.msra.mxu1 %v10637_v49  ;;  %v10557_v49 = vcombine.low %v2482_v34, %v2490_v35  ;;  %v2714_v63 = vld [vmem:[#allocation12 + $0x1050] sm:$0xff]  ;;  %v10734_v34 = vcombine.high %v2658_v31, %v2666_v32 }
 0x33a   :  { %8821 = vmatprep.mubr.bf16.mxu1 %v11696_v51  ;;  %8831 = vmatpush1.bf16.msra.mxu0 %v10893_v57  ;;  %v8538_v4 = vpop.f32.mrf.mxu0  ;;  %v10798_v57 = vcombine.high %v2722_v46, %v2730_v47  ;;  %v10781_v44 = vcombine.low %v2706_v62, %v2714_v63  ;;  %v2650_v37 = vld [vmem:[#allocation12 + $0xe50] sm:$0xff] }
 0x33b   :  { %8862 = vmatprep.mubr.bf16.mxu0 %v11722_v18  ;;  %v11767_v7 = vadd.f32 %v8538_v4, %v11757_v13  ;;  %8791 = vmatprep.subr.bf16.mxu1 %v10622_v58  ;;  %v2506_v13 = vld [vmem:[#allocation12 + $0x9d0] sm:$0xff] }
 0x33c   :  { %8832 = vmatprep.subr.bf16.mxu0 %v10878_v53  ;;  %v8540_v8 = vpop.f32.mrf.mxu0  ;;  %v10574_v0 = vcombine.high %v2498_v30, %v2506_v13  ;;  %v10573_v38 = vcombine.low %v2498_v30, %v2506_v13  ;;  %v2450_v58 = vld [vmem:[#allocation12 + $0x810] sm:$0xff]  ;;  %v10541_v53 = vcombine.low %v2466_v20, %v2474_v43  ;;  %v10718_v20 = vcombine.high %v2642_v36, %v2650_v37 }
 0x33d   :  { %8792 = vmatpush1.bf16.msra.mxu1 %v10621_v3  ;;  %v10526_v1 = vcombine.high %v2450_v58, %v2458_v61  ;;  %v10782_v3 = vcombine.high %v2706_v62, %v2714_v63  ;;  %v2690_v4 = vld [vmem:[#allocation12 + $0xf90] sm:$0xff]  ;;  %v10525_v10 = vcombine.low %v2450_v58, %v2458_v61 }
 0x33e   :  { %8833 = vmatpush1.bf16.msra.mxu0 %v10877_v5  ;;  %v8541_v17 = vpop.f32.mrf.mxu0  ;;  %8793 = vmatprep.subr.bf16.mxu1 %v10606_v45  ;;  %v2698_v5 = vld [vmem:[#allocation12 + $0xfd0] sm:$0xff] }
 0x33f   :  { %8834 = vmatprep.subr.bf16.mxu0 %v10862_v9  ;;  %v2946_v45 = vld [vmem:[#allocation12 + $0x1790] sm:$0xff]  ;;  %v10766_v8 = vcombine.high %v2690_v4, %v2698_v5 }
 0x340   :  { %v2954_v9 = vld [vmem:[#allocation12 + $0x17d0] sm:$0xff] }
 0x341   :  { %8794 = vmatpush1.bf16.msra.mxu1 %v10605_v15  ;;  %v11022_v11 = vcombine.high %v2946_v45, %v2954_v9  ;;  %v2682_v15 = vld [vmem:[#allocation12 + $0xf50] sm:$0xff] }
 0x342   :  { %8835 = vmatpush1.bf16.msra.mxu0 %v10861_v19  ;;  %8795 = vmatprep.subr.bf16.mxu1 %v10590_v27  ;;  %v2930_v17 = vld [vmem:[#allocation12 + $0x1710] sm:$0xff]  ;;  %v10765_v27 = vcombine.low %v2690_v4, %v2698_v5  ;;  %v10750_v30 = vcombine.high %v2674_v14, %v2682_v15 }
 0x343   :  { %8836 = vmatprep.subr.bf16.mxu0 %v10846_v29  ;;  %v2938_v19 = vld [vmem:[#allocation12 + $0x1750] sm:$0xff]  ;;  %v11021_v29 = vcombine.low %v2946_v45, %v2954_v9 }
 0x344   :  { %v11006_v13 = vcombine.high %v2930_v17, %v2938_v19  ;;  %v2626_v46 = vld [vmem:[#allocation12 + $0xd90] sm:$0xff] }
 0x345   :  { %8796 = vmatpush1.bf16.msra.mxu1 %v10589_v59  ;;  %v2914_v59 = vld [vmem:[#allocation12 + $0x1690] sm:$0xff] }
 0x346   :  { %8837 = vmatpush1.bf16.msra.mxu0 %v10845_v60  ;;  %8797 = vmatprep.subr.bf16.mxu1 %v10574_v0  ;;  %v2922_v60 = vld [vmem:[#allocation12 + $0x16d0] sm:$0xff]  ;;  %v10749_v0 = vcombine.low %v2674_v14, %v2682_v15 }
 0x347   :  { %8838 = vmatprep.subr.bf16.mxu0 %v10830_v33  ;;  %v11005_v33 = vcombine.low %v2930_v17, %v2938_v19  ;;  %v10990_v35 = vcombine.high %v2914_v59, %v2922_v60  ;;  %v2634_v47 = vld [vmem:[#allocation12 + $0xdd0] sm:$0xff] }
 0x348   :  { %v10702_v58 = vcombine.high %v2626_v46, %v2634_v47  ;;  %v2610_v62 = vld [vmem:[#allocation12 + $0xd10] sm:$0xff] }
 0x349   :  { %8798 = vmatpush1.bf16.msra.mxu1 %v10573_v38  ;;  %v2898_v38 = vld [vmem:[#allocation12 + $0x1610] sm:$0xff] }
 0x34a   :  { %8839 = vmatpush1.bf16.msra.mxu0 %v10829_v39  ;;  %8799 = vmatprep.subr.bf16.mxu1 %v10558_v40  ;;  %v2906_v39 = vld [vmem:[#allocation12 + $0x1650] sm:$0xff]  ;;  %v10733_v40 = vcombine.low %v2658_v31, %v2666_v32 }
 0x34b   :  { %8840 = vmatprep.subr.bf16.mxu0 %v10814_v42  ;;  %v10989_v42 = vcombine.low %v2914_v59, %v2922_v60  ;;  %v10974_v43 = vcombine.high %v2898_v38, %v2906_v39  ;;  %v2618_v63 = vld [vmem:[#allocation12 + $0xd50] sm:$0xff] }
 0x34c   :  { %v10686_v4 = vcombine.high %v2610_v62, %v2618_v63  ;;  %v2594_v45 = vld [vmem:[#allocation12 + $0xc90] sm:$0xff] }
 0x34d   :  { %8800 = vmatpush1.bf16.msra.mxu1 %v10557_v49  ;;  %v2882_v49 = vld [vmem:[#allocation12 + $0x1590] sm:$0xff] }
 0x34e   :  { %8841 = vmatpush1.bf16.msra.mxu0 %v10813_v50  ;;  %8801 = vmatprep.subr.bf16.mxu1 %v10542_v56  ;;  %v2890_v50 = vld [vmem:[#allocation12 + $0x15d0] sm:$0xff]  ;;  %v10717_v56 = vcombine.low %v2642_v36, %v2650_v37 }
 0x34f   :  { %8842 = vmatprep.subr.bf16.mxu0 %v10798_v57  ;;  %v10973_v57 = vcombine.low %v2898_v38, %v2906_v39  ;;  %v10958_v61 = vcombine.high %v2882_v49, %v2890_v50  ;;  %v2602_v9 = vld [vmem:[#allocation12 + $0xcd0] sm:$0xff] }
 0x350   :  { %v10670_v14 = vcombine.high %v2594_v45, %v2602_v9  ;;  %v2578_v17 = vld [vmem:[#allocation12 + $0xc10] sm:$0xff] }
 0x351   :  { %8802 = vmatpush1.bf16.msra.mxu1 %v10541_v53  ;;  %v2866_v53 = vld [vmem:[#allocation12 + $0x1510] sm:$0xff] }
 0x352   :  { %8843 = vmatpush1.bf16.msra.mxu0 %v10797_v54  ;;  %8803 = vmatprep.subr.bf16.mxu1 %v10526_v1  ;;  %v2874_v54 = vld [vmem:[#allocation12 + $0x1550] sm:$0xff]  ;;  %v10701_v1 = vcombine.low %v2626_v46, %v2634_v47 }
 0x353   :  { %8844 = vmatprep.subr.bf16.mxu0 %v10782_v3  ;;  %v10957_v3 = vcombine.low %v2882_v49, %v2890_v50  ;;  %v10942_v5 = vcombine.high %v2866_v53, %v2874_v54  ;;  %v2586_v19 = vld [vmem:[#allocation12 + $0xc50] sm:$0xff] }
 0x354   :  { %v10654_v31 = vcombine.high %v2578_v17, %v2586_v19  ;;  %v3074_v59 = vld [vmem:[#allocation12 + $0x1b90] sm:$0xff] }
 0x355   :  { %8804 = vmatpush1.bf16.msra.mxu1 %v10525_v10  ;;  %v2850_v10 = vld [vmem:[#allocation12 + $0x1490] sm:$0xff] }
 0x356   :  { %8845 = vmatpush1.bf16.msra.mxu0 %v10781_v44  ;;  %8805 = vmatprep.subr.bf16.mxu1 %v10766_v8  ;;  %v2858_v44 = vld [vmem:[#allocation12 + $0x14d0] sm:$0xff]  ;;  %v10685_v8 = vcombine.low %v2610_v62, %v2618_v63 }
 0x357   :  { %8846 = vmatprep.subr.bf16.mxu0 %v11022_v11  ;;  %v10941_v11 = vcombine.low %v2866_v53, %v2874_v54  ;;  %v10926_v15 = vcombine.high %v2850_v10, %v2858_v44  ;;  %v3082_v60 = vld [vmem:[#allocation12 + $0x1bd0] sm:$0xff] }
 0x358   :  { %v11150_v36 = vcombine.high %v3074_v59, %v3082_v60  ;;  %v3058_v38 = vld [vmem:[#allocation12 + $0x1b10] sm:$0xff] }
 0x359   :  { %8806 = vmatpush2.bf16.msra.mxu1 %v10765_v27  ;;  %v2834_v27 = vld [vmem:[#allocation12 + $0x1410] sm:$0xff] }
 0x35a   :  { %8847 = vmatpush2.bf16.msra.mxu0 %v11021_v29  ;;  %8807 = vmatprep.subr.bf16.mxu1 %v10750_v30  ;;  %v2842_v29 = vld [vmem:[#allocation12 + $0x1450] sm:$0xff]  ;;  %v10669_v30 = vcombine.low %v2594_v45, %v2602_v9 }
 0x35b   :  { %8848 = vmatprep.subr.bf16.mxu0 %v11006_v13  ;;  %v10925_v13 = vcombine.low %v2850_v10, %v2858_v44  ;;  %v10910_v32 = vcombine.high %v2834_v27, %v2842_v29  ;;  %v3066_v39 = vld [vmem:[#allocation12 + $0x1b50] sm:$0xff]  ;;  %v2259_v44 = vld [vmem:[#allocation12 + $0x218] sm:$0xff] }
 0x35c   :  { %v11134_v46 = vcombine.high %v3058_v38, %v3066_v39  ;;  %v3042_v47 = vld [vmem:[#allocation12 + $0x1a90] sm:$0xff]  ;;  %v11133_v63 = vcombine.low %v3058_v38, %v3066_v39 }
 0x35d   :  { %8808 = vmatpush2.bf16.msra.mxu1 %v10749_v0  ;;  %v2307_v0 = vld [vmem:[#allocation12 + $0x398] sm:$0xff]  ;;  %v3050_v49 = vld [vmem:[#allocation12 + $0x1ad0] sm:$0xff] }
 0x35e   :  { %8849 = vmatpush2.bf16.msra.mxu0 %v11005_v33  ;;  %8809 = vmatprep.subr.bf16.mxu1 %v10734_v34  ;;  %v2315_v33 = vld [vmem:[#allocation12 + $0x3d8] sm:$0xff]  ;;  %v10653_v34 = vcombine.low %v2578_v17, %v2586_v19  ;;  %v3026_v45 = vld [vmem:[#allocation12 + $0x1a10] sm:$0xff] }
 0x35f   :  { %8850 = vmatprep.subr.bf16.mxu0 %v10990_v35  ;;  %v10909_v35 = vcombine.low %v2834_v27, %v2842_v29  ;;  %v10384_v37 = vcombine.high %v2307_v0, %v2315_v33  ;;  %v3010_v27 = vld [vmem:[#allocation12 + $0x1990] sm:$0xff] }
 0x360   :  { %v3018_v29 = vld [vmem:[#allocation12 + $0x19d0] sm:$0xff] }
 0x361   :  { %8810 = vmatpush2.bf16.msra.mxu1 %v10733_v40  ;;  %v11149_v40 = vcombine.low %v3074_v59, %v3082_v60  ;;  %v11086_v59 = vcombine.high %v3010_v27, %v3018_v29 }
 0x362   :  { %8851 = vmatpush2.bf16.msra.mxu0 %v10989_v42  ;;  %8811 = vmatprep.subr.bf16.mxu1 %v10718_v20  ;;  %v2291_v42 = vld [vmem:[#allocation12 + $0x318] sm:$0xff] }
 0x363   :  { %8852 = vmatprep.subr.bf16.mxu0 %v10974_v43  ;;  %v2299_v20 = vld [vmem:[#allocation12 + $0x358] sm:$0xff]  ;;  %v10383_v43 = vcombine.low %v2307_v0, %v2315_v33  ;;  %v2994_v0 = vld [vmem:[#allocation12 + $0x1910] sm:$0xff] }
 0x364   :  { %v3002_v33 = vld [vmem:[#allocation12 + $0x1950] sm:$0xff] }
 0x365   :  { %8812 = vmatpush2.bf16.msra.mxu1 %v10717_v56  ;;  %v11070_v38 = vcombine.high %v2994_v0, %v3002_v33 }
 0x366   :  { %8853 = vmatpush2.bf16.msra.mxu0 %v10973_v57  ;;  %8813 = vmatprep.subr.bf16.mxu1 %v10702_v58  ;;  %v10368_v57 = vcombine.high %v2291_v42, %v2299_v20  ;;  %v2275_v58 = vld [vmem:[#allocation12 + $0x298] sm:$0xff] }
 0x367   :  { %8854 = vmatprep.subr.bf16.mxu0 %v10958_v61  ;;  %v2283_v61 = vld [vmem:[#allocation12 + $0x2d8] sm:$0xff] }
 0x368   :  { %v10351_v17 = vcombine.low %v2275_v58, %v2283_v61 }
 0x369   :  { %8814 = vmatpush2.bf16.msra.mxu1 %v10701_v1  ;;  %v10367_v1 = vcombine.low %v2291_v42, %v2299_v20  ;;  %v2986_v42 = vld [vmem:[#allocation12 + $0x18d0] sm:$0xff]  ;;  %v2211_v20 = vld [vmem:[#allocation12 + $0x98] sm:$0xff] }
 0x36a   :  { %8855 = vmatpush2.bf16.msra.mxu0 %v10957_v3  ;;  %8815 = vmatprep.subr.bf16.mxu1 %v10686_v4  ;;  %v11118_v3 = vcombine.high %v3042_v47, %v3050_v49 }
 0x36b   :  { %8856 = vmatprep.subr.bf16.mxu0 %v10942_v5  ;;  %v10352_v5 = vcombine.high %v2275_v58, %v2283_v61  ;;  %v2970_v58 = vld [vmem:[#allocation12 + $0x1850] sm:$0xff]  ;;  %v2195_v61 = vld [vmem:[#allocation12 + $0x18] sm:$0xff] }
 0x36d   :  { %8816 = vmatpush2.bf16.msra.mxu1 %v10685_v8  ;;  %v2267_v8 = vld [vmem:[#allocation12 + $0x258] sm:$0xff] }
 0x36e   :  { %8857 = vmatpush2.bf16.msra.mxu0 %v10941_v11  ;;  %8817 = vmatprep.subr.bf16.mxu1 %v10670_v14  ;;  %v11117_v11 = vcombine.low %v3042_v47, %v3050_v49 }
 0x36f   :  { %8858 = vmatprep.subr.bf16.mxu0 %v10926_v15 }
 0x371   :  { %8818 = vmatpush2.bf16.msra.mxu1 %v10669_v30  ;;  %v2243_v30 = vld [vmem:[#allocation12 + $0x198] sm:$0xff] }
 0x372   :  { %8859 = vmatpush2.bf16.msra.mxu0 %v10925_v13  ;;  %8819 = vmatprep.subr.bf16.mxu1 %v10654_v31  ;;  %v2251_v13 = vld [vmem:[#allocation12 + $0x1d8] sm:$0xff] }
 0x373   :  { %8860 = vmatprep.subr.bf16.mxu0 %v10910_v32  ;;  %v10335_v32 = vcombine.low %v2259_v44, %v2267_v8  ;;  %v10320_v60 = vcombine.high %v2243_v30, %v2251_v13 }
 0x375   :  { %8820 = vmatpush2.bf16.msra.mxu1 %v10653_v34  ;;  %v2227_v34 = vld [vmem:[#allocation12 + $0x118] sm:$0xff] }
 0x376   :  { %8861 = vmatpush2.bf16.msra.mxu0 %v10909_v35  ;;  %8871 = vmatprep.subr.bf16.mxu1 %v11150_v36  ;;  %v2235_v35 = vld [vmem:[#allocation12 + $0x158] sm:$0xff]  ;;  %v11085_v36 = vcombine.low %v3010_v27, %v3018_v29 }
 0x377   :  { %8912 = vmatprep.subr.bf16.mxu0 %v10384_v37  ;;  %v10319_v37 = vcombine.low %v2243_v30, %v2251_v13  ;;  %v10304_v39 = vcombine.high %v2227_v34, %v2235_v35  ;;  %v10303_v47 = vcombine.low %v2227_v34, %v2235_v35 }
 0x378   :  { %v11769_v50 = vpop.f32.mrf.mxu0  ;;  %8822 = vmatmul.mubr.bf16.vlgmr.msra.gmra.mxu1 %v11700_v52  ;;  %v8577_v56 = vpop.f32.mrf.mxu1 }
 0x379   :  { %8863 = vmatmul.mubr.bf16.vlgmr.msra.gmra.mxu0 %v11724_v23  ;;  %v11774_v62 = vadd.f32 %v8577_v56, %v11762_v2  ;;  %8872 = vmatpush1.bf16.msra.mxu1 %v11149_v40  ;;  %v3034_v2 = vld [vmem:[#allocation12 + $0x1a50] sm:$0xff] }
 0x37a   :  { %8903 = vmatprep.mubr.bf16.mxu1 %v11737_v6  ;;  %8913 = vmatpush1.bf16.msra.mxu0 %v10383_v43  ;;  %v11777_v53 = vpop.f32.mrf.mxu0  ;;  %v8579_v54 = vpop.f32.mrf.mxu1  ;;  %v11102_v19 = vcombine.high %v3026_v45, %v3034_v2  ;;  %v11101_v31 = vcombine.low %v3026_v45, %v3034_v2  ;;  %v2978_v40 = vld [vmem:[#allocation12 + $0x1890] sm:$0xff]  ;;  %v2219_v43 = vld [vmem:[#allocation12 + $0xd8] sm:$0xff] }
 0x37b   :  { %8944 = vmatprep.mubr.bf16.mxu0 %v11676_v16  ;;  %v11781_v4 = vadd.f32 %v8579_v54, %v11767_v7  ;;  %8873 = vmatprep.subr.bf16.mxu1 %v11134_v46  ;;  %v10336_v7 = vcombine.high %v2259_v44, %v2267_v8  ;;  %v11069_v46 = vcombine.low %v2994_v0, %v3002_v33  ;;  %v3202_v45 = vld [vmem:[#allocation12 + $0x1f90] sm:$0xff] }
 0x37c   :  { %v8622_v9 = vpop.f32.mrf.mxu0  ;;  %8914 = vmatprep.subr.bf16.mxu0 %v10368_v57  ;;  %v8581_v10 = vpop.f32.mrf.mxu1  ;;  %v11054_v49 = vcombine.high %v2978_v40, %v2986_v42  ;;  %v10288_v56 = vcombine.high %v2211_v20, %v2219_v43  ;;  %v2962_v57 = vld [vmem:[#allocation12 + $0x1810] sm:$0xff]  ;;  %v11053_v54 = vcombine.low %v2978_v40, %v2986_v42 }
 0x37d   :  { %8874 = vmatpush1.bf16.msra.mxu1 %v11133_v63  ;;  %v2203_v63 = vld [vmem:[#allocation12 + $0x58] sm:$0xff]  ;;  %v3210_v2 = vld [vmem:[#allocation12 + $0x1fd0] sm:$0xff]  ;;  %v11037_v44 = vcombine.low %v2962_v57, %v2970_v58 }
 0x37e   :  { %8915 = vmatpush1.bf16.msra.mxu0 %v10367_v1  ;;  %v8623_v14 = vpop.f32.mrf.mxu0  ;;  %v8582_v15 = vpop.f32.mrf.mxu1  ;;  %8875 = vmatprep.subr.bf16.mxu1 %v11118_v3  ;;  %v10287_v1 = vcombine.low %v2211_v20, %v2219_v43  ;;  %v11038_v3 = vcombine.high %v2962_v57, %v2970_v58  ;;  %v2435_v9 = vld [vmem:[#allocation12 + $0x798] sm:$0xff]  ;;  %v10271_v8 = vcombine.low %v2195_v61, %v2203_v63 }
 0x37f   :  { %8916 = vmatprep.subr.bf16.mxu0 %v10352_v5  ;;  %v10272_v5 = vcombine.high %v2195_v61, %v2203_v63  ;;  %v2443_v10 = vld [vmem:[#allocation12 + $0x7d8] sm:$0xff]  ;;  %v3186_v15 = vld [vmem:[#allocation12 + $0x1f10] sm:$0xff]  ;;  %v11277_v27 = vcombine.low %v3202_v45, %v3210_v2 }
 0x380   :  { %v10512_v14 = vcombine.high %v2435_v9, %v2443_v10  ;;  %v10511_v29 = vcombine.low %v2435_v9, %v2443_v10 }
 0x381   :  { %8876 = vmatpush1.bf16.msra.mxu1 %v11117_v11  ;;  %v11278_v11 = vcombine.high %v3202_v45, %v3210_v2 }
 0x382   :  { %8917 = vmatpush1.bf16.msra.mxu0 %v10351_v17  ;;  %8877 = vmatprep.subr.bf16.mxu1 %v11102_v19  ;;  %v3194_v17 = vld [vmem:[#allocation12 + $0x1f50] sm:$0xff]  ;;  %v2419_v19 = vld [vmem:[#allocation12 + $0x718] sm:$0xff] }
 0x383   :  { %8918 = vmatprep.subr.bf16.mxu0 %v10336_v7  ;;  %v2427_v7 = vld [vmem:[#allocation12 + $0x758] sm:$0xff]  ;;  %v11262_v30 = vcombine.high %v3186_v15, %v3194_v17  ;;  %v11261_v0 = vcombine.low %v3186_v15, %v3194_v17 }
 0x384   :  { %v10496_v13 = vcombine.high %v2419_v19, %v2427_v7  ;;  %v10495_v33 = vcombine.low %v2419_v19, %v2427_v7 }
 0x385   :  { %8878 = vmatpush1.bf16.msra.mxu1 %v11101_v31  ;;  %v3170_v31 = vld [vmem:[#allocation12 + $0x1e90] sm:$0xff] }
 0x386   :  { %8919 = vmatpush1.bf16.msra.mxu0 %v10335_v32  ;;  %8879 = vmatprep.subr.bf16.mxu1 %v11086_v59  ;;  %v3178_v32 = vld [vmem:[#allocation12 + $0x1ed0] sm:$0xff]  ;;  %v2403_v59 = vld [vmem:[#allocation12 + $0x698] sm:$0xff] }
 0x387   :  { %8920 = vmatprep.subr.bf16.mxu0 %v10320_v60  ;;  %v2411_v60 = vld [vmem:[#allocation12 + $0x6d8] sm:$0xff]  ;;  %v11246_v34 = vcombine.high %v3170_v31, %v3178_v32  ;;  %v11245_v40 = vcombine.low %v3170_v31, %v3178_v32 }
 0x388   :  { %v10480_v35 = vcombine.high %v2403_v59, %v2411_v60  ;;  %v10479_v42 = vcombine.low %v2403_v59, %v2411_v60 }
 0x389   :  { %8880 = vmatpush1.bf16.msra.mxu1 %v11085_v36  ;;  %v3154_v36 = vld [vmem:[#allocation12 + $0x1e10] sm:$0xff] }
 0x38a   :  { %8921 = vmatpush1.bf16.msra.mxu0 %v10319_v37  ;;  %8881 = vmatprep.subr.bf16.mxu1 %v11070_v38  ;;  %v3162_v37 = vld [vmem:[#allocation12 + $0x1e50] sm:$0xff]  ;;  %v2387_v38 = vld [vmem:[#allocation12 + $0x618] sm:$0xff] }
 0x38b   :  { %8922 = vmatprep.subr.bf16.mxu0 %v10304_v39  ;;  %v2395_v39 = vld [vmem:[#allocation12 + $0x658] sm:$0xff]  ;;  %v11230_v20 = vcombine.high %v3154_v36, %v3162_v37  ;;  %v11229_v57 = vcombine.low %v3154_v36, %v3162_v37 }
 0x38c   :  { %v10464_v43 = vcombine.high %v2387_v38, %v2395_v39  ;;  %v10463_v58 = vcombine.low %v2387_v38, %v2395_v39  ;;  %v11783_v39 = vld [vmem:[#allocation14] sm:$0xff] }
 0x38d   :  { %8882 = vmatpush1.bf16.msra.mxu1 %v11069_v46  ;;  %v3138_v46 = vld [vmem:[#allocation12 + $0x1d90] sm:$0xff] }
 0x38e   :  { %8923 = vmatpush1.bf16.msra.mxu0 %v10303_v47  ;;  %8883 = vmatprep.subr.bf16.mxu1 %v11054_v49  ;;  %v3146_v47 = vld [vmem:[#allocation12 + $0x1dd0] sm:$0xff]  ;;  %v2371_v49 = vld [vmem:[#allocation12 + $0x598] sm:$0xff] }
 0x38f   :  { %8924 = vmatprep.subr.bf16.mxu0 %v10288_v56  ;;  %v2379_v56 = vld [vmem:[#allocation12 + $0x5d8] sm:$0xff]  ;;  %v11214_v61 = vcombine.high %v3138_v46, %v3146_v47  ;;  %v11213_v45 = vcombine.low %v3138_v46, %v3146_v47  ;;  %v3235_v46 = vrot.slane %v11783_v39, %v11638_v25 }
 0x390   :  { %v10448_v63 = vcombine.high %v2371_v49, %v2379_v56  ;;  %v10447_v2 = vcombine.low %v2371_v49, %v2379_v56  ;;  %v2803_v49 = vld [vmem:[#allocation12 + $0x1318] sm:$0xff] }
 0x391   :  { %8884 = vmatpush1.bf16.msra.mxu1 %v11053_v54  ;;  %v3122_v54 = vld [vmem:[#allocation12 + $0x1d10] sm:$0xff]  ;;  %v2811_v56 = vld [vmem:[#allocation12 + $0x1358] sm:$0xff] }
 0x392   :  { %8925 = vmatpush1.bf16.msra.mxu0 %v10287_v1  ;;  %8885 = vmatprep.subr.bf16.mxu1 %v11038_v3  ;;  %v3130_v1 = vld [vmem:[#allocation12 + $0x1d50] sm:$0xff]  ;;  %v2355_v3 = vld [vmem:[#allocation12 + $0x518] sm:$0xff] }
 0x393   :  { %8926 = vmatprep.subr.bf16.mxu0 %v10272_v5  ;;  %v2363_v5 = vld [vmem:[#allocation12 + $0x558] sm:$0xff]  ;;  %v11198_v9 = vcombine.high %v3122_v54, %v3130_v1  ;;  %v11197_v15 = vcombine.low %v3122_v54, %v3130_v1 }
 0x394   :  { %v10432_v10 = vcombine.high %v2355_v3, %v2363_v5  ;;  %v10431_v17 = vcombine.low %v2355_v3, %v2363_v5  ;;  %v2539_v54 = vld [vmem:[#allocation12 + $0xad8] sm:$0xff]  ;;  %v10880_v5 = vcombine.high %v2803_v49, %v2811_v56 }
 0x395   :  { %8886 = vmatpush1.bf16.msra.mxu1 %v11037_v44  ;;  %v3106_v44 = vld [vmem:[#allocation12 + $0x1c90] sm:$0xff] }
 0x396   :  { %8927 = vmatpush1.bf16.msra.mxu0 %v10271_v8  ;;  %8887 = vmatprep.subr.bf16.mxu1 %v11278_v11  ;;  %v3114_v8 = vld [vmem:[#allocation12 + $0x1cd0] sm:$0xff]  ;;  %v2339_v11 = vld [vmem:[#allocation12 + $0x498] sm:$0xff] }
 0x397   :  { %8928 = vmatprep.subr.bf16.mxu0 %v10512_v14  ;;  %v2347_v14 = vld [vmem:[#allocation12 + $0x4d8] sm:$0xff]  ;;  %v11182_v19 = vcombine.high %v3106_v44, %v3114_v8  ;;  %v11181_v31 = vcombine.low %v3106_v44, %v3114_v8 }
 0x398   :  { %v10416_v7 = vcombine.high %v2339_v11, %v2347_v14  ;;  %v10415_v32 = vcombine.low %v2339_v11, %v2347_v14  ;;  %v10879_v11 = vcombine.low %v2803_v49, %v2811_v56  ;;  %v2739_v49 = vld [vmem:[#allocation12 + $0x1118] sm:$0xff] }
 0x399   :  { %8888 = vmatpush2.bf16.msra.mxu1 %v11277_v27  ;;  %v3090_v27 = vld [vmem:[#allocation12 + $0x1c10] sm:$0xff]  ;;  %v2747_v56 = vld [vmem:[#allocation12 + $0x1158] sm:$0xff] }
 0x39a   :  { %8929 = vmatpush2.bf16.msra.mxu0 %v10511_v29  ;;  %8889 = vmatprep.subr.bf16.mxu1 %v11262_v30  ;;  %v3098_v29 = vld [vmem:[#allocation12 + $0x1c50] sm:$0xff]  ;;  %v2323_v30 = vld [vmem:[#allocation12 + $0x418] sm:$0xff] }
 0x39b   :  { %8930 = vmatprep.subr.bf16.mxu0 %v10496_v13  ;;  %v2331_v13 = vld [vmem:[#allocation12 + $0x458] sm:$0xff]  ;;  %v11166_v59 = vcombine.high %v3090_v27, %v3098_v29  ;;  %v11165_v36 = vcombine.low %v3090_v27, %v3098_v29 }
 0x39c   :  { %v10400_v60 = vcombine.high %v2323_v30, %v2331_v13  ;;  %v10399_v37 = vcombine.low %v2323_v30, %v2331_v13  ;;  %v2771_v30 = vld [vmem:[#allocation12 + $0x1218] sm:$0xff] }
 0x39d   :  { %8890 = vmatpush2.bf16.msra.mxu1 %v11261_v0  ;;  %v2563_v0 = vld [vmem:[#allocation12 + $0xb98] sm:$0xff] }
 0x39e   :  { %8931 = vmatpush2.bf16.msra.mxu0 %v10495_v33  ;;  %8891 = vmatprep.subr.bf16.mxu1 %v11246_v34  ;;  %v2571_v33 = vld [vmem:[#allocation12 + $0xbd8] sm:$0xff] }
 0x39f   :  { %8932 = vmatprep.subr.bf16.mxu0 %v10480_v35  ;;  %v2819_v34 = vld [vmem:[#allocation12 + $0x1398] sm:$0xff]  ;;  %v10640_v38 = vcombine.high %v2563_v0, %v2571_v33  ;;  %v10639_v47 = vcombine.low %v2563_v0, %v2571_v33 }
 0x3a0   :  { %v2827_v35 = vld [vmem:[#allocation12 + $0x13d8] sm:$0xff] }
 0x3a1   :  { %8892 = vmatpush2.bf16.msra.mxu1 %v11245_v40  ;;  %v3231_v40 = vrot.slane %v11783_v39, %v11632_v22  ;;  %v2779_v13 = vld [vmem:[#allocation12 + $0x1258] sm:$0xff] }
 0x3a2   :  { %8933 = vmatpush2.bf16.msra.mxu0 %v10479_v42  ;;  %8893 = vmatprep.subr.bf16.mxu1 %v11230_v20  ;;  %v10896_v42 = vcombine.high %v2819_v34, %v2827_v35  ;;  %v2547_v20 = vld [vmem:[#allocation12 + $0xb18] sm:$0xff] }
 0x3a3   :  { %8934 = vmatprep.subr.bf16.mxu0 %v10464_v43  ;;  %v2555_v43 = vld [vmem:[#allocation12 + $0xb58] sm:$0xff] }
 0x3a4   :  { %v10623_v44 = vcombine.low %v2547_v20, %v2555_v43 }
 0x3a5   :  { %8894 = vmatpush2.bf16.msra.mxu1 %v11229_v57  ;;  %v10895_v57 = vcombine.low %v2819_v34, %v2827_v35  ;;  %v10848_v34 = vcombine.high %v2771_v30, %v2779_v13  ;;  %v2499_v35 = vld [vmem:[#allocation12 + $0x998] sm:$0xff] }
 0x3a6   :  { %8935 = vmatpush2.bf16.msra.mxu0 %v10463_v58  ;;  %8895 = vmatprep.subr.bf16.mxu1 %v11214_v61  ;;  %v8619_v58 = vadd.f32 %v11769_v50, %v3231_v40  ;;  %v10624_v61 = vcombine.high %v2547_v20, %v2555_v43 }
 0x3a7   :  { %8936 = vmatprep.subr.bf16.mxu0 %v10448_v63  ;;  %v2531_v63 = vld [vmem:[#allocation12 + $0xa98] sm:$0xff] }
 0x3a8   :  { %v10608_v14 = vcombine.high %v2531_v63, %v2539_v54 }
 0x3a9   :  { %8896 = vmatpush2.bf16.msra.mxu1 %v11213_v45  ;;  %v2787_v45 = vld [vmem:[#allocation12 + $0x1298] sm:$0xff] }
 0x3aa   :  { %8937 = vmatpush2.bf16.msra.mxu0 %v10447_v2  ;;  %8897 = vmatprep.subr.bf16.mxu1 %v11198_v9  ;;  %v2795_v2 = vld [vmem:[#allocation12 + $0x12d8] sm:$0xff]  ;;  %v8621_v9 = vadd.f32 %v11777_v53, %v3235_v46 }
 0x3ab   :  { %8938 = vmatprep.subr.bf16.mxu0 %v10432_v10  ;;  %v2515_v53 = vld [vmem:[#allocation12 + $0xa18] sm:$0xff]  ;;  %v10863_v0 = vcombine.low %v2787_v45, %v2795_v2 }
 0x3ac   :  { %v2483_v46 = vld [vmem:[#allocation12 + $0x918] sm:$0xff] }
 0x3ad   :  { %8898 = vmatpush2.bf16.msra.mxu1 %v11197_v15 }
 0x3ae   :  { %8939 = vmatpush2.bf16.msra.mxu0 %v10431_v17  ;;  %8899 = vmatprep.subr.bf16.mxu1 %v11182_v19  ;;  %v10864_v19 = vcombine.high %v2787_v45, %v2795_v2  ;;  %v10815_v2 = vcombine.low %v2739_v49, %v2747_v56 }
 0x3af   :  { %8940 = vmatprep.subr.bf16.mxu0 %v10416_v7  ;;  %v2523_v7 = vld [vmem:[#allocation12 + $0xa58] sm:$0xff] }
 0x3b0   :  { %v10592_v33 = vcombine.high %v2515_v53, %v2523_v7  ;;  %v10591_v40 = vcombine.low %v2515_v53, %v2523_v7  ;;  %v2691_v7 = vld [vmem:[#allocation12 + $0xf98] sm:$0xff] }
 0x3b1   :  { %8900 = vmatpush2.bf16.msra.mxu1 %v11181_v31 }
 0x3b2   :  { %8941 = vmatpush2.bf16.msra.mxu0 %v10415_v32  ;;  %8901 = vmatprep.subr.bf16.mxu1 %v11166_v59  ;;  %v10607_v32 = vcombine.low %v2531_v63, %v2539_v54  ;;  %v10816_v63 = vcombine.high %v2739_v49, %v2747_v56  ;;  %v2467_v54 = vld [vmem:[#allocation12 + $0x898] sm:$0xff] }
 0x3b3   :  { %8942 = vmatprep.subr.bf16.mxu0 %v10400_v60 }
 0x3b5   :  { %8902 = vmatpush2.bf16.msra.mxu1 %v11165_v36  ;;  %v2507_v36 = vld [vmem:[#allocation12 + $0x9d8] sm:$0xff] }
 0x3b6   :  { %8943 = vmatpush2.bf16.msra.mxu0 %v10399_v37  ;;  %8953 = vmatprep.subr.bf16.mxu1 %v10640_v38  ;;  %v2755_v37 = vld [vmem:[#allocation12 + $0x1198] sm:$0xff]  ;;  %v10576_v20 = vcombine.high %v2499_v35, %v2507_v36 }
 0x3b7   :  { %8994 = vmatprep.subr.bf16.mxu0 %v10896_v42  ;;  %v2763_v38 = vld [vmem:[#allocation12 + $0x11d8] sm:$0xff]  ;;  %v10847_v42 = vcombine.low %v2771_v30, %v2779_v13 }
 0x3b8   :  { %v8659_v1 = vpop.f32.mrf.mxu1  ;;  %v8700_v3 = vpop.f32.mrf.mxu0  ;;  %8904 = vmatmul.mubr.bf16.vlgmr.msra.gmra.mxu1 %v11739_v55  ;;  %v10832_v43 = vcombine.high %v2755_v37, %v2763_v38  ;;  %v2955_v30 = vld [vmem:[#allocation12 + $0x17d8] sm:$0xff] }
 0x3b9   :  { %v8660_v10 = vadd.f32 %v8659_v1, %v8619_v58  ;;  %8945 = vmatmul.mubr.bf16.vlgmr.msra.gmra.mxu0 %v11691_v12  ;;  %8954 = vmatpush1.bf16.msra.mxu1 %v10639_v47  ;;  %v2491_v47 = vld [vmem:[#allocation12 + $0x958] sm:$0xff]  ;;  %v10831_v58 = vcombine.low %v2755_v37, %v2763_v38 }
 0x3ba   :  { %8985 = vmatprep.mubr.bf16.mxu1 %v11696_v51  ;;  %8995 = vmatpush1.bf16.msra.mxu0 %v10895_v57  ;;  %v8661_v50 = vpop.f32.mrf.mxu1  ;;  %v8702_v8 = vpop.f32.mrf.mxu0  ;;  %v10575_v57 = vcombine.low %v2499_v35, %v2507_v36  ;;  %v2475_v1 = vld [vmem:[#allocation12 + $0x8d8] sm:$0xff]  ;;  %v10559_v45 = vcombine.low %v2483_v46, %v2491_v47 }
 0x3bb   :  { %v11794_v15 = vadd.f32 %v8700_v3, %v8660_v10  ;;  %9026 = vmatprep.mubr.bf16.mxu0 %v11722_v18  ;;  %v8662_v17 = vadd.f32 %v8661_v50, %v8621_v9  ;;  %8955 = vmatprep.subr.bf16.mxu1 %v10624_v61  ;;  %v10560_v61 = vcombine.high %v2483_v46, %v2491_v47  ;;  %v2723_v3 = vld [vmem:[#allocation12 + $0x1098] sm:$0xff] }
 0x3bc   :  { %v8663_v27 = vpop.f32.mrf.mxu1  ;;  %v8704_v29 = vpop.f32.mrf.mxu0  ;;  %8996 = vmatprep.subr.bf16.mxu0 %v10880_v5  ;;  %v2731_v5 = vld [vmem:[#allocation12 + $0x10d8] sm:$0xff]  ;;  %v10544_v9 = vcombine.high %v2467_v54, %v2475_v1 }
 0x3bd   :  { %v11797_v31 = vadd.f32 %v8702_v8, %v8662_v17  ;;  %8956 = vmatpush1.bf16.msra.mxu1 %v10623_v44  ;;  %v10800_v10 = vcombine.high %v2723_v3, %v2731_v5  ;;  %v2451_v44 = vld [vmem:[#allocation12 + $0x818] sm:$0xff]  ;;  %v10799_v17 = vcombine.low %v2723_v3, %v2731_v5 }
 0x3be   :  { %8997 = vmatpush1.bf16.msra.mxu0 %v10879_v11  ;;  %v8664_v59 = vpop.f32.mrf.mxu1  ;;  %v8705_v60 = vpop.f32.mrf.mxu0  ;;  %8957 = vmatprep.subr.bf16.mxu1 %v10608_v14  ;;  %v2459_v50 = vld [vmem:[#allocation12 + $0x858] sm:$0xff]  ;;  %v10543_v14 = vcombine.low %v2467_v54, %v2475_v1 }
 0x3bf   :  { %8998 = vmatprep.subr.bf16.mxu0 %v10864_v19  ;;  %v2707_v8 = vld [vmem:[#allocation12 + $0x1018] sm:$0xff]  ;;  %v10528_v19 = vcombine.high %v2451_v44, %v2459_v50  ;;  %v10527_v13 = vcombine.low %v2451_v44, %v2459_v50 }
 0x3c0   :  { %v2715_v11 = vld [vmem:[#allocation12 + $0x1058] sm:$0xff] }
 0x3c1   :  { %8958 = vmatpush1.bf16.msra.mxu1 %v10607_v32  ;;  %v10784_v53 = vcombine.high %v2707_v8, %v2715_v11  ;;  %v2699_v27 = vld [vmem:[#allocation12 + $0xfd8] sm:$0xff]  ;;  %v10783_v32 = vcombine.low %v2707_v8, %v2715_v11 }
 0x3c2   :  { %8999 = vmatpush1.bf16.msra.mxu0 %v10863_v0  ;;  %8959 = vmatprep.subr.bf16.mxu1 %v10592_v33  ;;  %v2947_v29 = vld [vmem:[#allocation12 + $0x1798] sm:$0xff]  ;;  %v10768_v59 = vcombine.high %v2691_v7, %v2699_v27  ;;  %v10767_v36 = vcombine.low %v2691_v7, %v2699_v27 }
 0x3c3   :  { %9000 = vmatprep.subr.bf16.mxu0 %v10848_v34  ;;  %v11024_v60 = vcombine.high %v2947_v29, %v2955_v30  ;;  %v2675_v0 = vld [vmem:[#allocation12 + $0xf18] sm:$0xff]  ;;  %v11023_v37 = vcombine.low %v2947_v29, %v2955_v30 }
 0x3c4   :  { %v2683_v33 = vld [vmem:[#allocation12 + $0xf58] sm:$0xff] }
 0x3c5   :  { %8960 = vmatpush1.bf16.msra.mxu1 %v10591_v40  ;;  %v2931_v34 = vld [vmem:[#allocation12 + $0x1718] sm:$0xff]  ;;  %v10752_v38 = vcombine.high %v2675_v0, %v2683_v33  ;;  %v10751_v47 = vcombine.low %v2675_v0, %v2683_v33 }
 0x3c6   :  { %9001 = vmatpush1.bf16.msra.mxu0 %v10847_v42  ;;  %8961 = vmatprep.subr.bf16.mxu1 %v10576_v20  ;;  %v2939_v35 = vld [vmem:[#allocation12 + $0x1758] sm:$0xff] }
 0x3c7   :  { %9002 = vmatprep.subr.bf16.mxu0 %v10832_v43  ;;  %v11008_v40 = vcombine.high %v2931_v34, %v2939_v35  ;;  %v2659_v42 = vld [vmem:[#allocation12 + $0xe98] sm:$0xff]  ;;  %v11007_v49 = vcombine.low %v2931_v34, %v2939_v35 }
 0x3c8   :  { %v2667_v20 = vld [vmem:[#allocation12 + $0xed8] sm:$0xff] }
 0x3c9   :  { %8962 = vmatpush1.bf16.msra.mxu1 %v10575_v57  ;;  %v2915_v43 = vld [vmem:[#allocation12 + $0x1698] sm:$0xff]  ;;  %v10736_v56 = vcombine.high %v2659_v42, %v2667_v20  ;;  %v10735_v1 = vcombine.low %v2659_v42, %v2667_v20 }
 0x3ca   :  { %9003 = vmatpush1.bf16.msra.mxu0 %v10831_v58  ;;  %8963 = vmatprep.subr.bf16.mxu1 %v10560_v61  ;;  %v2923_v46 = vld [vmem:[#allocation12 + $0x16d8] sm:$0xff] }
 0x3cb   :  { %9004 = vmatprep.subr.bf16.mxu0 %v10816_v63  ;;  %v10992_v57 = vcombine.high %v2915_v43, %v2923_v46  ;;  %v2643_v58 = vld [vmem:[#allocation12 + $0xe18] sm:$0xff]  ;;  %v10991_v3 = vcombine.low %v2915_v43, %v2923_v46 }
 0x3cc   :  { %v2651_v61 = vld [vmem:[#allocation12 + $0xe58] sm:$0xff] }
 0x3cd   :  { %8964 = vmatpush1.bf16.msra.mxu1 %v10559_v45  ;;  %v2899_v63 = vld [vmem:[#allocation12 + $0x1618] sm:$0xff]  ;;  %v10720_v5 = vcombine.high %v2643_v58, %v2651_v61  ;;  %v10719_v50 = vcombine.low %v2643_v58, %v2651_v61  ;;  %v2316_v58 = vld [vmem:[#allocation12 + $0x3e0] sm:$0xff] }
 0x3ce   :  { %9005 = vmatpush1.bf16.msra.mxu0 %v10815_v2  ;;  %8965 = vmatprep.subr.bf16.mxu1 %v10544_v9  ;;  %v2907_v54 = vld [vmem:[#allocation12 + $0x1658] sm:$0xff] }
 0x3cf   :  { %9006 = vmatprep.subr.bf16.mxu0 %v10800_v10  ;;  %v10976_v45 = vcombine.high %v2899_v63, %v2907_v54  ;;  %v2627_v2 = vld [vmem:[#allocation12 + $0xd98] sm:$0xff]  ;;  %v10975_v8 = vcombine.low %v2899_v63, %v2907_v54 }
 0x3d0   :  { %v2635_v9 = vld [vmem:[#allocation12 + $0xdd8] sm:$0xff] }
 0x3d1   :  { %8966 = vmatpush1.bf16.msra.mxu1 %v10543_v14  ;;  %v2883_v10 = vld [vmem:[#allocation12 + $0x1598] sm:$0xff]  ;;  %v10704_v11 = vcombine.high %v2627_v2, %v2635_v9  ;;  %v10703_v27 = vcombine.low %v2627_v2, %v2635_v9  ;;  %v9784_v9 = vstv %s11801_s6  ;;  %s12157_s6 = sld [smem:[#allocation15 + $0x1f]] }
 0x3d2   :  { %9007 = vmatpush1.bf16.msra.mxu0 %v10799_v17  ;;  %8967 = vmatprep.subr.bf16.mxu1 %v10528_v19  ;;  %v2891_v44 = vld [vmem:[#allocation12 + $0x15d8] sm:$0xff] }
 0x3d3   :  { %9008 = vmatprep.subr.bf16.mxu0 %v10784_v53  ;;  %v10960_v14 = vcombine.high %v2883_v10, %v2891_v44  ;;  %v2611_v17 = vld [vmem:[#allocation12 + $0xd18] sm:$0xff]  ;;  %v10959_v29 = vcombine.low %v2883_v10, %v2891_v44  ;;  %v9787_v10 = vstv %s11803_s7  ;;  %v9790_v44 = vstv %s11805_s1  ;;  %s11320_s7 = sld [smem:[#allocation15 + $0x20]]  ;;  %s11552_s1 = smov [#allocation16]  }
 0x3d4   :  { %v2619_v19 = vld [vmem:[#allocation12 + $0xd58] sm:$0xff] }
 0x3d5   :  { %8968 = vmatpush1.bf16.msra.mxu1 %v10527_v13  ;;  %v2867_v53 = vld [vmem:[#allocation12 + $0x1518] sm:$0xff]  ;;  %v10688_v30 = vcombine.high %v2611_v17, %v2619_v19  ;;  %v10687_v33 = vcombine.low %v2611_v17, %v2619_v19  ;;  %v9733_v19 = vmax.f32 %v11781_v4, 0.0 }
 0x3d6   :  { %9009 = vmatpush1.bf16.msra.mxu0 %v10783_v32  ;;  %8969 = vmatprep.subr.bf16.mxu1 %v10768_v59  ;;  %v2875_v7 = vld [vmem:[#allocation12 + $0x1558] sm:$0xff] }
 0x3d7   :  { %9010 = vmatprep.subr.bf16.mxu0 %v11024_v60  ;;  %v10944_v13 = vcombine.high %v2867_v53, %v2875_v7  ;;  %v2595_v32 = vld [vmem:[#allocation12 + $0xc98] sm:$0xff]  ;;  %v10943_v34 = vcombine.low %v2867_v53, %v2875_v7 }
 0x3d8   :  { %v2603_v59 = vld [vmem:[#allocation12 + $0xcd8] sm:$0xff] }
 0x3d9   :  { %8970 = vmatpush2.bf16.msra.mxu1 %v10767_v36  ;;  %v2851_v60 = vld [vmem:[#allocation12 + $0x1498] sm:$0xff]  ;;  %v10672_v35 = vcombine.high %v2595_v32, %v2603_v59  ;;  %v10671_v20 = vcombine.low %v2595_v32, %v2603_v59  ;;  %v11826_v59 = vld [vmem:[#allocation12 + $0x2a0] sm:$0xff] }
 0x3da   :  { %9011 = vmatpush2.bf16.msra.mxu0 %v11023_v37  ;;  %8971 = vmatprep.subr.bf16.mxu1 %v10752_v38  ;;  %v2859_v0 = vld [vmem:[#allocation12 + $0x14d8] sm:$0xff] }
 0x3db   :  { %9012 = vmatprep.subr.bf16.mxu0 %v11008_v40  ;;  %v10928_v36 = vcombine.high %v2851_v60, %v2859_v0  ;;  %v2579_v37 = vld [vmem:[#allocation12 + $0xc18] sm:$0xff]  ;;  %v10927_v43 = vcombine.low %v2851_v60, %v2859_v0  ;;  %v11828_v60 = vld [vmem:[#allocation12 + $0x2e0] sm:$0xff]  ;;  %v9793_v0 = vstv %s11807_s20  ;;  %s9988_s20 = sshll.u32 %s11552_s1, 4  ;;  %s9989_s20 = int_to_ptr.vmem [resolvable:$true] %s9988_s20 }
 0x3dc   :  { %v2587_v38 = vld [vmem:[#allocation12 + $0xc58] sm:$0xff]  ;;  %p11512_p8 = scmp.lt.s32.totalorder %s9989_s20, %s9989_s20 }
 0x3dd   :  { %8972 = vmatpush2.bf16.msra.mxu1 %v10751_v47  ;;  %v2835_v40 = vld [vmem:[#allocation12 + $0x1418] sm:$0xff]  ;;  %v10656_v46 = vcombine.high %v2579_v37, %v2587_v38  ;;  %v10655_v61 = vcombine.low %v2579_v37, %v2587_v38  ;;  %v9803_v37 = vstv %s11811_s22  ;;  %v9808_v38 = vstv %s11813_s23 }
 0x3de   :  { %9013 = vmatpush2.bf16.msra.mxu0 %v11007_v49  ;;  %8973 = vmatprep.subr.bf16.mxu1 %v10736_v56  ;;  %v2843_v42 = vld [vmem:[#allocation12 + $0x1458] sm:$0xff] }
 0x3df   :  { %9014 = vmatprep.subr.bf16.mxu0 %v10992_v57  ;;  %v10912_v47 = vcombine.high %v2835_v40, %v2843_v42  ;;  %v3075_v49 = vld [vmem:[#allocation12 + $0x1b98] sm:$0xff]  ;;  %v2308_v57 = vld [vmem:[#allocation12 + $0x3a0] sm:$0xff]  ;;  %v10911_v63 = vcombine.low %v2835_v40, %v2843_v42 }
 0x3e0   :  { %v3083_v56 = vld [vmem:[#allocation12 + $0x1bd8] sm:$0xff] }
 0x3e1   :  { %8974 = vmatpush2.bf16.msra.mxu1 %v10735_v1  ;;  %v11152_v54 = vcombine.high %v3075_v49, %v3083_v56  ;;  %v9732_v1 = vmax.f32 %v11774_v62, 0.0  ;;  %v3067_v2 = vld [vmem:[#allocation12 + $0x1b58] sm:$0xff] }
 0x3e2   :  { %9015 = vmatpush2.bf16.msra.mxu0 %v10991_v3  ;;  %8975 = vmatprep.subr.bf16.mxu1 %v10720_v5  ;;  %v10386_v3 = vcombine.high %v2308_v57, %v2316_v58  ;;  %v9781_v5 = vstv %s11799_s4  ;;  %v11821_v53 = vld [vmem:[#allocation12 + $0x1a98] sm:$0xff]  ;;  %s12155_s4 = sld [smem:[#allocation15 + $0x1e]] }
 0x3e3   :  { %9016 = vmatprep.subr.bf16.mxu0 %v10976_v45  ;;  %v3059_v45 = vld [vmem:[#allocation12 + $0x1b18] sm:$0xff]  ;;  %v9782_v17 = vmul.f32 %v9781_v5, %v9732_v1 }
 0x3e4   :  { %v11136_v62 = vcombine.high %v3059_v45, %v3067_v2  ;;  %v11823_v7 = vld [vmem:[#allocation12 + $0x1ad8] sm:$0xff] }
 0x3e5   :  { %8976 = vmatpush2.bf16.msra.mxu1 %v10719_v50  ;;  %v11151_v50 = vcombine.low %v3075_v49, %v3083_v56  ;;  %v11120_v42 = vcombine.high %v11821_v53, %v11823_v7  ;;  %v10354_v49 = vcombine.high %v11826_v59, %v11828_v60  ;;  %v3035_v56 = vld [vmem:[#allocation12 + $0x1a58] sm:$0xff] }
 0x3e6   :  { %9017 = vmatpush2.bf16.msra.mxu0 %v10975_v8  ;;  %8977 = vmatprep.subr.bf16.mxu1 %v10704_v11  ;;  %v2292_v8 = vld [vmem:[#allocation12 + $0x320] sm:$0xff] }
 0x3e7   :  { %9018 = vmatprep.subr.bf16.mxu0 %v10960_v14  ;;  %v2300_v11 = vld [vmem:[#allocation12 + $0x360] sm:$0xff]  ;;  %v10385_v14 = vcombine.low %v2308_v57, %v2316_v58 }
 0x3e8   :  { %v10370_v32 = vcombine.high %v2292_v8, %v2300_v11  ;;  %v2260_v57 = vld [vmem:[#allocation12 + $0x220] sm:$0xff] }
 0x3e9   :  { %8978 = vmatpush2.bf16.msra.mxu1 %v10703_v27  ;;  %v9785_v27 = vmul.f32 %v9784_v9, %v9732_v1  ;;  %v2268_v58 = vld [vmem:[#allocation12 + $0x260] sm:$0xff] }
 0x3ea   :  { %9019 = vmatpush2.bf16.msra.mxu0 %v10959_v29  ;;  %8979 = vmatprep.subr.bf16.mxu1 %v10688_v30  ;;  %v9788_v29 = vmul.f32 %v9787_v10, %v9732_v1  ;;  %v9791_v30 = vmul.f32 %v9790_v44, %v9732_v1 }
 0x3eb   :  { %9020 = vmatprep.subr.bf16.mxu0 %v10944_v13 }
 0x3ed   :  { %8980 = vmatpush2.bf16.msra.mxu1 %v10687_v33 }
 0x3ee   :  { %9021 = vmatpush2.bf16.msra.mxu0 %v10943_v34  ;;  %8981 = vmatprep.subr.bf16.mxu1 %v10672_v35  ;;  %v11135_v34 = vcombine.low %v3059_v45, %v3067_v2  ;;  %v10369_v35 = vcombine.low %v2292_v8, %v2300_v11 }
 0x3ef   :  { %9022 = vmatprep.subr.bf16.mxu0 %v10928_v36  ;;  %v9798_v36 = vstv %s11809_s21  ;;  %s11507_s21 = scalar_lea.vmem %s9989_s20, 1024 }
 0x3f0   :  { %p11508_p7 = scmp.ne.s32.totalorder %s9989_s20, %s11507_s21  ;;  %p11513_p9 = scmp.lt.s32.totalorder %s11507_s21, %s11507_s21 }
 0x3f1   :  { %8982 = vmatpush2.bf16.msra.mxu1 %v10671_v20  ;;  %v3027_v20 = vld [vmem:[#allocation12 + $0x1a18] sm:$0xff] }
 0x3f2   :  { %9023 = vmatpush2.bf16.msra.mxu0 %v10927_v43  ;;  %8983 = vmatprep.subr.bf16.mxu1 %v10656_v46  ;;  %p11514_p10 = por %p11513_p9, %p11512_p8 }
 0x3f3   :  { %9024 = vmatprep.subr.bf16.mxu0 %v10912_v47 }
 0x3f4   :  { %p11515_p11 = pnand %p11514_p10, %p11508_p7 }
 0x3f5   :  { %8984 = vmatpush2.bf16.msra.mxu1 %v10655_v61  ;;  %v9786_v61 = vmul.f32 %v9784_v9, %v9733_v19  ;;  %v10353_v9 = vcombine.low %v11826_v59, %v11828_v60  ;;  %v2252_v59 = vld [vmem:[#allocation12 + $0x1e0] sm:$0xff]  ;;  %v11103_v60 = vcombine.low %v3027_v20, %v3035_v56 }
 0x3f6   :  { %9025 = vmatpush2.bf16.msra.mxu0 %v10911_v63  ;;  %9035 = vmatprep.subr.bf16.mxu1 %v11152_v54  ;;  %v9789_v63 = vmul.f32 %v9787_v10, %v9733_v19  ;;  %v9792_v54 = vmul.f32 %v9790_v44, %v9733_v19  ;;  %v11104_v10 = vcombine.high %v3027_v20, %v3035_v56 }
 0x3f7   :  { %9076 = vmatprep.subr.bf16.mxu0 %v10386_v3  ;;  %v11119_v3 = vcombine.low %v11821_v53, %v11823_v7  ;;  %v10338_v44 = vcombine.high %v2260_v57, %v2268_v58 }
 0x3f8   :  { %v8741_v13 = vpop.f32.mrf.mxu1  ;;  %8986 = vmatmul.mubr.bf16.vlgmr.msra.gmra.mxu1 %v11700_v52 }
 0x3f9   :  { %v8742_v4 = vadd.f32 %v8741_v13, %v11794_v15  ;;  %v11832_v33 = vpop.f32.mrf.mxu0  ;;  %9027 = vmatmul.mubr.bf16.vlgmr.msra.gmra.mxu0 %v11724_v23  ;;  %9036 = vmatpush1.bf16.msra.mxu1 %v11151_v50  ;;  %v9783_v15 = vmul.f32 %v9781_v5, %v9733_v19  ;;  %v3019_v19 = vld [vmem:[#allocation12 + $0x19d8] sm:$0xff] }
 0x3fa   :  { %9067 = vmatprep.mubr.bf16.mxu1 %v11737_v6  ;;  %9077 = vmatpush1.bf16.msra.mxu0 %v10385_v14  ;;  %v8743_v40 = vpop.f32.mrf.mxu1  ;;  %v3011_v14 = vld [vmem:[#allocation12 + $0x1998] sm:$0xff] }
 0x3fb   :  { %v9734_v43 = vmax.f32 %v8742_v4, 0.0  ;;  %9108 = vmatprep.mubr.bf16.mxu0 %v11676_v16  ;;  %v8744_v46 = vadd.f32 %v8743_v40, %v11797_v31  ;;  %v11843_v47 = vpop.f32.mrf.mxu0  ;;  %9037 = vmatprep.subr.bf16.mxu1 %v11136_v62  ;;  %v11087_v20 = vcombine.low %v3011_v14, %v3019_v19 }
 0x3fc   :  { %v8745_v1 = vpop.f32.mrf.mxu1  ;;  %9078 = vmatprep.subr.bf16.mxu0 %v10370_v32 }
 0x3fd   :  { %v9794_v5 = vmul.f32 %v9793_v0, %v9734_v43  ;;  %v9799_v45 = vmul.f32 %v9798_v36, %v9734_v43  ;;  %v9804_v31 = vmul.f32 %v9803_v37, %v9734_v43  ;;  %v9809_v2 = vmul.f32 %v9808_v38, %v9734_v43  ;;  %v8786_v50 = vpop.f32.mrf.mxu0  ;;  %9038 = vmatpush1.bf16.msra.mxu1 %v11135_v34 }
 0x3fe   :  { %v9735_v8 = vmax.f32 %v8744_v46, 0.0  ;;  %9079 = vmatpush1.bf16.msra.mxu0 %v10369_v35  ;;  %v8746_v11 = vpop.f32.mrf.mxu1  ;;  %9039 = vmatprep.subr.bf16.mxu1 %v11120_v42  ;;  %v2244_v42 = vld [vmem:[#allocation12 + $0x1a0] sm:$0xff]  ;;  %v10337_v43 = vcombine.low %v2260_v57, %v2268_v58  ;;  %v11088_v46 = vcombine.high %v3011_v14, %v3019_v19  ;;  %v2979_v58 = vld [vmem:[#allocation12 + $0x1898] sm:$0xff] }
 0x3ff   :  { %v11851_v62 = vadd.f32 %v9794_v5, %v9782_v17  ;;  %v11853_v53 = vadd.f32 %v9799_v45, %v9785_v27  ;;  %v11855_v7 = vadd.f32 %v9804_v31, %v9788_v29  ;;  %v11857_v13 = vadd.f32 %v9809_v2, %v9791_v30  ;;  %v8787_v32 = vpop.f32.mrf.mxu0  ;;  %9080 = vmatprep.subr.bf16.mxu0 %v10354_v49  ;;  %v2236_v49 = vld [vmem:[#allocation12 + $0x160] sm:$0xff]  ;;  %v2963_v31 = vld [vmem:[#allocation12 + $0x1818] sm:$0xff] }
 0x400   :  { %v9795_v4 = vmul.f32 %v9793_v0, %v9735_v8  ;;  %v9800_v34 = vmul.f32 %v9798_v36, %v9735_v8  ;;  %v9805_v35 = vmul.f32 %v9803_v37, %v9735_v8  ;;  %v9810_v40 = vmul.f32 %v9808_v38, %v9735_v8  ;;  %v2995_v36 = vld [vmem:[#allocation12 + $0x1918] sm:$0xff]  ;;  %v2228_v38 = vld [vmem:[#allocation12 + $0x120] sm:$0xff] }
 0x401   :  { %9040 = vmatpush1.bf16.msra.mxu1 %v11119_v3  ;;  %v10322_v0 = vcombine.high %v2244_v42, %v2252_v59  ;;  %v3003_v37 = vld [vmem:[#allocation12 + $0x1958] sm:$0xff]  ;;  %v10306_v57 = vcombine.high %v2228_v38, %v2236_v49  ;;  %v10305_v3 = vcombine.low %v2228_v38, %v2236_v49  ;;  %v2196_v50 = vld [vmem:[#allocation12 + $0x20] sm:$0xff] }
 0x402   :  { %v11859_v17 = vadd.f32 %v9795_v4, %v9783_v15  ;;  %v11861_v27 = vadd.f32 %v9800_v34, %v9786_v61  ;;  %v11863_v29 = vadd.f32 %v9805_v35, %v9789_v63  ;;  %v11865_v30 = vadd.f32 %v9810_v40, %v9792_v54  ;;  %9081 = vmatpush1.bf16.msra.mxu0 %v10353_v9  ;;  %v2987_v61 = vld [vmem:[#allocation12 + $0x18d8] sm:$0xff]  ;;  %v2212_v63 = vld [vmem:[#allocation12 + $0xa0] sm:$0xff] }
 0x403   :  { %9041 = vmatprep.subr.bf16.mxu1 %v11104_v10  ;;  %9082 = vmatprep.subr.bf16.mxu0 %v10338_v44  ;;  %v10321_v15 = vcombine.low %v2244_v42, %v2252_v59  ;;  %v11072_v56 = vcombine.high %v2995_v36, %v3003_v37  ;;  %v2220_v54 = vld [vmem:[#allocation12 + $0xe0] sm:$0xff]  ;;  %v11071_v1 = vcombine.low %v2995_v36, %v3003_v37  ;;  %v2971_v2 = vld [vmem:[#allocation12 + $0x1858] sm:$0xff] }
 0x404   :  { %v11056_v5 = vcombine.high %v2979_v58, %v2987_v61  ;;  %v10290_v45 = vcombine.high %v2212_v63, %v2220_v54  ;;  %v2204_v8 = vld [vmem:[#allocation12 + $0x60] sm:$0xff]  ;;  %v11055_v11 = vcombine.low %v2979_v58, %v2987_v61  ;;  %v10289_v9 = vcombine.low %v2212_v63, %v2220_v54  ;;  %v3203_v14 = vld [vmem:[#allocation12 + $0x1f98] sm:$0xff] }
 0x405   :  { %9042 = vmatpush1.bf16.msra.mxu1 %v11103_v60  ;;  %v11040_v10 = vcombine.high %v2963_v31, %v2971_v2  ;;  %v10274_v44 = vcombine.high %v2196_v50, %v2204_v8  ;;  %v3211_v19 = vld [vmem:[#allocation12 + $0x1fd8] sm:$0xff]  ;;  %v2436_v32 = vld [vmem:[#allocation12 + $0x7a0] sm:$0xff]  ;;  %v11039_v34 = vcombine.low %v2963_v31, %v2971_v2  ;;  %v10273_v35 = vcombine.low %v2196_v50, %v2204_v8 }
 0x406   :  { %9083 = vmatpush1.bf16.msra.mxu0 %v10337_v43  ;;  %9043 = vmatprep.subr.bf16.mxu1 %v11088_v46  ;;  %v2444_v4 = vld [vmem:[#allocation12 + $0x7e0] sm:$0xff]  ;;  %v11280_v40 = vcombine.high %v3203_v14, %v3211_v19  ;;  %v3187_v59 = vld [vmem:[#allocation12 + $0x1f18] sm:$0xff] }
 0x407   :  { %9084 = vmatprep.subr.bf16.mxu0 %v10322_v0  ;;  %v10514_v42 = vcombine.high %v2436_v32, %v2444_v4  ;;  %v3195_v60 = vld [vmem:[#allocation12 + $0x1f58] sm:$0xff]  ;;  %v2420_v43 = vld [vmem:[#allocation12 + $0x720] sm:$0xff]  ;;  %v11279_v0 = vcombine.low %v3203_v14, %v3211_v19  ;;  %v10513_v36 = vcombine.low %v2436_v32, %v2444_v4 }
 0x408   :  { %v2428_v46 = vld [vmem:[#allocation12 + $0x760] sm:$0xff]  ;;  %v11264_v37 = vcombine.high %v3187_v59, %v3195_v60  ;;  %v3171_v49 = vld [vmem:[#allocation12 + $0x1e98] sm:$0xff] }
 0x409   :  { %9044 = vmatpush1.bf16.msra.mxu1 %v11087_v20  ;;  %v10498_v38 = vcombine.high %v2420_v43, %v2428_v46  ;;  %v3179_v20 = vld [vmem:[#allocation12 + $0x1ed8] sm:$0xff]  ;;  %v10497_v58 = vcombine.low %v2420_v43, %v2428_v46 }
 0x40a   :  { %9085 = vmatpush1.bf16.msra.mxu0 %v10321_v15  ;;  %9045 = vmatprep.subr.bf16.mxu1 %v11072_v56  ;;  %v2404_v15 = vld [vmem:[#allocation12 + $0x6a0] sm:$0xff]  ;;  %v11248_v61 = vcombine.high %v3171_v49, %v3179_v20  ;;  %v3155_v54 = vld [vmem:[#allocation12 + $0x1e18] sm:$0xff] }
 0x40b   :  { %9086 = vmatprep.subr.bf16.mxu0 %v10306_v57  ;;  %v2412_v56 = vld [vmem:[#allocation12 + $0x6e0] sm:$0xff]  ;;  %v11263_v57 = vcombine.low %v3187_v59, %v3195_v60  ;;  %v3139_v8 = vld [vmem:[#allocation12 + $0x1d98] sm:$0xff] }
 0x40c   :  { %v10482_v63 = vcombine.high %v2404_v15, %v2412_v56  ;;  %v10481_v31 = vcombine.low %v2404_v15, %v2412_v56  ;;  %v3123_v4 = vld [vmem:[#allocation12 + $0x1d18] sm:$0xff] }
 0x40d   :  { %9046 = vmatpush1.bf16.msra.mxu1 %v11071_v1  ;;  %v3163_v1 = vld [vmem:[#allocation12 + $0x1e58] sm:$0xff] }
 0x40e   :  { %9087 = vmatpush1.bf16.msra.mxu0 %v10305_v3  ;;  %9047 = vmatprep.subr.bf16.mxu1 %v11056_v5  ;;  %v2388_v3 = vld [vmem:[#allocation12 + $0x620] sm:$0xff]  ;;  %v11232_v2 = vcombine.high %v3155_v54, %v3163_v1  ;;  %v3107_v46 = vld [vmem:[#allocation12 + $0x1c98] sm:$0xff] }
 0x40f   :  { %9088 = vmatprep.subr.bf16.mxu0 %v10290_v45  ;;  %v2396_v5 = vld [vmem:[#allocation12 + $0x660] sm:$0xff]  ;;  %v11247_v45 = vcombine.low %v3171_v49, %v3179_v20  ;;  %v3091_v56 = vld [vmem:[#allocation12 + $0x1c18] sm:$0xff] }
 0x410   :  { %v10466_v50 = vcombine.high %v2388_v3, %v2396_v5  ;;  %v10465_v14 = vcombine.low %v2388_v3, %v2396_v5  ;;  %v2564_v5 = vld [vmem:[#allocation12 + $0xba0] sm:$0xff] }
 0x411   :  { %9048 = vmatpush1.bf16.msra.mxu1 %v11055_v11  ;;  %v3147_v11 = vld [vmem:[#allocation12 + $0x1dd8] sm:$0xff] }
 0x412   :  { %9089 = vmatpush1.bf16.msra.mxu0 %v10289_v9  ;;  %9049 = vmatprep.subr.bf16.mxu1 %v11040_v10  ;;  %v2372_v9 = vld [vmem:[#allocation12 + $0x5a0] sm:$0xff]  ;;  %v11216_v19 = vcombine.high %v3139_v8, %v3147_v11 }
 0x413   :  { %9090 = vmatprep.subr.bf16.mxu0 %v10274_v44  ;;  %v2380_v10 = vld [vmem:[#allocation12 + $0x5e0] sm:$0xff]  ;;  %v11231_v44 = vcombine.low %v3155_v54, %v3163_v1 }
 0x414   :  { %v10450_v32 = vcombine.high %v2372_v9, %v2380_v10  ;;  %v10449_v59 = vcombine.low %v2372_v9, %v2380_v10  ;;  %v3239_v9 = vrot.slane %v11783_v39, %v11711_v41 }
 0x415   :  { %9050 = vmatpush1.bf16.msra.mxu1 %v11039_v34  ;;  %v3131_v34 = vld [vmem:[#allocation12 + $0x1d58] sm:$0xff] }
 0x416   :  { %9091 = vmatpush1.bf16.msra.mxu0 %v10273_v35  ;;  %9051 = vmatprep.subr.bf16.mxu1 %v11280_v40  ;;  %v2356_v35 = vld [vmem:[#allocation12 + $0x520] sm:$0xff]  ;;  %v11200_v60 = vcombine.high %v3123_v4, %v3131_v34 }
 0x417   :  { %9092 = vmatprep.subr.bf16.mxu0 %v10514_v42  ;;  %v2364_v40 = vld [vmem:[#allocation12 + $0x560] sm:$0xff]  ;;  %v11215_v42 = vcombine.low %v3139_v8, %v3147_v11 }
 0x418   :  { %v10434_v43 = vcombine.high %v2356_v35, %v2364_v40  ;;  %v10433_v49 = vcombine.low %v2356_v35, %v2364_v40  ;;  %v8783_v40 = vadd.f32 %v11832_v33, %v3239_v9 }
 0x419   :  { %9052 = vmatpush2.bf16.msra.mxu1 %v11279_v0  ;;  %v3115_v0 = vld [vmem:[#allocation12 + $0x1cd8] sm:$0xff] }
 0x41a   :  { %9093 = vmatpush2.bf16.msra.mxu0 %v10513_v36  ;;  %9053 = vmatprep.subr.bf16.mxu1 %v11264_v37  ;;  %v2340_v36 = vld [vmem:[#allocation12 + $0x4a0] sm:$0xff]  ;;  %v11184_v20 = vcombine.high %v3107_v46, %v3115_v0 }
 0x41b   :  { %9094 = vmatprep.subr.bf16.mxu0 %v10498_v38  ;;  %v2348_v37 = vld [vmem:[#allocation12 + $0x4e0] sm:$0xff]  ;;  %v11199_v38 = vcombine.low %v3123_v4, %v3131_v34 }
 0x41c   :  { %v10418_v15 = vcombine.high %v2340_v36, %v2348_v37  ;;  %v10417_v54 = vcombine.low %v2340_v36, %v2348_v37  ;;  %v2804_v4 = vld [vmem:[#allocation12 + $0x1320] sm:$0xff] }
 0x41d   :  { %9054 = vmatpush2.bf16.msra.mxu1 %v11263_v57  ;;  %v3099_v57 = vld [vmem:[#allocation12 + $0x1c58] sm:$0xff]  ;;  %v2812_v34 = vld [vmem:[#allocation12 + $0x1360] sm:$0xff] }
 0x41e   :  { %9095 = vmatpush2.bf16.msra.mxu0 %v10497_v58  ;;  %9055 = vmatprep.subr.bf16.mxu1 %v11248_v61  ;;  %v2324_v58 = vld [vmem:[#allocation12 + $0x420] sm:$0xff]  ;;  %v11168_v1 = vcombine.high %v3091_v56, %v3099_v57 }
 0x41f   :  { %9096 = vmatprep.subr.bf16.mxu0 %v10482_v63  ;;  %v2332_v61 = vld [vmem:[#allocation12 + $0x460] sm:$0xff]  ;;  %v11183_v63 = vcombine.low %v3107_v46, %v3115_v0  ;;  %v10882_v46 = vcombine.high %v2804_v4, %v2812_v34 }
 0x420   :  { %v10402_v3 = vcombine.high %v2324_v58, %v2332_v61  ;;  %v10401_v8 = vcombine.low %v2324_v58, %v2332_v61  ;;  %v2788_v0 = vld [vmem:[#allocation12 + $0x12a0] sm:$0xff] }
 0x421   :  { %9056 = vmatpush2.bf16.msra.mxu1 %v11247_v45  ;;  %v2572_v45 = vld [vmem:[#allocation12 + $0xbe0] sm:$0xff] }
 0x422   :  { %9097 = vmatpush2.bf16.msra.mxu0 %v10481_v31  ;;  %9057 = vmatprep.subr.bf16.mxu1 %v11232_v2  ;;  %v2820_v31 = vld [vmem:[#allocation12 + $0x13a0] sm:$0xff]  ;;  %v10642_v11 = vcombine.high %v2564_v5, %v2572_v45 }
 0x423   :  { %9098 = vmatprep.subr.bf16.mxu0 %v10466_v50  ;;  %v2828_v2 = vld [vmem:[#allocation12 + $0x13e0] sm:$0xff]  ;;  %v11167_v50 = vcombine.low %v3091_v56, %v3099_v57 }
 0x424   :  { %v10898_v10 = vcombine.high %v2820_v31, %v2828_v2  ;;  %v10897_v35 = vcombine.low %v2820_v31, %v2828_v2  ;;  %v2796_v36 = vld [vmem:[#allocation12 + $0x12e0] sm:$0xff] }
 0x425   :  { %9058 = vmatpush2.bf16.msra.mxu1 %v11231_v44  ;;  %v2548_v44 = vld [vmem:[#allocation12 + $0xb20] sm:$0xff] }
 0x426   :  { %9099 = vmatpush2.bf16.msra.mxu0 %v10465_v14  ;;  %9059 = vmatprep.subr.bf16.mxu1 %v11216_v19  ;;  %v2556_v14 = vld [vmem:[#allocation12 + $0xb60] sm:$0xff]  ;;  %v3243_v19 = vrot.slane %v11783_v39, %v11714_v48 }
 0x427   :  { %9100 = vmatprep.subr.bf16.mxu0 %v10450_v32  ;;  %v10641_v32 = vcombine.low %v2564_v5, %v2572_v45  ;;  %v2516_v61 = vld [vmem:[#allocation12 + $0xa20] sm:$0xff] }
 0x428   :  { %v8785_v39 = vadd.f32 %v11843_v47, %v3243_v19  ;;  %v10866_v47 = vcombine.high %v2788_v0, %v2796_v36  ;;  %v2764_v19 = vld [vmem:[#allocation12 + $0x11e0] sm:$0xff] }
 0x429   :  { %9060 = vmatpush2.bf16.msra.mxu1 %v11215_v42  ;;  %v10626_v42 = vcombine.high %v2548_v44, %v2556_v14 }
 0x42a   :  { %9101 = vmatpush2.bf16.msra.mxu0 %v10449_v59  ;;  %9061 = vmatprep.subr.bf16.mxu1 %v11200_v60  ;;  %v2532_v59 = vld [vmem:[#allocation12 + $0xaa0] sm:$0xff] }
 0x42b   :  { %9102 = vmatprep.subr.bf16.mxu0 %v10434_v43  ;;  %v2540_v60 = vld [vmem:[#allocation12 + $0xae0] sm:$0xff] }
 0x42c   :  { %v10609_v31 = vcombine.low %v2532_v59, %v2540_v60 }
 0x42d   :  { %9062 = vmatpush2.bf16.msra.mxu1 %v11199_v38 }
 0x42e   :  { %9103 = vmatpush2.bf16.msra.mxu0 %v10433_v49  ;;  %9063 = vmatprep.subr.bf16.mxu1 %v11184_v20  ;;  %v10625_v49 = vcombine.low %v2548_v44, %v2556_v14  ;;  %v10881_v20 = vcombine.low %v2804_v4, %v2812_v34  ;;  %v2508_v44 = vld [vmem:[#allocation12 + $0x9e0] sm:$0xff] }
 0x42f   :  { %9104 = vmatprep.subr.bf16.mxu0 %v10418_v15  ;;  %v10610_v15 = vcombine.high %v2532_v59, %v2540_v60  ;;  %v2756_v14 = vld [vmem:[#allocation12 + $0x11a0] sm:$0xff] }
 0x430   :  { %v2740_v59 = vld [vmem:[#allocation12 + $0x1120] sm:$0xff] }
 0x431   :  { %9064 = vmatpush2.bf16.msra.mxu1 %v11183_v63  ;;  %v2524_v63 = vld [vmem:[#allocation12 + $0xa60] sm:$0xff] }
 0x432   :  { %9105 = vmatpush2.bf16.msra.mxu0 %v10417_v54  ;;  %9065 = vmatprep.subr.bf16.mxu1 %v11168_v1  ;;  %v2772_v1 = vld [vmem:[#allocation12 + $0x1220] sm:$0xff] }
 0x433   :  { %9106 = vmatprep.subr.bf16.mxu0 %v10402_v3  ;;  %v2780_v3 = vld [vmem:[#allocation12 + $0x1260] sm:$0xff] }
 0x434   :  { %v10850_v9 = vcombine.high %v2772_v1, %v2780_v3  ;;  %v10849_v4 = vcombine.low %v2772_v1, %v2780_v3  ;;  %v2748_v60 = vld [vmem:[#allocation12 + $0x1160] sm:$0xff] }
 0x435   :  { %9066 = vmatpush2.bf16.msra.mxu1 %v11167_v50  ;;  %v10865_v50 = vcombine.low %v2788_v0, %v2796_v36  ;;  %v10818_v36 = vcombine.high %v2740_v59, %v2748_v60 }
 0x436   :  { %9107 = vmatpush2.bf16.msra.mxu0 %v10401_v8  ;;  %9117 = vmatprep.subr.bf16.mxu1 %v10642_v11  ;;  %v10594_v8 = vcombine.high %v2516_v61, %v2524_v63 }
 0x437   :  { %9158 = vmatprep.subr.bf16.mxu0 %v10898_v10  ;;  %v2500_v10 = vld [vmem:[#allocation12 + $0x9a0] sm:$0xff] }
 0x438   :  { %v8823_v43 = vpop.f32.mrf.mxu1  ;;  %9068 = vmatmul.mubr.bf16.vlgmr.msra.gmra.mxu1 %v11739_v55  ;;  %v10578_v34 = vcombine.high %v2500_v10, %v2508_v44 }
 0x439   :  { %v8824_v37 = vadd.f32 %v8823_v43, %v8783_v40  ;;  %v8864_v38 = vpop.f32.mrf.mxu0  ;;  %9109 = vmatmul.mubr.bf16.vlgmr.msra.gmra.mxu0 %v11691_v12  ;;  %9118 = vmatpush1.bf16.msra.mxu1 %v10641_v32  ;;  %v10593_v32 = vcombine.low %v2516_v61, %v2524_v63  ;;  %v2484_v40 = vld [vmem:[#allocation12 + $0x920] sm:$0xff]  ;;  %v10577_v43 = vcombine.low %v2500_v10, %v2508_v44 }
 0x43a   :  { %9149 = vmatprep.mubr.bf16.mxu1 %v11696_v51  ;;  %9159 = vmatpush1.bf16.msra.mxu0 %v10897_v35  ;;  %v8825_v33 = vpop.f32.mrf.mxu1  ;;  %v10834_v35 = vcombine.high %v2756_v14, %v2764_v19  ;;  %v2708_v61 = vld [vmem:[#allocation12 + $0x1020] sm:$0xff] }
 0x43b   :  { %v11876_v56 = vadd.f32 %v8864_v38, %v8824_v37  ;;  %9190 = vmatprep.mubr.bf16.mxu0 %v11722_v18  ;;  %v8826_v57 = vadd.f32 %v8825_v33, %v8785_v39  ;;  %v8866_v58 = vpop.f32.mrf.mxu0  ;;  %9119 = vmatprep.subr.bf16.mxu1 %v10626_v42  ;;  %v2492_v42 = vld [vmem:[#allocation12 + $0x960] sm:$0xff] }
 0x43c   :  { %v8827_v54 = vpop.f32.mrf.mxu1  ;;  %9160 = vmatprep.subr.bf16.mxu0 %v10882_v46  ;;  %v10833_v46 = vcombine.low %v2756_v14, %v2764_v19  ;;  %v10562_v0 = vcombine.high %v2484_v40, %v2492_v42  ;;  %v2468_v39 = vld [vmem:[#allocation12 + $0x8a0] sm:$0xff]  ;;  %v10561_v33 = vcombine.low %v2484_v40, %v2492_v42 }
 0x43d   :  { %v11879_v5 = vadd.f32 %v8866_v58, %v8826_v57  ;;  %v8868_v45 = vpop.f32.mrf.mxu0  ;;  %9120 = vmatpush1.bf16.msra.mxu1 %v10625_v49  ;;  %v2476_v37 = vld [vmem:[#allocation12 + $0x8e0] sm:$0xff] }
 0x43e   :  { %9161 = vmatpush1.bf16.msra.mxu0 %v10881_v20  ;;  %v8828_v2 = vpop.f32.mrf.mxu1  ;;  %9121 = vmatprep.subr.bf16.mxu1 %v10610_v15  ;;  %v2724_v38 = vld [vmem:[#allocation12 + $0x10a0] sm:$0xff]  ;;  %v10817_v20 = vcombine.low %v2740_v59, %v2748_v60  ;;  %v10546_v15 = vcombine.high %v2468_v39, %v2476_v37  ;;  %v10545_v54 = vcombine.low %v2468_v39, %v2476_v37 }
 0x43f   :  { %v8869_v11 = vpop.f32.mrf.mxu0  ;;  %9162 = vmatprep.subr.bf16.mxu0 %v10866_v47  ;;  %v2732_v49 = vld [vmem:[#allocation12 + $0x10e0] sm:$0xff] }
 0x440   :  { %v10802_v57 = vcombine.high %v2724_v38, %v2732_v49  ;;  %v2452_v58 = vld [vmem:[#allocation12 + $0x820] sm:$0xff]  ;;  %v10801_v1 = vcombine.low %v2724_v38, %v2732_v49 }
 0x441   :  { %9122 = vmatpush1.bf16.msra.mxu1 %v10609_v31  ;;  %v2460_v47 = vld [vmem:[#allocation12 + $0x860] sm:$0xff] }
 0x442   :  { %9163 = vmatpush1.bf16.msra.mxu0 %v10865_v50  ;;  %9123 = vmatprep.subr.bf16.mxu1 %v10594_v8  ;;  %v2716_v63 = vld [vmem:[#allocation12 + $0x1060] sm:$0xff]  ;;  %v10530_v3 = vcombine.high %v2452_v58, %v2460_v47  ;;  %v10529_v11 = vcombine.low %v2452_v58, %v2460_v47 }
 0x443   :  { %9164 = vmatprep.subr.bf16.mxu0 %v10850_v9  ;;  %v10786_v45 = vcombine.high %v2708_v61, %v2716_v63  ;;  %v2692_v31 = vld [vmem:[#allocation12 + $0xfa0] sm:$0xff]  ;;  %v10785_v9 = vcombine.low %v2708_v61, %v2716_v63 }
 0x444   :  { %v2700_v2 = vld [vmem:[#allocation12 + $0xfe0] sm:$0xff] }
 0x445   :  { %9124 = vmatpush1.bf16.msra.mxu1 %v10593_v32  ;;  %v2948_v50 = vld [vmem:[#allocation12 + $0x17a0] sm:$0xff]  ;;  %v10770_v10 = vcombine.high %v2692_v31, %v2700_v2 }
 0x446   :  { %9165 = vmatpush1.bf16.msra.mxu0 %v10849_v4  ;;  %9125 = vmatprep.subr.bf16.mxu1 %v10578_v34  ;;  %v2956_v8 = vld [vmem:[#allocation12 + $0x17e0] sm:$0xff]  ;;  %v10769_v34 = vcombine.low %v2692_v31, %v2700_v2 }
 0x447   :  { %9166 = vmatprep.subr.bf16.mxu0 %v10834_v35  ;;  %v11026_v44 = vcombine.high %v2948_v50, %v2956_v8  ;;  %v2676_v14 = vld [vmem:[#allocation12 + $0xf20] sm:$0xff]  ;;  %v11025_v35 = vcombine.low %v2948_v50, %v2956_v8 }
 0x448   :  { %v2684_v19 = vld [vmem:[#allocation12 + $0xf60] sm:$0xff] }
 0x449   :  { %9126 = vmatpush1.bf16.msra.mxu1 %v10577_v43  ;;  %v2932_v32 = vld [vmem:[#allocation12 + $0x1720] sm:$0xff]  ;;  %v10754_v40 = vcombine.high %v2676_v14, %v2684_v19 }
 0x44a   :  { %9167 = vmatpush1.bf16.msra.mxu0 %v10833_v46  ;;  %9127 = vmatprep.subr.bf16.mxu1 %v10562_v0  ;;  %v2940_v4 = vld [vmem:[#allocation12 + $0x1760] sm:$0xff]  ;;  %v10753_v0 = vcombine.low %v2676_v14, %v2684_v19 }
 0x44b   :  { %9168 = vmatprep.subr.bf16.mxu0 %v10818_v36  ;;  %v11010_v42 = vcombine.high %v2932_v32, %v2940_v4  ;;  %v2660_v59 = vld [vmem:[#allocation12 + $0xea0] sm:$0xff]  ;;  %v11009_v36 = vcombine.low %v2932_v32, %v2940_v4 }
 0x44c   :  { %v2668_v60 = vld [vmem:[#allocation12 + $0xee0] sm:$0xff] }
 0x44d   :  { %9128 = vmatpush1.bf16.msra.mxu1 %v10561_v33  ;;  %v2916_v43 = vld [vmem:[#allocation12 + $0x16a0] sm:$0xff]  ;;  %v10738_v39 = vcombine.high %v2660_v59, %v2668_v60 }
 0x44e   :  { %9169 = vmatpush1.bf16.msra.mxu0 %v10817_v20  ;;  %9129 = vmatprep.subr.bf16.mxu1 %v10546_v15  ;;  %v2924_v46 = vld [vmem:[#allocation12 + $0x16e0] sm:$0xff]  ;;  %v10737_v15 = vcombine.low %v2660_v59, %v2668_v60 }
 0x44f   :  { %9170 = vmatprep.subr.bf16.mxu0 %v10802_v57  ;;  %v10994_v37 = vcombine.high %v2916_v43, %v2924_v46  ;;  %v2644_v38 = vld [vmem:[#allocation12 + $0xe20] sm:$0xff]  ;;  %v10993_v57 = vcombine.low %v2916_v43, %v2924_v46 }
 0x450   :  { %v2652_v49 = vld [vmem:[#allocation12 + $0xe60] sm:$0xff] }
 0x451   :  { %9130 = vmatpush1.bf16.msra.mxu1 %v10545_v54  ;;  %v2900_v33 = vld [vmem:[#allocation12 + $0x1620] sm:$0xff]  ;;  %v10722_v58 = vcombine.high %v2644_v38, %v2652_v49 }
 0x452   :  { %9171 = vmatpush1.bf16.msra.mxu0 %v10801_v1  ;;  %9131 = vmatprep.subr.bf16.mxu1 %v10530_v3  ;;  %v2908_v20 = vld [vmem:[#allocation12 + $0x1660] sm:$0xff]  ;;  %v10721_v3 = vcombine.low %v2644_v38, %v2652_v49 }
 0x453   :  { %9172 = vmatprep.subr.bf16.mxu0 %v10786_v45  ;;  %v10978_v47 = vcombine.high %v2900_v33, %v2908_v20  ;;  %v2628_v61 = vld [vmem:[#allocation12 + $0xda0] sm:$0xff]  ;;  %v10977_v45 = vcombine.low %v2900_v33, %v2908_v20 }
 0x454   :  { %v2636_v63 = vld [vmem:[#allocation12 + $0xde0] sm:$0xff] }
 0x455   :  { %9132 = vmatpush1.bf16.msra.mxu1 %v10529_v11  ;;  %v2884_v54 = vld [vmem:[#allocation12 + $0x15a0] sm:$0xff]  ;;  %v10706_v31 = vcombine.high %v2628_v61, %v2636_v63 }
 0x456   :  { %9173 = vmatpush1.bf16.msra.mxu0 %v10785_v9  ;;  %9133 = vmatprep.subr.bf16.mxu1 %v10770_v10  ;;  %v2892_v1 = vld [vmem:[#allocation12 + $0x15e0] sm:$0xff]  ;;  %v10705_v10 = vcombine.low %v2628_v61, %v2636_v63 }
 0x457   :  { %9174 = vmatprep.subr.bf16.mxu0 %v11026_v44  ;;  %v10962_v2 = vcombine.high %v2884_v54, %v2892_v1  ;;  %v2612_v50 = vld [vmem:[#allocation12 + $0xd20] sm:$0xff]  ;;  %v10961_v44 = vcombine.low %v2884_v54, %v2892_v1 }
 0x458   :  { %v2620_v8 = vld [vmem:[#allocation12 + $0xd60] sm:$0xff] }
 0x459   :  { %9134 = vmatpush2.bf16.msra.mxu1 %v10769_v34  ;;  %v2868_v11 = vld [vmem:[#allocation12 + $0x1520] sm:$0xff]  ;;  %v10690_v14 = vcombine.high %v2612_v50, %v2620_v8 }
 0x45a   :  { %9175 = vmatpush2.bf16.msra.mxu0 %v11025_v35  ;;  %9135 = vmatprep.subr.bf16.mxu1 %v10754_v40  ;;  %v2876_v9 = vld [vmem:[#allocation12 + $0x1560] sm:$0xff]  ;;  %v10689_v40 = vcombine.low %v2612_v50, %v2620_v8 }
 0x45b   :  { %9176 = vmatprep.subr.bf16.mxu0 %v11010_v42  ;;  %v10946_v19 = vcombine.high %v2868_v11, %v2876_v9  ;;  %v2596_v32 = vld [vmem:[#allocation12 + $0xca0] sm:$0xff]  ;;  %v10945_v42 = vcombine.low %v2868_v11, %v2876_v9 }
 0x45c   :  { %v2604_v4 = vld [vmem:[#allocation12 + $0xce0] sm:$0xff] }
 0x45d   :  { %9136 = vmatpush2.bf16.msra.mxu1 %v10753_v0  ;;  %v2852_v34 = vld [vmem:[#allocation12 + $0x14a0] sm:$0xff]  ;;  %v10674_v59 = vcombine.high %v2596_v32, %v2604_v4 }
 0x45e   :  { %9177 = vmatpush2.bf16.msra.mxu0 %v11009_v36  ;;  %9137 = vmatprep.subr.bf16.mxu1 %v10738_v39  ;;  %v2860_v35 = vld [vmem:[#allocation12 + $0x14e0] sm:$0xff]  ;;  %v10673_v39 = vcombine.low %v2596_v32, %v2604_v4  ;;  %v9813_v32 = vstv %s11881_s24 }
 0x45f   :  { %9178 = vmatprep.subr.bf16.mxu0 %v10994_v37  ;;  %v10930_v60 = vcombine.high %v2852_v34, %v2860_v35  ;;  %v2580_v43 = vld [vmem:[#allocation12 + $0xc20] sm:$0xff]  ;;  %v10929_v37 = vcombine.low %v2852_v34, %v2860_v35 }
 0x460   :  { %v2588_v46 = vld [vmem:[#allocation12 + $0xc60] sm:$0xff] }
 0x461   :  { %9138 = vmatpush2.bf16.msra.mxu1 %v10737_v15  ;;  %v2836_v0 = vld [vmem:[#allocation12 + $0x1420] sm:$0xff]  ;;  %v10658_v38 = vcombine.high %v2580_v43, %v2588_v46  ;;  %v2309_v15 = vld [vmem:[#allocation12 + $0x3a8] sm:$0xff] }
 0x462   :  { %9179 = vmatpush2.bf16.msra.mxu0 %v10993_v57  ;;  %9139 = vmatprep.subr.bf16.mxu1 %v10722_v58  ;;  %v2844_v36 = vld [vmem:[#allocation12 + $0x1460] sm:$0xff]  ;;  %v2317_v57 = vld [vmem:[#allocation12 + $0x3e8] sm:$0xff]  ;;  %v10657_v58 = vcombine.low %v2580_v43, %v2588_v46 }
 0x463   :  { %9180 = vmatprep.subr.bf16.mxu0 %v10978_v47  ;;  %v10914_v49 = vcombine.high %v2836_v0, %v2844_v36  ;;  %v3076_v33 = vld [vmem:[#allocation12 + $0x1ba0] sm:$0xff]  ;;  %v10913_v47 = vcombine.low %v2836_v0, %v2844_v36  ;;  %v10388_v63 = vcombine.high %v2309_v15, %v2317_v57 }
 0x464   :  { %v3084_v20 = vld [vmem:[#allocation12 + $0x1be0] sm:$0xff] }
 0x465   :  { %9140 = vmatpush2.bf16.msra.mxu1 %v10721_v3  ;;  %v11154_v61 = vcombine.high %v3076_v33, %v3084_v20  ;;  %v3060_v54 = vld [vmem:[#allocation12 + $0x1b20] sm:$0xff]  ;;  %v11153_v3 = vcombine.low %v3076_v33, %v3084_v20 }
 0x466   :  { %9181 = vmatpush2.bf16.msra.mxu0 %v10977_v45  ;;  %9141 = vmatprep.subr.bf16.mxu1 %v10706_v31  ;;  %v3068_v1 = vld [vmem:[#allocation12 + $0x1b60] sm:$0xff]  ;;  %v2293_v45 = vld [vmem:[#allocation12 + $0x328] sm:$0xff] }
 0x467   :  { %9182 = vmatprep.subr.bf16.mxu0 %v10962_v2  ;;  %v2301_v31 = vld [vmem:[#allocation12 + $0x368] sm:$0xff]  ;;  %v10387_v2 = vcombine.low %v2309_v15, %v2317_v57  ;;  %v11138_v50 = vcombine.high %v3060_v54, %v3068_v1  ;;  %v3044_v8 = vld [vmem:[#allocation12 + $0x1aa0] sm:$0xff]  ;;  %v11137_v34 = vcombine.low %v3060_v54, %v3068_v1 }
 0x468   :  { %v3052_v11 = vld [vmem:[#allocation12 + $0x1ae0] sm:$0xff]  ;;  %v10371_v35 = vcombine.low %v2293_v45, %v2301_v31 }
 0x469   :  { %9142 = vmatpush2.bf16.msra.mxu1 %v10705_v10  ;;  %v10372_v10 = vcombine.high %v2293_v45, %v2301_v31  ;;  %v11122_v43 = vcombine.high %v3044_v8, %v3052_v11  ;;  %v3028_v46 = vld [vmem:[#allocation12 + $0x1a20] sm:$0xff]  ;;  %v11121_v20 = vcombine.low %v3044_v8, %v3052_v11 }
 0x46a   :  { %9183 = vmatpush2.bf16.msra.mxu0 %v10961_v44  ;;  %9143 = vmatprep.subr.bf16.mxu1 %v10690_v14  ;;  %v11890_v44 = vld [vmem:[#allocation12 + $0x2a8] sm:$0xff]  ;;  %v3012_v45 = vld [vmem:[#allocation12 + $0x19a0] sm:$0xff] }
 0x46b   :  { %9184 = vmatprep.subr.bf16.mxu0 %v10946_v19  ;;  %v11892_v14 = vld [vmem:[#allocation12 + $0x2e8] sm:$0xff]  ;;  %v3020_v31 = vld [vmem:[#allocation12 + $0x19e0] sm:$0xff] }
 0x46c   :  { %v10355_v54 = vcombine.low %v11890_v44, %v11892_v14 }
 0x46d   :  { %9144 = vmatpush2.bf16.msra.mxu1 %v10689_v40  ;;  %v9818_v40 = vstv %s11883_s3 }
 0x46e   :  { %9185 = vmatpush2.bf16.msra.mxu0 %v10945_v42  ;;  %9145 = vmatprep.subr.bf16.mxu1 %v10674_v59  ;;  %v9823_v42 = vstv %s11885_s25  ;;  %v9828_v59 = vstv %s11887_s26 }
 0x46f   :  { %9186 = vmatprep.subr.bf16.mxu0 %v10930_v60 }
 0x471   :  { %9146 = vmatpush2.bf16.msra.mxu1 %v10673_v39  ;;  %v10356_v39 = vcombine.high %v11890_v44, %v11892_v14 }
 0x472   :  { %9187 = vmatpush2.bf16.msra.mxu0 %v10929_v37  ;;  %9147 = vmatprep.subr.bf16.mxu1 %v10658_v38  ;;  %v3036_v37 = vld [vmem:[#allocation12 + $0x1a60] sm:$0xff]  ;;  %v2261_v38 = vld [vmem:[#allocation12 + $0x228] sm:$0xff] }
 0x473   :  { %9188 = vmatprep.subr.bf16.mxu0 %v10914_v49  ;;  %v2269_v49 = vld [vmem:[#allocation12 + $0x268] sm:$0xff]  ;;  %v11106_v1 = vcombine.high %v3028_v46, %v3036_v37 }
 0x475   :  { %9148 = vmatpush2.bf16.msra.mxu1 %v10657_v58 }
 0x476   :  { %9189 = vmatpush2.bf16.msra.mxu0 %v10913_v47  ;;  %9199 = vmatprep.subr.bf16.mxu1 %v11154_v61 }
 0x477   :  { %9240 = vmatprep.subr.bf16.mxu0 %v10388_v63 }
 0x478   :  { %v8905_v9 = vpop.f32.mrf.mxu1  ;;  %9150 = vmatmul.mubr.bf16.vlgmr.msra.gmra.mxu1 %v11700_v52 }
 0x479   :  { %v8906_v19 = vadd.f32 %v8905_v9, %v11876_v56  ;;  %v11896_v4 = vpop.f32.mrf.mxu0  ;;  %9191 = vmatmul.mubr.bf16.vlgmr.msra.gmra.mxu0 %v11724_v23  ;;  %9200 = vmatpush1.bf16.msra.mxu1 %v11153_v3  ;;  %v10340_v3 = vcombine.high %v2261_v38, %v2269_v49 }
 0x47a   :  { %9231 = vmatprep.mubr.bf16.mxu1 %v11737_v6  ;;  %9241 = vmatpush1.bf16.msra.mxu0 %v10387_v2  ;;  %v8907_v60 = vpop.f32.mrf.mxu1 }
 0x47b   :  { %v9736_v0 = vmax.f32 %v8906_v19, 0.0  ;;  %9272 = vmatprep.mubr.bf16.mxu0 %v11676_v16  ;;  %v8908_v56 = vadd.f32 %v8907_v60, %v11879_v5  ;;  %v11905_v36 = vpop.f32.mrf.mxu0  ;;  %9201 = vmatprep.subr.bf16.mxu1 %v11138_v50  ;;  %v10339_v60 = vcombine.low %v2261_v38, %v2269_v49  ;;  %v2221_v38 = vld [vmem:[#allocation12 + $0xe8] sm:$0xff] }
 0x47c   :  { %v8909_v33 = vpop.f32.mrf.mxu1  ;;  %9242 = vmatprep.subr.bf16.mxu0 %v10372_v10 }
 0x47d   :  { %v9814_v15 = vmul.f32 %v9813_v32, %v9736_v0  ;;  %v9819_v57 = vmul.f32 %v9818_v40, %v9736_v0  ;;  %v9824_v58 = vmul.f32 %v9823_v42, %v9736_v0  ;;  %v9829_v47 = vmul.f32 %v9828_v59, %v9736_v0  ;;  %v8950_v61 = vpop.f32.mrf.mxu0  ;;  %9202 = vmatpush1.bf16.msra.mxu1 %v11137_v34  ;;  %v2245_v34 = vld [vmem:[#allocation12 + $0x1a8] sm:$0xff] }
 0x47e   :  { %v9737_v63 = vmax.f32 %v8908_v56, 0.0  ;;  %9243 = vmatpush1.bf16.msra.mxu0 %v10371_v35  ;;  %v8910_v5 = vpop.f32.mrf.mxu1  ;;  %9203 = vmatprep.subr.bf16.mxu1 %v11122_v43  ;;  %v2253_v35 = vld [vmem:[#allocation12 + $0x1e8] sm:$0xff]  ;;  %v11090_v43 = vcombine.high %v3012_v45, %v3020_v31 }
 0x47f   :  { %v11912_v2 = vadd.f32 %v9814_v15, %v11851_v62  ;;  %v11915_v50 = vadd.f32 %v9819_v57, %v11853_v53  ;;  %v11918_v8 = vadd.f32 %v9824_v58, %v11855_v7  ;;  %v11921_v11 = vadd.f32 %v9829_v47, %v11857_v13  ;;  %v8951_v9 = vpop.f32.mrf.mxu0  ;;  %9244 = vmatprep.subr.bf16.mxu0 %v10356_v39  ;;  %v2237_v0 = vld [vmem:[#allocation12 + $0x168] sm:$0xff]  ;;  %v2980_v39 = vld [vmem:[#allocation12 + $0x18a0] sm:$0xff] }
 0x480   :  { %v9815_v10 = vmul.f32 %v9813_v32, %v9737_v63  ;;  %v9820_v44 = vmul.f32 %v9818_v40, %v9737_v63  ;;  %v9825_v14 = vmul.f32 %v9823_v42, %v9737_v63  ;;  %v9830_v19 = vmul.f32 %v9828_v59, %v9737_v63  ;;  %v2996_v42 = vld [vmem:[#allocation12 + $0x1920] sm:$0xff]  ;;  %v2197_v47 = vld [vmem:[#allocation12 + $0x28] sm:$0xff] }
 0x481   :  { %9204 = vmatpush1.bf16.msra.mxu1 %v11121_v20  ;;  %v11105_v62 = vcombine.low %v3028_v46, %v3036_v37  ;;  %v10324_v40 = vcombine.high %v2245_v34, %v2253_v35  ;;  %v3004_v59 = vld [vmem:[#allocation12 + $0x1960] sm:$0xff]  ;;  %v2229_v46 = vld [vmem:[#allocation12 + $0x128] sm:$0xff] }
 0x482   :  { %v11924_v53 = vadd.f32 %v9815_v10, %v11859_v17  ;;  %v11927_v7 = vadd.f32 %v9820_v44, %v11861_v27  ;;  %v11930_v13 = vadd.f32 %v9825_v14, %v11863_v29  ;;  %v11933_v32 = vadd.f32 %v9830_v19, %v11865_v30  ;;  %9245 = vmatpush1.bf16.msra.mxu0 %v10355_v54  ;;  %v2988_v37 = vld [vmem:[#allocation12 + $0x18e0] sm:$0xff]  ;;  %v2213_v30 = vld [vmem:[#allocation12 + $0xa8] sm:$0xff] }
 0x483   :  { %9205 = vmatprep.subr.bf16.mxu1 %v11106_v1  ;;  %9246 = vmatprep.subr.bf16.mxu0 %v10340_v3  ;;  %v11089_v17 = vcombine.low %v3012_v45, %v3020_v31  ;;  %v10323_v27 = vcombine.low %v2245_v34, %v2253_v35  ;;  %v11074_v56 = vcombine.high %v2996_v42, %v3004_v59  ;;  %v2964_v57 = vld [vmem:[#allocation12 + $0x1820] sm:$0xff]  ;;  %v2205_v61 = vld [vmem:[#allocation12 + $0x68] sm:$0xff] }
 0x484   :  { %v10308_v29 = vcombine.high %v2229_v46, %v2237_v0  ;;  %v11073_v49 = vcombine.low %v2996_v42, %v3004_v59  ;;  %v10307_v33 = vcombine.low %v2229_v46, %v2237_v0  ;;  %v11058_v20 = vcombine.high %v2980_v39, %v2988_v37  ;;  %v2972_v58 = vld [vmem:[#allocation12 + $0x1860] sm:$0xff]  ;;  %v2437_v31 = vld [vmem:[#allocation12 + $0x7a8] sm:$0xff] }
 0x485   :  { %9206 = vmatpush1.bf16.msra.mxu1 %v11105_v62  ;;  %v10292_v15 = vcombine.high %v2213_v30, %v2221_v38  ;;  %v11057_v63 = vcombine.low %v2980_v39, %v2988_v37  ;;  %v10291_v5 = vcombine.low %v2213_v30, %v2221_v38  ;;  %v11042_v54 = vcombine.high %v2964_v57, %v2972_v58  ;;  %v3204_v3 = vld [vmem:[#allocation12 + $0x1fa0] sm:$0xff]  ;;  %v2445_v9 = vld [vmem:[#allocation12 + $0x7e8] sm:$0xff] }
 0x486   :  { %9247 = vmatpush1.bf16.msra.mxu0 %v10339_v60  ;;  %9207 = vmatprep.subr.bf16.mxu1 %v11090_v43  ;;  %v10276_v1 = vcombine.high %v2197_v47, %v2205_v61  ;;  %v3212_v45 = vld [vmem:[#allocation12 + $0x1fe0] sm:$0xff]  ;;  %v11041_v10 = vcombine.low %v2964_v57, %v2972_v58  ;;  %v10275_v44 = vcombine.low %v2197_v47, %v2205_v61  ;;  %v2421_v62 = vld [vmem:[#allocation12 + $0x728] sm:$0xff] }
 0x487   :  { %9248 = vmatprep.subr.bf16.mxu0 %v10324_v40  ;;  %v11282_v14 = vcombine.high %v3204_v3, %v3212_v45  ;;  %v10516_v19 = vcombine.high %v2437_v31, %v2445_v9  ;;  %v3188_v34 = vld [vmem:[#allocation12 + $0x1f20] sm:$0xff]  ;;  %v2429_v60 = vld [vmem:[#allocation12 + $0x768] sm:$0xff]  ;;  %v11281_v43 = vcombine.low %v3204_v3, %v3212_v45  ;;  %v10515_v40 = vcombine.low %v2437_v31, %v2445_v9 }
 0x488   :  { %v3196_v35 = vld [vmem:[#allocation12 + $0x1f60] sm:$0xff]  ;;  %v10500_v59 = vcombine.high %v2421_v62, %v2429_v60 }
 0x489   :  { %9208 = vmatpush1.bf16.msra.mxu1 %v11089_v17  ;;  %v11266_v42 = vcombine.high %v3188_v34, %v3196_v35  ;;  %v3172_v46 = vld [vmem:[#allocation12 + $0x1ea0] sm:$0xff]  ;;  %v2405_v17 = vld [vmem:[#allocation12 + $0x6a8] sm:$0xff] }
 0x48a   :  { %9249 = vmatpush1.bf16.msra.mxu0 %v10323_v27  ;;  %9209 = vmatprep.subr.bf16.mxu1 %v11074_v56  ;;  %v3180_v0 = vld [vmem:[#allocation12 + $0x1ee0] sm:$0xff]  ;;  %v2413_v27 = vld [vmem:[#allocation12 + $0x6e8] sm:$0xff]  ;;  %v11265_v56 = vcombine.low %v3188_v34, %v3196_v35 }
 0x48b   :  { %9250 = vmatprep.subr.bf16.mxu0 %v10308_v29  ;;  %v10499_v29 = vcombine.low %v2421_v62, %v2429_v60  ;;  %v11250_v39 = vcombine.high %v3172_v46, %v3180_v0  ;;  %v10484_v37 = vcombine.high %v2405_v17, %v2413_v27  ;;  %v3156_v30 = vld [vmem:[#allocation12 + $0x1e20] sm:$0xff] }
 0x48c   :  { %v3164_v38 = vld [vmem:[#allocation12 + $0x1e60] sm:$0xff] }
 0x48d   :  { %9210 = vmatpush1.bf16.msra.mxu1 %v11073_v49  ;;  %v2389_v49 = vld [vmem:[#allocation12 + $0x628] sm:$0xff]  ;;  %v11234_v57 = vcombine.high %v3156_v30, %v3164_v38  ;;  %v3140_v47 = vld [vmem:[#allocation12 + $0x1da0] sm:$0xff] }
 0x48e   :  { %9251 = vmatpush1.bf16.msra.mxu0 %v10307_v33  ;;  %9211 = vmatprep.subr.bf16.mxu1 %v11058_v20  ;;  %v2397_v33 = vld [vmem:[#allocation12 + $0x668] sm:$0xff]  ;;  %v11249_v20 = vcombine.low %v3172_v46, %v3180_v0  ;;  %v3148_v61 = vld [vmem:[#allocation12 + $0x1de0] sm:$0xff] }
 0x48f   :  { %9252 = vmatprep.subr.bf16.mxu0 %v10292_v15  ;;  %v10483_v15 = vcombine.low %v2405_v17, %v2413_v27  ;;  %v10468_v58 = vcombine.high %v2389_v49, %v2397_v33  ;;  %v11218_v3 = vcombine.high %v3140_v47, %v3148_v61  ;;  %v3124_v31 = vld [vmem:[#allocation12 + $0x1d20] sm:$0xff] }
 0x490   :  { %v3132_v9 = vld [vmem:[#allocation12 + $0x1d60] sm:$0xff] }
 0x491   :  { %9212 = vmatpush1.bf16.msra.mxu1 %v11057_v63  ;;  %v2373_v63 = vld [vmem:[#allocation12 + $0x5a8] sm:$0xff]  ;;  %v11202_v34 = vcombine.high %v3124_v31, %v3132_v9  ;;  %v3108_v62 = vld [vmem:[#allocation12 + $0x1ca0] sm:$0xff] }
 0x492   :  { %9253 = vmatpush1.bf16.msra.mxu0 %v10291_v5  ;;  %9213 = vmatprep.subr.bf16.mxu1 %v11042_v54  ;;  %v2381_v5 = vld [vmem:[#allocation12 + $0x5e8] sm:$0xff]  ;;  %v11233_v54 = vcombine.low %v3156_v30, %v3164_v38  ;;  %v3116_v60 = vld [vmem:[#allocation12 + $0x1ce0] sm:$0xff] }
 0x493   :  { %9254 = vmatprep.subr.bf16.mxu0 %v10276_v1  ;;  %v10467_v1 = vcombine.low %v2389_v49, %v2397_v33  ;;  %v10452_v45 = vcombine.high %v2373_v63, %v2381_v5  ;;  %v11186_v46 = vcombine.high %v3108_v62, %v3116_v60  ;;  %v3092_v17 = vld [vmem:[#allocation12 + $0x1c20] sm:$0xff]  ;;  %v2565_v49 = vld [vmem:[#allocation12 + $0xba8] sm:$0xff] }
 0x494   :  { %v3100_v27 = vld [vmem:[#allocation12 + $0x1c60] sm:$0xff]  ;;  %v2573_v33 = vld [vmem:[#allocation12 + $0xbe8] sm:$0xff] }
 0x495   :  { %9214 = vmatpush1.bf16.msra.mxu1 %v11041_v10  ;;  %v2357_v10 = vld [vmem:[#allocation12 + $0x528] sm:$0xff]  ;;  %v11170_v30 = vcombine.high %v3092_v17, %v3100_v27 }
 0x496   :  { %9255 = vmatpush1.bf16.msra.mxu0 %v10275_v44  ;;  %9215 = vmatprep.subr.bf16.mxu1 %v11282_v14  ;;  %v2365_v44 = vld [vmem:[#allocation12 + $0x568] sm:$0xff]  ;;  %v11217_v14 = vcombine.low %v3140_v47, %v3148_v61  ;;  %v10644_v47 = vcombine.high %v2565_v49, %v2573_v33  ;;  %v11357_v61 = vld [vmem:[#allocation14] sm:$0xff] }
 0x497   :  { %9256 = vmatprep.subr.bf16.mxu0 %v10516_v19  ;;  %v10451_v19 = vcombine.low %v2373_v63, %v2381_v5  ;;  %v10436_v35 = vcombine.high %v2357_v10, %v2365_v44  ;;  %v3247_v63 = vrot.slane %v11357_v61, %v11730_v26 }
 0x499   :  { %9216 = vmatpush2.bf16.msra.mxu1 %v11281_v43  ;;  %v2341_v43 = vld [vmem:[#allocation12 + $0x4a8] sm:$0xff] }
 0x49a   :  { %9257 = vmatpush2.bf16.msra.mxu0 %v10515_v40  ;;  %9217 = vmatprep.subr.bf16.mxu1 %v11266_v42  ;;  %v2349_v40 = vld [vmem:[#allocation12 + $0x4e8] sm:$0xff]  ;;  %v11201_v42 = vcombine.low %v3124_v31, %v3132_v9 }
 0x49b   :  { %9258 = vmatprep.subr.bf16.mxu0 %v10500_v59  ;;  %v10435_v59 = vcombine.low %v2357_v10, %v2365_v44  ;;  %v10420_v0 = vcombine.high %v2341_v43, %v2349_v40  ;;  %v2805_v31 = vld [vmem:[#allocation12 + $0x1328] sm:$0xff]  ;;  %v8947_v44 = vadd.f32 %v11896_v4, %v3247_v63 }
 0x49c   :  { %v2813_v9 = vld [vmem:[#allocation12 + $0x1368] sm:$0xff] }
 0x49d   :  { %9218 = vmatpush2.bf16.msra.mxu1 %v11265_v56  ;;  %v2325_v56 = vld [vmem:[#allocation12 + $0x428] sm:$0xff] }
 0x49e   :  { %9259 = vmatpush2.bf16.msra.mxu0 %v10499_v29  ;;  %9219 = vmatprep.subr.bf16.mxu1 %v11250_v39  ;;  %v2333_v29 = vld [vmem:[#allocation12 + $0x468] sm:$0xff]  ;;  %v11185_v39 = vcombine.low %v3108_v62, %v3116_v60  ;;  %v10884_v62 = vcombine.high %v2805_v31, %v2813_v9 }
 0x49f   :  { %9260 = vmatprep.subr.bf16.mxu0 %v10484_v37  ;;  %v10419_v37 = vcombine.low %v2341_v43, %v2349_v40  ;;  %v10404_v38 = vcombine.high %v2325_v56, %v2333_v29  ;;  %v2789_v60 = vld [vmem:[#allocation12 + $0x12a8] sm:$0xff] }
 0x4a0   :  { %v2797_v43 = vld [vmem:[#allocation12 + $0x12e8] sm:$0xff] }
 0x4a1   :  { %9220 = vmatpush2.bf16.msra.mxu1 %v11249_v20  ;;  %v2821_v20 = vld [vmem:[#allocation12 + $0x13a8] sm:$0xff] }
 0x4a2   :  { %9261 = vmatpush2.bf16.msra.mxu0 %v10483_v15  ;;  %9221 = vmatprep.subr.bf16.mxu1 %v11234_v57  ;;  %v2829_v15 = vld [vmem:[#allocation12 + $0x13e8] sm:$0xff]  ;;  %v11169_v57 = vcombine.low %v3092_v17, %v3100_v27 }
 0x4a3   :  { %9262 = vmatprep.subr.bf16.mxu0 %v10468_v58  ;;  %v10403_v58 = vcombine.low %v2325_v56, %v2333_v29  ;;  %v10900_v5 = vcombine.high %v2821_v20, %v2829_v15  ;;  %v10899_v10 = vcombine.low %v2821_v20, %v2829_v15 }
 0x4a5   :  { %9222 = vmatpush2.bf16.msra.mxu1 %v11233_v54  ;;  %v2549_v54 = vld [vmem:[#allocation12 + $0xb28] sm:$0xff] }
 0x4a6   :  { %9263 = vmatpush2.bf16.msra.mxu0 %v10467_v1  ;;  %9223 = vmatprep.subr.bf16.mxu1 %v11218_v3  ;;  %v2557_v1 = vld [vmem:[#allocation12 + $0xb68] sm:$0xff]  ;;  %v3251_v3 = vrot.slane %v11357_v61, %v11733_v28 }
 0x4a7   :  { %9264 = vmatprep.subr.bf16.mxu0 %v10452_v45  ;;  %v10643_v45 = vcombine.low %v2565_v49, %v2573_v33  ;;  %v2781_v49 = vld [vmem:[#allocation12 + $0x1268] sm:$0xff] }
 0x4a8   :  { %v8949_v40 = vadd.f32 %v11905_v36, %v3251_v3  ;;  %v10868_v36 = vcombine.high %v2789_v60, %v2797_v43  ;;  %v2765_v3 = vld [vmem:[#allocation12 + $0x11e8] sm:$0xff] }
 0x4a9   :  { %9224 = vmatpush2.bf16.msra.mxu1 %v11217_v14  ;;  %v10628_v14 = vcombine.high %v2549_v54, %v2557_v1 }
 0x4aa   :  { %9265 = vmatpush2.bf16.msra.mxu0 %v10451_v19  ;;  %9225 = vmatprep.subr.bf16.mxu1 %v11202_v34  ;;  %v2533_v19 = vld [vmem:[#allocation12 + $0xaa8] sm:$0xff] }
 0x4ab   :  { %9266 = vmatprep.subr.bf16.mxu0 %v10436_v35  ;;  %v2541_v34 = vld [vmem:[#allocation12 + $0xae8] sm:$0xff] }
 0x4ac   :  { %v10612_v17 = vcombine.high %v2533_v19, %v2541_v34  ;;  %v10611_v15 = vcombine.low %v2533_v19, %v2541_v34  ;;  %v2741_v19 = vld [vmem:[#allocation12 + $0x1128] sm:$0xff] }
 0x4ad   :  { %9226 = vmatpush2.bf16.msra.mxu1 %v11201_v42  ;;  %v2749_v34 = vld [vmem:[#allocation12 + $0x1168] sm:$0xff] }
 0x4ae   :  { %9267 = vmatpush2.bf16.msra.mxu0 %v10435_v59  ;;  %9227 = vmatprep.subr.bf16.mxu1 %v11186_v46  ;;  %v10627_v46 = vcombine.low %v2549_v54, %v2557_v1  ;;  %v2509_v54 = vld [vmem:[#allocation12 + $0x9e8] sm:$0xff] }
 0x4af   :  { %9268 = vmatprep.subr.bf16.mxu0 %v10420_v0  ;;  %v10883_v0 = vcombine.low %v2805_v31, %v2813_v9  ;;  %v2757_v1 = vld [vmem:[#allocation12 + $0x11a8] sm:$0xff] }
 0x4b1   :  { %9228 = vmatpush2.bf16.msra.mxu1 %v11185_v39  ;;  %v2517_v39 = vld [vmem:[#allocation12 + $0xa28] sm:$0xff] }
 0x4b2   :  { %9269 = vmatpush2.bf16.msra.mxu0 %v10419_v37  ;;  %9229 = vmatprep.subr.bf16.mxu1 %v11170_v30  ;;  %v2525_v37 = vld [vmem:[#allocation12 + $0xa68] sm:$0xff] }
 0x4b3   :  { %9270 = vmatprep.subr.bf16.mxu0 %v10404_v38  ;;  %v2773_v38 = vld [vmem:[#allocation12 + $0x1228] sm:$0xff] }
 0x4b4   :  { %v10852_v63 = vcombine.high %v2773_v38, %v2781_v49  ;;  %v10851_v31 = vcombine.low %v2773_v38, %v2781_v49 }
 0x4b5   :  { %9230 = vmatpush2.bf16.msra.mxu1 %v11169_v57 }
 0x4b6   :  { %9271 = vmatpush2.bf16.msra.mxu0 %v10403_v58  ;;  %9281 = vmatprep.subr.bf16.mxu1 %v10644_v47  ;;  %v10867_v58 = vcombine.low %v2789_v60, %v2797_v43  ;;  %v10596_v47 = vcombine.high %v2517_v39, %v2525_v37  ;;  %v10820_v43 = vcombine.high %v2741_v19, %v2749_v34 }
 0x4b7   :  { %9322 = vmatprep.subr.bf16.mxu0 %v10900_v5  ;;  %v2501_v5 = vld [vmem:[#allocation12 + $0x9a8] sm:$0xff] }
 0x4b8   :  { %v8987_v35 = vpop.f32.mrf.mxu1  ;;  %9232 = vmatmul.mubr.bf16.vlgmr.msra.gmra.mxu1 %v11739_v55  ;;  %v10580_v9 = vcombine.high %v2501_v5, %v2509_v54 }
 0x4b9   :  { %v8988_v42 = vadd.f32 %v8987_v35, %v8947_v44  ;;  %v9028_v59 = vpop.f32.mrf.mxu0  ;;  %9273 = vmatmul.mubr.bf16.vlgmr.msra.gmra.mxu0 %v11691_v12  ;;  %9282 = vmatpush1.bf16.msra.mxu1 %v10643_v45  ;;  %v10595_v45 = vcombine.low %v2517_v39, %v2525_v37  ;;  %v2485_v44 = vld [vmem:[#allocation12 + $0x928] sm:$0xff]  ;;  %v10579_v35 = vcombine.low %v2501_v5, %v2509_v54 }
 0x4ba   :  { %9313 = vmatprep.mubr.bf16.mxu1 %v11696_v51  ;;  %9323 = vmatpush1.bf16.msra.mxu0 %v10899_v10  ;;  %v8989_v4 = vpop.f32.mrf.mxu1  ;;  %v10836_v10 = vcombine.high %v2757_v1, %v2765_v3  ;;  %v2709_v39 = vld [vmem:[#allocation12 + $0x1028] sm:$0xff] }
 0x4bb   :  { %v11942_v27 = vadd.f32 %v9028_v59, %v8988_v42  ;;  %9354 = vmatprep.mubr.bf16.mxu0 %v11722_v18  ;;  %v8990_v56 = vadd.f32 %v8989_v4, %v8949_v40  ;;  %v9030_v29 = vpop.f32.mrf.mxu0  ;;  %9283 = vmatprep.subr.bf16.mxu1 %v10628_v14  ;;  %v2493_v14 = vld [vmem:[#allocation12 + $0x968] sm:$0xff] }
 0x4bc   :  { %v8991_v30 = vpop.f32.mrf.mxu1  ;;  %9324 = vmatprep.subr.bf16.mxu0 %v10884_v62  ;;  %v10835_v62 = vcombine.low %v2757_v1, %v2765_v3  ;;  %v10564_v60 = vcombine.high %v2485_v44, %v2493_v14  ;;  %v2469_v40 = vld [vmem:[#allocation12 + $0x8a8] sm:$0xff]  ;;  %v10563_v4 = vcombine.low %v2485_v44, %v2493_v14 }
 0x4bd   :  { %v11945_v33 = vadd.f32 %v9030_v29, %v8990_v56  ;;  %v9032_v20 = vpop.f32.mrf.mxu0  ;;  %9284 = vmatpush1.bf16.msra.mxu1 %v10627_v46  ;;  %v2477_v42 = vld [vmem:[#allocation12 + $0x8e8] sm:$0xff] }
 0x4be   :  { %9325 = vmatpush1.bf16.msra.mxu0 %v10883_v0  ;;  %v8992_v57 = vpop.f32.mrf.mxu1  ;;  %9285 = vmatprep.subr.bf16.mxu1 %v10612_v17  ;;  %v2725_v59 = vld [vmem:[#allocation12 + $0x10a8] sm:$0xff]  ;;  %v10819_v0 = vcombine.low %v2741_v19, %v2749_v34  ;;  %v10548_v17 = vcombine.high %v2469_v40, %v2477_v42  ;;  %v10547_v30 = vcombine.low %v2469_v40, %v2477_v42 }
 0x4bf   :  { %v9033_v61 = vpop.f32.mrf.mxu0  ;;  %9326 = vmatprep.subr.bf16.mxu0 %v10868_v36  ;;  %v2733_v46 = vld [vmem:[#allocation12 + $0x10e8] sm:$0xff] }
 0x4c0   :  { %v10804_v56 = vcombine.high %v2725_v59, %v2733_v46  ;;  %v2453_v29 = vld [vmem:[#allocation12 + $0x828] sm:$0xff]  ;;  %v10803_v38 = vcombine.low %v2725_v59, %v2733_v46 }
 0x4c1   :  { %9286 = vmatpush1.bf16.msra.mxu1 %v10611_v15  ;;  %v2461_v36 = vld [vmem:[#allocation12 + $0x868] sm:$0xff] }
 0x4c2   :  { %9327 = vmatpush1.bf16.msra.mxu0 %v10867_v58  ;;  %9287 = vmatprep.subr.bf16.mxu1 %v10596_v47  ;;  %v2717_v37 = vld [vmem:[#allocation12 + $0x1068] sm:$0xff]  ;;  %v10532_v49 = vcombine.high %v2453_v29, %v2461_v36  ;;  %v10531_v61 = vcombine.low %v2453_v29, %v2461_v36 }
 0x4c3   :  { %9328 = vmatprep.subr.bf16.mxu0 %v10852_v63  ;;  %v10788_v20 = vcombine.high %v2709_v39, %v2717_v37  ;;  %v2693_v15 = vld [vmem:[#allocation12 + $0xfa8] sm:$0xff]  ;;  %v10787_v63 = vcombine.low %v2709_v39, %v2717_v37 }
 0x4c4   :  { %v2701_v57 = vld [vmem:[#allocation12 + $0xfe8] sm:$0xff] }
 0x4c5   :  { %9288 = vmatpush1.bf16.msra.mxu1 %v10595_v45  ;;  %v2949_v58 = vld [vmem:[#allocation12 + $0x17a8] sm:$0xff]  ;;  %v10772_v5 = vcombine.high %v2693_v15, %v2701_v57 }
 0x4c6   :  { %9329 = vmatpush1.bf16.msra.mxu0 %v10851_v31  ;;  %9289 = vmatprep.subr.bf16.mxu1 %v10580_v9  ;;  %v2957_v47 = vld [vmem:[#allocation12 + $0x17e8] sm:$0xff]  ;;  %v10771_v9 = vcombine.low %v2693_v15, %v2701_v57 }
 0x4c7   :  { %9330 = vmatprep.subr.bf16.mxu0 %v10836_v10  ;;  %v11028_v54 = vcombine.high %v2949_v58, %v2957_v47  ;;  %v2677_v1 = vld [vmem:[#allocation12 + $0xf28] sm:$0xff]  ;;  %v11027_v10 = vcombine.low %v2949_v58, %v2957_v47 }
 0x4c8   :  { %v2685_v3 = vld [vmem:[#allocation12 + $0xf68] sm:$0xff] }
 0x4c9   :  { %9290 = vmatpush1.bf16.msra.mxu1 %v10579_v35  ;;  %v2933_v45 = vld [vmem:[#allocation12 + $0x1728] sm:$0xff]  ;;  %v10756_v44 = vcombine.high %v2677_v1, %v2685_v3 }
 0x4ca   :  { %9331 = vmatpush1.bf16.msra.mxu0 %v10835_v62  ;;  %9291 = vmatprep.subr.bf16.mxu1 %v10564_v60  ;;  %v2941_v31 = vld [vmem:[#allocation12 + $0x1768] sm:$0xff]  ;;  %v10755_v60 = vcombine.low %v2677_v1, %v2685_v3 }
 0x4cb   :  { %9332 = vmatprep.subr.bf16.mxu0 %v10820_v43  ;;  %v11012_v14 = vcombine.high %v2933_v45, %v2941_v31  ;;  %v2661_v19 = vld [vmem:[#allocation12 + $0xea8] sm:$0xff]  ;;  %v11011_v43 = vcombine.low %v2933_v45, %v2941_v31 }
 0x4cc   :  { %v2669_v34 = vld [vmem:[#allocation12 + $0xee8] sm:$0xff] }
 0x4cd   :  { %9292 = vmatpush1.bf16.msra.mxu1 %v10563_v4  ;;  %v2917_v35 = vld [vmem:[#allocation12 + $0x16a8] sm:$0xff]  ;;  %v10740_v40 = vcombine.high %v2661_v19, %v2669_v34 }
 0x4ce   :  { %9333 = vmatpush1.bf16.msra.mxu0 %v10819_v0  ;;  %9293 = vmatprep.subr.bf16.mxu1 %v10548_v17  ;;  %v2925_v62 = vld [vmem:[#allocation12 + $0x16e8] sm:$0xff]  ;;  %v10739_v17 = vcombine.low %v2661_v19, %v2669_v34 }
 0x4cf   :  { %9334 = vmatprep.subr.bf16.mxu0 %v10804_v56  ;;  %v10996_v42 = vcombine.high %v2917_v35, %v2925_v62  ;;  %v2645_v59 = vld [vmem:[#allocation12 + $0xe28] sm:$0xff]  ;;  %v10995_v56 = vcombine.low %v2917_v35, %v2925_v62 }
 0x4d0   :  { %v2653_v46 = vld [vmem:[#allocation12 + $0xe68] sm:$0xff] }
 0x4d1   :  { %9294 = vmatpush1.bf16.msra.mxu1 %v10547_v30  ;;  %v2901_v4 = vld [vmem:[#allocation12 + $0x1628] sm:$0xff]  ;;  %v10724_v29 = vcombine.high %v2645_v59, %v2653_v46 }
 0x4d2   :  { %9335 = vmatpush1.bf16.msra.mxu0 %v10803_v38  ;;  %9295 = vmatprep.subr.bf16.mxu1 %v10532_v49  ;;  %v2909_v0 = vld [vmem:[#allocation12 + $0x1668] sm:$0xff]  ;;  %v10723_v49 = vcombine.low %v2645_v59, %v2653_v46 }
 0x4d3   :  { %9336 = vmatprep.subr.bf16.mxu0 %v10788_v20  ;;  %v10980_v36 = vcombine.high %v2901_v4, %v2909_v0  ;;  %v2629_v39 = vld [vmem:[#allocation12 + $0xda8] sm:$0xff]  ;;  %v10979_v20 = vcombine.low %v2901_v4, %v2909_v0 }
 0x4d4   :  { %v2637_v37 = vld [vmem:[#allocation12 + $0xde8] sm:$0xff] }
 0x4d5   :  { %9296 = vmatpush1.bf16.msra.mxu1 %v10531_v61  ;;  %v2885_v30 = vld [vmem:[#allocation12 + $0x15a8] sm:$0xff]  ;;  %v10708_v15 = vcombine.high %v2629_v39, %v2637_v37 }
 0x4d6   :  { %9337 = vmatpush1.bf16.msra.mxu0 %v10787_v63  ;;  %9297 = vmatprep.subr.bf16.mxu1 %v10772_v5  ;;  %v2893_v38 = vld [vmem:[#allocation12 + $0x15e8] sm:$0xff]  ;;  %v10707_v5 = vcombine.low %v2629_v39, %v2637_v37 }
 0x4d7   :  { %9338 = vmatprep.subr.bf16.mxu0 %v11028_v54  ;;  %v10964_v57 = vcombine.high %v2885_v30, %v2893_v38  ;;  %v2613_v58 = vld [vmem:[#allocation12 + $0xd28] sm:$0xff]  ;;  %v10963_v54 = vcombine.low %v2885_v30, %v2893_v38 }
 0x4d8   :  { %v2621_v47 = vld [vmem:[#allocation12 + $0xd68] sm:$0xff] }
 0x4d9   :  { %9298 = vmatpush2.bf16.msra.mxu1 %v10771_v9  ;;  %v2869_v61 = vld [vmem:[#allocation12 + $0x1528] sm:$0xff]  ;;  %v10692_v1 = vcombine.high %v2613_v58, %v2621_v47 }
 0x4da   :  { %9339 = vmatpush2.bf16.msra.mxu0 %v11027_v10  ;;  %9299 = vmatprep.subr.bf16.mxu1 %v10756_v44  ;;  %v2877_v63 = vld [vmem:[#allocation12 + $0x1568] sm:$0xff]  ;;  %v10691_v44 = vcombine.low %v2613_v58, %v2621_v47 }
 0x4db   :  { %9340 = vmatprep.subr.bf16.mxu0 %v11012_v14  ;;  %v10948_v3 = vcombine.high %v2869_v61, %v2877_v63  ;;  %v2597_v45 = vld [vmem:[#allocation12 + $0xca8] sm:$0xff]  ;;  %v10947_v14 = vcombine.low %v2869_v61, %v2877_v63 }
 0x4dc   :  { %v2605_v31 = vld [vmem:[#allocation12 + $0xce8] sm:$0xff] }
 0x4dd   :  { %9300 = vmatpush2.bf16.msra.mxu1 %v10755_v60  ;;  %v2853_v9 = vld [vmem:[#allocation12 + $0x14a8] sm:$0xff]  ;;  %v10676_v19 = vcombine.high %v2597_v45, %v2605_v31 }
 0x4de   :  { %9341 = vmatpush2.bf16.msra.mxu0 %v11011_v43  ;;  %9301 = vmatprep.subr.bf16.mxu1 %v10740_v40  ;;  %v2861_v10 = vld [vmem:[#allocation12 + $0x14e8] sm:$0xff]  ;;  %v10675_v40 = vcombine.low %v2597_v45, %v2605_v31  ;;  %v9833_v45 = vstv %s11947_s27 }
 0x4df   :  { %9342 = vmatprep.subr.bf16.mxu0 %v10996_v42  ;;  %v10932_v34 = vcombine.high %v2853_v9, %v2861_v10  ;;  %v2581_v35 = vld [vmem:[#allocation12 + $0xc28] sm:$0xff]  ;;  %v10931_v42 = vcombine.low %v2853_v9, %v2861_v10 }
 0x4e0   :  { %v2589_v62 = vld [vmem:[#allocation12 + $0xc68] sm:$0xff] }
 0x4e1   :  { %9302 = vmatpush2.bf16.msra.mxu1 %v10739_v17  ;;  %v2837_v60 = vld [vmem:[#allocation12 + $0x1428] sm:$0xff]  ;;  %v10660_v59 = vcombine.high %v2581_v35, %v2589_v62  ;;  %v2310_v17 = vld [vmem:[#allocation12 + $0x3b0] sm:$0xff] }
 0x4e2   :  { %9343 = vmatpush2.bf16.msra.mxu0 %v10995_v56  ;;  %9303 = vmatprep.subr.bf16.mxu1 %v10724_v29  ;;  %v2845_v43 = vld [vmem:[#allocation12 + $0x1468] sm:$0xff]  ;;  %v2318_v56 = vld [vmem:[#allocation12 + $0x3f0] sm:$0xff]  ;;  %v10659_v29 = vcombine.low %v2581_v35, %v2589_v62 }
 0x4e3   :  { %9344 = vmatprep.subr.bf16.mxu0 %v10980_v36  ;;  %v10916_v46 = vcombine.high %v2837_v60, %v2845_v43  ;;  %v3077_v4 = vld [vmem:[#allocation12 + $0x1ba8] sm:$0xff]  ;;  %v10915_v36 = vcombine.low %v2837_v60, %v2845_v43  ;;  %v10390_v37 = vcombine.high %v2310_v17, %v2318_v56 }
 0x4e4   :  { %v3085_v0 = vld [vmem:[#allocation12 + $0x1be8] sm:$0xff] }
 0x4e5   :  { %9304 = vmatpush2.bf16.msra.mxu1 %v10723_v49  ;;  %v11156_v39 = vcombine.high %v3077_v4, %v3085_v0  ;;  %v3061_v30 = vld [vmem:[#allocation12 + $0x1b28] sm:$0xff]  ;;  %v11155_v49 = vcombine.low %v3077_v4, %v3085_v0 }
 0x4e6   :  { %9345 = vmatpush2.bf16.msra.mxu0 %v10979_v20  ;;  %9305 = vmatprep.subr.bf16.mxu1 %v10708_v15  ;;  %v3069_v38 = vld [vmem:[#allocation12 + $0x1b68] sm:$0xff]  ;;  %v2294_v20 = vld [vmem:[#allocation12 + $0x330] sm:$0xff] }
 0x4e7   :  { %9346 = vmatprep.subr.bf16.mxu0 %v10964_v57  ;;  %v2302_v15 = vld [vmem:[#allocation12 + $0x370] sm:$0xff]  ;;  %v10389_v57 = vcombine.low %v2310_v17, %v2318_v56  ;;  %v11140_v58 = vcombine.high %v3061_v30, %v3069_v38  ;;  %v3045_v47 = vld [vmem:[#allocation12 + $0x1aa8] sm:$0xff]  ;;  %v11139_v9 = vcombine.low %v3061_v30, %v3069_v38 }
 0x4e8   :  { %v3053_v61 = vld [vmem:[#allocation12 + $0x1ae8] sm:$0xff]  ;;  %v10373_v10 = vcombine.low %v2294_v20, %v2302_v15 }
 0x4e9   :  { %9306 = vmatpush2.bf16.msra.mxu1 %v10707_v5  ;;  %v10374_v5 = vcombine.high %v2294_v20, %v2302_v15  ;;  %v11124_v35 = vcombine.high %v3045_v47, %v3053_v61  ;;  %v3029_v62 = vld [vmem:[#allocation12 + $0x1a28] sm:$0xff]  ;;  %v11123_v0 = vcombine.low %v3045_v47, %v3053_v61 }
 0x4ea   :  { %9347 = vmatpush2.bf16.msra.mxu0 %v10963_v54  ;;  %9307 = vmatprep.subr.bf16.mxu1 %v10692_v1  ;;  %v11956_v54 = vld [vmem:[#allocation12 + $0x2b0] sm:$0xff]  ;;  %v3013_v20 = vld [vmem:[#allocation12 + $0x19a8] sm:$0xff] }
 0x4eb   :  { %9348 = vmatprep.subr.bf16.mxu0 %v10948_v3  ;;  %v11958_v1 = vld [vmem:[#allocation12 + $0x2f0] sm:$0xff]  ;;  %v3021_v15 = vld [vmem:[#allocation12 + $0x19e8] sm:$0xff] }
 0x4ec   :  { %v10357_v30 = vcombine.low %v11956_v54, %v11958_v1 }
 0x4ed   :  { %9308 = vmatpush2.bf16.msra.mxu1 %v10691_v44  ;;  %v9838_v44 = vstv %s11949_s28 }
 0x4ee   :  { %9349 = vmatpush2.bf16.msra.mxu0 %v10947_v14  ;;  %9309 = vmatprep.subr.bf16.mxu1 %v10676_v19  ;;  %v9843_v14 = vstv %s11951_s29  ;;  %v9848_v19 = vstv %s11953_s5 }
 0x4ef   :  { %9350 = vmatprep.subr.bf16.mxu0 %v10932_v34 }
 0x4f1   :  { %9310 = vmatpush2.bf16.msra.mxu1 %v10675_v40  ;;  %v10358_v40 = vcombine.high %v11956_v54, %v11958_v1 }
 0x4f2   :  { %9351 = vmatpush2.bf16.msra.mxu0 %v10931_v42  ;;  %9311 = vmatprep.subr.bf16.mxu1 %v10660_v59  ;;  %v3037_v42 = vld [vmem:[#allocation12 + $0x1a68] sm:$0xff]  ;;  %v2262_v59 = vld [vmem:[#allocation12 + $0x230] sm:$0xff] }
 0x4f3   :  { %9352 = vmatprep.subr.bf16.mxu0 %v10916_v46  ;;  %v2270_v46 = vld [vmem:[#allocation12 + $0x270] sm:$0xff]  ;;  %v11108_v38 = vcombine.high %v3029_v62, %v3037_v42 }
 0x4f5   :  { %9312 = vmatpush2.bf16.msra.mxu1 %v10659_v29 }
 0x4f6   :  { %9353 = vmatpush2.bf16.msra.mxu0 %v10915_v36  ;;  %9363 = vmatprep.subr.bf16.mxu1 %v11156_v39 }
 0x4f7   :  { %9404 = vmatprep.subr.bf16.mxu0 %v10390_v37 }
 0x4f8   :  { %v9069_v63 = vpop.f32.mrf.mxu1  ;;  %9314 = vmatmul.mubr.bf16.vlgmr.msra.gmra.mxu1 %v11700_v52 }
 0x4f9   :  { %v9070_v3 = vadd.f32 %v9069_v63, %v11942_v27  ;;  %v11962_v31 = vpop.f32.mrf.mxu0  ;;  %9355 = vmatmul.mubr.bf16.vlgmr.msra.gmra.mxu0 %v11724_v23  ;;  %9364 = vmatpush1.bf16.msra.mxu1 %v11155_v49  ;;  %v10342_v49 = vcombine.high %v2262_v59, %v2270_v46 }
 0x4fa   :  { %9395 = vmatprep.mubr.bf16.mxu1 %v11737_v6  ;;  %9405 = vmatpush1.bf16.msra.mxu0 %v10389_v57  ;;  %v9071_v34 = vpop.f32.mrf.mxu1 }
 0x4fb   :  { %v9738_v60 = vmax.f32 %v9070_v3, 0.0  ;;  %9436 = vmatprep.mubr.bf16.mxu0 %v11676_v16  ;;  %v9072_v27 = vadd.f32 %v9071_v34, %v11945_v33  ;;  %v11971_v43 = vpop.f32.mrf.mxu0  ;;  %9365 = vmatprep.subr.bf16.mxu1 %v11140_v58  ;;  %v10341_v34 = vcombine.low %v2262_v59, %v2270_v46  ;;  %v2222_v59 = vld [vmem:[#allocation12 + $0xf0] sm:$0xff] }
 0x4fc   :  { %v9073_v4 = vpop.f32.mrf.mxu1  ;;  %9406 = vmatprep.subr.bf16.mxu0 %v10374_v5 }
 0x4fd   :  { %v9834_v17 = vmul.f32 %v9833_v45, %v9738_v60  ;;  %v9839_v56 = vmul.f32 %v9838_v44, %v9738_v60  ;;  %v9844_v29 = vmul.f32 %v9843_v14, %v9738_v60  ;;  %v9849_v36 = vmul.f32 %v9848_v19, %v9738_v60  ;;  %v9114_v39 = vpop.f32.mrf.mxu0  ;;  %9366 = vmatpush1.bf16.msra.mxu1 %v11139_v9  ;;  %v2246_v9 = vld [vmem:[#allocation12 + $0x1b0] sm:$0xff] }
 0x4fe   :  { %v9739_v37 = vmax.f32 %v9072_v27, 0.0  ;;  %9407 = vmatpush1.bf16.msra.mxu0 %v10373_v10  ;;  %v9074_v33 = vpop.f32.mrf.mxu1  ;;  %9367 = vmatprep.subr.bf16.mxu1 %v11124_v35  ;;  %v2254_v10 = vld [vmem:[#allocation12 + $0x1f0] sm:$0xff]  ;;  %v11092_v35 = vcombine.high %v3013_v20, %v3021_v15 }
 0x4ff   :  { %v11978_v57 = vadd.f32 %v9834_v17, %v11912_v2  ;;  %v11981_v58 = vadd.f32 %v9839_v56, %v11915_v50  ;;  %v11984_v47 = vadd.f32 %v9844_v29, %v11918_v8  ;;  %v11987_v61 = vadd.f32 %v9849_v36, %v11921_v11  ;;  %v9115_v63 = vpop.f32.mrf.mxu0  ;;  %9408 = vmatprep.subr.bf16.mxu0 %v10358_v40  ;;  %v2238_v60 = vld [vmem:[#allocation12 + $0x170] sm:$0xff]  ;;  %v2981_v40 = vld [vmem:[#allocation12 + $0x18a8] sm:$0xff] }
 0x500   :  { %v9835_v5 = vmul.f32 %v9833_v45, %v9739_v37  ;;  %v9840_v54 = vmul.f32 %v9838_v44, %v9739_v37  ;;  %v9845_v1 = vmul.f32 %v9843_v14, %v9739_v37  ;;  %v9850_v3 = vmul.f32 %v9848_v19, %v9739_v37  ;;  %v2997_v14 = vld [vmem:[#allocation12 + $0x1928] sm:$0xff]  ;;  %v2198_v36 = vld [vmem:[#allocation12 + $0x30] sm:$0xff] }
 0x501   :  { %9368 = vmatpush1.bf16.msra.mxu1 %v11123_v0  ;;  %v11107_v2 = vcombine.low %v3029_v62, %v3037_v42  ;;  %v10326_v44 = vcombine.high %v2246_v9, %v2254_v10  ;;  %v3005_v19 = vld [vmem:[#allocation12 + $0x1968] sm:$0xff]  ;;  %v2230_v62 = vld [vmem:[#allocation12 + $0x130] sm:$0xff] }
 0x502   :  { %v11990_v50 = vadd.f32 %v9835_v5, %v11924_v53  ;;  %v11993_v8 = vadd.f32 %v9840_v54, %v11927_v7  ;;  %v11996_v11 = vadd.f32 %v9845_v1, %v11930_v13  ;;  %v11999_v45 = vadd.f32 %v9850_v3, %v11933_v32  ;;  %9409 = vmatpush1.bf16.msra.mxu0 %v10357_v30  ;;  %v2989_v42 = vld [vmem:[#allocation12 + $0x18e8] sm:$0xff]  ;;  %v2214_v32 = vld [vmem:[#allocation12 + $0xb0] sm:$0xff] }
 0x503   :  { %9369 = vmatprep.subr.bf16.mxu1 %v11108_v38  ;;  %9410 = vmatprep.subr.bf16.mxu0 %v10342_v49  ;;  %v11091_v53 = vcombine.low %v3013_v20, %v3021_v15  ;;  %v10325_v7 = vcombine.low %v2246_v9, %v2254_v10  ;;  %v11076_v27 = vcombine.high %v2997_v14, %v3005_v19  ;;  %v2965_v56 = vld [vmem:[#allocation12 + $0x1828] sm:$0xff]  ;;  %v2206_v39 = vld [vmem:[#allocation12 + $0x70] sm:$0xff] }
 0x504   :  { %v10310_v13 = vcombine.high %v2230_v62, %v2238_v60  ;;  %v11075_v46 = vcombine.low %v2997_v14, %v3005_v19  ;;  %v10309_v4 = vcombine.low %v2230_v62, %v2238_v60  ;;  %v11060_v0 = vcombine.high %v2981_v40, %v2989_v42  ;;  %v2973_v29 = vld [vmem:[#allocation12 + $0x1868] sm:$0xff]  ;;  %v2438_v15 = vld [vmem:[#allocation12 + $0x7b0] sm:$0xff] }
 0x505   :  { %9370 = vmatpush1.bf16.msra.mxu1 %v11107_v2  ;;  %v10294_v17 = vcombine.high %v2214_v32, %v2222_v59  ;;  %v11059_v37 = vcombine.low %v2981_v40, %v2989_v42  ;;  %v10293_v33 = vcombine.low %v2214_v32, %v2222_v59  ;;  %v11044_v30 = vcombine.high %v2965_v56, %v2973_v29  ;;  %v3205_v49 = vld [vmem:[#allocation12 + $0x1fa8] sm:$0xff]  ;;  %v2446_v63 = vld [vmem:[#allocation12 + $0x7f0] sm:$0xff] }
 0x506   :  { %9411 = vmatpush1.bf16.msra.mxu0 %v10341_v34  ;;  %9371 = vmatprep.subr.bf16.mxu1 %v11092_v35  ;;  %v10278_v38 = vcombine.high %v2198_v36, %v2206_v39  ;;  %v3213_v20 = vld [vmem:[#allocation12 + $0x1fe8] sm:$0xff]  ;;  %v11043_v5 = vcombine.low %v2965_v56, %v2973_v29  ;;  %v10277_v54 = vcombine.low %v2198_v36, %v2206_v39  ;;  %v2422_v2 = vld [vmem:[#allocation12 + $0x730] sm:$0xff] }
 0x507   :  { %9412 = vmatprep.subr.bf16.mxu0 %v10326_v44  ;;  %v11284_v1 = vcombine.high %v3205_v49, %v3213_v20  ;;  %v10518_v3 = vcombine.high %v2438_v15, %v2446_v63  ;;  %v3189_v9 = vld [vmem:[#allocation12 + $0x1f28] sm:$0xff]  ;;  %v2430_v34 = vld [vmem:[#allocation12 + $0x770] sm:$0xff]  ;;  %v11283_v35 = vcombine.low %v3205_v49, %v3213_v20  ;;  %v10517_v44 = vcombine.low %v2438_v15, %v2446_v63 }
 0x508   :  { %v3197_v10 = vld [vmem:[#allocation12 + $0x1f68] sm:$0xff]  ;;  %v10502_v19 = vcombine.high %v2422_v2, %v2430_v34 }
 0x509   :  { %9372 = vmatpush1.bf16.msra.mxu1 %v11091_v53  ;;  %v11268_v14 = vcombine.high %v3189_v9, %v3197_v10  ;;  %v3173_v62 = vld [vmem:[#allocation12 + $0x1ea8] sm:$0xff]  ;;  %v2406_v53 = vld [vmem:[#allocation12 + $0x6b0] sm:$0xff] }
 0x50a   :  { %9413 = vmatpush1.bf16.msra.mxu0 %v10325_v7  ;;  %9373 = vmatprep.subr.bf16.mxu1 %v11076_v27  ;;  %v3181_v60 = vld [vmem:[#allocation12 + $0x1ee8] sm:$0xff]  ;;  %v2414_v7 = vld [vmem:[#allocation12 + $0x6f0] sm:$0xff]  ;;  %v11267_v27 = vcombine.low %v3189_v9, %v3197_v10 }
 0x50b   :  { %9414 = vmatprep.subr.bf16.mxu0 %v10310_v13  ;;  %v10501_v13 = vcombine.low %v2422_v2, %v2430_v34  ;;  %v11252_v40 = vcombine.high %v3173_v62, %v3181_v60  ;;  %v10486_v42 = vcombine.high %v2406_v53, %v2414_v7  ;;  %v3157_v32 = vld [vmem:[#allocation12 + $0x1e28] sm:$0xff] }
 0x50c   :  { %v3165_v59 = vld [vmem:[#allocation12 + $0x1e68] sm:$0xff] }
 0x50d   :  { %9374 = vmatpush1.bf16.msra.mxu1 %v11075_v46  ;;  %v2390_v46 = vld [vmem:[#allocation12 + $0x630] sm:$0xff]  ;;  %v11236_v56 = vcombine.high %v3157_v32, %v3165_v59  ;;  %v3141_v36 = vld [vmem:[#allocation12 + $0x1da8] sm:$0xff] }
 0x50e   :  { %9415 = vmatpush1.bf16.msra.mxu0 %v10309_v4  ;;  %9375 = vmatprep.subr.bf16.mxu1 %v11060_v0  ;;  %v2398_v4 = vld [vmem:[#allocation12 + $0x670] sm:$0xff]  ;;  %v11251_v0 = vcombine.low %v3173_v62, %v3181_v60  ;;  %v3149_v39 = vld [vmem:[#allocation12 + $0x1de8] sm:$0xff] }
 0x50f   :  { %9416 = vmatprep.subr.bf16.mxu0 %v10294_v17  ;;  %v10485_v17 = vcombine.low %v2406_v53, %v2414_v7  ;;  %v10470_v29 = vcombine.high %v2390_v46, %v2398_v4  ;;  %v11220_v49 = vcombine.high %v3141_v36, %v3149_v39  ;;  %v3125_v15 = vld [vmem:[#allocation12 + $0x1d28] sm:$0xff] }
 0x510   :  { %v3133_v63 = vld [vmem:[#allocation12 + $0x1d68] sm:$0xff] }
 0x511   :  { %9376 = vmatpush1.bf16.msra.mxu1 %v11059_v37  ;;  %v2374_v37 = vld [vmem:[#allocation12 + $0x5b0] sm:$0xff]  ;;  %v11204_v9 = vcombine.high %v3125_v15, %v3133_v63  ;;  %v3109_v2 = vld [vmem:[#allocation12 + $0x1ca8] sm:$0xff] }
 0x512   :  { %9417 = vmatpush1.bf16.msra.mxu0 %v10293_v33  ;;  %9377 = vmatprep.subr.bf16.mxu1 %v11044_v30  ;;  %v2382_v33 = vld [vmem:[#allocation12 + $0x5f0] sm:$0xff]  ;;  %v11235_v30 = vcombine.low %v3157_v32, %v3165_v59  ;;  %v3117_v34 = vld [vmem:[#allocation12 + $0x1ce8] sm:$0xff] }
 0x513   :  { %9418 = vmatprep.subr.bf16.mxu0 %v10278_v38  ;;  %v10469_v38 = vcombine.low %v2390_v46, %v2398_v4  ;;  %v10454_v20 = vcombine.high %v2374_v37, %v2382_v33  ;;  %v11188_v62 = vcombine.high %v3109_v2, %v3117_v34  ;;  %v3093_v53 = vld [vmem:[#allocation12 + $0x1c28] sm:$0xff]  ;;  %v2566_v46 = vld [vmem:[#allocation12 + $0xbb0] sm:$0xff] }
 0x514   :  { %v3101_v7 = vld [vmem:[#allocation12 + $0x1c68] sm:$0xff]  ;;  %v2574_v4 = vld [vmem:[#allocation12 + $0xbf0] sm:$0xff] }
 0x515   :  { %9378 = vmatpush1.bf16.msra.mxu1 %v11043_v5  ;;  %v2358_v5 = vld [vmem:[#allocation12 + $0x530] sm:$0xff]  ;;  %v11172_v32 = vcombine.high %v3093_v53, %v3101_v7 }
 0x516   :  { %9419 = vmatpush1.bf16.msra.mxu0 %v10277_v54  ;;  %9379 = vmatprep.subr.bf16.mxu1 %v11284_v1  ;;  %v2366_v54 = vld [vmem:[#allocation12 + $0x570] sm:$0xff]  ;;  %v11219_v1 = vcombine.low %v3141_v36, %v3149_v39  ;;  %v10646_v39 = vcombine.high %v2566_v46, %v2574_v4 }
 0x517   :  { %9420 = vmatprep.subr.bf16.mxu0 %v10518_v3  ;;  %v10453_v3 = vcombine.low %v2374_v37, %v2382_v33  ;;  %v10438_v10 = vcombine.high %v2358_v5, %v2366_v54 }
 0x519   :  { %9380 = vmatpush2.bf16.msra.mxu1 %v11283_v35  ;;  %v2342_v35 = vld [vmem:[#allocation12 + $0x4b0] sm:$0xff] }
 0x51a   :  { %9421 = vmatpush2.bf16.msra.mxu0 %v10517_v44  ;;  %9381 = vmatprep.subr.bf16.mxu1 %v11268_v14  ;;  %v2350_v44 = vld [vmem:[#allocation12 + $0x4f0] sm:$0xff]  ;;  %v11203_v14 = vcombine.low %v3125_v15, %v3133_v63 }
 0x51b   :  { %9422 = vmatprep.subr.bf16.mxu0 %v10502_v19  ;;  %v10437_v19 = vcombine.low %v2358_v5, %v2366_v54  ;;  %v10422_v60 = vcombine.high %v2342_v35, %v2350_v44  ;;  %v2806_v15 = vld [vmem:[#allocation12 + $0x1330] sm:$0xff] }
 0x51c   :  { %v2814_v63 = vld [vmem:[#allocation12 + $0x1370] sm:$0xff] }
 0x51d   :  { %9382 = vmatpush2.bf16.msra.mxu1 %v11267_v27  ;;  %v2326_v27 = vld [vmem:[#allocation12 + $0x430] sm:$0xff] }
 0x51e   :  { %9423 = vmatpush2.bf16.msra.mxu0 %v10501_v13  ;;  %9383 = vmatprep.subr.bf16.mxu1 %v11252_v40  ;;  %v2334_v13 = vld [vmem:[#allocation12 + $0x470] sm:$0xff]  ;;  %v11187_v40 = vcombine.low %v3109_v2, %v3117_v34 }
 0x51f   :  { %9424 = vmatprep.subr.bf16.mxu0 %v10486_v42  ;;  %v10421_v42 = vcombine.low %v2342_v35, %v2350_v44  ;;  %v10406_v59 = vcombine.high %v2326_v27, %v2334_v13  ;;  %v10405_v36 = vcombine.low %v2326_v27, %v2334_v13  ;;  %v2790_v2 = vld [vmem:[#allocation12 + $0x12b0] sm:$0xff] }
 0x520   :  { %v2798_v34 = vld [vmem:[#allocation12 + $0x12f0] sm:$0xff] }
 0x521   :  { %9384 = vmatpush2.bf16.msra.mxu1 %v11251_v0  ;;  %v12001_v0 = vld [vmem:[#allocation14 + $0x8] sm:$0xff]  ;;  %v2518_v27 = vld [vmem:[#allocation12 + $0xa30] sm:$0xff] }
 0x522   :  { %9425 = vmatpush2.bf16.msra.mxu0 %v10485_v17  ;;  %9385 = vmatprep.subr.bf16.mxu1 %v11236_v56  ;;  %v2822_v17 = vld [vmem:[#allocation12 + $0x13b0] sm:$0xff]  ;;  %v3255_v37 = vrot.slane %v12001_v0, %v11629_v21 }
 0x523   :  { %9426 = vmatprep.subr.bf16.mxu0 %v10470_v29  ;;  %v2830_v56 = vld [vmem:[#allocation12 + $0x13f0] sm:$0xff]  ;;  %v11171_v29 = vcombine.low %v3093_v53, %v3101_v7 }
 0x524   :  { %v10902_v33 = vcombine.high %v2822_v17, %v2830_v56  ;;  %v10901_v5 = vcombine.low %v2822_v17, %v2830_v56  ;;  %v9111_v54 = vadd.f32 %v11962_v31, %v3255_v37  ;;  %v2542_v21 = vld [vmem:[#allocation12 + $0xaf0] sm:$0xff]  ;;  %v10869_v56 = vcombine.low %v2790_v2, %v2798_v34 }
 0x525   :  { %9386 = vmatpush2.bf16.msra.mxu1 %v11235_v30  ;;  %v2550_v30 = vld [vmem:[#allocation12 + $0xb30] sm:$0xff] }
 0x526   :  { %9427 = vmatpush2.bf16.msra.mxu0 %v10469_v38  ;;  %9387 = vmatprep.subr.bf16.mxu1 %v11220_v49  ;;  %v2558_v38 = vld [vmem:[#allocation12 + $0xb70] sm:$0xff]  ;;  %v3259_v49 = vrot.slane %v12001_v0, %v11635_v24 }
 0x527   :  { %9428 = vmatprep.subr.bf16.mxu0 %v10454_v20  ;;  %v10645_v20 = vcombine.low %v2566_v46, %v2574_v4  ;;  %v2526_v13 = vld [vmem:[#allocation12 + $0xa70] sm:$0xff] }
 0x528   :  { %v9113_v24 = vadd.f32 %v11971_v43, %v3259_v49  ;;  %v10870_v43 = vcombine.high %v2790_v2, %v2798_v34  ;;  %v2502_v37 = vld [vmem:[#allocation12 + $0x9b0] sm:$0xff]  ;;  %v10597_v49 = vcombine.low %v2518_v27, %v2526_v13 }
 0x529   :  { %9388 = vmatpush2.bf16.msra.mxu1 %v11219_v1  ;;  %v10630_v1 = vcombine.high %v2550_v30, %v2558_v38  ;;  %v2470_v34 = vld [vmem:[#allocation12 + $0x8b0] sm:$0xff] }
 0x52a   :  { %9429 = vmatpush2.bf16.msra.mxu0 %v10453_v3  ;;  %9389 = vmatprep.subr.bf16.mxu1 %v11204_v9  ;;  %v2534_v3 = vld [vmem:[#allocation12 + $0xab0] sm:$0xff] }
 0x52b   :  { %9430 = vmatprep.subr.bf16.mxu0 %v10438_v10  ;;  %v10886_v10 = vcombine.high %v2806_v15, %v2814_v63  ;;  %v10613_v4 = vcombine.low %v2534_v3, %v2542_v21 }
 0x52d   :  { %9390 = vmatpush2.bf16.msra.mxu1 %v11203_v14  ;;  %v10629_v14 = vcombine.low %v2550_v30, %v2558_v38  ;;  %v2758_v30 = vld [vmem:[#allocation12 + $0x11b0] sm:$0xff] }
 0x52e   :  { %9431 = vmatpush2.bf16.msra.mxu0 %v10437_v19  ;;  %9391 = vmatprep.subr.bf16.mxu1 %v11188_v62  ;;  %v10885_v19 = vcombine.low %v2806_v15, %v2814_v63  ;;  %v10614_v62 = vcombine.high %v2534_v3, %v2542_v21  ;;  %v2766_v38 = vld [vmem:[#allocation12 + $0x11f0] sm:$0xff] }
 0x52f   :  { %9432 = vmatprep.subr.bf16.mxu0 %v10422_v60  ;;  %v10838_v63 = vcombine.high %v2758_v30, %v2766_v38  ;;  %v2750_v3 = vld [vmem:[#allocation12 + $0x1170] sm:$0xff] }
 0x531   :  { %9392 = vmatpush2.bf16.msra.mxu1 %v11187_v40 }
 0x532   :  { %9433 = vmatpush2.bf16.msra.mxu0 %v10421_v42  ;;  %9393 = vmatprep.subr.bf16.mxu1 %v11172_v32  ;;  %v2774_v42 = vld [vmem:[#allocation12 + $0x1230] sm:$0xff] }
 0x533   :  { %9434 = vmatprep.subr.bf16.mxu0 %v10406_v59  ;;  %v2782_v32 = vld [vmem:[#allocation12 + $0x1270] sm:$0xff] }
 0x535   :  { %9394 = vmatpush2.bf16.msra.mxu1 %v11171_v29  ;;  %v10598_v29 = vcombine.high %v2518_v27, %v2526_v13  ;;  %v2718_v27 = vld [vmem:[#allocation12 + $0x1070] sm:$0xff] }
 0x536   :  { %9435 = vmatpush2.bf16.msra.mxu0 %v10405_v36  ;;  %9445 = vmatprep.subr.bf16.mxu1 %v10646_v39  ;;  %v10854_v39 = vcombine.high %v2774_v42, %v2782_v32 }
 0x537   :  { %9486 = vmatprep.subr.bf16.mxu0 %v10902_v33  ;;  %v2510_v33 = vld [vmem:[#allocation12 + $0x9f0] sm:$0xff] }
 0x538   :  { %v9151_v9 = vpop.f32.mrf.mxu1  ;;  %9396 = vmatmul.mubr.bf16.vlgmr.msra.gmra.mxu1 %v11739_v55  ;;  %v10582_v15 = vcombine.high %v2502_v37, %v2510_v33  ;;  %v10581_v21 = vcombine.low %v2502_v37, %v2510_v33  ;;  %v2678_v33 = vld [vmem:[#allocation12 + $0xf30] sm:$0xff] }
 0x539   :  { %v9152_v35 = vadd.f32 %v9151_v9, %v9111_v54  ;;  %v9192_v44 = vpop.f32.mrf.mxu0  ;;  %9437 = vmatmul.mubr.bf16.vlgmr.msra.gmra.mxu0 %v11691_v12  ;;  %9446 = vmatpush1.bf16.msra.mxu1 %v10645_v20  ;;  %v10853_v20 = vcombine.low %v2774_v42, %v2782_v32  ;;  %v2494_v54 = vld [vmem:[#allocation12 + $0x970] sm:$0xff]  ;;  %v10837_v9 = vcombine.low %v2758_v30, %v2766_v38 }
 0x53a   :  { %9477 = vmatprep.mubr.bf16.mxu1 %v11696_v51  ;;  %9487 = vmatpush1.bf16.msra.mxu0 %v10901_v5  ;;  %v9153_v31 = vpop.f32.mrf.mxu1  ;;  %v2486_v5 = vld [vmem:[#allocation12 + $0x930] sm:$0xff] }
 0x53b   :  { %v12012_v60 = vadd.f32 %v9192_v44, %v9152_v35  ;;  %9518 = vmatprep.mubr.bf16.mxu0 %v11722_v18  ;;  %v9154_v53 = vadd.f32 %v9153_v31, %v9113_v24  ;;  %v9194_v7 = vpop.f32.mrf.mxu0  ;;  %9447 = vmatprep.subr.bf16.mxu1 %v10630_v1  ;;  %v2742_v1 = vld [vmem:[#allocation12 + $0x1130] sm:$0xff] }
 0x53c   :  { %v9155_v40 = vpop.f32.mrf.mxu1  ;;  %9488 = vmatprep.subr.bf16.mxu0 %v10886_v10  ;;  %v10566_v10 = vcombine.high %v2486_v5, %v2494_v54  ;;  %v10822_v2 = vcombine.high %v2742_v1, %v2750_v3  ;;  %v2478_v24 = vld [vmem:[#allocation12 + $0x8f0] sm:$0xff]  ;;  %v10821_v31 = vcombine.low %v2742_v1, %v2750_v3 }
 0x53d   :  { %v12015_v59 = vadd.f32 %v9194_v7, %v9154_v53  ;;  %v9196_v46 = vpop.f32.mrf.mxu0  ;;  %9448 = vmatpush1.bf16.msra.mxu1 %v10629_v14  ;;  %v2726_v35 = vld [vmem:[#allocation12 + $0x10b0] sm:$0xff]  ;;  %v10565_v14 = vcombine.low %v2486_v5, %v2494_v54  ;;  %v10549_v13 = vcombine.low %v2470_v34, %v2478_v24 }
 0x53e   :  { %9489 = vmatpush1.bf16.msra.mxu0 %v10885_v19  ;;  %v9156_v17 = vpop.f32.mrf.mxu1  ;;  %9449 = vmatprep.subr.bf16.mxu1 %v10614_v62  ;;  %v2734_v44 = vld [vmem:[#allocation12 + $0x10f0] sm:$0xff]  ;;  %v10550_v19 = vcombine.high %v2470_v34, %v2478_v24 }
 0x53f   :  { %v9197_v36 = vpop.f32.mrf.mxu0  ;;  %9490 = vmatprep.subr.bf16.mxu0 %v10870_v43  ;;  %v10806_v62 = vcombine.high %v2726_v35, %v2734_v44  ;;  %v2454_v53 = vld [vmem:[#allocation12 + $0x830] sm:$0xff]  ;;  %v10805_v40 = vcombine.low %v2726_v35, %v2734_v44 }
 0x540   :  { %v2462_v7 = vld [vmem:[#allocation12 + $0x870] sm:$0xff] }
 0x541   :  { %9450 = vmatpush1.bf16.msra.mxu1 %v10613_v4  ;;  %v2710_v43 = vld [vmem:[#allocation12 + $0x1030] sm:$0xff]  ;;  %v10534_v42 = vcombine.high %v2454_v53, %v2462_v7 }
 0x542   :  { %9491 = vmatpush1.bf16.msra.mxu0 %v10869_v56  ;;  %9451 = vmatprep.subr.bf16.mxu1 %v10598_v29  ;;  %v10790_v32 = vcombine.high %v2710_v43, %v2718_v27  ;;  %v2694_v46 = vld [vmem:[#allocation12 + $0xfb0] sm:$0xff]  ;;  %v10533_v29 = vcombine.low %v2454_v53, %v2462_v7  ;;  %v10789_v36 = vcombine.low %v2710_v43, %v2718_v27 }
 0x543   :  { %9492 = vmatprep.subr.bf16.mxu0 %v10854_v39  ;;  %v2702_v4 = vld [vmem:[#allocation12 + $0xff0] sm:$0xff] }
 0x544   :  { %v2950_v17 = vld [vmem:[#allocation12 + $0x17b0] sm:$0xff]  ;;  %v10774_v39 = vcombine.high %v2694_v46, %v2702_v4 }
 0x545   :  { %9452 = vmatpush1.bf16.msra.mxu1 %v10597_v49  ;;  %v2958_v56 = vld [vmem:[#allocation12 + $0x17f0] sm:$0xff] }
 0x546   :  { %9493 = vmatpush1.bf16.msra.mxu0 %v10853_v20  ;;  %9453 = vmatprep.subr.bf16.mxu1 %v10582_v15  ;;  %v11030_v37 = vcombine.high %v2950_v17, %v2958_v56  ;;  %v2686_v30 = vld [vmem:[#allocation12 + $0xf70] sm:$0xff]  ;;  %v10773_v20 = vcombine.low %v2694_v46, %v2702_v4  ;;  %v11029_v15 = vcombine.low %v2950_v17, %v2958_v56 }
 0x547   :  { %9494 = vmatprep.subr.bf16.mxu0 %v10838_v63  ;;  %v2934_v38 = vld [vmem:[#allocation12 + $0x1730] sm:$0xff]  ;;  %v10758_v63 = vcombine.high %v2678_v33, %v2686_v30 }
 0x548   :  { %v2942_v49 = vld [vmem:[#allocation12 + $0x1770] sm:$0xff] }
 0x549   :  { %9454 = vmatpush1.bf16.msra.mxu1 %v10581_v21  ;;  %v11014_v5 = vcombine.high %v2934_v38, %v2942_v49  ;;  %v2662_v54 = vld [vmem:[#allocation12 + $0xeb0] sm:$0xff] }
 0x54a   :  { %9495 = vmatpush1.bf16.msra.mxu0 %v10837_v9  ;;  %9455 = vmatprep.subr.bf16.mxu1 %v10566_v10  ;;  %v2670_v1 = vld [vmem:[#allocation12 + $0xef0] sm:$0xff]  ;;  %v10757_v9 = vcombine.low %v2678_v33, %v2686_v30  ;;  %v11013_v10 = vcombine.low %v2934_v38, %v2942_v49 }
 0x54b   :  { %9496 = vmatprep.subr.bf16.mxu0 %v10822_v2  ;;  %v2918_v3 = vld [vmem:[#allocation12 + $0x16b0] sm:$0xff]  ;;  %v10742_v2 = vcombine.high %v2662_v54, %v2670_v1 }
 0x54c   :  { %v2926_v21 = vld [vmem:[#allocation12 + $0x16f0] sm:$0xff] }
 0x54d   :  { %9456 = vmatpush1.bf16.msra.mxu1 %v10565_v14  ;;  %v10998_v34 = vcombine.high %v2918_v3, %v2926_v21  ;;  %v2646_v24 = vld [vmem:[#allocation12 + $0xe30] sm:$0xff] }
 0x54e   :  { %9497 = vmatpush1.bf16.msra.mxu0 %v10821_v31  ;;  %9457 = vmatprep.subr.bf16.mxu1 %v10550_v19  ;;  %v2654_v35 = vld [vmem:[#allocation12 + $0xe70] sm:$0xff]  ;;  %v10741_v31 = vcombine.low %v2662_v54, %v2670_v1  ;;  %v10997_v19 = vcombine.low %v2918_v3, %v2926_v21 }
 0x54f   :  { %9498 = vmatprep.subr.bf16.mxu0 %v10806_v62  ;;  %v2902_v44 = vld [vmem:[#allocation12 + $0x1630] sm:$0xff]  ;;  %v10726_v62 = vcombine.high %v2646_v24, %v2654_v35 }
 0x550   :  { %v2910_v14 = vld [vmem:[#allocation12 + $0x1670] sm:$0xff] }
 0x551   :  { %9458 = vmatpush1.bf16.msra.mxu1 %v10549_v13  ;;  %v10982_v53 = vcombine.high %v2902_v44, %v2910_v14  ;;  %v2630_v7 = vld [vmem:[#allocation12 + $0xdb0] sm:$0xff] }
 0x552   :  { %9499 = vmatpush1.bf16.msra.mxu0 %v10805_v40  ;;  %9459 = vmatprep.subr.bf16.mxu1 %v10534_v42  ;;  %v2638_v43 = vld [vmem:[#allocation12 + $0xdf0] sm:$0xff]  ;;  %v10725_v40 = vcombine.low %v2646_v24, %v2654_v35  ;;  %v10981_v42 = vcombine.low %v2902_v44, %v2910_v14  ;;  %v2311_v14 = vld [vmem:[#allocation12 + $0x3b8] sm:$0xff] }
 0x553   :  { %9500 = vmatprep.subr.bf16.mxu0 %v10790_v32  ;;  %v2886_v27 = vld [vmem:[#allocation12 + $0x15b0] sm:$0xff]  ;;  %v10710_v32 = vcombine.high %v2630_v7, %v2638_v43 }
 0x554   :  { %v2894_v13 = vld [vmem:[#allocation12 + $0x15f0] sm:$0xff] }
 0x555   :  { %9460 = vmatpush1.bf16.msra.mxu1 %v10533_v29  ;;  %v10966_v46 = vcombine.high %v2886_v27, %v2894_v13  ;;  %v2614_v4 = vld [vmem:[#allocation12 + $0xd30] sm:$0xff] }
 0x556   :  { %9501 = vmatpush1.bf16.msra.mxu0 %v10789_v36  ;;  %9461 = vmatprep.subr.bf16.mxu1 %v10774_v39  ;;  %v2622_v17 = vld [vmem:[#allocation12 + $0xd70] sm:$0xff]  ;;  %v10709_v36 = vcombine.low %v2630_v7, %v2638_v43  ;;  %v10965_v39 = vcombine.low %v2886_v27, %v2894_v13 }
 0x557   :  { %9502 = vmatprep.subr.bf16.mxu0 %v11030_v37  ;;  %v2870_v56 = vld [vmem:[#allocation12 + $0x1530] sm:$0xff]  ;;  %v10694_v37 = vcombine.high %v2614_v4, %v2622_v17 }
 0x558   :  { %v2878_v29 = vld [vmem:[#allocation12 + $0x1570] sm:$0xff] }
 0x559   :  { %9462 = vmatpush2.bf16.msra.mxu1 %v10773_v20  ;;  %v10950_v33 = vcombine.high %v2870_v56, %v2878_v29  ;;  %v2598_v30 = vld [vmem:[#allocation12 + $0xcb0] sm:$0xff] }
 0x55a   :  { %9503 = vmatpush2.bf16.msra.mxu0 %v11029_v15  ;;  %9463 = vmatprep.subr.bf16.mxu1 %v10758_v63  ;;  %v2606_v38 = vld [vmem:[#allocation12 + $0xcf0] sm:$0xff]  ;;  %v10693_v15 = vcombine.low %v2614_v4, %v2622_v17  ;;  %v10949_v63 = vcombine.low %v2870_v56, %v2878_v29 }
 0x55b   :  { %9504 = vmatprep.subr.bf16.mxu0 %v11014_v5  ;;  %v2854_v49 = vld [vmem:[#allocation12 + $0x14b0] sm:$0xff]  ;;  %v10678_v5 = vcombine.high %v2598_v30, %v2606_v38 }
 0x55c   :  { %v2862_v20 = vld [vmem:[#allocation12 + $0x14f0] sm:$0xff] }
 0x55d   :  { %9464 = vmatpush2.bf16.msra.mxu1 %v10757_v9  ;;  %v10934_v54 = vcombine.high %v2854_v49, %v2862_v20  ;;  %v2582_v1 = vld [vmem:[#allocation12 + $0xc30] sm:$0xff] }
 0x55e   :  { %9505 = vmatpush2.bf16.msra.mxu0 %v11013_v10  ;;  %9465 = vmatprep.subr.bf16.mxu1 %v10742_v2  ;;  %v2590_v3 = vld [vmem:[#allocation12 + $0xc70] sm:$0xff]  ;;  %v10677_v10 = vcombine.low %v2598_v30, %v2606_v38  ;;  %v10933_v2 = vcombine.low %v2854_v49, %v2862_v20  ;;  %v9858_v20 = vstv %s12019_s9 }
 0x55f   :  { %9506 = vmatprep.subr.bf16.mxu0 %v10998_v34  ;;  %v2838_v21 = vld [vmem:[#allocation12 + $0x1430] sm:$0xff]  ;;  %v10662_v34 = vcombine.high %v2582_v1, %v2590_v3 }
 0x560   :  { %v2846_v9 = vld [vmem:[#allocation12 + $0x1470] sm:$0xff] }
 0x561   :  { %9466 = vmatpush2.bf16.msra.mxu1 %v10741_v31  ;;  %v10918_v24 = vcombine.high %v2838_v21, %v2846_v9  ;;  %v3078_v35 = vld [vmem:[#allocation12 + $0x1bb0] sm:$0xff]  ;;  %v2319_v31 = vld [vmem:[#allocation12 + $0x3f8] sm:$0xff] }
 0x562   :  { %9507 = vmatpush2.bf16.msra.mxu0 %v10997_v19  ;;  %9467 = vmatprep.subr.bf16.mxu1 %v10726_v62  ;;  %v3086_v44 = vld [vmem:[#allocation12 + $0x1bf0] sm:$0xff]  ;;  %v10661_v19 = vcombine.low %v2582_v1, %v2590_v3  ;;  %v10917_v62 = vcombine.low %v2838_v21, %v2846_v9  ;;  %v10392_v7 = vcombine.high %v2311_v14, %v2319_v31 }
 0x563   :  { %9508 = vmatprep.subr.bf16.mxu0 %v10982_v53  ;;  %v11158_v53 = vcombine.high %v3078_v35, %v3086_v44  ;;  %v3062_v43 = vld [vmem:[#allocation12 + $0x1b30] sm:$0xff]  ;;  %v11157_v13 = vcombine.low %v3078_v35, %v3086_v44 }
 0x564   :  { %v3070_v27 = vld [vmem:[#allocation12 + $0x1b70] sm:$0xff] }
 0x565   :  { %9468 = vmatpush2.bf16.msra.mxu1 %v10725_v40  ;;  %v2295_v40 = vld [vmem:[#allocation12 + $0x338] sm:$0xff]  ;;  %v3046_v4 = vld [vmem:[#allocation12 + $0x1ab0] sm:$0xff]  ;;  %v11141_v38 = vcombine.low %v3062_v43, %v3070_v27 }
 0x566   :  { %9509 = vmatpush2.bf16.msra.mxu0 %v10981_v42  ;;  %9469 = vmatprep.subr.bf16.mxu1 %v10710_v32  ;;  %v2303_v42 = vld [vmem:[#allocation12 + $0x378] sm:$0xff]  ;;  %v10391_v32 = vcombine.low %v2311_v14, %v2319_v31  ;;  %v3054_v17 = vld [vmem:[#allocation12 + $0x1af0] sm:$0xff] }
 0x567   :  { %9510 = vmatprep.subr.bf16.mxu0 %v10966_v46  ;;  %v11142_v46 = vcombine.high %v3062_v43, %v3070_v27  ;;  %v10376_v29 = vcombine.high %v2295_v40, %v2303_v42  ;;  %v10375_v49 = vcombine.low %v2295_v40, %v2303_v42  ;;  %v3030_v1 = vld [vmem:[#allocation12 + $0x1a30] sm:$0xff]  ;;  %v11125_v35 = vcombine.low %v3046_v4, %v3054_v17 }
 0x568   :  { %v3014_v27 = vld [vmem:[#allocation12 + $0x19b0] sm:$0xff] }
 0x569   :  { %9470 = vmatpush2.bf16.msra.mxu1 %v10709_v36  ;;  %v12026_v36 = vld [vmem:[#allocation12 + $0x2b8] sm:$0xff] }
 0x56a   :  { %9511 = vmatpush2.bf16.msra.mxu0 %v10965_v39  ;;  %9471 = vmatprep.subr.bf16.mxu1 %v10694_v37  ;;  %v12028_v39 = vld [vmem:[#allocation12 + $0x2f8] sm:$0xff] }
 0x56b   :  { %9512 = vmatprep.subr.bf16.mxu0 %v10950_v33  ;;  %v9853_v33 = vstv %s12017_s30  ;;  %v10360_v9 = vcombine.high %v12026_v36, %v12028_v39 }
 0x56d   :  { %9472 = vmatpush2.bf16.msra.mxu1 %v10693_v15  ;;  %v9863_v15 = vstv %s12021_s10 }
 0x56e   :  { %9513 = vmatpush2.bf16.msra.mxu0 %v10949_v63  ;;  %9473 = vmatprep.subr.bf16.mxu1 %v10678_v5  ;;  %v9868_v63 = vstv %s12023_s11 }
 0x56f   :  { %9514 = vmatprep.subr.bf16.mxu0 %v10934_v54  ;;  %v11126_v54 = vcombine.high %v3046_v4, %v3054_v17 }
 0x571   :  { %9474 = vmatpush2.bf16.msra.mxu1 %v10677_v10  ;;  %v3038_v10 = vld [vmem:[#allocation12 + $0x1a70] sm:$0xff] }
 0x572   :  { %9515 = vmatpush2.bf16.msra.mxu0 %v10933_v2  ;;  %9475 = vmatprep.subr.bf16.mxu1 %v10662_v34  ;;  %v2263_v2 = vld [vmem:[#allocation12 + $0x238] sm:$0xff] }
 0x573   :  { %9516 = vmatprep.subr.bf16.mxu0 %v10918_v24  ;;  %v2271_v34 = vld [vmem:[#allocation12 + $0x278] sm:$0xff] }
 0x574   :  { %v10344_v43 = vcombine.high %v2263_v2, %v2271_v34 }
 0x575   :  { %9476 = vmatpush2.bf16.msra.mxu1 %v10661_v19 }
 0x576   :  { %9517 = vmatpush2.bf16.msra.mxu0 %v10917_v62  ;;  %9527 = vmatprep.subr.bf16.mxu1 %v11158_v53  ;;  %v10359_v53 = vcombine.low %v12026_v36, %v12028_v39  ;;  %v2247_v39 = vld [vmem:[#allocation12 + $0x1b8] sm:$0xff] }
 0x577   :  { %9568 = vmatprep.subr.bf16.mxu0 %v10392_v7  ;;  %v11110_v7 = vcombine.high %v3030_v1, %v3038_v10 }
 0x578   :  { %v9233_v56 = vpop.f32.mrf.mxu1  ;;  %9478 = vmatmul.mubr.bf16.vlgmr.msra.gmra.mxu1 %v11700_v52 }
 0x579   :  { %v9234_v37 = vadd.f32 %v9233_v56, %v12012_v60  ;;  %v12032_v30 = vpop.f32.mrf.mxu0  ;;  %9519 = vmatmul.mubr.bf16.vlgmr.msra.gmra.mxu0 %v11724_v23  ;;  %9528 = vmatpush1.bf16.msra.mxu1 %v11157_v13  ;;  %v3022_v13 = vld [vmem:[#allocation12 + $0x19f0] sm:$0xff] }
 0x57a   :  { %9559 = vmatprep.mubr.bf16.mxu1 %v11737_v6  ;;  %9569 = vmatpush1.bf16.msra.mxu0 %v10391_v32  ;;  %v9235_v5 = vpop.f32.mrf.mxu1 }
 0x57b   :  { %v9740_v3 = vmax.f32 %v9234_v37, 0.0  ;;  %9600 = vmatprep.mubr.bf16.mxu0 %v11676_v16  ;;  %v9236_v60 = vadd.f32 %v9235_v5, %v12015_v59  ;;  %v12041_v21 = vpop.f32.mrf.mxu0  ;;  %9529 = vmatprep.subr.bf16.mxu1 %v11142_v46  ;;  %v2255_v37 = vld [vmem:[#allocation12 + $0x1f8] sm:$0xff] }
 0x57c   :  { %v9237_v24 = vpop.f32.mrf.mxu1  ;;  %9570 = vmatprep.subr.bf16.mxu0 %v10376_v29  ;;  %v2231_v5 = vld [vmem:[#allocation12 + $0x138] sm:$0xff] }
 0x57d   :  { %v9854_v44 = vmul.f32 %v9853_v33, %v9740_v3  ;;  %v9859_v14 = vmul.f32 %v9858_v20, %v9740_v3  ;;  %v9864_v31 = vmul.f32 %v9863_v15, %v9740_v3  ;;  %v9869_v19 = vmul.f32 %v9868_v63, %v9740_v3  ;;  %v9278_v62 = vpop.f32.mrf.mxu0  ;;  %9530 = vmatpush1.bf16.msra.mxu1 %v11141_v38  ;;  %v2982_v3 = vld [vmem:[#allocation12 + $0x18b0] sm:$0xff] }
 0x57e   :  { %v9741_v16 = vmax.f32 %v9236_v60, 0.0  ;;  %9571 = vmatpush1.bf16.msra.mxu0 %v10375_v49  ;;  %v9238_v59 = vpop.f32.mrf.mxu1  ;;  %9531 = vmatprep.subr.bf16.mxu1 %v11126_v54  ;;  %v10343_v38 = vcombine.low %v2263_v2, %v2271_v34  ;;  %v11094_v49 = vcombine.high %v3014_v27, %v3022_v13  ;;  %v2239_v54 = vld [vmem:[#allocation12 + $0x178] sm:$0xff]  ;;  %v2990_v60 = vld [vmem:[#allocation12 + $0x18f0] sm:$0xff] }
 0x57f   :  { %v12048_v40 = vadd.f32 %v9854_v44, %v11978_v57  ;;  %v12051_v42 = vadd.f32 %v9859_v14, %v11981_v58  ;;  %v12054_v32 = vadd.f32 %v9864_v31, %v11984_v47  ;;  %v12057_v46 = vadd.f32 %v9869_v19, %v11987_v61  ;;  %v9279_v4 = vpop.f32.mrf.mxu0  ;;  %9572 = vmatprep.subr.bf16.mxu0 %v10360_v9  ;;  %v2223_v9 = vld [vmem:[#allocation12 + $0xf8] sm:$0xff]  ;;  %v2974_v44 = vld [vmem:[#allocation12 + $0x1870] sm:$0xff] }
 0x580   :  { %v9855_v17 = vmul.f32 %v9853_v33, %v9741_v16  ;;  %v9860_v56 = vmul.f32 %v9858_v20, %v9741_v16  ;;  %v9865_v29 = vmul.f32 %v9863_v15, %v9741_v16  ;;  %v9870_v36 = vmul.f32 %v9868_v63, %v9741_v16  ;;  %v2998_v15 = vld [vmem:[#allocation12 + $0x1930] sm:$0xff]  ;;  %v2199_v14 = vld [vmem:[#allocation12 + $0x38] sm:$0xff] }
 0x581   :  { %9532 = vmatpush1.bf16.msra.mxu1 %v11125_v35  ;;  %v11109_v57 = vcombine.low %v3030_v1, %v3038_v10  ;;  %v10328_v20 = vcombine.high %v2247_v39, %v2255_v37  ;;  %v3006_v63 = vld [vmem:[#allocation12 + $0x1970] sm:$0xff]  ;;  %v10311_v2 = vcombine.low %v2231_v5, %v2239_v54  ;;  %v11062_v34 = vcombine.high %v2982_v3, %v2990_v60  ;;  %v2207_v31 = vld [vmem:[#allocation12 + $0x78] sm:$0xff] }
 0x582   :  { %v12060_v58 = vadd.f32 %v9855_v17, %v11990_v50  ;;  %v12063_v47 = vadd.f32 %v9860_v56, %v11993_v8  ;;  %v12066_v61 = vadd.f32 %v9865_v29, %v11996_v11  ;;  %v12069_v33 = vadd.f32 %v9870_v36, %v11999_v45  ;;  %9573 = vmatpush1.bf16.msra.mxu0 %v10359_v53  ;;  %v2215_v45 = vld [vmem:[#allocation12 + $0xb8] sm:$0xff]  ;;  %v2966_v35 = vld [vmem:[#allocation12 + $0x1830] sm:$0xff] }
 0x583   :  { %9533 = vmatprep.subr.bf16.mxu1 %v11110_v7  ;;  %9574 = vmatprep.subr.bf16.mxu0 %v10344_v43  ;;  %v11093_v50 = vcombine.low %v3014_v27, %v3022_v13  ;;  %v10327_v8 = vcombine.low %v2247_v39, %v2255_v37  ;;  %v11078_v1 = vcombine.high %v2998_v15, %v3006_v63  ;;  %v3206_v53 = vld [vmem:[#allocation12 + $0x1fb0] sm:$0xff]  ;;  %v2439_v43 = vld [vmem:[#allocation12 + $0x7b8] sm:$0xff] }
 0x584   :  { %v10312_v11 = vcombine.high %v2231_v5, %v2239_v54  ;;  %v11077_v10 = vcombine.low %v2998_v15, %v3006_v63  ;;  %v10296_v24 = vcombine.high %v2215_v45, %v2223_v9  ;;  %v11061_v19 = vcombine.low %v2982_v3, %v2990_v60  ;;  %v3214_v7 = vld [vmem:[#allocation12 + $0x1ff0] sm:$0xff]  ;;  %v2447_v27 = vld [vmem:[#allocation12 + $0x7f8] sm:$0xff] }
 0x585   :  { %9534 = vmatpush1.bf16.msra.mxu1 %v11109_v57  ;;  %v10295_v62 = vcombine.low %v2215_v45, %v2223_v9  ;;  %v11046_v16 = vcombine.high %v2966_v35, %v2974_v44  ;;  %v10280_v59 = vcombine.high %v2199_v14, %v2207_v31  ;;  %v11045_v13 = vcombine.low %v2966_v35, %v2974_v44  ;;  %v3190_v29 = vld [vmem:[#allocation12 + $0x1f30] sm:$0xff]  ;;  %v2423_v39 = vld [vmem:[#allocation12 + $0x738] sm:$0xff] }
 0x586   :  { %9575 = vmatpush1.bf16.msra.mxu0 %v10343_v38  ;;  %9535 = vmatprep.subr.bf16.mxu1 %v11094_v49  ;;  %v10279_v4 = vcombine.low %v2199_v14, %v2207_v31  ;;  %v11286_v17 = vcombine.high %v3206_v53, %v3214_v7  ;;  %v10520_v56 = vcombine.high %v2439_v43, %v2447_v27  ;;  %v3198_v36 = vld [vmem:[#allocation12 + $0x1f70] sm:$0xff]  ;;  %v2431_v37 = vld [vmem:[#allocation12 + $0x778] sm:$0xff] }
 0x587   :  { %9576 = vmatprep.subr.bf16.mxu0 %v10328_v20  ;;  %v11285_v57 = vcombine.low %v3206_v53, %v3214_v7  ;;  %v10519_v38 = vcombine.low %v2439_v43, %v2447_v27  ;;  %v11270_v49 = vcombine.high %v3190_v29, %v3198_v36  ;;  %v10504_v20 = vcombine.high %v2423_v39, %v2431_v37  ;;  %v3174_v15 = vld [vmem:[#allocation12 + $0x1eb0] sm:$0xff]  ;;  %v2407_v5 = vld [vmem:[#allocation12 + $0x6b8] sm:$0xff] }
 0x588   :  { %v3182_v63 = vld [vmem:[#allocation12 + $0x1ef0] sm:$0xff]  ;;  %v2415_v54 = vld [vmem:[#allocation12 + $0x6f8] sm:$0xff] }
 0x589   :  { %9536 = vmatpush1.bf16.msra.mxu1 %v11093_v50  ;;  %v11269_v50 = vcombine.low %v3190_v29, %v3198_v36  ;;  %v3158_v3 = vld [vmem:[#allocation12 + $0x1e30] sm:$0xff]  ;;  %v2391_v45 = vld [vmem:[#allocation12 + $0x638] sm:$0xff] }
 0x58a   :  { %9577 = vmatpush1.bf16.msra.mxu0 %v10327_v8  ;;  %9537 = vmatprep.subr.bf16.mxu1 %v11078_v1  ;;  %v10503_v8 = vcombine.low %v2423_v39, %v2431_v37  ;;  %v11254_v1 = vcombine.high %v3174_v15, %v3182_v63  ;;  %v3166_v60 = vld [vmem:[#allocation12 + $0x1e70] sm:$0xff]  ;;  %v2399_v9 = vld [vmem:[#allocation12 + $0x678] sm:$0xff] }
 0x58b   :  { %9578 = vmatprep.subr.bf16.mxu0 %v10312_v11  ;;  %v10488_v11 = vcombine.high %v2407_v5, %v2415_v54  ;;  %v3142_v35 = vld [vmem:[#allocation12 + $0x1db0] sm:$0xff]  ;;  %v2375_v14 = vld [vmem:[#allocation12 + $0x5b8] sm:$0xff] }
 0x58c   :  { %v3150_v44 = vld [vmem:[#allocation12 + $0x1df0] sm:$0xff]  ;;  %v2383_v31 = vld [vmem:[#allocation12 + $0x5f8] sm:$0xff] }
 0x58d   :  { %9538 = vmatpush1.bf16.msra.mxu1 %v11077_v10  ;;  %v11253_v10 = vcombine.low %v3174_v15, %v3182_v63  ;;  %v3126_v53 = vld [vmem:[#allocation12 + $0x1d30] sm:$0xff]  ;;  %v2359_v43 = vld [vmem:[#allocation12 + $0x538] sm:$0xff] }
 0x58e   :  { %9579 = vmatpush1.bf16.msra.mxu0 %v10311_v2  ;;  %9539 = vmatprep.subr.bf16.mxu1 %v11062_v34  ;;  %v10487_v2 = vcombine.low %v2407_v5, %v2415_v54  ;;  %v11238_v34 = vcombine.high %v3158_v3, %v3166_v60  ;;  %v3134_v7 = vld [vmem:[#allocation12 + $0x1d70] sm:$0xff]  ;;  %v2367_v27 = vld [vmem:[#allocation12 + $0x578] sm:$0xff] }
 0x58f   :  { %9580 = vmatprep.subr.bf16.mxu0 %v10296_v24  ;;  %v10472_v24 = vcombine.high %v2391_v45, %v2399_v9  ;;  %v3110_v29 = vld [vmem:[#allocation12 + $0x1cb0] sm:$0xff]  ;;  %v2343_v39 = vld [vmem:[#allocation12 + $0x4b8] sm:$0xff] }
 0x590   :  { %v3118_v36 = vld [vmem:[#allocation12 + $0x1cf0] sm:$0xff]  ;;  %v2351_v37 = vld [vmem:[#allocation12 + $0x4f8] sm:$0xff] }
 0x591   :  { %9540 = vmatpush1.bf16.msra.mxu1 %v11061_v19  ;;  %v11237_v19 = vcombine.low %v3158_v3, %v3166_v60  ;;  %v3094_v15 = vld [vmem:[#allocation12 + $0x1c30] sm:$0xff]  ;;  %v2327_v5 = vld [vmem:[#allocation12 + $0x438] sm:$0xff] }
 0x592   :  { %9581 = vmatpush1.bf16.msra.mxu0 %v10295_v62  ;;  %9541 = vmatprep.subr.bf16.mxu1 %v11046_v16  ;;  %v10471_v62 = vcombine.low %v2391_v45, %v2399_v9  ;;  %v11222_v16 = vcombine.high %v3142_v35, %v3150_v44  ;;  %v3102_v63 = vld [vmem:[#allocation12 + $0x1c70] sm:$0xff]  ;;  %v2335_v54 = vld [vmem:[#allocation12 + $0x478] sm:$0xff] }
 0x593   :  { %9582 = vmatprep.subr.bf16.mxu0 %v10280_v59  ;;  %v10456_v59 = vcombine.high %v2375_v14, %v2383_v31  ;;  %v2567_v3 = vld [vmem:[#allocation12 + $0xbb8] sm:$0xff] }
 0x594   :  { %v2575_v60 = vld [vmem:[#allocation12 + $0xbf8] sm:$0xff] }
 0x595   :  { %9542 = vmatpush1.bf16.msra.mxu1 %v11045_v13  ;;  %v11221_v13 = vcombine.low %v3142_v35, %v3150_v44  ;;  %v2823_v45 = vld [vmem:[#allocation12 + $0x13b8] sm:$0xff] }
 0x596   :  { %9583 = vmatpush1.bf16.msra.mxu0 %v10279_v4  ;;  %9543 = vmatprep.subr.bf16.mxu1 %v11286_v17  ;;  %v10455_v4 = vcombine.low %v2375_v14, %v2383_v31  ;;  %v11206_v17 = vcombine.high %v3126_v53, %v3134_v7  ;;  %v2831_v9 = vld [vmem:[#allocation12 + $0x13f8] sm:$0xff]  ;;  %v3267_v31 = vrot.slane %v12001_v0, %v11638_v25 }
 0x597   :  { %9584 = vmatprep.subr.bf16.mxu0 %v10520_v56  ;;  %v10440_v56 = vcombine.high %v2359_v43, %v2367_v27  ;;  %v10904_v35 = vcombine.high %v2823_v45, %v2831_v9  ;;  %v2551_v44 = vld [vmem:[#allocation12 + $0xb38] sm:$0xff] }
 0x598   :  { %v2559_v14 = vld [vmem:[#allocation12 + $0xb78] sm:$0xff]  ;;  %v9277_v25 = vadd.f32 %v12041_v21, %v3267_v31 }
 0x599   :  { %9544 = vmatpush2.bf16.msra.mxu1 %v11285_v57  ;;  %v11205_v57 = vcombine.low %v3126_v53, %v3134_v7  ;;  %v10632_v7 = vcombine.high %v2551_v44, %v2559_v14  ;;  %v2751_v31 = vld [vmem:[#allocation12 + $0x1178] sm:$0xff] }
 0x59a   :  { %9585 = vmatpush2.bf16.msra.mxu0 %v10519_v38  ;;  %9545 = vmatprep.subr.bf16.mxu1 %v11270_v49  ;;  %v10439_v38 = vcombine.low %v2359_v43, %v2367_v27  ;;  %v11190_v49 = vcombine.high %v3110_v29, %v3118_v36  ;;  %v2535_v43 = vld [vmem:[#allocation12 + $0xab8] sm:$0xff] }
 0x59b   :  { %9586 = vmatprep.subr.bf16.mxu0 %v10504_v20  ;;  %v10424_v20 = vcombine.high %v2343_v39, %v2351_v37 }
 0x59d   :  { %9546 = vmatpush2.bf16.msra.mxu1 %v11269_v50  ;;  %v11189_v50 = vcombine.low %v3110_v29, %v3118_v36  ;;  %v10631_v29 = vcombine.low %v2551_v44, %v2559_v14  ;;  %v2495_v44 = vld [vmem:[#allocation12 + $0x978] sm:$0xff] }
 0x59e   :  { %9587 = vmatpush2.bf16.msra.mxu0 %v10503_v8  ;;  %9547 = vmatprep.subr.bf16.mxu1 %v11254_v1  ;;  %v10423_v8 = vcombine.low %v2343_v39, %v2351_v37  ;;  %v11174_v1 = vcombine.high %v3094_v15, %v3102_v63  ;;  %v2743_v14 = vld [vmem:[#allocation12 + $0x1138] sm:$0xff] }
 0x59f   :  { %9588 = vmatprep.subr.bf16.mxu0 %v10488_v11  ;;  %v10408_v11 = vcombine.high %v2327_v5, %v2335_v54 }
 0x5a1   :  { %9548 = vmatpush2.bf16.msra.mxu1 %v11253_v10  ;;  %v11173_v10 = vcombine.low %v3094_v15, %v3102_v63  ;;  %v2783_v63 = vld [vmem:[#allocation12 + $0x1278] sm:$0xff] }
 0x5a2   :  { %9589 = vmatpush2.bf16.msra.mxu0 %v10487_v2  ;;  %9549 = vmatprep.subr.bf16.mxu1 %v11238_v34  ;;  %v10407_v2 = vcombine.low %v2327_v5, %v2335_v54  ;;  %v10648_v34 = vcombine.high %v2567_v3, %v2575_v60 }
 0x5a3   :  { %9590 = vmatprep.subr.bf16.mxu0 %v10472_v24  ;;  %v3263_v24 = vrot.slane %v12001_v0, %v11632_v22  ;;  %v2543_v22 = vld [vmem:[#allocation12 + $0xaf8] sm:$0xff] }
 0x5a4   :  { %v10616_v39 = vcombine.high %v2535_v43, %v2543_v22  ;;  %v10615_v54 = vcombine.low %v2535_v43, %v2543_v22  ;;  %v2727_v43 = vld [vmem:[#allocation12 + $0x10b8] sm:$0xff] }
 0x5a5   :  { %9550 = vmatpush2.bf16.msra.mxu1 %v11237_v19  ;;  %v10647_v19 = vcombine.low %v2567_v3, %v2575_v60  ;;  %v9275_v53 = vadd.f32 %v12032_v30, %v3263_v24  ;;  %v2503_v3 = vld [vmem:[#allocation12 + $0x9b8] sm:$0xff] }
 0x5a6   :  { %9591 = vmatpush2.bf16.msra.mxu0 %v10471_v62  ;;  %9551 = vmatprep.subr.bf16.mxu1 %v11222_v16  ;;  %v2807_v62 = vld [vmem:[#allocation12 + $0x1338] sm:$0xff] }
 0x5a7   :  { %9592 = vmatprep.subr.bf16.mxu0 %v10456_v59  ;;  %v2815_v16 = vld [vmem:[#allocation12 + $0x1378] sm:$0xff]  ;;  %v10903_v59 = vcombine.low %v2823_v45, %v2831_v9 }
 0x5a8   :  { %v10887_v36 = vcombine.low %v2807_v62, %v2815_v16  ;;  %v2511_v60 = vld [vmem:[#allocation12 + $0x9f8] sm:$0xff] }
 0x5a9   :  { %9552 = vmatpush2.bf16.msra.mxu1 %v11221_v13  ;;  %v10888_v13 = vcombine.high %v2807_v62, %v2815_v16  ;;  %v2759_v45 = vld [vmem:[#allocation12 + $0x11b8] sm:$0xff] }
 0x5aa   :  { %9593 = vmatpush2.bf16.msra.mxu0 %v10455_v4  ;;  %9553 = vmatprep.subr.bf16.mxu1 %v11206_v17  ;;  %v2791_v4 = vld [vmem:[#allocation12 + $0x12b8] sm:$0xff] }
 0x5ab   :  { %9594 = vmatprep.subr.bf16.mxu0 %v10440_v56  ;;  %v2799_v17 = vld [vmem:[#allocation12 + $0x12f8] sm:$0xff] }
 0x5ac   :  { %v10872_v21 = vcombine.high %v2791_v4, %v2799_v17  ;;  %v2767_v9 = vld [vmem:[#allocation12 + $0x11f8] sm:$0xff] }
 0x5ad   :  { %9554 = vmatpush2.bf16.msra.mxu1 %v11205_v57  ;;  %v10840_v24 = vcombine.high %v2759_v45, %v2767_v9  ;;  %v10839_v62 = vcombine.low %v2759_v45, %v2767_v9  ;;  %v2735_v22 = vld [vmem:[#allocation12 + $0x10f8] sm:$0xff] }
 0x5ae   :  { %9595 = vmatpush2.bf16.msra.mxu0 %v10439_v38  ;;  %9555 = vmatprep.subr.bf16.mxu1 %v11190_v49  ;;  %v2519_v49 = vld [vmem:[#allocation12 + $0xa38] sm:$0xff] }
 0x5af   :  { %9596 = vmatprep.subr.bf16.mxu0 %v10424_v20  ;;  %v2527_v20 = vld [vmem:[#allocation12 + $0xa78] sm:$0xff] }
 0x5b0   :  { %v2663_v45 = vld [vmem:[#allocation12 + $0xeb8] sm:$0xff] }
 0x5b1   :  { %9556 = vmatpush2.bf16.msra.mxu1 %v11189_v50  ;;  %v2671_v9 = vld [vmem:[#allocation12 + $0xef8] sm:$0xff] }
 0x5b2   :  { %9597 = vmatpush2.bf16.msra.mxu0 %v10423_v8  ;;  %9557 = vmatprep.subr.bf16.mxu1 %v11174_v1  ;;  %v10871_v8 = vcombine.low %v2791_v4, %v2799_v17  ;;  %v10808_v17 = vcombine.high %v2727_v43, %v2735_v22 }
 0x5b3   :  { %9598 = vmatprep.subr.bf16.mxu0 %v10408_v11 }
 0x5b5   :  { %9558 = vmatpush2.bf16.msra.mxu1 %v11173_v10  ;;  %v10599_v10 = vcombine.low %v2519_v49, %v2527_v20 }
 0x5b6   :  { %9599 = vmatpush2.bf16.msra.mxu0 %v10407_v2  ;;  %9609 = vmatprep.subr.bf16.mxu1 %v10648_v34  ;;  %v10584_v34 = vcombine.high %v2503_v3, %v2511_v60 }
 0x5b7   :  { %9650 = vmatprep.subr.bf16.mxu0 %v10904_v35  ;;  %v2487_v35 = vld [vmem:[#allocation12 + $0x938] sm:$0xff] }
 0x5b8   :  { %v9315_v27 = vpop.f32.mrf.mxu1  ;;  %9560 = vmatmul.mubr.bf16.vlgmr.msra.gmra.mxu1 %v11739_v55  ;;  %v10568_v16 = vcombine.high %v2487_v35, %v2495_v44 }
 0x5b9   :  { %v9316_v0 = vadd.f32 %v9315_v27, %v9275_v53  ;;  %v9356_v56 = vpop.f32.mrf.mxu0  ;;  %9601 = vmatmul.mubr.bf16.vlgmr.msra.gmra.mxu0 %v11691_v12  ;;  %9610 = vmatpush1.bf16.msra.mxu1 %v10647_v19  ;;  %v2775_v12 = vld [vmem:[#allocation12 + $0x1238] sm:$0xff]  ;;  %v10583_v19 = vcombine.low %v2503_v3, %v2511_v60  ;;  %v10567_v27 = vcombine.low %v2487_v35, %v2495_v44 }
 0x5ba   :  { %9641 = vmatprep.mubr.bf16.mxu1 %v11696_v51  ;;  %9651 = vmatpush1.bf16.msra.mxu0 %v10903_v59  ;;  %v9317_v30 = vpop.f32.mrf.mxu1  ;;  %v10856_v11 = vcombine.high %v2775_v12, %v2783_v63  ;;  %v10855_v2 = vcombine.low %v2775_v12, %v2783_v63  ;;  %v10824_v59 = vcombine.high %v2743_v14, %v2751_v31  ;;  %v2471_v53 = vld [vmem:[#allocation12 + $0x8b8] sm:$0xff] }
 0x5bb   :  { %v12080_v37 = vadd.f32 %v9356_v56, %v9316_v0  ;;  %9682 = vmatprep.mubr.bf16.mxu0 %v11722_v18  ;;  %v9318_v57 = vadd.f32 %v9317_v30, %v9277_v25  ;;  %v9358_v38 = vpop.f32.mrf.mxu0  ;;  %9611 = vmatprep.subr.bf16.mxu1 %v10632_v7  ;;  %v10600_v18 = vcombine.high %v2519_v49, %v2527_v20  ;;  %v2479_v7 = vld [vmem:[#allocation12 + $0x8f8] sm:$0xff] }
 0x5bc   :  { %v9319_v15 = vpop.f32.mrf.mxu1  ;;  %9652 = vmatprep.subr.bf16.mxu0 %v10888_v13  ;;  %v10823_v13 = vcombine.low %v2743_v14, %v2751_v31  ;;  %v10552_v4 = vcombine.high %v2471_v53, %v2479_v7  ;;  %v2455_v25 = vld [vmem:[#allocation12 + $0x838] sm:$0xff]  ;;  %v10551_v30 = vcombine.low %v2471_v53, %v2479_v7  ;;  %v10744_v35 = vcombine.high %v2663_v45, %v2671_v9 }
 0x5bd   :  { %v12083_v5 = vadd.f32 %v9358_v38, %v9318_v57  ;;  %v9360_v51 = vpop.f32.mrf.mxu0  ;;  %9612 = vmatpush1.bf16.msra.mxu1 %v10631_v29  ;;  %v2463_v0 = vld [vmem:[#allocation12 + $0x878] sm:$0xff] }
 0x5be   :  { %9653 = vmatpush1.bf16.msra.mxu0 %v10887_v36  ;;  %v9320_v50 = vpop.f32.mrf.mxu1  ;;  %9613 = vmatprep.subr.bf16.mxu1 %v10616_v39  ;;  %v2711_v56 = vld [vmem:[#allocation12 + $0x1038] sm:$0xff]  ;;  %v10807_v36 = vcombine.low %v2727_v43, %v2735_v22  ;;  %v10536_v39 = vcombine.high %v2455_v25, %v2463_v0  ;;  %v10535_v15 = vcombine.low %v2455_v25, %v2463_v0 }
 0x5bf   :  { %v9361_v1 = vpop.f32.mrf.mxu0  ;;  %9654 = vmatprep.subr.bf16.mxu0 %v10872_v21  ;;  %v2719_v29 = vld [vmem:[#allocation12 + $0x1078] sm:$0xff] }
 0x5c0   :  { %v10792_v57 = vcombine.high %v2711_v56, %v2719_v29  ;;  %v2695_v38 = vld [vmem:[#allocation12 + $0xfb8] sm:$0xff]  ;;  %v10791_v12 = vcombine.low %v2711_v56, %v2719_v29 }
 0x5c1   :  { %9614 = vmatpush1.bf16.msra.mxu1 %v10615_v54  ;;  %v2703_v21 = vld [vmem:[#allocation12 + $0xff8] sm:$0xff] }
 0x5c2   :  { %9655 = vmatpush1.bf16.msra.mxu0 %v10871_v8  ;;  %9615 = vmatprep.subr.bf16.mxu1 %v10600_v18  ;;  %v2951_v49 = vld [vmem:[#allocation12 + $0x17b8] sm:$0xff]  ;;  %v10776_v63 = vcombine.high %v2695_v38, %v2703_v21  ;;  %v10775_v1 = vcombine.low %v2695_v38, %v2703_v21 }
 0x5c3   :  { %9656 = vmatprep.subr.bf16.mxu0 %v10856_v11  ;;  %v2959_v20 = vld [vmem:[#allocation12 + $0x17f8] sm:$0xff] }
 0x5c4   :  { %v11032_v51 = vcombine.high %v2951_v49, %v2959_v20  ;;  %v2679_v54 = vld [vmem:[#allocation12 + $0xf38] sm:$0xff]  ;;  %v11031_v11 = vcombine.low %v2951_v49, %v2959_v20 }
 0x5c5   :  { %9616 = vmatpush1.bf16.msra.mxu1 %v10599_v10  ;;  %v2687_v50 = vld [vmem:[#allocation12 + $0xf78] sm:$0xff] }
 0x5c6   :  { %9657 = vmatpush1.bf16.msra.mxu0 %v10855_v2  ;;  %9617 = vmatprep.subr.bf16.mxu1 %v10584_v34  ;;  %v2935_v8 = vld [vmem:[#allocation12 + $0x1738] sm:$0xff]  ;;  %v10760_v3 = vcombine.high %v2679_v54, %v2687_v50  ;;  %v10759_v34 = vcombine.low %v2679_v54, %v2687_v50 }
 0x5c7   :  { %9658 = vmatprep.subr.bf16.mxu0 %v10840_v24  ;;  %v2943_v18 = vld [vmem:[#allocation12 + $0x1778] sm:$0xff] }
 0x5c8   :  { %v11016_v60 = vcombine.high %v2935_v8, %v2943_v18  ;;  %v2919_v10 = vld [vmem:[#allocation12 + $0x16b8] sm:$0xff]  ;;  %v11015_v24 = vcombine.low %v2935_v8, %v2943_v18 }
 0x5c9   :  { %9618 = vmatpush1.bf16.msra.mxu1 %v10583_v19  ;;  %v2927_v2 = vld [vmem:[#allocation12 + $0x16f8] sm:$0xff] }
 0x5ca   :  { %9659 = vmatpush1.bf16.msra.mxu0 %v10839_v62  ;;  %9619 = vmatprep.subr.bf16.mxu1 %v10568_v16  ;;  %v11000_v44 = vcombine.high %v2919_v10, %v2927_v2  ;;  %v2647_v14 = vld [vmem:[#allocation12 + $0xe38] sm:$0xff]  ;;  %v10743_v16 = vcombine.low %v2663_v45, %v2671_v9 }
 0x5cb   :  { %9660 = vmatprep.subr.bf16.mxu0 %v10824_v59  ;;  %v2655_v31 = vld [vmem:[#allocation12 + $0xe78] sm:$0xff]  ;;  %v10999_v59 = vcombine.low %v2919_v10, %v2927_v2 }
 0x5cc   :  { %v2903_v19 = vld [vmem:[#allocation12 + $0x1638] sm:$0xff]  ;;  %v10728_v53 = vcombine.high %v2647_v14, %v2655_v31 }
 0x5cd   :  { %9620 = vmatpush1.bf16.msra.mxu1 %v10567_v27  ;;  %v2911_v62 = vld [vmem:[#allocation12 + $0x1678] sm:$0xff] }
 0x5ce   :  { %9661 = vmatpush1.bf16.msra.mxu0 %v10823_v13  ;;  %9621 = vmatprep.subr.bf16.mxu1 %v10552_v4  ;;  %v10984_v7 = vcombine.high %v2903_v19, %v2911_v62  ;;  %v2631_v43 = vld [vmem:[#allocation12 + $0xdb8] sm:$0xff]  ;;  %v10727_v4 = vcombine.low %v2647_v14, %v2655_v31 }
 0x5cf   :  { %9662 = vmatprep.subr.bf16.mxu0 %v10808_v17  ;;  %v2639_v22 = vld [vmem:[#allocation12 + $0xdf8] sm:$0xff]  ;;  %v10983_v17 = vcombine.low %v2903_v19, %v2911_v62 }
 0x5d0   :  { %v2887_v27 = vld [vmem:[#allocation12 + $0x15b8] sm:$0xff]  ;;  %v10712_v25 = vcombine.high %v2631_v43, %v2639_v22 }
 0x5d1   :  { %9622 = vmatpush1.bf16.msra.mxu1 %v10551_v30  ;;  %v2895_v13 = vld [vmem:[#allocation12 + $0x15f8] sm:$0xff] }
 0x5d2   :  { %9663 = vmatpush1.bf16.msra.mxu0 %v10807_v36  ;;  %9623 = vmatprep.subr.bf16.mxu1 %v10536_v39  ;;  %v10968_v0 = vcombine.high %v2887_v27, %v2895_v13  ;;  %v2615_v56 = vld [vmem:[#allocation12 + $0xd38] sm:$0xff]  ;;  %v10711_v39 = vcombine.low %v2631_v43, %v2639_v22 }
 0x5d3   :  { %9664 = vmatprep.subr.bf16.mxu0 %v10792_v57  ;;  %v2623_v29 = vld [vmem:[#allocation12 + $0xd78] sm:$0xff]  ;;  %v10967_v57 = vcombine.low %v2887_v27, %v2895_v13  ;;  %v9878_v27 = vstv %s12087_s13  ;;  %v9883_v13 = vstv %s12089_s0 }
 0x5d4   :  { %v2871_v30 = vld [vmem:[#allocation12 + $0x1538] sm:$0xff]  ;;  %v10696_v38 = vcombine.high %v2615_v56, %v2623_v29 }
 0x5d5   :  { %9624 = vmatpush1.bf16.msra.mxu1 %v10535_v15  ;;  %v2879_v36 = vld [vmem:[#allocation12 + $0x1578] sm:$0xff] }
 0x5d6   :  { %9665 = vmatpush1.bf16.msra.mxu0 %v10791_v12  ;;  %9625 = vmatprep.subr.bf16.mxu1 %v10776_v63  ;;  %v10952_v21 = vcombine.high %v2871_v30, %v2879_v36  ;;  %v2599_v49 = vld [vmem:[#allocation12 + $0xcb8] sm:$0xff]  ;;  %v10695_v63 = vcombine.low %v2615_v56, %v2623_v29 }
 0x5d7   :  { %9666 = vmatprep.subr.bf16.mxu0 %v11032_v51  ;;  %v2607_v20 = vld [vmem:[#allocation12 + $0xcf8] sm:$0xff]  ;;  %v10951_v51 = vcombine.low %v2871_v30, %v2879_v36 }
 0x5d8   :  { %v2855_v15 = vld [vmem:[#allocation12 + $0x14b8] sm:$0xff]  ;;  %v10680_v54 = vcombine.high %v2599_v49, %v2607_v20 }
 0x5d9   :  { %9626 = vmatpush2.bf16.msra.mxu1 %v10775_v1  ;;  %v2863_v12 = vld [vmem:[#allocation12 + $0x14f8] sm:$0xff] }
 0x5da   :  { %9667 = vmatpush2.bf16.msra.mxu0 %v11031_v11  ;;  %9627 = vmatprep.subr.bf16.mxu1 %v10760_v3  ;;  %v10936_v50 = vcombine.high %v2855_v15, %v2863_v12  ;;  %v2583_v8 = vld [vmem:[#allocation12 + $0xc38] sm:$0xff]  ;;  %v10679_v3 = vcombine.low %v2599_v49, %v2607_v20 }
 0x5db   :  { %9668 = vmatprep.subr.bf16.mxu0 %v11016_v60  ;;  %v2591_v18 = vld [vmem:[#allocation12 + $0xc78] sm:$0xff]  ;;  %v10935_v60 = vcombine.low %v2855_v15, %v2863_v12 }
 0x5dc   :  { %v2839_v1 = vld [vmem:[#allocation12 + $0x1438] sm:$0xff]  ;;  %v10664_v45 = vcombine.high %v2583_v8, %v2591_v18 }
 0x5dd   :  { %9628 = vmatpush2.bf16.msra.mxu1 %v10759_v34  ;;  %v2847_v11 = vld [vmem:[#allocation12 + $0x1478] sm:$0xff]  ;;  %v10663_v34 = vcombine.low %v2583_v8, %v2591_v18 }
 0x5de   :  { %9669 = vmatpush2.bf16.msra.mxu0 %v11015_v24  ;;  %9629 = vmatprep.subr.bf16.mxu1 %v10744_v35  ;;  %v10920_v9 = vcombine.high %v2839_v1, %v2847_v11  ;;  %v3079_v10 = vld [vmem:[#allocation12 + $0x1bb8] sm:$0xff]  ;;  %v10919_v24 = vcombine.low %v2839_v1, %v2847_v11 }
 0x5df   :  { %9670 = vmatprep.subr.bf16.mxu0 %v11000_v44  ;;  %v3087_v2 = vld [vmem:[#allocation12 + $0x1bf8] sm:$0xff] }
 0x5e0   :  { %v11160_v35 = vcombine.high %v3079_v10, %v3087_v2  ;;  %v3063_v44 = vld [vmem:[#allocation12 + $0x1b38] sm:$0xff]  ;;  %v11159_v31 = vcombine.low %v3079_v10, %v3087_v2 }
 0x5e1   :  { %9630 = vmatpush2.bf16.msra.mxu1 %v10743_v16  ;;  %v3071_v14 = vld [vmem:[#allocation12 + $0x1b78] sm:$0xff] }
 0x5e2   :  { %9671 = vmatpush2.bf16.msra.mxu0 %v10999_v59  ;;  %9631 = vmatprep.subr.bf16.mxu1 %v10728_v53  ;;  %v11144_v19 = vcombine.high %v3063_v44, %v3071_v14  ;;  %v3047_v62 = vld [vmem:[#allocation12 + $0x1ab8] sm:$0xff]  ;;  %v11143_v22 = vcombine.low %v3063_v44, %v3071_v14 }
 0x5e3   :  { %9672 = vmatprep.subr.bf16.mxu0 %v10984_v7  ;;  %v3055_v16 = vld [vmem:[#allocation12 + $0x1af8] sm:$0xff]  ;;  %v9873_v7 = vstv %s12085_s12 }
 0x5e4   :  { %v3039_v29 = vld [vmem:[#allocation12 + $0x1a78] sm:$0xff]  ;;  %v11127_v36 = vcombine.low %v3047_v62, %v3055_v16 }
 0x5e5   :  { %9632 = vmatpush2.bf16.msra.mxu1 %v10727_v4  ;;  %v9888_v4 = vstv %s12091_s14  ;;  %v3015_v15 = vld [vmem:[#allocation12 + $0x19b8] sm:$0xff] }
 0x5e6   :  { %9673 = vmatpush2.bf16.msra.mxu0 %v10983_v17  ;;  %9633 = vmatprep.subr.bf16.mxu1 %v10712_v25  ;;  %v11128_v25 = vcombine.high %v3047_v62, %v3055_v16  ;;  %v3023_v12 = vld [vmem:[#allocation12 + $0x19f8] sm:$0xff] }
 0x5e7   :  { %9674 = vmatprep.subr.bf16.mxu0 %v10968_v0  ;;  %v11095_v10 = vcombine.low %v3015_v15, %v3023_v12  ;;  %v2975_v44 = vld [vmem:[#allocation12 + $0x1878] sm:$0xff] }
 0x5e8   :  { %v3207_v14 = vld [vmem:[#allocation12 + $0x1fb8] sm:$0xff] }
 0x5e9   :  { %9634 = vmatpush2.bf16.msra.mxu1 %v10711_v39  ;;  %v3191_v16 = vld [vmem:[#allocation12 + $0x1f38] sm:$0xff] }
 0x5ea   :  { %9675 = vmatpush2.bf16.msra.mxu0 %v10967_v57  ;;  %9635 = vmatprep.subr.bf16.mxu1 %v10696_v38 }
 0x5eb   :  { %9676 = vmatprep.subr.bf16.mxu0 %v10952_v21 }
 0x5ed   :  { %9636 = vmatpush2.bf16.msra.mxu1 %v10695_v63 }
 0x5ee   :  { %9677 = vmatpush2.bf16.msra.mxu0 %v10951_v51  ;;  %9637 = vmatprep.subr.bf16.mxu1 %v10680_v54 }
 0x5ef   :  { %9678 = vmatprep.subr.bf16.mxu0 %v10936_v50 }
 0x5f1   :  { %9638 = vmatpush2.bf16.msra.mxu1 %v10679_v3 }
 0x5f2   :  { %9679 = vmatpush2.bf16.msra.mxu0 %v10935_v60  ;;  %9639 = vmatprep.subr.bf16.mxu1 %v10664_v45  ;;  %v11096_v60 = vcombine.high %v3015_v15, %v3023_v12  ;;  %v2999_v45 = vld [vmem:[#allocation12 + $0x1938] sm:$0xff] }
 0x5f3   :  { %9680 = vmatprep.subr.bf16.mxu0 %v10920_v9  ;;  %v3007_v9 = vld [vmem:[#allocation12 + $0x1978] sm:$0xff] }
 0x5f4   :  { %v11080_v2 = vcombine.high %v2999_v45, %v3007_v9  ;;  %v3095_v15 = vld [vmem:[#allocation12 + $0x1c38] sm:$0xff] }
 0x5f5   :  { %9640 = vmatpush2.bf16.msra.mxu1 %v10663_v34  ;;  %v2983_v34 = vld [vmem:[#allocation12 + $0x18b8] sm:$0xff] }
 0x5f6   :  { %9681 = vmatpush2.bf16.msra.mxu0 %v10919_v24  ;;  %9691 = vmatprep.subr.bf16.mxu1 %v11160_v35  ;;  %v2991_v24 = vld [vmem:[#allocation12 + $0x18f8] sm:$0xff] }
 0x5f7   :  { %v2967_v35 = vld [vmem:[#allocation12 + $0x1838] sm:$0xff] }
 0x5f8   :  { %v9397_v59 = vpop.f32.mrf.mxu1  ;;  %9642 = vmatmul.mubr.bf16.vlgmr.msra.gmra.mxu1 %v11700_v52  ;;  %v3103_v12 = vld [vmem:[#allocation12 + $0x1c78] sm:$0xff] }
 0x5f9   :  { %v9398_v53 = vadd.f32 %v9397_v59, %v12080_v37  ;;  %v12096_v43 = vpop.f32.mrf.mxu0  ;;  %9683 = vmatmul.mubr.bf16.vlgmr.msra.gmra.mxu0 %v11724_v23  ;;  %9692 = vmatpush1.bf16.msra.mxu1 %v11159_v31  ;;  %v3031_v37 = vld [vmem:[#allocation12 + $0x1a38] sm:$0xff] }
 0x5fa   :  { %9723 = vmatprep.mubr.bf16.mxu1 %v11737_v6  ;;  %v9399_v17 = vpop.f32.mrf.mxu1  ;;  %9693 = vmatprep.subr.bf16.mxu1 %v11144_v19  ;;  %v11112_v20 = vcombine.high %v3031_v37, %v3039_v29  ;;  %v11111_v3 = vcombine.low %v3031_v37, %v3039_v29  ;;  %v3215_v31 = vld [vmem:[#allocation12 + $0x1ff8] sm:$0xff]  ;;  %v11047_v19 = vcombine.low %v2967_v35, %v2975_v44 }
 0x5fb   :  { %v9742_v0 = vmax.f32 %v9398_v53, 0.0  ;;  %v9400_v52 = vadd.f32 %v9399_v17, %v12083_v5  ;;  %v12104_v56 = vpop.f32.mrf.mxu0  ;;  %v11288_v62 = vcombine.high %v3207_v14, %v3215_v31  ;;  %v3199_v59 = vld [vmem:[#allocation12 + $0x1f78] sm:$0xff]  ;;  %v11287_v53 = vcombine.low %v3207_v14, %v3215_v31 }
 0x5fc   :  { %v9401_v30 = vpop.f32.mrf.mxu1  ;;  %v3159_v17 = vld [vmem:[#allocation12 + $0x1e38] sm:$0xff]  ;;  %v9893_v14 = vstv %s11312_s15  ;;  %v9903_v31 = vstv %s11314_s16 }
 0x5fd   :  { %v9874_v23 = vmul.f32 %v9873_v7, %v9742_v0  ;;  %v9879_v39 = vmul.f32 %v9878_v27, %v9742_v0  ;;  %v9884_v57 = vmul.f32 %v9883_v13, %v9742_v0  ;;  %v9889_v38 = vmul.f32 %v9888_v4, %v9742_v0  ;;  %v9442_v21 = vpop.f32.mrf.mxu0  ;;  %9694 = vmatpush1.bf16.msra.mxu1 %v11143_v22  ;;  %v3175_v22 = vld [vmem:[#allocation12 + $0x1eb8] sm:$0xff] }
 0x5fe   :  { %v9743_v49 = vmax.f32 %v9400_v52, 0.0  ;;  %v9402_v6 = vpop.f32.mrf.mxu1  ;;  %9695 = vmatprep.subr.bf16.mxu1 %v11128_v25  ;;  %v3167_v25 = vld [vmem:[#allocation12 + $0x1e78] sm:$0xff] }
 0x5ff   :  { %v12107_v5 = vadd.f32 %v9874_v23, %v12048_v40  ;;  %v12110_v63 = vadd.f32 %v9879_v39, %v12051_v42  ;;  %v12113_v51 = vadd.f32 %v9884_v57, %v12054_v32  ;;  %v12116_v54 = vadd.f32 %v9889_v38, %v12057_v46  ;;  %v9443_v50 = vpop.f32.mrf.mxu0  ;;  %v3143_v37 = vld [vmem:[#allocation12 + $0x1db8] sm:$0xff] }
 0x600   :  { %v9875_v8 = vmul.f32 %v9873_v7, %v9743_v49  ;;  %v9880_v18 = vmul.f32 %v9878_v27, %v9743_v49  ;;  %v9885_v1 = vmul.f32 %v9883_v13, %v9743_v49  ;;  %v9890_v11 = vmul.f32 %v9888_v4, %v9743_v49  ;;  %v3183_v27 = vld [vmem:[#allocation12 + $0x1ef8] sm:$0xff] }
 0x601   :  { %9696 = vmatpush1.bf16.msra.mxu1 %v11127_v36  ;;  %v11272_v7 = vcombine.high %v3191_v16, %v3199_v59  ;;  %v11271_v13 = vcombine.low %v3191_v16, %v3199_v59  ;;  %v11256_v4 = vcombine.high %v3175_v22, %v3183_v27  ;;  %v11255_v0 = vcombine.low %v3175_v22, %v3183_v27  ;;  %v3151_v29 = vld [vmem:[#allocation12 + $0x1df8] sm:$0xff] }
 0x602   :  { %v12119_v40 = vadd.f32 %v9875_v8, %v12060_v58  ;;  %v12122_v42 = vadd.f32 %v9880_v18, %v12063_v47  ;;  %v12125_v32 = vadd.f32 %v9885_v1, %v12066_v61  ;;  %v12128_v46 = vadd.f32 %v9890_v11, %v12069_v33  ;;  %9697 = vmatprep.subr.bf16.mxu1 %v11112_v20  ;;  %v3127_v23 = vld [vmem:[#allocation12 + $0x1d38] sm:$0xff]  ;;  %v12130_v1 = vld [vmem:[#allocation14 + $0x8] sm:$0xff] }
 0x603   :  { %v11079_v58 = vcombine.low %v2999_v45, %v3007_v9  ;;  %v11064_v47 = vcombine.high %v2983_v34, %v2991_v24  ;;  %v11063_v61 = vcombine.low %v2983_v34, %v2991_v24  ;;  %v11048_v33 = vcombine.high %v2967_v35, %v2975_v44  ;;  %v3135_v39 = vld [vmem:[#allocation12 + $0x1d78] sm:$0xff] }
 0x604   :  { %v11240_v52 = vcombine.high %v3159_v17, %v3167_v25  ;;  %v11239_v30 = vcombine.low %v3159_v17, %v3167_v25  ;;  %v11224_v36 = vcombine.high %v3143_v37, %v3151_v29  ;;  %v11223_v57 = vcombine.low %v3143_v37, %v3151_v29  ;;  %v3111_v21 = vld [vmem:[#allocation12 + $0x1cb8] sm:$0xff] }
 0x605   :  { %9698 = vmatpush1.bf16.msra.mxu1 %v11111_v3  ;;  %v11208_v38 = vcombine.high %v3127_v23, %v3135_v39  ;;  %v3119_v49 = vld [vmem:[#allocation12 + $0x1cf8] sm:$0xff]  ;;  %v11207_v6 = vcombine.low %v3127_v23, %v3135_v39  ;;  %v11176_v8 = vcombine.high %v3095_v15, %v3103_v12  ;;  %v11175_v18 = vcombine.low %v3095_v15, %v3103_v12 }
 0x606   :  { %9699 = vmatprep.subr.bf16.mxu1 %v11096_v60  ;;  %v11192_v20 = vcombine.high %v3111_v21, %v3119_v49  ;;  %v11191_v50 = vcombine.low %v3111_v21, %v3119_v49  ;;  %v3271_v11 = vrot.slane %v12130_v1, %v11711_v41  ;;  %v3275_v3 = vrot.slane %v12130_v1, %v11714_v48 }
 0x608   :  { %v9439_v60 = vadd.f32 %v12096_v43, %v3271_v11  ;;  %v9441_v9 = vadd.f32 %v12104_v56, %v3275_v3  ;;  %v9898_v56 = vstv %s11313_s2 }
 0x609   :  { %9700 = vmatpush1.bf16.msra.mxu1 %v11095_v10 }
 0x60a   :  { %9701 = vmatprep.subr.bf16.mxu1 %v11080_v2 }
 0x60d   :  { %9702 = vmatpush1.bf16.msra.mxu1 %v11079_v58 }
 0x60e   :  { %9703 = vmatprep.subr.bf16.mxu1 %v11064_v47 }
 0x611   :  { %9704 = vmatpush1.bf16.msra.mxu1 %v11063_v61 }
 0x612   :  { %9705 = vmatprep.subr.bf16.mxu1 %v11048_v33 }
 0x615   :  { %9706 = vmatpush1.bf16.msra.mxu1 %v11047_v19  ;;  %v9908_v19 = vstv %s11315_s17 }
 0x616   :  { %9707 = vmatprep.subr.bf16.mxu1 %v11288_v62 }
 0x619   :  { %9708 = vmatpush2.bf16.msra.mxu1 %v11287_v53 }
 0x61a   :  { %9709 = vmatprep.subr.bf16.mxu1 %v11272_v7 }
 0x61d   :  { %9710 = vmatpush2.bf16.msra.mxu1 %v11271_v13 }
 0x61e   :  { %9711 = vmatprep.subr.bf16.mxu1 %v11256_v4 }
 0x621   :  { %9712 = vmatpush2.bf16.msra.mxu1 %v11255_v0 }
 0x622   :  { %9713 = vmatprep.subr.bf16.mxu1 %v11240_v52 }
 0x625   :  { %9714 = vmatpush2.bf16.msra.mxu1 %v11239_v30 }
 0x626   :  { %9715 = vmatprep.subr.bf16.mxu1 %v11224_v36 }
 0x629   :  { %9716 = vmatpush2.bf16.msra.mxu1 %v11223_v57 }
 0x62a   :  { %9717 = vmatprep.subr.bf16.mxu1 %v11208_v38 }
 0x62d   :  { %9718 = vmatpush2.bf16.msra.mxu1 %v11207_v6 }
 0x62e   :  { %9719 = vmatprep.subr.bf16.mxu1 %v11192_v20 }
 0x631   :  { %9720 = vmatpush2.bf16.msra.mxu1 %v11191_v50 }
 0x632   :  { %9721 = vmatprep.subr.bf16.mxu1 %v11176_v8 }
 0x635   :  { %9722 = vmatpush2.bf16.msra.mxu1 %v11175_v18  ;;  %v3279_v18 = vrot.slane %v12130_v1, %v11730_v26 }
 0x638   :  { %v9479_v45 = vpop.f32.mrf.mxu1  ;;  %9724 = vmatmul.mubr.bf16.vlgmr.msra.gmra.mxu1 %v11739_v55 }
 0x639   :  { %v9480_v10 = vadd.f32 %v9479_v45, %v9439_v60  ;;  %v9520_v2 = vpop.f32.mrf.mxu0  ;;  %v9913_v60 = vstv %s12151_s18  ;;  %v9918_v45 = vstv %s12153_s19 }
 0x63a   :  { %v9481_v34 = vpop.f32.mrf.mxu1 }
 0x63b   :  { %v9521_v24 = vadd.f32 %v9520_v2, %v9480_v10  ;;  %v9482_v58 = vadd.f32 %v9481_v34, %v9441_v9  ;;  %v9522_v47 = vpop.f32.mrf.mxu0  ;;  %v9923_v9 = vstv %s12155_s4  ;;  %v9928_v10 = vstv %s12157_s6 }
 0x63c   :  { %v9483_v35 = vpop.f32.mrf.mxu1 }
 0x63d   :  { %v9523_v44 = vadd.f32 %v9522_v47, %v9482_v58  ;;  %v9524_v41 = vpop.f32.mrf.mxu0 }
 0x63e   :  { %v9484_v61 = vpop.f32.mrf.mxu1 }
 0x63f   :  { %v9525_v33 = vpop.f32.mrf.mxu0  ;;  %v9933_v61 = vstv %s11320_s7 }
 0x678   :  { %v9561_v48 = vpop.f32.mrf.mxu1 }
 0x679   :  { %v9562_v43 = vadd.f32 %v9561_v48, %v9521_v24  ;;  %v9602_v55 = vpop.f32.mrf.mxu0 }
 0x67a   :  { %v9563_v62 = vpop.f32.mrf.mxu1 }
 0x67b   :  { %v9744_v16 = vmax.f32 %v9562_v43, 0.0  ;;  %v9564_v59 = vadd.f32 %v9563_v62, %v9523_v44  ;;  %v9604_v53 = vpop.f32.mrf.mxu0 }
 0x67c   :  { %v9565_v7 = vpop.f32.mrf.mxu1 }
 0x67d   :  { %v9894_v22 = vmul.f32 %v9893_v14, %v9744_v16  ;;  %v9899_v27 = vmul.f32 %v9898_v56, %v9744_v16  ;;  %v9904_v13 = vmul.f32 %v9903_v31, %v9744_v16  ;;  %v9909_v4 = vmul.f32 %v9908_v19, %v9744_v16  ;;  %v9606_v17 = vpop.f32.mrf.mxu0 }
 0x67e   :  { %v9745_v25 = vmax.f32 %v9564_v59, 0.0  ;;  %v9566_v0 = vpop.f32.mrf.mxu1 }
 0x67f   :  { %v9896_v52 = vadd.f32 %v9894_v22, %v12107_v5  ;;  %v9901_v37 = vadd.f32 %v9899_v27, %v12110_v63  ;;  %v9906_v29 = vadd.f32 %v9904_v13, %v12113_v51  ;;  %v9911_v30 = vadd.f32 %v9909_v4, %v12116_v54  ;;  %v9607_v36 = vpop.f32.mrf.mxu0 }
 0x680   :  { %v9895_v23 = vmul.f32 %v9893_v14, %v9745_v25  ;;  %v9900_v39 = vmul.f32 %v9898_v56, %v9745_v25  ;;  %v9905_v57 = vmul.f32 %v9903_v31, %v9745_v25  ;;  %v9910_v38 = vmul.f32 %v9908_v19, %v9745_v25 }
 0x682   :  { %v9897_v21 = vadd.f32 %v9895_v23, %v12119_v40  ;;  %v9902_v49 = vadd.f32 %v9900_v39, %v12122_v42  ;;  %v9907_v6 = vadd.f32 %v9905_v57, %v12125_v32  ;;  %v9912_v20 = vadd.f32 %v9910_v38, %v12128_v46 }
 0x683   :  { %v3283_v40 = vrot.slane %v12130_v1, %v11733_v28  ;;  %v9603_v42 = vadd.f32 %v9602_v55, %v3279_v18 }
 0x685   :  { %v9605_v32 = vadd.f32 %v9604_v53, %v3283_v40 }
 0x6b8   :  { %v9643_v5 = vpop.f32.mrf.mxu1 }
 0x6b9   :  { %v9684_v15 = vpop.f32.mrf.mxu0  ;;  %v9644_v46 = vadd.f32 %v9643_v5, %v9603_v42 }
 0x6ba   :  { %v9645_v63 = vpop.f32.mrf.mxu1 }
 0x6bb   :  { %v9686_v12 = vpop.f32.mrf.mxu0  ;;  %v9646_v11 = vadd.f32 %v9645_v63, %v9605_v32  ;;  %v9685_v26 = vadd.f32 %v9684_v15, %v9644_v46 }
 0x6bc   :  { %v9647_v51 = vpop.f32.mrf.mxu1 }
 0x6bd   :  { %v9688_v50 = vpop.f32.mrf.mxu0  ;;  %v9687_v28 = vadd.f32 %v9686_v12, %v9646_v11 }
 0x6be   :  { %v9648_v54 = vpop.f32.mrf.mxu1 }
 0x6bf   :  { %v9689_v8 = vpop.f32.mrf.mxu0 }
 0x6f8   :  { %v9725_v3 = vpop.f32.mrf.mxu1 }
 0x6f9   :  { %v9726_v1 = vadd.f32 %v9725_v3, %v9685_v26 }
 0x6fa   :  { %v9727_v2 = vpop.f32.mrf.mxu1 }
 0x6fb   :  { %v9746_v34 = vmax.f32 %v9726_v1, 0.0  ;;  %v9728_v24 = vadd.f32 %v9727_v2, %v9687_v28 }
 0x6fc   :  { %v9729_v58 = vpop.f32.mrf.mxu1 }
 0x6fd   :  { %v9914_v47 = vmul.f32 %v9913_v60, %v9746_v34  ;;  %v9919_v35 = vmul.f32 %v9918_v45, %v9746_v34  ;;  %v9924_v44 = vmul.f32 %v9923_v9, %v9746_v34  ;;  %v9929_v41 = vmul.f32 %v9928_v10, %v9746_v34 }
 0x6fe   :  { %v9747_v33 = vmax.f32 %v9728_v24, 0.0  ;;  %v9730_v48 = vpop.f32.mrf.mxu1 }
 0x6ff   :  { %v9916_v43 = vadd.f32 %v9914_v47, %v9896_v52  ;;  %v9921_v55 = vadd.f32 %v9919_v35, %v9901_v37  ;;  %v9926_v14 = vadd.f32 %v9924_v44, %v9906_v29  ;;  %v9931_v56 = vadd.f32 %v9929_v41, %v9911_v30 }
 0x700   :  { %v9915_v31 = vmul.f32 %v9913_v60, %v9747_v33  ;;  %v9920_v19 = vmul.f32 %v9918_v45, %v9747_v33  ;;  %v9925_v62 = vmul.f32 %v9923_v9, %v9747_v33  ;;  %v9930_v16 = vmul.f32 %v9928_v10, %v9747_v33 }
 0x701   :  { %v9934_v59 = vadd.f32 %v9933_v61, %v9916_v43  ;;  %v9946_v53 = vadd.f32 %v9933_v61, %v9921_v55  ;;  %v9958_v7 = vadd.f32 %v9933_v61, %v9926_v14  ;;  %v9970_v22 = vadd.f32 %v9933_v61, %v9931_v56 }
 0x702   :  { %v9917_v27 = vadd.f32 %v9915_v31, %v9897_v21  ;;  %v9922_v13 = vadd.f32 %v9920_v19, %v9902_v49  ;;  %v9927_v4 = vadd.f32 %v9925_v62, %v9907_v6  ;;  %v9932_v17 = vadd.f32 %v9930_v16, %v9912_v20 }
 0x703   :  { %v9936_v25 = vmul.f32 0.5, %v9934_v59  ;;  %v9948_v0 = vmul.f32 0.5, %v9946_v53  ;;  %v9960_v36 = vmul.f32 0.5, %v9958_v7  ;;  %v9972_v23 = vmul.f32 0.5, %v9970_v22 }
 0x704   :  { %v9935_v52 = vadd.f32 %v9933_v61, %v9917_v27  ;;  %v9947_v37 = vadd.f32 %v9933_v61, %v9922_v13  ;;  %v9959_v29 = vadd.f32 %v9933_v61, %v9927_v4  ;;  %v9971_v30 = vadd.f32 %v9933_v61, %v9932_v17 }
 0x705   :  { %11339 = vtanh.f32 %v9936_v25 }
 0x706   :  { %11341 = vtanh.f32 %v9948_v0  ;;  %v9937_v39 = vmul.f32 0.5, %v9935_v52  ;;  %v9949_v57 = vmul.f32 0.5, %v9947_v37  ;;  %v9961_v38 = vmul.f32 0.5, %v9959_v29 }
 0x707   :  { %11343 = vtanh.f32 %v9960_v36  ;;  %v9973_v5 = vmul.f32 0.5, %v9971_v30 }
 0x708   :  { %11345 = vtanh.f32 %v9972_v23 }
 0x709   :  { %11347 = vtanh.f32 %v9937_v39 }
 0x70a   :  { %11349 = vtanh.f32 %v9949_v57 }
 0x70b   :  { %11351 = vtanh.f32 %v9961_v38 }
 0x70c   :  { %11353 = vtanh.f32 %v9973_v5 }
 0x712   :  { %v11340_v21 = vpop.eup %11339 }
 0x713   :  { %v11342_v49 = vpop.eup %11341  ;;  %v9940_v6 = vmul.f32 0.5, %v11340_v21 }
 0x714   :  { %v11344_v20 = vpop.eup %11343  ;;  %v9952_v15 = vmul.f32 0.5, %v11342_v49 }
 0x715   :  { %v11346_v63 = vpop.eup %11345  ;;  %v9942_v12 = vadd.f32 0.5, %v9940_v6  ;;  %v9964_v51 = vmul.f32 0.5, %v11344_v20 }
 0x716   :  { %v11348_v50 = vpop.eup %11347  ;;  %v9954_v54 = vadd.f32 0.5, %v9952_v15  ;;  %v9976_v8 = vmul.f32 0.5, %v11346_v63 }
 0x717   :  { %v11350_v18 = vpop.eup %11349  ;;  %9944 = vst [vmem:[#allocation16] sm:$0xff] %v9942_v12  ;;  %v9966_v40 = vadd.f32 0.5, %v9964_v51  ;;  %v9941_v42 = vmul.f32 0.5, %v11348_v50 }
 0x718   :  { %v11352_v32 = vpop.eup %11351  ;;  %9956 = vst [vmem:[#allocation16 + $0x10] sm:$0xff] %v9954_v54  ;;  %v9978_v46 = vadd.f32 0.5, %v9976_v8  ;;  %v9953_v11 = vmul.f32 0.5, %v11350_v18 }
 0x719   :  { %v11354_v26 = vpop.eup %11353  ;;  %9968 = vst [vmem:[#allocation16 + $0x20] sm:$0xff] %v9966_v40  ;;  %v9943_v3 = vadd.f32 0.5, %v9941_v42  ;;  %v9965_v28 = vmul.f32 0.5, %v11352_v32 }
 0x71a   :  { %9980 = vst [vmem:[#allocation16 + $0x30] sm:$0xff] %v9978_v46  ;;  %v9955_v1 = vadd.f32 0.5, %v9953_v11  ;;  %v9977_v60 = vmul.f32 0.5, %v11354_v26 }
 0x71b   :  { %9945 = vst [vmem:[#allocation16 + $0x8] sm:$0xff] %v9943_v3  ;;  %v9967_v45 = vadd.f32 0.5, %v9965_v28 }
 0x71c   :  { %9957 = vst [vmem:[#allocation16 + $0x18] sm:$0xff] %v9955_v1  ;;  %v9979_v9 = vadd.f32 0.5, %v9977_v60 }
 0x71d   :  { %9969 = vst [vmem:[#allocation16 + $0x28] sm:$0xff] %v9967_v45 }
 0x71e   :  { %9981 = vst [vmem:[#allocation16 + $0x38] sm:$0xff] %v9979_v9 }
 0x71f   :  { %11518 = shalt.err (!%p11515_p11)
}
 0x720   :  { %9991 = dma.vmem_to_hbm [thread:$0]  %s9989_s20, 1024, %s12174_s8, [#allocation4]  }
 0x721   :  { %11537 = dma.done.wait [#allocation4], 1024  }
 0x722   :  { %11538 = vsyncadd [#allocation4], 4294966272 }
 0x723   :  { %9995 = vsyncpa [#allocation3], 1 }
 0x724   :  { %9996 = vsyncpa [#allocation7], 1 }
 0x725   :  { %9997 = vsyncpa [#allocation10], 1 }
 0x726   :  { %9998 = vsyncpa [#allocation13], 1 }
 0x727   :  { %9999 = vsyncpa [#allocation4], 1 }
 0x728   :  { %10000 = vsyncpa [#allocation5], 1 }

</bundles_post_ra>
